<compile_context>
chip_gen: v5e
topology: v5e:2x2
jax: 0.10.0
libtpu: 0.0.40
codegen_flags: <defaults>
</compile_context>

<pallas_src>
import jax
import jax.numpy as jnp
import numpy as np
from jax import lax
from jax.experimental import pallas as pl
from jax.experimental.pallas import tpu as pltpu


# ---------------------------------------------------------------------------
# Compiler params
# ---------------------------------------------------------------------------
def _vmem_limit_bytes():
    # v5e/v6e: 128 MiB physical -> ~100 MiB scoped; v7x: 64 MiB -> ~48 MiB.
    try:
        phys = pltpu.get_tpu_info().vmem_capacity_bytes
        return int(min(phys - 16 * 1024 * 1024, 100 * 1024 * 1024))
    except Exception:
        return 32 * 1024 * 1024  # safe default everywhere


def _compiler_params():
    return pltpu.CompilerParams(
        dimension_semantics=("parallel",),
        vmem_limit_bytes=_vmem_limit_bytes(),
    )


# ---------------------------------------------------------------------------
# Kernels (all NHWC inside; batch dim squeezed out by the BlockSpecs)
# ---------------------------------------------------------------------------
def _fused_up_conv_kernel(x_ref, skip_ref, wup_ref, bup_ref, w1_ref,
                          scale_ref, shift_ref, o_ref, pad):
    # Fused: ConvTranspose2d(k=2,s=2) -> concat(skip) -> Conv3x3 -> BN -> ReLU.
    #   x_ref:    (H, W, Cin)        bf16   coarse input
    #   skip_ref: (H, 2, W, 2*Cb)    bf16   fine skip in free space-to-depth view
    #   wup_ref:  (Cin, 4*Ch)        bf16   deconv weight, columns ordered (p,q,c)
    #   bup_ref:  (1, 4*Ch)          f32
    #   w1_ref:   (9, Cc, Cout)      bf16   conv1 weight over the concat, Cc=Ch+Cb
    #   scale/shift: (1, Cout)       f32    folded BN (+conv bias)
    #   o_ref:    (H, 2, W, 2*Cout)         phase-major out (free-reshape -> 2H,2W)
    #   pad:      (H+2, W+2, 4*Cc)   bf16   coarse halo; per-phase blocks [U_pq|S_pq]
    H, W, Cin = x_ref.shape
    Ch = wup_ref.shape[1] // 4
    Cb = skip_ref.shape[-1] // 2
    Cc = w1_ref.shape[1]
    Cout = o_ref.shape[-1] // 2

    # ---- zero only the 1-pixel coarse halo border (interior overwritten) ----
    zrow = jnp.zeros((W + 2, 4 * Cc), pad.dtype)
    zcol = jnp.zeros((H + 2, 4 * Cc), pad.dtype)
    pad[0, :, :] = zrow
    pad[H + 1, :, :] = zrow
    pad[:, 0, :] = zcol
    pad[:, W + 1, :] = zcol

    # ---- deconv: one MXU matmul produces all 4 phases at once ----
    xb = x_ref[...].reshape(H * W, Cin)
    u = jnp.dot(xb, wup_ref[...], preferred_element_type=jnp.float32)
    u = (u + bup_ref[...]).astype(pad.dtype).reshape(H, W, 4 * Ch)

    # ---- scatter up / skip phases into the halo scratch (concat fused) ----
    for p in range(2):
        for q in range(2):
            k = 2 * p + q
            pad[1:H + 1, 1:W + 1, k * Cc:k * Cc + Ch] = \
                u[:, :, k * Ch:(k + 1) * Ch]
            pad[1:H + 1, 1:W + 1, k * Cc + Ch:(k + 1) * Cc] = \
                skip_ref[:, p, :, q * Cb:(q + 1) * Cb]

    # ---- 3x3 conv on the (virtual) fine grid, phase decomposed ----
    # fine offset e = a + dh - 1 = 2*di + p  (coarse shift di, row phase p)
    start = (0, 1, 1, 2)   # 1 + di  indexed by  a + dh
    phase = (1, 0, 1, 0)   # p       indexed by  a + dh
    pairs = (((0, 0),), ((0, 1), (1, 0)), ((0, 2), (1, 1)), ((1, 2),))

    acc = [[None, None], [None, None]]
    for E in range(4):                 # row offset group (a + dh)
        for F in range(4):             # col offset group (b + dw)
            blk = (2 * phase[E] + phase[F]) * Cc
            tap = pad[start[E]:start[E] + H, start[F]:start[F] + W,
                      blk:blk + Cc]
            tap = tap.reshape(H * W, Cc)
            for a, dh in pairs[E]:
                for b, dw in pairs[F]:
                    t = jnp.dot(tap, w1_ref[dh * 3 + dw],
                                preferred_element_type=jnp.float32)
                    acc[a][b] = t if acc[a][b] is None else acc[a][b] + t

    # ---- BN + ReLU epilogue; both column phases packed in one store ----
    for a in range(2):
        ys = []
        for b in range(2):
            y = acc[a][b] * scale_ref[...] + shift_ref[...]
            ys.append(jnp.maximum(y, 0.0).reshape(H, W, Cout))
        o_ref[:, a, :, :] = jnp.concatenate(ys, axis=-1).astype(o_ref.dtype)


def _conv_bn_relu_kernel(x_ref, w_ref, scale_ref, shift_ref, o_ref, x_pad):
    # 3x3 conv (pad=1, halo built in VMEM) + folded BN + ReLU.
    #   x_ref: (H, W, Cin) ; w_ref: (9, Cin, Cout) bf16 ; scale/shift: (1, Cout)
    H, W, Cout = o_ref.shape
    Cin = x_ref.shape[-1]

    # zero only the 1-pixel border each step (interior fully overwritten)
    zrow = jnp.zeros((W + 2, Cin), x_pad.dtype)
    zcol = jnp.zeros((H + 2, Cin), x_pad.dtype)
    x_pad[0, :, :] = zrow
    x_pad[H + 1, :, :] = zrow
    x_pad[:, 0, :] = zcol
    x_pad[:, W + 1, :] = zcol
    x_pad[1:H + 1, 1:W + 1, :] = x_ref[...].astype(x_pad.dtype)

    # hoist the 3 column-shifted views (3 sublane relayouts instead of 9)
    cols = [x_pad[:, kw:kw + W, :] for kw in range(3)]

    acc = None
    for kh in range(3):
        for kw in range(3):
            tap = cols[kw][kh:kh + H, :, :].reshape(H * W, Cin)
            t = jnp.dot(tap, w_ref[kh * 3 + kw],
                        preferred_element_type=jnp.float32)
            acc = t if acc is None else acc + t

    y = acc * scale_ref[...] + shift_ref[...]            # f32 epilogue
    o_ref[...] = jnp.maximum(y, 0.0).reshape(H, W, Cout).astype(o_ref.dtype)


# ---------------------------------------------------------------------------
# Wrappers
# ---------------------------------------------------------------------------
def _fold_bn(p, eps):
    scale = p['gamma'] / jnp.sqrt(p['var'] + eps)
    shift = (p['b'] - p['mean']) * scale + p['beta']
    cout = scale.shape[0]
    return scale.reshape(1, cout), shift.reshape(1, cout)


def _fused_up_first_conv(x_bf16, skip_r_bf16, up_w, up_b, p, out_dtype,
                         eps=1e-5):
    N, H, W, Cin = x_bf16.shape
    Ch = up_w.shape[1]                                    # (Cin, Ch, 2, 2)
    Cb = skip_r_bf16.shape[-1] // 2
    Cc = Ch + Cb
    Cout = p['w'].shape[0]                                # (Cout, Cc, 3, 3)

    w_up = jnp.transpose(up_w, (0, 2, 3, 1)).reshape(Cin, 4 * Ch)
    w_up = w_up.astype(jnp.bfloat16)                      # columns (p, q, c)
    b_up = jnp.tile(up_b, 4).reshape(1, 4 * Ch).astype(jnp.float32)
    w1 = jnp.transpose(p['w'], (2, 3, 1, 0)).reshape(9, Cc, Cout)
    w1 = w1.astype(jnp.bfloat16)
    scale, shift = _fold_bn(p, eps)

    return pl.pallas_call(
        _fused_up_conv_kernel,
        out_shape=jax.ShapeDtypeStruct((N, H, 2, W, 2 * Cout), out_dtype),
        grid=(N,),
        in_specs=[
            pl.BlockSpec((None, H, W, Cin), lambda n: (n, 0, 0, 0)),
            pl.BlockSpec((None, H, 2, W, 2 * Cb), lambda n: (n, 0, 0, 0, 0)),
            pl.BlockSpec((Cin, 4 * Ch), lambda n: (0, 0)),
            pl.BlockSpec((1, 4 * Ch), lambda n: (0, 0)),
            pl.BlockSpec((9, Cc, Cout), lambda n: (0, 0, 0)),
            pl.BlockSpec((1, Cout), lambda n: (0, 0)),
            pl.BlockSpec((1, Cout), lambda n: (0, 0)),
        ],
        out_specs=pl.BlockSpec((None, H, 2, W, 2 * Cout),
                               lambda n: (n, 0, 0, 0, 0)),
        scratch_shapes=[pltpu.VMEM((H + 2, W + 2, 4 * Cc), jnp.bfloat16)],
        compiler_params=_compiler_params(),
    )(x_bf16, skip_r_bf16, w_up, b_up, w1, scale, shift)


def _conv_bn_relu(x_nhwc, p, out_dtype, eps=1e-5):
    N, H, W, Cin = x_nhwc.shape
    Cout = p['w'].shape[0]
    w = jnp.transpose(p['w'], (2, 3, 1, 0)).reshape(9, Cin, Cout)
    w = w.astype(jnp.bfloat16)
    scale, shift = _fold_bn(p, eps)
    return pl.pallas_call(
        _conv_bn_relu_kernel,
        out_shape=jax.ShapeDtypeStruct((N, H, W, Cout), out_dtype),
        grid=(N,),
        in_specs=[
            pl.BlockSpec((None, H, W, Cin), lambda n: (n, 0, 0, 0)),
            pl.BlockSpec((9, Cin, Cout), lambda n: (0, 0, 0)),
            pl.BlockSpec((1, Cout), lambda n: (0, 0)),
            pl.BlockSpec((1, Cout), lambda n: (0, 0)),
        ],
        out_specs=pl.BlockSpec((None, H, W, Cout), lambda n: (n, 0, 0, 0)),
        scratch_shapes=[pltpu.VMEM((H + 2, W + 2, Cin), jnp.bfloat16)],
        compiler_params=_compiler_params(),
    )(x_nhwc, w, scale, shift)


def up_block(x_nchw, skip_nchw, params):
    """UpBlock.forward: out = up(x); x = cat([out, skip], C); nConvs(x)."""
    # TODO(synk): NCHW<->NHWC boundary transposes kept only for PyTorch parity;
    #             drop them if the surrounding model stays NHWC.
    x = jnp.transpose(x_nchw, (0, 2, 3, 1)).astype(jnp.bfloat16)
    skip = jnp.transpose(skip_nchw, (0, 2, 3, 1)).astype(jnp.bfloat16)
    N, H, W, _ = x.shape
    Cb = skip.shape[-1]
    # Free (metadata-only) space-to-depth view of skip: (N,2H,2W,Cb)->(N,H,2,W,2Cb)
    skip_r = skip.reshape(N, H, 2, W, 2 * Cb)

    convs = params['convs']
    last = len(convs) - 1
    Cout0 = convs[0]['w'].shape[0]
    y = _fused_up_first_conv(
        x, skip_r, params['up_w'], params['up_b'], convs[0],
        jnp.float32 if last == 0 else jnp.bfloat16)
    # Free reshape back to the standard fine-grid layout.
    cur = y.reshape(N, 2 * H, 2 * W, Cout0)
    for i, p in enumerate(convs[1:], start=1):
        cur = _conv_bn_relu(cur, p, jnp.float32 if i == last else jnp.bfloat16)
    return jnp.transpose(cur, (0, 3, 1, 2))


# ---------------------------------------------------------------------------
# Deterministic parameter init (fresh-module shapes, synthetic values)
# ---------------------------------------------------------------------------
def init_params(key, in_channels, out_channels, nb_conv):
    ch = in_channels // 2
    keys = jax.random.split(key, 2 + 2 * nb_conv)
    params = {
        'up_w': 0.1 * jax.random.normal(keys[0], (in_channels, ch, 2, 2),
                                        jnp.float32),
        'up_b': 0.1 * jax.random.normal(keys[1], (ch,), jnp.float32),
        'convs': [],
    }
    cin = in_channels  # after concat: ch (up) + ch (skip) = in_channels
    for i in range(nb_conv):
        w = 0.1 * jax.random.normal(keys[2 + 2 * i],
                                    (out_channels, cin, 3, 3), jnp.float32)
        b = 0.1 * jax.random.normal(keys[3 + 2 * i], (out_channels,),
                                    jnp.float32)
        params['convs'].append({
            'w': w, 'b': b,
            'gamma': jnp.ones((out_channels,), jnp.float32),
            'beta': jnp.zeros((out_channels,), jnp.float32),
            'mean': jnp.zeros((out_channels,), jnp.float32),
            'var': jnp.ones((out_channels,), jnp.float32),
        })
        cin = out_channels
    return params


# ---------------------------------------------------------------------------
# Pure-JAX reference (f32 end-to-end) for correctness check
# ---------------------------------------------------------------------------
def reference(x_nchw, skip_nchw, params, eps=1e-5):
    x = jnp.transpose(x_nchw, (0, 2, 3, 1))
    skip = jnp.transpose(skip_nchw, (0, 2, 3, 1))
    N, H, W, _ = x.shape
    wt = params['up_w']
    Ch = wt.shape[1]
    up = jnp.einsum('nhwi,iokl->nhkwlo', x, wt).reshape(N, 2 * H, 2 * W, Ch)
    up = up + params['up_b']
    cur = jnp.concatenate([up, skip], axis=-1)
    for p in params['convs']:
        w_hwio = jnp.transpose(p['w'], (2, 3, 1, 0))
        y = lax.conv_general_dilated(cur, w_hwio, (1, 1), 'SAME',
                                     dimension_numbers=('NHWC', 'HWIO', 'NHWC'))
        y = y + p['b']
        scale = p['gamma'] / jnp.sqrt(p['var'] + eps)
        y = (y - p['mean']) * scale + p['beta']
        cur = jnp.maximum(y, 0.0)
    return jnp.transpose(cur, (0, 3, 1, 2))


if __name__ == "__main__":
    key = jax.random.PRNGKey(0)
    in_channels, out_channels, nb_conv = 8, 4, 2
    N, H, W = 2, 8, 8                         # x: coarse feature map (NCHW)

    k_x, k_s, k_p = jax.random.split(key, 3)
    x = jax.random.normal(k_x, (N, in_channels, H, W), jnp.float32)
    skip = jax.random.normal(k_s, (N, in_channels // 2, 2 * H, 2 * W),
                             jnp.float32)
    params = init_params(k_p, in_channels, out_channels, nb_conv)

    out = jax.jit(up_block)(x, skip, params)
    out = jax.block_until_ready(out)

    ref = jax.block_until_ready(reference(x, skip, params))
    assert out.shape == (N, out_channels, 2 * H, 2 * W), out.shape
    # bf16 matmul operands (f32 accumulation) -> looser tolerance than pure f32.
    np.testing.assert_allclose(np.asarray(out), np.asarray(ref),
                               atol=5e-2, rtol=5e-2)

    print("KERNEL_OK")
</pallas_src>

<mosaic_0001>
module attributes {stable_mosaic.version = 11 : i64} {
  func.func @_fused_up_conv_kernel(%arg0: i32, %arg1: memref<1x8x8x8xbf16, #tpu.memory_space<vmem>>, %arg2: memref<1x8x2x8x8xbf16, #tpu.memory_space<vmem>>, %arg3: memref<8x16xbf16, #tpu.memory_space<vmem>>, %arg4: memref<1x16xf32, #tpu.memory_space<vmem>>, %arg5: memref<9x8x4xbf16, #tpu.memory_space<vmem>>, %arg6: memref<1x4xf32, #tpu.memory_space<vmem>>, %arg7: memref<1x4xf32, #tpu.memory_space<vmem>>, %arg8: memref<1x8x2x8x8xbf16, #tpu.memory_space<vmem>>, %arg9: memref<10x10x32xbf16, #tpu.memory_space<vmem>>) attributes {dimension_semantics = [#tpu.dimension_semantics<parallel>], iteration_bounds = array<i64: 2>, scalar_prefetch = 0 : i64, scratch_operands = 1 : i64, tpu.core_type = #tpu.core_type<tc>, window_params = [{transform_indices = @transform_0, window_bounds = array<i64: 1, 8, 8, 8>}, {transform_indices = @transform_1, window_bounds = array<i64: 1, 8, 2, 8, 8>}, {pipeline_mode = #tpu.pipeline_mode<synchronous>, transform_indices = @transform_2, window_bounds = array<i64: 8, 16>}, {pipeline_mode = #tpu.pipeline_mode<synchronous>, transform_indices = @transform_3, window_bounds = array<i64: 1, 16>}, {pipeline_mode = #tpu.pipeline_mode<synchronous>, transform_indices = @transform_4, window_bounds = array<i64: 9, 8, 4>}, {pipeline_mode = #tpu.pipeline_mode<synchronous>, transform_indices = @transform_5, window_bounds = array<i64: 1, 4>}, {pipeline_mode = #tpu.pipeline_mode<synchronous>, transform_indices = @transform_6, window_bounds = array<i64: 1, 4>}, {transform_indices = @transform_7, window_bounds = array<i64: 1, 8, 2, 8, 8>}]} {
    %cst = arith.constant 0.000000e+00 : bf16
    %0 = vector.broadcast %cst : bf16 to vector<10x32xbf16>
    %cst_0 = arith.constant 0.000000e+00 : bf16
    %1 = vector.broadcast %cst_0 : bf16 to vector<10x32xbf16>
    %c0 = arith.constant 0 : index
    %c0_1 = arith.constant 0 : index
    %c0_2 = arith.constant 0 : index
    %2 = vector.load %arg9[%c0, %c0_1, %c0_2] : memref<10x10x32xbf16, #tpu.memory_space<vmem>>, vector<1x10x32xbf16>
    %3 = vector.shape_cast %2 : vector<1x10x32xbf16> to vector<10x32xbf16>
    %4 = vector.shape_cast %0 : vector<10x32xbf16> to vector<1x10x32xbf16>
    tpu.vector_store %arg9[%c0, %c0_1, %c0_2], %4 {strides = array<i32>} : memref<10x10x32xbf16, #tpu.memory_space<vmem>>, vector<1x10x32xbf16>,
    %c9 = arith.constant 9 : index
    %c0_3 = arith.constant 0 : index
    %c0_4 = arith.constant 0 : index
    %5 = vector.load %arg9[%c9, %c0_3, %c0_4] : memref<10x10x32xbf16, #tpu.memory_space<vmem>>, vector<1x10x32xbf16>
    %6 = vector.shape_cast %5 : vector<1x10x32xbf16> to vector<10x32xbf16>
    %7 = vector.shape_cast %0 : vector<10x32xbf16> to vector<1x10x32xbf16>
    tpu.vector_store %arg9[%c9, %c0_3, %c0_4], %7 {strides = array<i32>} : memref<10x10x32xbf16, #tpu.memory_space<vmem>>, vector<1x10x32xbf16>,
    %c0_5 = arith.constant 0 : index
    %c0_6 = arith.constant 0 : index
    %c0_7 = arith.constant 0 : index
    %8 = vector.load %arg9[%c0_5, %c0_6, %c0_7] : memref<10x10x32xbf16, #tpu.memory_space<vmem>>, vector<10x1x32xbf16>
    %9 = vector.shape_cast %8 : vector<10x1x32xbf16> to vector<10x32xbf16>
    %10 = vector.shape_cast %1 : vector<10x32xbf16> to vector<10x1x32xbf16>
    tpu.vector_store %arg9[%c0_5, %c0_6, %c0_7], %10 {strides = array<i32>} : memref<10x10x32xbf16, #tpu.memory_space<vmem>>, vector<10x1x32xbf16>,
    %c0_8 = arith.constant 0 : index
    %c9_9 = arith.constant 9 : index
    %c0_10 = arith.constant 0 : index
    %11 = vector.load %arg9[%c0_8, %c9_9, %c0_10] : memref<10x10x32xbf16, #tpu.memory_space<vmem>>, vector<10x1x32xbf16>
    %12 = vector.shape_cast %11 : vector<10x1x32xbf16> to vector<10x32xbf16>
    %13 = vector.shape_cast %1 : vector<10x32xbf16> to vector<10x1x32xbf16>
    tpu.vector_store %arg9[%c0_8, %c9_9, %c0_10], %13 {strides = array<i32>} : memref<10x10x32xbf16, #tpu.memory_space<vmem>>, vector<10x1x32xbf16>,
    %c0_11 = arith.constant 0 : index
    %c0_12 = arith.constant 0 : index
    %c0_13 = arith.constant 0 : index
    %c0_14 = arith.constant 0 : index
    %14 = vector.load %arg1[%c0_11, %c0_12, %c0_13, %c0_14] : memref<1x8x8x8xbf16, #tpu.memory_space<vmem>>, vector<1x8x8x8xbf16>
    %15 = vector.shape_cast %14 : vector<1x8x8x8xbf16> to vector<8x8x8xbf16>
    %16 = vector.shape_cast %15 : vector<8x8x8xbf16> to vector<64x8xbf16>
    %c0_15 = arith.constant 0 : index
    %c0_16 = arith.constant 0 : index
    %17 = vector.load %arg3[%c0_15, %c0_16] : memref<8x16xbf16, #tpu.memory_space<vmem>>, vector<8x16xbf16>
    %cst_17 = arith.constant dense<0.000000e+00> : vector<64x16xf32>
    %18 = tpu.matmul %16, %17, %cst_17 {dimension_numbers = #tpu.dot_dimension_numbers<[1], [0], [0], [1], [0, 0, 1, 1], [], []>} : vector<64x8xbf16>, vector<8x16xbf16>, vector<64x16xf32> -> vector<64x16xf32>
    %c0_18 = arith.constant 0 : index
    %c0_19 = arith.constant 0 : index
    %19 = vector.load %arg4[%c0_18, %c0_19] : memref<1x16xf32, #tpu.memory_space<vmem>>, vector<1x16xf32>
    %20 = vector.broadcast %19 : vector<1x16xf32> to vector<64x16xf32>
    %21 = arith.addf %18, %20 : vector<64x16xf32>
    %22 = arith.truncf %21 : vector<64x16xf32> to vector<64x16xbf16>
    %23 = vector.shape_cast %22 : vector<64x16xbf16> to vector<8x8x16xbf16>
    %24 = vector.extract_strided_slice %23 {offsets = [0, 0, 0], sizes = [8, 8, 4], strides = [1, 1, 1]} : vector<8x8x16xbf16> to vector<8x8x4xbf16>
    %c1 = arith.constant 1 : index
    %c1_20 = arith.constant 1 : index
    %c0_21 = arith.constant 0 : index
    %25 = vector.load %arg9[%c1, %c1_20, %c0_21] : memref<10x10x32xbf16, #tpu.memory_space<vmem>>, vector<8x8x4xbf16>
    tpu.vector_store %arg9[%c1, %c1_20, %c0_21], %24 {strides = array<i32>} : memref<10x10x32xbf16, #tpu.memory_space<vmem>>, vector<8x8x4xbf16>,
    %c0_22 = arith.constant 0 : index
    %c0_23 = arith.constant 0 : index
    %c0_24 = arith.constant 0 : index
    %c0_25 = arith.constant 0 : index
    %c0_26 = arith.constant 0 : index
    %26 = vector.load %arg2[%c0_22, %c0_23, %c0_24, %c0_25, %c0_26] : memref<1x8x2x8x8xbf16, #tpu.memory_space<vmem>>, vector<1x8x1x8x4xbf16>
    %27 = vector.shape_cast %26 : vector<1x8x1x8x4xbf16> to vector<8x8x4xbf16>
    %c1_27 = arith.constant 1 : index
    %c1_28 = arith.constant 1 : index
    %c4 = arith.constant 4 : index
    %28 = vector.load %arg9[%c1_27, %c1_28, %c4] : memref<10x10x32xbf16, #tpu.memory_space<vmem>>, vector<8x8x4xbf16>
    tpu.vector_store %arg9[%c1_27, %c1_28, %c4], %27 {strides = array<i32>} : memref<10x10x32xbf16, #tpu.memory_space<vmem>>, vector<8x8x4xbf16>,
    %29 = vector.extract_strided_slice %23 {offsets = [0, 0, 4], sizes = [8, 8, 4], strides = [1, 1, 1]} : vector<8x8x16xbf16> to vector<8x8x4xbf16>
    %c1_29 = arith.constant 1 : index
    %c1_30 = arith.constant 1 : index
    %c8 = arith.constant 8 : index
    %30 = vector.load %arg9[%c1_29, %c1_30, %c8] : memref<10x10x32xbf16, #tpu.memory_space<vmem>>, vector<8x8x4xbf16>
    tpu.vector_store %arg9[%c1_29, %c1_30, %c8], %29 {strides = array<i32>} : memref<10x10x32xbf16, #tpu.memory_space<vmem>>, vector<8x8x4xbf16>,
    %c0_31 = arith.constant 0 : index
    %c0_32 = arith.constant 0 : index
    %c0_33 = arith.constant 0 : index
    %c0_34 = arith.constant 0 : index
    %c4_35 = arith.constant 4 : index
    %31 = vector.load %arg2[%c0_31, %c0_32, %c0_33, %c0_34, %c4_35] : memref<1x8x2x8x8xbf16, #tpu.memory_space<vmem>>, vector<1x8x1x8x4xbf16>
    %32 = vector.shape_cast %31 : vector<1x8x1x8x4xbf16> to vector<8x8x4xbf16>
    %c1_36 = arith.constant 1 : index
    %c1_37 = arith.constant 1 : index
    %c12 = arith.constant 12 : index
    %33 = vector.load %arg9[%c1_36, %c1_37, %c12] : memref<10x10x32xbf16, #tpu.memory_space<vmem>>, vector<8x8x4xbf16>
    tpu.vector_store %arg9[%c1_36, %c1_37, %c12], %32 {strides = array<i32>} : memref<10x10x32xbf16, #tpu.memory_space<vmem>>, vector<8x8x4xbf16>,
    %34 = vector.extract_strided_slice %23 {offsets = [0, 0, 8], sizes = [8, 8, 4], strides = [1, 1, 1]} : vector<8x8x16xbf16> to vector<8x8x4xbf16>
    %c1_38 = arith.constant 1 : index
    %c1_39 = arith.constant 1 : index
    %c16 = arith.constant 16 : index
    %35 = vector.load %arg9[%c1_38, %c1_39, %c16] : memref<10x10x32xbf16, #tpu.memory_space<vmem>>, vector<8x8x4xbf16>
    tpu.vector_store %arg9[%c1_38, %c1_39, %c16], %34 {strides = array<i32>} : memref<10x10x32xbf16, #tpu.memory_space<vmem>>, vector<8x8x4xbf16>,
    %c0_40 = arith.constant 0 : index
    %c0_41 = arith.constant 0 : index
    %c1_42 = arith.constant 1 : index
    %c0_43 = arith.constant 0 : index
    %c0_44 = arith.constant 0 : index
    %36 = vector.load %arg2[%c0_40, %c0_41, %c1_42, %c0_43, %c0_44] : memref<1x8x2x8x8xbf16, #tpu.memory_space<vmem>>, vector<1x8x1x8x4xbf16>
    %37 = vector.shape_cast %36 : vector<1x8x1x8x4xbf16> to vector<8x8x4xbf16>
    %c1_45 = arith.constant 1 : index
    %c1_46 = arith.constant 1 : index
    %c20 = arith.constant 20 : index
    %38 = vector.load %arg9[%c1_45, %c1_46, %c20] : memref<10x10x32xbf16, #tpu.memory_space<vmem>>, vector<8x8x4xbf16>
    tpu.vector_store %arg9[%c1_45, %c1_46, %c20], %37 {strides = array<i32>} : memref<10x10x32xbf16, #tpu.memory_space<vmem>>, vector<8x8x4xbf16>,
    %39 = vector.extract_strided_slice %23 {offsets = [0, 0, 12], sizes = [8, 8, 4], strides = [1, 1, 1]} : vector<8x8x16xbf16> to vector<8x8x4xbf16>
    %c1_47 = arith.constant 1 : index
    %c1_48 = arith.constant 1 : index
    %c24 = arith.constant 24 : index
    %40 = vector.load %arg9[%c1_47, %c1_48, %c24] : memref<10x10x32xbf16, #tpu.memory_space<vmem>>, vector<8x8x4xbf16>
    tpu.vector_store %arg9[%c1_47, %c1_48, %c24], %39 {strides = array<i32>} : memref<10x10x32xbf16, #tpu.memory_space<vmem>>, vector<8x8x4xbf16>,
    %c0_49 = arith.constant 0 : index
    %c0_50 = arith.constant 0 : index
    %c1_51 = arith.constant 1 : index
    %c0_52 = arith.constant 0 : index
    %c4_53 = arith.constant 4 : index
    %41 = vector.load %arg2[%c0_49, %c0_50, %c1_51, %c0_52, %c4_53] : memref<1x8x2x8x8xbf16, #tpu.memory_space<vmem>>, vector<1x8x1x8x4xbf16>
    %42 = vector.shape_cast %41 : vector<1x8x1x8x4xbf16> to vector<8x8x4xbf16>
    %c1_54 = arith.constant 1 : index
    %c1_55 = arith.constant 1 : index
    %c28 = arith.constant 28 : index
    %43 = vector.load %arg9[%c1_54, %c1_55, %c28] : memref<10x10x32xbf16, #tpu.memory_space<vmem>>, vector<8x8x4xbf16>
    tpu.vector_store %arg9[%c1_54, %c1_55, %c28], %42 {strides = array<i32>} : memref<10x10x32xbf16, #tpu.memory_space<vmem>>, vector<8x8x4xbf16>,
    %c0_56 = arith.constant 0 : index
    %c0_57 = arith.constant 0 : index
    %c24_58 = arith.constant 24 : index
    %44 = vector.load %arg9[%c0_56, %c0_57, %c24_58] : memref<10x10x32xbf16, #tpu.memory_space<vmem>>, vector<8x8x8xbf16>
    %45 = vector.shape_cast %44 : vector<8x8x8xbf16> to vector<64x8xbf16>
    %c0_59 = arith.constant 0 : index
    %c0_60 = arith.constant 0 : index
    %c0_61 = arith.constant 0 : index
    %46 = vector.load %arg5[%c0_59, %c0_60, %c0_61] : memref<9x8x4xbf16, #tpu.memory_space<vmem>>, vector<1x8x4xbf16>
    %47 = vector.shape_cast %46 : vector<1x8x4xbf16> to vector<8x4xbf16>
    %cst_62 = arith.constant dense<0.000000e+00> : vector<64x4xf32>
    %48 = tpu.matmul %45, %47, %cst_62 {dimension_numbers = #tpu.dot_dimension_numbers<[1], [0], [0], [1], [0, 0, 1, 1], [], []>} : vector<64x8xbf16>, vector<8x4xbf16>, vector<64x4xf32> -> vector<64x4xf32>
    %c0_63 = arith.constant 0 : index
    %c1_64 = arith.constant 1 : index
    %c16_65 = arith.constant 16 : index
    %49 = vector.load %arg9[%c0_63, %c1_64, %c16_65] : memref<10x10x32xbf16, #tpu.memory_space<vmem>>, vector<8x8x8xbf16>
    %50 = vector.shape_cast %49 : vector<8x8x8xbf16> to vector<64x8xbf16>
    %c1_66 = arith.constant 1 : index
    %c0_67 = arith.constant 0 : index
    %c0_68 = arith.constant 0 : index
    %51 = vector.load %arg5[%c1_66, %c0_67, %c0_68] : memref<9x8x4xbf16, #tpu.memory_space<vmem>>, vector<1x8x4xbf16>
    %52 = vector.shape_cast %51 : vector<1x8x4xbf16> to vector<8x4xbf16>
    %cst_69 = arith.constant dense<0.000000e+00> : vector<64x4xf32>
    %53 = tpu.matmul %50, %52, %cst_69 {dimension_numbers = #tpu.dot_dimension_numbers<[1], [0], [0], [1], [0, 0, 1, 1], [], []>} : vector<64x8xbf16>, vector<8x4xbf16>, vector<64x4xf32> -> vector<64x4xf32>
    %54 = arith.addf %48, %53 : vector<64x4xf32>
    %c0_70 = arith.constant 0 : index
    %c0_71 = arith.constant 0 : index
    %c0_72 = arith.constant 0 : index
    %55 = vector.load %arg5[%c0_70, %c0_71, %c0_72] : memref<9x8x4xbf16, #tpu.memory_space<vmem>>, vector<1x8x4xbf16>
    %56 = vector.shape_cast %55 : vector<1x8x4xbf16> to vector<8x4xbf16>
    %cst_73 = arith.constant dense<0.000000e+00> : vector<64x4xf32>
    %57 = tpu.matmul %50, %56, %cst_73 {dimension_numbers = #tpu.dot_dimension_numbers<[1], [0], [0], [1], [0, 0, 1, 1], [], []>} : vector<64x8xbf16>, vector<8x4xbf16>, vector<64x4xf32> -> vector<64x4xf32>
    %c0_74 = arith.constant 0 : index
    %c1_75 = arith.constant 1 : index
    %c24_76 = arith.constant 24 : index
    %58 = vector.load %arg9[%c0_74, %c1_75, %c24_76] : memref<10x10x32xbf16, #tpu.memory_space<vmem>>, vector<8x8x8xbf16>
    %59 = vector.shape_cast %58 : vector<8x8x8xbf16> to vector<64x8xbf16>
    %c2 = arith.constant 2 : index
    %c0_77 = arith.constant 0 : index
    %c0_78 = arith.constant 0 : index
    %60 = vector.load %arg5[%c2, %c0_77, %c0_78] : memref<9x8x4xbf16, #tpu.memory_space<vmem>>, vector<1x8x4xbf16>
    %61 = vector.shape_cast %60 : vector<1x8x4xbf16> to vector<8x4xbf16>
    %cst_79 = arith.constant dense<0.000000e+00> : vector<64x4xf32>
    %62 = tpu.matmul %59, %61, %cst_79 {dimension_numbers = #tpu.dot_dimension_numbers<[1], [0], [0], [1], [0, 0, 1, 1], [], []>} : vector<64x8xbf16>, vector<8x4xbf16>, vector<64x4xf32> -> vector<64x4xf32>
    %63 = arith.addf %54, %62 : vector<64x4xf32>
    %c1_80 = arith.constant 1 : index
    %c0_81 = arith.constant 0 : index
    %c0_82 = arith.constant 0 : index
    %64 = vector.load %arg5[%c1_80, %c0_81, %c0_82] : memref<9x8x4xbf16, #tpu.memory_space<vmem>>, vector<1x8x4xbf16>
    %65 = vector.shape_cast %64 : vector<1x8x4xbf16> to vector<8x4xbf16>
    %cst_83 = arith.constant dense<0.000000e+00> : vector<64x4xf32>
    %66 = tpu.matmul %59, %65, %cst_83 {dimension_numbers = #tpu.dot_dimension_numbers<[1], [0], [0], [1], [0, 0, 1, 1], [], []>} : vector<64x8xbf16>, vector<8x4xbf16>, vector<64x4xf32> -> vector<64x4xf32>
    %67 = arith.addf %57, %66 : vector<64x4xf32>
    %c0_84 = arith.constant 0 : index
    %c2_85 = arith.constant 2 : index
    %c16_86 = arith.constant 16 : index
    %68 = vector.load %arg9[%c0_84, %c2_85, %c16_86] : memref<10x10x32xbf16, #tpu.memory_space<vmem>>, vector<8x8x8xbf16>
    %69 = vector.shape_cast %68 : vector<8x8x8xbf16> to vector<64x8xbf16>
    %c2_87 = arith.constant 2 : index
    %c0_88 = arith.constant 0 : index
    %c0_89 = arith.constant 0 : index
    %70 = vector.load %arg5[%c2_87, %c0_88, %c0_89] : memref<9x8x4xbf16, #tpu.memory_space<vmem>>, vector<1x8x4xbf16>
    %71 = vector.shape_cast %70 : vector<1x8x4xbf16> to vector<8x4xbf16>
    %cst_90 = arith.constant dense<0.000000e+00> : vector<64x4xf32>
    %72 = tpu.matmul %69, %71, %cst_90 {dimension_numbers = #tpu.dot_dimension_numbers<[1], [0], [0], [1], [0, 0, 1, 1], [], []>} : vector<64x8xbf16>, vector<8x4xbf16>, vector<64x4xf32> -> vector<64x4xf32>
    %73 = arith.addf %67, %72 : vector<64x4xf32>
    %c1_91 = arith.constant 1 : index
    %c0_92 = arith.constant 0 : index
    %c8_93 = arith.constant 8 : index
    %74 = vector.load %arg9[%c1_91, %c0_92, %c8_93] : memref<10x10x32xbf16, #tpu.memory_space<vmem>>, vector<8x8x8xbf16>
    %75 = vector.shape_cast %74 : vector<8x8x8xbf16> to vector<64x8xbf16>
    %c3 = arith.constant 3 : index
    %c0_94 = arith.constant 0 : index
    %c0_95 = arith.constant 0 : index
    %76 = vector.load %arg5[%c3, %c0_94, %c0_95] : memref<9x8x4xbf16, #tpu.memory_space<vmem>>, vector<1x8x4xbf16>
    %77 = vector.shape_cast %76 : vector<1x8x4xbf16> to vector<8x4xbf16>
    %cst_96 = arith.constant dense<0.000000e+00> : vector<64x4xf32>
    %78 = tpu.matmul %75, %77, %cst_96 {dimension_numbers = #tpu.dot_dimension_numbers<[1], [0], [0], [1], [0, 0, 1, 1], [], []>} : vector<64x8xbf16>, vector<8x4xbf16>, vector<64x4xf32> -> vector<64x4xf32>
    %79 = arith.addf %63, %78 : vector<64x4xf32>
    %c0_97 = arith.constant 0 : index
    %c0_98 = arith.constant 0 : index
    %c0_99 = arith.constant 0 : index
    %80 = vector.load %arg5[%c0_97, %c0_98, %c0_99] : memref<9x8x4xbf16, #tpu.memory_space<vmem>>, vector<1x8x4xbf16>
    %81 = vector.shape_cast %80 : vector<1x8x4xbf16> to vector<8x4xbf16>
    %cst_100 = arith.constant dense<0.000000e+00> : vector<64x4xf32>
    %82 = tpu.matmul %75, %81, %cst_100 {dimension_numbers = #tpu.dot_dimension_numbers<[1], [0], [0], [1], [0, 0, 1, 1], [], []>} : vector<64x8xbf16>, vector<8x4xbf16>, vector<64x4xf32> -> vector<64x4xf32>
    %c1_101 = arith.constant 1 : index
    %c1_102 = arith.constant 1 : index
    %c0_103 = arith.constant 0 : index
    %83 = vector.load %arg9[%c1_101, %c1_102, %c0_103] : memref<10x10x32xbf16, #tpu.memory_space<vmem>>, vector<8x8x8xbf16>
    %84 = vector.shape_cast %83 : vector<8x8x8xbf16> to vector<64x8xbf16>
    %c4_104 = arith.constant 4 : index
    %c0_105 = arith.constant 0 : index
    %c0_106 = arith.constant 0 : index
    %85 = vector.load %arg5[%c4_104, %c0_105, %c0_106] : memref<9x8x4xbf16, #tpu.memory_space<vmem>>, vector<1x8x4xbf16>
    %86 = vector.shape_cast %85 : vector<1x8x4xbf16> to vector<8x4xbf16>
    %cst_107 = arith.constant dense<0.000000e+00> : vector<64x4xf32>
    %87 = tpu.matmul %84, %86, %cst_107 {dimension_numbers = #tpu.dot_dimension_numbers<[1], [0], [0], [1], [0, 0, 1, 1], [], []>} : vector<64x8xbf16>, vector<8x4xbf16>, vector<64x4xf32> -> vector<64x4xf32>
    %88 = arith.addf %79, %87 : vector<64x4xf32>
    %c3_108 = arith.constant 3 : index
    %c0_109 = arith.constant 0 : index
    %c0_110 = arith.constant 0 : index
    %89 = vector.load %arg5[%c3_108, %c0_109, %c0_110] : memref<9x8x4xbf16, #tpu.memory_space<vmem>>, vector<1x8x4xbf16>
    %90 = vector.shape_cast %89 : vector<1x8x4xbf16> to vector<8x4xbf16>
    %cst_111 = arith.constant dense<0.000000e+00> : vector<64x4xf32>
    %91 = tpu.matmul %84, %90, %cst_111 {dimension_numbers = #tpu.dot_dimension_numbers<[1], [0], [0], [1], [0, 0, 1, 1], [], []>} : vector<64x8xbf16>, vector<8x4xbf16>, vector<64x4xf32> -> vector<64x4xf32>
    %92 = arith.addf %73, %91 : vector<64x4xf32>
    %c1_112 = arith.constant 1 : index
    %c0_113 = arith.constant 0 : index
    %c0_114 = arith.constant 0 : index
    %93 = vector.load %arg5[%c1_112, %c0_113, %c0_114] : memref<9x8x4xbf16, #tpu.memory_space<vmem>>, vector<1x8x4xbf16>
    %94 = vector.shape_cast %93 : vector<1x8x4xbf16> to vector<8x4xbf16>
    %cst_115 = arith.constant dense<0.000000e+00> : vector<64x4xf32>
    %95 = tpu.matmul %84, %94, %cst_115 {dimension_numbers = #tpu.dot_dimension_numbers<[1], [0], [0], [1], [0, 0, 1, 1], [], []>} : vector<64x8xbf16>, vector<8x4xbf16>, vector<64x4xf32> -> vector<64x4xf32>
    %96 = arith.addf %82, %95 : vector<64x4xf32>
    %c0_116 = arith.constant 0 : index
    %c0_117 = arith.constant 0 : index
    %c0_118 = arith.constant 0 : index
    %97 = vector.load %arg5[%c0_116, %c0_117, %c0_118] : memref<9x8x4xbf16, #tpu.memory_space<vmem>>, vector<1x8x4xbf16>
    %98 = vector.shape_cast %97 : vector<1x8x4xbf16> to vector<8x4xbf16>
    %cst_119 = arith.constant dense<0.000000e+00> : vector<64x4xf32>
    %99 = tpu.matmul %84, %98, %cst_119 {dimension_numbers = #tpu.dot_dimension_numbers<[1], [0], [0], [1], [0, 0, 1, 1], [], []>} : vector<64x8xbf16>, vector<8x4xbf16>, vector<64x4xf32> -> vector<64x4xf32>
    %c1_120 = arith.constant 1 : index
    %c1_121 = arith.constant 1 : index
    %c8_122 = arith.constant 8 : index
    %100 = vector.load %arg9[%c1_120, %c1_121, %c8_122] : memref<10x10x32xbf16, #tpu.memory_space<vmem>>, vector<8x8x8xbf16>
    %101 = vector.shape_cast %100 : vector<8x8x8xbf16> to vector<64x8xbf16>
    %c5 = arith.constant 5 : index
    %c0_123 = arith.constant 0 : index
    %c0_124 = arith.constant 0 : index
    %102 = vector.load %arg5[%c5, %c0_123, %c0_124] : memref<9x8x4xbf16, #tpu.memory_space<vmem>>, vector<1x8x4xbf16>
    %103 = vector.shape_cast %102 : vector<1x8x4xbf16> to vector<8x4xbf16>
    %cst_125 = arith.constant dense<0.000000e+00> : vector<64x4xf32>
    %104 = tpu.matmul %101, %103, %cst_125 {dimension_numbers = #tpu.dot_dimension_numbers<[1], [0], [0], [1], [0, 0, 1, 1], [], []>} : vector<64x8xbf16>, vector<8x4xbf16>, vector<64x4xf32> -> vector<64x4xf32>
    %105 = arith.addf %88, %104 : vector<64x4xf32>
    %c4_126 = arith.constant 4 : index
    %c0_127 = arith.constant 0 : index
    %c0_128 = arith.constant 0 : index
    %106 = vector.load %arg5[%c4_126, %c0_127, %c0_128] : memref<9x8x4xbf16, #tpu.memory_space<vmem>>, vector<1x8x4xbf16>
    %107 = vector.shape_cast %106 : vector<1x8x4xbf16> to vector<8x4xbf16>
    %cst_129 = arith.constant dense<0.000000e+00> : vector<64x4xf32>
    %108 = tpu.matmul %101, %107, %cst_129 {dimension_numbers = #tpu.dot_dimension_numbers<[1], [0], [0], [1], [0, 0, 1, 1], [], []>} : vector<64x8xbf16>, vector<8x4xbf16>, vector<64x4xf32> -> vector<64x4xf32>
    %109 = arith.addf %92, %108 : vector<64x4xf32>
    %c2_130 = arith.constant 2 : index
    %c0_131 = arith.constant 0 : index
    %c0_132 = arith.constant 0 : index
    %110 = vector.load %arg5[%c2_130, %c0_131, %c0_132] : memref<9x8x4xbf16, #tpu.memory_space<vmem>>, vector<1x8x4xbf16>
    %111 = vector.shape_cast %110 : vector<1x8x4xbf16> to vector<8x4xbf16>
    %cst_133 = arith.constant dense<0.000000e+00> : vector<64x4xf32>
    %112 = tpu.matmul %101, %111, %cst_133 {dimension_numbers = #tpu.dot_dimension_numbers<[1], [0], [0], [1], [0, 0, 1, 1], [], []>} : vector<64x8xbf16>, vector<8x4xbf16>, vector<64x4xf32> -> vector<64x4xf32>
    %113 = arith.addf %96, %112 : vector<64x4xf32>
    %c1_134 = arith.constant 1 : index
    %c0_135 = arith.constant 0 : index
    %c0_136 = arith.constant 0 : index
    %114 = vector.load %arg5[%c1_134, %c0_135, %c0_136] : memref<9x8x4xbf16, #tpu.memory_space<vmem>>, vector<1x8x4xbf16>
    %115 = vector.shape_cast %114 : vector<1x8x4xbf16> to vector<8x4xbf16>
    %cst_137 = arith.constant dense<0.000000e+00> : vector<64x4xf32>
    %116 = tpu.matmul %101, %115, %cst_137 {dimension_numbers = #tpu.dot_dimension_numbers<[1], [0], [0], [1], [0, 0, 1, 1], [], []>} : vector<64x8xbf16>, vector<8x4xbf16>, vector<64x4xf32> -> vector<64x4xf32>
    %117 = arith.addf %99, %116 : vector<64x4xf32>
    %c1_138 = arith.constant 1 : index
    %c2_139 = arith.constant 2 : index
    %c0_140 = arith.constant 0 : index
    %118 = vector.load %arg9[%c1_138, %c2_139, %c0_140] : memref<10x10x32xbf16, #tpu.memory_space<vmem>>, vector<8x8x8xbf16>
    %119 = vector.shape_cast %118 : vector<8x8x8xbf16> to vector<64x8xbf16>
    %c5_141 = arith.constant 5 : index
    %c0_142 = arith.constant 0 : index
    %c0_143 = arith.constant 0 : index
    %120 = vector.load %arg5[%c5_141, %c0_142, %c0_143] : memref<9x8x4xbf16, #tpu.memory_space<vmem>>, vector<1x8x4xbf16>
    %121 = vector.shape_cast %120 : vector<1x8x4xbf16> to vector<8x4xbf16>
    %cst_144 = arith.constant dense<0.000000e+00> : vector<64x4xf32>
    %122 = tpu.matmul %119, %121, %cst_144 {dimension_numbers = #tpu.dot_dimension_numbers<[1], [0], [0], [1], [0, 0, 1, 1], [], []>} : vector<64x8xbf16>, vector<8x4xbf16>, vector<64x4xf32> -> vector<64x4xf32>
    %123 = arith.addf %109, %122 : vector<64x4xf32>
    %c2_145 = arith.constant 2 : index
    %c0_146 = arith.constant 0 : index
    %c0_147 = arith.constant 0 : index
    %124 = vector.load %arg5[%c2_145, %c0_146, %c0_147] : memref<9x8x4xbf16, #tpu.memory_space<vmem>>, vector<1x8x4xbf16>
    %125 = vector.shape_cast %124 : vector<1x8x4xbf16> to vector<8x4xbf16>
    %cst_148 = arith.constant dense<0.000000e+00> : vector<64x4xf32>
    %126 = tpu.matmul %119, %125, %cst_148 {dimension_numbers = #tpu.dot_dimension_numbers<[1], [0], [0], [1], [0, 0, 1, 1], [], []>} : vector<64x8xbf16>, vector<8x4xbf16>, vector<64x4xf32> -> vector<64x4xf32>
    %127 = arith.addf %117, %126 : vector<64x4xf32>
    %c1_149 = arith.constant 1 : index
    %c0_150 = arith.constant 0 : index
    %c24_151 = arith.constant 24 : index
    %128 = vector.load %arg9[%c1_149, %c0_150, %c24_151] : memref<10x10x32xbf16, #tpu.memory_space<vmem>>, vector<8x8x8xbf16>
    %129 = vector.shape_cast %128 : vector<8x8x8xbf16> to vector<64x8xbf16>
    %c6 = arith.constant 6 : index
    %c0_152 = arith.constant 0 : index
    %c0_153 = arith.constant 0 : index
    %130 = vector.load %arg5[%c6, %c0_152, %c0_153] : memref<9x8x4xbf16, #tpu.memory_space<vmem>>, vector<1x8x4xbf16>
    %131 = vector.shape_cast %130 : vector<1x8x4xbf16> to vector<8x4xbf16>
    %cst_154 = arith.constant dense<0.000000e+00> : vector<64x4xf32>
    %132 = tpu.matmul %129, %131, %cst_154 {dimension_numbers = #tpu.dot_dimension_numbers<[1], [0], [0], [1], [0, 0, 1, 1], [], []>} : vector<64x8xbf16>, vector<8x4xbf16>, vector<64x4xf32> -> vector<64x4xf32>
    %133 = arith.addf %105, %132 : vector<64x4xf32>
    %c3_155 = arith.constant 3 : index
    %c0_156 = arith.constant 0 : index
    %c0_157 = arith.constant 0 : index
    %134 = vector.load %arg5[%c3_155, %c0_156, %c0_157] : memref<9x8x4xbf16, #tpu.memory_space<vmem>>, vector<1x8x4xbf16>
    %135 = vector.shape_cast %134 : vector<1x8x4xbf16> to vector<8x4xbf16>
    %cst_158 = arith.constant dense<0.000000e+00> : vector<64x4xf32>
    %136 = tpu.matmul %129, %135, %cst_158 {dimension_numbers = #tpu.dot_dimension_numbers<[1], [0], [0], [1], [0, 0, 1, 1], [], []>} : vector<64x8xbf16>, vector<8x4xbf16>, vector<64x4xf32> -> vector<64x4xf32>
    %137 = arith.addf %113, %136 : vector<64x4xf32>
    %c1_159 = arith.constant 1 : index
    %c1_160 = arith.constant 1 : index
    %c16_161 = arith.constant 16 : index
    %138 = vector.load %arg9[%c1_159, %c1_160, %c16_161] : memref<10x10x32xbf16, #tpu.memory_space<vmem>>, vector<8x8x8xbf16>
    %139 = vector.shape_cast %138 : vector<8x8x8xbf16> to vector<64x8xbf16>
    %c7 = arith.constant 7 : index
    %c0_162 = arith.constant 0 : index
    %c0_163 = arith.constant 0 : index
    %140 = vector.load %arg5[%c7, %c0_162, %c0_163] : memref<9x8x4xbf16, #tpu.memory_space<vmem>>, vector<1x8x4xbf16>
    %141 = vector.shape_cast %140 : vector<1x8x4xbf16> to vector<8x4xbf16>
    %cst_164 = arith.constant dense<0.000000e+00> : vector<64x4xf32>
    %142 = tpu.matmul %139, %141, %cst_164 {dimension_numbers = #tpu.dot_dimension_numbers<[1], [0], [0], [1], [0, 0, 1, 1], [], []>} : vector<64x8xbf16>, vector<8x4xbf16>, vector<64x4xf32> -> vector<64x4xf32>
    %143 = arith.addf %133, %142 : vector<64x4xf32>
    %c6_165 = arith.constant 6 : index
    %c0_166 = arith.constant 0 : index
    %c0_167 = arith.constant 0 : index
    %144 = vector.load %arg5[%c6_165, %c0_166, %c0_167] : memref<9x8x4xbf16, #tpu.memory_space<vmem>>, vector<1x8x4xbf16>
    %145 = vector.shape_cast %144 : vector<1x8x4xbf16> to vector<8x4xbf16>
    %cst_168 = arith.constant dense<0.000000e+00> : vector<64x4xf32>
    %146 = tpu.matmul %139, %145, %cst_168 {dimension_numbers = #tpu.dot_dimension_numbers<[1], [0], [0], [1], [0, 0, 1, 1], [], []>} : vector<64x8xbf16>, vector<8x4xbf16>, vector<64x4xf32> -> vector<64x4xf32>
    %147 = arith.addf %123, %146 : vector<64x4xf32>
    %c4_169 = arith.constant 4 : index
    %c0_170 = arith.constant 0 : index
    %c0_171 = arith.constant 0 : index
    %148 = vector.load %arg5[%c4_169, %c0_170, %c0_171] : memref<9x8x4xbf16, #tpu.memory_space<vmem>>, vector<1x8x4xbf16>
    %149 = vector.shape_cast %148 : vector<1x8x4xbf16> to vector<8x4xbf16>
    %cst_172 = arith.constant dense<0.000000e+00> : vector<64x4xf32>
    %150 = tpu.matmul %139, %149, %cst_172 {dimension_numbers = #tpu.dot_dimension_numbers<[1], [0], [0], [1], [0, 0, 1, 1], [], []>} : vector<64x8xbf16>, vector<8x4xbf16>, vector<64x4xf32> -> vector<64x4xf32>
    %151 = arith.addf %137, %150 : vector<64x4xf32>
    %c3_173 = arith.constant 3 : index
    %c0_174 = arith.constant 0 : index
    %c0_175 = arith.constant 0 : index
    %152 = vector.load %arg5[%c3_173, %c0_174, %c0_175] : memref<9x8x4xbf16, #tpu.memory_space<vmem>>, vector<1x8x4xbf16>
    %153 = vector.shape_cast %152 : vector<1x8x4xbf16> to vector<8x4xbf16>
    %cst_176 = arith.constant dense<0.000000e+00> : vector<64x4xf32>
    %154 = tpu.matmul %139, %153, %cst_176 {dimension_numbers = #tpu.dot_dimension_numbers<[1], [0], [0], [1], [0, 0, 1, 1], [], []>} : vector<64x8xbf16>, vector<8x4xbf16>, vector<64x4xf32> -> vector<64x4xf32>
    %155 = arith.addf %127, %154 : vector<64x4xf32>
    %c1_177 = arith.constant 1 : index
    %c1_178 = arith.constant 1 : index
    %c24_179 = arith.constant 24 : index
    %156 = vector.load %arg9[%c1_177, %c1_178, %c24_179] : memref<10x10x32xbf16, #tpu.memory_space<vmem>>, vector<8x8x8xbf16>
    %157 = vector.shape_cast %156 : vector<8x8x8xbf16> to vector<64x8xbf16>
    %c8_180 = arith.constant 8 : index
    %c0_181 = arith.constant 0 : index
    %c0_182 = arith.constant 0 : index
    %158 = vector.load %arg5[%c8_180, %c0_181, %c0_182] : memref<9x8x4xbf16, #tpu.memory_space<vmem>>, vector<1x8x4xbf16>
    %159 = vector.shape_cast %158 : vector<1x8x4xbf16> to vector<8x4xbf16>
    %cst_183 = arith.constant dense<0.000000e+00> : vector<64x4xf32>
    %160 = tpu.matmul %157, %159, %cst_183 {dimension_numbers = #tpu.dot_dimension_numbers<[1], [0], [0], [1], [0, 0, 1, 1], [], []>} : vector<64x8xbf16>, vector<8x4xbf16>, vector<64x4xf32> -> vector<64x4xf32>
    %161 = arith.addf %143, %160 : vector<64x4xf32>
    %c7_184 = arith.constant 7 : index
    %c0_185 = arith.constant 0 : index
    %c0_186 = arith.constant 0 : index
    %162 = vector.load %arg5[%c7_184, %c0_185, %c0_186] : memref<9x8x4xbf16, #tpu.memory_space<vmem>>, vector<1x8x4xbf16>
    %163 = vector.shape_cast %162 : vector<1x8x4xbf16> to vector<8x4xbf16>
    %cst_187 = arith.constant dense<0.000000e+00> : vector<64x4xf32>
    %164 = tpu.matmul %157, %163, %cst_187 {dimension_numbers = #tpu.dot_dimension_numbers<[1], [0], [0], [1], [0, 0, 1, 1], [], []>} : vector<64x8xbf16>, vector<8x4xbf16>, vector<64x4xf32> -> vector<64x4xf32>
    %165 = arith.addf %147, %164 : vector<64x4xf32>
    %c5_188 = arith.constant 5 : index
    %c0_189 = arith.constant 0 : index
    %c0_190 = arith.constant 0 : index
    %166 = vector.load %arg5[%c5_188, %c0_189, %c0_190] : memref<9x8x4xbf16, #tpu.memory_space<vmem>>, vector<1x8x4xbf16>
    %167 = vector.shape_cast %166 : vector<1x8x4xbf16> to vector<8x4xbf16>
    %cst_191 = arith.constant dense<0.000000e+00> : vector<64x4xf32>
    %168 = tpu.matmul %157, %167, %cst_191 {dimension_numbers = #tpu.dot_dimension_numbers<[1], [0], [0], [1], [0, 0, 1, 1], [], []>} : vector<64x8xbf16>, vector<8x4xbf16>, vector<64x4xf32> -> vector<64x4xf32>
    %169 = arith.addf %151, %168 : vector<64x4xf32>
    %c4_192 = arith.constant 4 : index
    %c0_193 = arith.constant 0 : index
    %c0_194 = arith.constant 0 : index
    %170 = vector.load %arg5[%c4_192, %c0_193, %c0_194] : memref<9x8x4xbf16, #tpu.memory_space<vmem>>, vector<1x8x4xbf16>
    %171 = vector.shape_cast %170 : vector<1x8x4xbf16> to vector<8x4xbf16>
    %cst_195 = arith.constant dense<0.000000e+00> : vector<64x4xf32>
    %172 = tpu.matmul %157, %171, %cst_195 {dimension_numbers = #tpu.dot_dimension_numbers<[1], [0], [0], [1], [0, 0, 1, 1], [], []>} : vector<64x8xbf16>, vector<8x4xbf16>, vector<64x4xf32> -> vector<64x4xf32>
    %173 = arith.addf %155, %172 : vector<64x4xf32>
    %c1_196 = arith.constant 1 : index
    %c2_197 = arith.constant 2 : index
    %c16_198 = arith.constant 16 : index
    %174 = vector.load %arg9[%c1_196, %c2_197, %c16_198] : memref<10x10x32xbf16, #tpu.memory_space<vmem>>, vector<8x8x8xbf16>
    %175 = vector.shape_cast %174 : vector<8x8x8xbf16> to vector<64x8xbf16>
    %c8_199 = arith.constant 8 : index
    %c0_200 = arith.constant 0 : index
    %c0_201 = arith.constant 0 : index
    %176 = vector.load %arg5[%c8_199, %c0_200, %c0_201] : memref<9x8x4xbf16, #tpu.memory_space<vmem>>, vector<1x8x4xbf16>
    %177 = vector.shape_cast %176 : vector<1x8x4xbf16> to vector<8x4xbf16>
    %cst_202 = arith.constant dense<0.000000e+00> : vector<64x4xf32>
    %178 = tpu.matmul %175, %177, %cst_202 {dimension_numbers = #tpu.dot_dimension_numbers<[1], [0], [0], [1], [0, 0, 1, 1], [], []>} : vector<64x8xbf16>, vector<8x4xbf16>, vector<64x4xf32> -> vector<64x4xf32>
    %179 = arith.addf %165, %178 : vector<64x4xf32>
    %c5_203 = arith.constant 5 : index
    %c0_204 = arith.constant 0 : index
    %c0_205 = arith.constant 0 : index
    %180 = vector.load %arg5[%c5_203, %c0_204, %c0_205] : memref<9x8x4xbf16, #tpu.memory_space<vmem>>, vector<1x8x4xbf16>
    %181 = vector.shape_cast %180 : vector<1x8x4xbf16> to vector<8x4xbf16>
    %cst_206 = arith.constant dense<0.000000e+00> : vector<64x4xf32>
    %182 = tpu.matmul %175, %181, %cst_206 {dimension_numbers = #tpu.dot_dimension_numbers<[1], [0], [0], [1], [0, 0, 1, 1], [], []>} : vector<64x8xbf16>, vector<8x4xbf16>, vector<64x4xf32> -> vector<64x4xf32>
    %183 = arith.addf %173, %182 : vector<64x4xf32>
    %c2_207 = arith.constant 2 : index
    %c0_208 = arith.constant 0 : index
    %c8_209 = arith.constant 8 : index
    %184 = vector.load %arg9[%c2_207, %c0_208, %c8_209] : memref<10x10x32xbf16, #tpu.memory_space<vmem>>, vector<8x8x8xbf16>
    %185 = vector.shape_cast %184 : vector<8x8x8xbf16> to vector<64x8xbf16>
    %c6_210 = arith.constant 6 : index
    %c0_211 = arith.constant 0 : index
    %c0_212 = arith.constant 0 : index
    %186 = vector.load %arg5[%c6_210, %c0_211, %c0_212] : memref<9x8x4xbf16, #tpu.memory_space<vmem>>, vector<1x8x4xbf16>
    %187 = vector.shape_cast %186 : vector<1x8x4xbf16> to vector<8x4xbf16>
    %cst_213 = arith.constant dense<0.000000e+00> : vector<64x4xf32>
    %188 = tpu.matmul %185, %187, %cst_213 {dimension_numbers = #tpu.dot_dimension_numbers<[1], [0], [0], [1], [0, 0, 1, 1], [], []>} : vector<64x8xbf16>, vector<8x4xbf16>, vector<64x4xf32> -> vector<64x4xf32>
    %189 = arith.addf %169, %188 : vector<64x4xf32>
    %c2_214 = arith.constant 2 : index
    %c1_215 = arith.constant 1 : index
    %c0_216 = arith.constant 0 : index
    %190 = vector.load %arg9[%c2_214, %c1_215, %c0_216] : memref<10x10x32xbf16, #tpu.memory_space<vmem>>, vector<8x8x8xbf16>
    %191 = vector.shape_cast %190 : vector<8x8x8xbf16> to vector<64x8xbf16>
    %c7_217 = arith.constant 7 : index
    %c0_218 = arith.constant 0 : index
    %c0_219 = arith.constant 0 : index
    %192 = vector.load %arg5[%c7_217, %c0_218, %c0_219] : memref<9x8x4xbf16, #tpu.memory_space<vmem>>, vector<1x8x4xbf16>
    %193 = vector.shape_cast %192 : vector<1x8x4xbf16> to vector<8x4xbf16>
    %cst_220 = arith.constant dense<0.000000e+00> : vector<64x4xf32>
    %194 = tpu.matmul %191, %193, %cst_220 {dimension_numbers = #tpu.dot_dimension_numbers<[1], [0], [0], [1], [0, 0, 1, 1], [], []>} : vector<64x8xbf16>, vector<8x4xbf16>, vector<64x4xf32> -> vector<64x4xf32>
    %195 = arith.addf %189, %194 : vector<64x4xf32>
    %c6_221 = arith.constant 6 : index
    %c0_222 = arith.constant 0 : index
    %c0_223 = arith.constant 0 : index
    %196 = vector.load %arg5[%c6_221, %c0_222, %c0_223] : memref<9x8x4xbf16, #tpu.memory_space<vmem>>, vector<1x8x4xbf16>
    %197 = vector.shape_cast %196 : vector<1x8x4xbf16> to vector<8x4xbf16>
    %cst_224 = arith.constant dense<0.000000e+00> : vector<64x4xf32>
    %198 = tpu.matmul %191, %197, %cst_224 {dimension_numbers = #tpu.dot_dimension_numbers<[1], [0], [0], [1], [0, 0, 1, 1], [], []>} : vector<64x8xbf16>, vector<8x4xbf16>, vector<64x4xf32> -> vector<64x4xf32>
    %199 = arith.addf %183, %198 : vector<64x4xf32>
    %c2_225 = arith.constant 2 : index
    %c1_226 = arith.constant 1 : index
    %c8_227 = arith.constant 8 : index
    %200 = vector.load %arg9[%c2_225, %c1_226, %c8_227] : memref<10x10x32xbf16, #tpu.memory_space<vmem>>, vector<8x8x8xbf16>
    %201 = vector.shape_cast %200 : vector<8x8x8xbf16> to vector<64x8xbf16>
    %c8_228 = arith.constant 8 : index
    %c0_229 = arith.constant 0 : index
    %c0_230 = arith.constant 0 : index
    %202 = vector.load %arg5[%c8_228, %c0_229, %c0_230] : memref<9x8x4xbf16, #tpu.memory_space<vmem>>, vector<1x8x4xbf16>
    %203 = vector.shape_cast %202 : vector<1x8x4xbf16> to vector<8x4xbf16>
    %cst_231 = arith.constant dense<0.000000e+00> : vector<64x4xf32>
    %204 = tpu.matmul %201, %203, %cst_231 {dimension_numbers = #tpu.dot_dimension_numbers<[1], [0], [0], [1], [0, 0, 1, 1], [], []>} : vector<64x8xbf16>, vector<8x4xbf16>, vector<64x4xf32> -> vector<64x4xf32>
    %205 = arith.addf %195, %204 : vector<64x4xf32>
    %c7_232 = arith.constant 7 : index
    %c0_233 = arith.constant 0 : index
    %c0_234 = arith.constant 0 : index
    %206 = vector.load %arg5[%c7_232, %c0_233, %c0_234] : memref<9x8x4xbf16, #tpu.memory_space<vmem>>, vector<1x8x4xbf16>
    %207 = vector.shape_cast %206 : vector<1x8x4xbf16> to vector<8x4xbf16>
    %cst_235 = arith.constant dense<0.000000e+00> : vector<64x4xf32>
    %208 = tpu.matmul %201, %207, %cst_235 {dimension_numbers = #tpu.dot_dimension_numbers<[1], [0], [0], [1], [0, 0, 1, 1], [], []>} : vector<64x8xbf16>, vector<8x4xbf16>, vector<64x4xf32> -> vector<64x4xf32>
    %209 = arith.addf %199, %208 : vector<64x4xf32>
    %c2_236 = arith.constant 2 : index
    %c2_237 = arith.constant 2 : index
    %c0_238 = arith.constant 0 : index
    %210 = vector.load %arg9[%c2_236, %c2_237, %c0_238] : memref<10x10x32xbf16, #tpu.memory_space<vmem>>, vector<8x8x8xbf16>
    %211 = vector.shape_cast %210 : vector<8x8x8xbf16> to vector<64x8xbf16>
    %c8_239 = arith.constant 8 : index
    %c0_240 = arith.constant 0 : index
    %c0_241 = arith.constant 0 : index
    %212 = vector.load %arg5[%c8_239, %c0_240, %c0_241] : memref<9x8x4xbf16, #tpu.memory_space<vmem>>, vector<1x8x4xbf16>
    %213 = vector.shape_cast %212 : vector<1x8x4xbf16> to vector<8x4xbf16>
    %cst_242 = arith.constant dense<0.000000e+00> : vector<64x4xf32>
    %214 = tpu.matmul %211, %213, %cst_242 {dimension_numbers = #tpu.dot_dimension_numbers<[1], [0], [0], [1], [0, 0, 1, 1], [], []>} : vector<64x8xbf16>, vector<8x4xbf16>, vector<64x4xf32> -> vector<64x4xf32>
    %215 = arith.addf %209, %214 : vector<64x4xf32>
    %c0_243 = arith.constant 0 : index
    %c0_244 = arith.constant 0 : index
    %216 = vector.load %arg6[%c0_243, %c0_244] : memref<1x4xf32, #tpu.memory_space<vmem>>, vector<1x4xf32>
    %217 = vector.broadcast %216 : vector<1x4xf32> to vector<64x4xf32>
    %218 = arith.mulf %161, %217 : vector<64x4xf32>
    %c0_245 = arith.constant 0 : index
    %c0_246 = arith.constant 0 : index
    %219 = vector.load %arg7[%c0_245, %c0_246] : memref<1x4xf32, #tpu.memory_space<vmem>>, vector<1x4xf32>
    %220 = vector.broadcast %219 : vector<1x4xf32> to vector<64x4xf32>
    %221 = arith.addf %218, %220 : vector<64x4xf32>
    %cst_247 = arith.constant 0.000000e+00 : f32
    %222 = vector.broadcast %cst_247 : f32 to vector<64x4xf32>
    %223 = arith.maximumf %221, %222 : vector<64x4xf32>
    %224 = vector.shape_cast %223 : vector<64x4xf32> to vector<8x8x4xf32>
    %c0_248 = arith.constant 0 : index
    %c0_249 = arith.constant 0 : index
    %225 = vector.load %arg6[%c0_248, %c0_249] : memref<1x4xf32, #tpu.memory_space<vmem>>, vector<1x4xf32>
    %226 = vector.broadcast %225 : vector<1x4xf32> to vector<64x4xf32>
    %227 = arith.mulf %179, %226 : vector<64x4xf32>
    %c0_250 = arith.constant 0 : index
    %c0_251 = arith.constant 0 : index
    %228 = vector.load %arg7[%c0_250, %c0_251] : memref<1x4xf32, #tpu.memory_space<vmem>>, vector<1x4xf32>
    %229 = vector.broadcast %228 : vector<1x4xf32> to vector<64x4xf32>
    %230 = arith.addf %227, %229 : vector<64x4xf32>
    %cst_252 = arith.constant 0.000000e+00 : f32
    %231 = vector.broadcast %cst_252 : f32 to vector<64x4xf32>
    %232 = arith.maximumf %230, %231 : vector<64x4xf32>
    %233 = vector.shape_cast %232 : vector<64x4xf32> to vector<8x8x4xf32>
    %234 = tpu.concatenate %224, %233 in 2 : vector<8x8x4xf32>, vector<8x8x4xf32> -> vector<8x8x8xf32>
    %235 = arith.truncf %234 : vector<8x8x8xf32> to vector<8x8x8xbf16>
    %c0_253 = arith.constant 0 : index
    %c0_254 = arith.constant 0 : index
    %c0_255 = arith.constant 0 : index
    %c0_256 = arith.constant 0 : index
    %c0_257 = arith.constant 0 : index
    %236 = vector.load %arg8[%c0_253, %c0_254, %c0_255, %c0_256, %c0_257] : memref<1x8x2x8x8xbf16, #tpu.memory_space<vmem>>, vector<1x8x1x8x8xbf16>
    %237 = vector.shape_cast %236 : vector<1x8x1x8x8xbf16> to vector<8x8x8xbf16>
    %238 = vector.shape_cast %235 : vector<8x8x8xbf16> to vector<1x8x1x8x8xbf16>
    tpu.vector_store %arg8[%c0_253, %c0_254, %c0_255, %c0_256, %c0_257], %238 {strides = array<i32>} : memref<1x8x2x8x8xbf16, #tpu.memory_space<vmem>>, vector<1x8x1x8x8xbf16>,
    %c0_258 = arith.constant 0 : index
    %c0_259 = arith.constant 0 : index
    %239 = vector.load %arg6[%c0_258, %c0_259] : memref<1x4xf32, #tpu.memory_space<vmem>>, vector<1x4xf32>
    %240 = vector.broadcast %239 : vector<1x4xf32> to vector<64x4xf32>
    %241 = arith.mulf %205, %240 : vector<64x4xf32>
    %c0_260 = arith.constant 0 : index
    %c0_261 = arith.constant 0 : index
    %242 = vector.load %arg7[%c0_260, %c0_261] : memref<1x4xf32, #tpu.memory_space<vmem>>, vector<1x4xf32>
    %243 = vector.broadcast %242 : vector<1x4xf32> to vector<64x4xf32>
    %244 = arith.addf %241, %243 : vector<64x4xf32>
    %cst_262 = arith.constant 0.000000e+00 : f32
    %245 = vector.broadcast %cst_262 : f32 to vector<64x4xf32>
    %246 = arith.maximumf %244, %245 : vector<64x4xf32>
    %247 = vector.shape_cast %246 : vector<64x4xf32> to vector<8x8x4xf32>
    %c0_263 = arith.constant 0 : index
    %c0_264 = arith.constant 0 : index
    %248 = vector.load %arg6[%c0_263, %c0_264] : memref<1x4xf32, #tpu.memory_space<vmem>>, vector<1x4xf32>
    %249 = vector.broadcast %248 : vector<1x4xf32> to vector<64x4xf32>
    %250 = arith.mulf %215, %249 : vector<64x4xf32>
    %c0_265 = arith.constant 0 : index
    %c0_266 = arith.constant 0 : index
    %251 = vector.load %arg7[%c0_265, %c0_266] : memref<1x4xf32, #tpu.memory_space<vmem>>, vector<1x4xf32>
    %252 = vector.broadcast %251 : vector<1x4xf32> to vector<64x4xf32>
    %253 = arith.addf %250, %252 : vector<64x4xf32>
    %cst_267 = arith.constant 0.000000e+00 : f32
    %254 = vector.broadcast %cst_267 : f32 to vector<64x4xf32>
    %255 = arith.maximumf %253, %254 : vector<64x4xf32>
    %256 = vector.shape_cast %255 : vector<64x4xf32> to vector<8x8x4xf32>
    %257 = tpu.concatenate %247, %256 in 2 : vector<8x8x4xf32>, vector<8x8x4xf32> -> vector<8x8x8xf32>
    %258 = arith.truncf %257 : vector<8x8x8xf32> to vector<8x8x8xbf16>
    %c0_268 = arith.constant 0 : index
    %c0_269 = arith.constant 0 : index
    %c1_270 = arith.constant 1 : index
    %c0_271 = arith.constant 0 : index
    %c0_272 = arith.constant 0 : index
    %259 = vector.load %arg8[%c0_268, %c0_269, %c1_270, %c0_271, %c0_272] : memref<1x8x2x8x8xbf16, #tpu.memory_space<vmem>>, vector<1x8x1x8x8xbf16>
    %260 = vector.shape_cast %259 : vector<1x8x1x8x8xbf16> to vector<8x8x8xbf16>
    %261 = vector.shape_cast %258 : vector<8x8x8xbf16> to vector<1x8x1x8x8xbf16>
    tpu.vector_store %arg8[%c0_268, %c0_269, %c1_270, %c0_271, %c0_272], %261 {strides = array<i32>} : memref<1x8x2x8x8xbf16, #tpu.memory_space<vmem>>, vector<1x8x1x8x8xbf16>,
    return
  }
  func.func @transform_0(%arg0: i32) -> (i32, i32, i32, i32) {
    %c0_i32 = arith.constant 0 : i32
    %c0_i32_0 = arith.constant 0 : i32
    %c0_i32_1 = arith.constant 0 : i32
    %c0_i32_2 = arith.constant 0 : i32
    return %arg0, %c0_i32, %c0_i32_0, %c0_i32_1 : i32, i32, i32, i32
  }
  func.func @transform_1(%arg0: i32) -> (i32, i32, i32, i32, i32) {
    %c0_i32 = arith.constant 0 : i32
    %c0_i32_0 = arith.constant 0 : i32
    %c0_i32_1 = arith.constant 0 : i32
    %c0_i32_2 = arith.constant 0 : i32
    %c0_i32_3 = arith.constant 0 : i32
    return %arg0, %c0_i32, %c0_i32_0, %c0_i32_1, %c0_i32_2 : i32, i32, i32, i32, i32
  }
  func.func @transform_2(%arg0: i32) -> (i32, i32) {
    %c0_i32 = arith.constant 0 : i32
    %c0_i32_0 = arith.constant 0 : i32
    %c0_i32_1 = arith.constant 0 : i32
    return %c0_i32, %c0_i32_0 : i32, i32
  }
  func.func @transform_3(%arg0: i32) -> (i32, i32) {
    %c0_i32 = arith.constant 0 : i32
    %c0_i32_0 = arith.constant 0 : i32
    %c0_i32_1 = arith.constant 0 : i32
    return %c0_i32, %c0_i32_0 : i32, i32
  }
  func.func @transform_4(%arg0: i32) -> (i32, i32, i32) {
    %c0_i32 = arith.constant 0 : i32
    %c0_i32_0 = arith.constant 0 : i32
    %c0_i32_1 = arith.constant 0 : i32
    %c0_i32_2 = arith.constant 0 : i32
    return %c0_i32, %c0_i32_0, %c0_i32_1 : i32, i32, i32
  }
  func.func @transform_5(%arg0: i32) -> (i32, i32) {
    %c0_i32 = arith.constant 0 : i32
    %c0_i32_0 = arith.constant 0 : i32
    %c0_i32_1 = arith.constant 0 : i32
    return %c0_i32, %c0_i32_0 : i32, i32
  }
  func.func @transform_6(%arg0: i32) -> (i32, i32) {
    %c0_i32 = arith.constant 0 : i32
    %c0_i32_0 = arith.constant 0 : i32
    %c0_i32_1 = arith.constant 0 : i32
    return %c0_i32, %c0_i32_0 : i32, i32
  }
  func.func @transform_7(%arg0: i32) -> (i32, i32, i32, i32, i32) {
    %c0_i32 = arith.constant 0 : i32
    %c0_i32_0 = arith.constant 0 : i32
    %c0_i32_1 = arith.constant 0 : i32
    %c0_i32_2 = arith.constant 0 : i32
    %c0_i32_3 = arith.constant 0 : i32
    return %arg0, %c0_i32, %c0_i32_0, %c0_i32_1, %c0_i32_2 : i32, i32, i32, i32, i32
  }
}

module attributes {stable_mosaic.version = 11 : i64} {
  func.func @_conv_bn_relu_kernel(%arg0: i32, %arg1: memref<1x16x16x4xbf16, #tpu.memory_space<vmem>>, %arg2: memref<9x4x4xbf16, #tpu.memory_space<vmem>>, %arg3: memref<1x4xf32, #tpu.memory_space<vmem>>, %arg4: memref<1x4xf32, #tpu.memory_space<vmem>>, %arg5: memref<1x16x16x4xf32, #tpu.memory_space<vmem>>, %arg6: memref<18x18x4xbf16, #tpu.memory_space<vmem>>) attributes {dimension_semantics = [#tpu.dimension_semantics<parallel>], iteration_bounds = array<i64: 2>, scalar_prefetch = 0 : i64, scratch_operands = 1 : i64, tpu.core_type = #tpu.core_type<tc>, window_params = [{transform_indices = @transform_0, window_bounds = array<i64: 1, 16, 16, 4>}, {pipeline_mode = #tpu.pipeline_mode<synchronous>, transform_indices = @transform_1, window_bounds = array<i64: 9, 4, 4>}, {pipeline_mode = #tpu.pipeline_mode<synchronous>, transform_indices = @transform_2, window_bounds = array<i64: 1, 4>}, {pipeline_mode = #tpu.pipeline_mode<synchronous>, transform_indices = @transform_3, window_bounds = array<i64: 1, 4>}, {transform_indices = @transform_4, window_bounds = array<i64: 1, 16, 16, 4>}]} {
    %cst = arith.constant 0.000000e+00 : bf16
    %0 = vector.broadcast %cst : bf16 to vector<18x4xbf16>
    %cst_0 = arith.constant 0.000000e+00 : bf16
    %1 = vector.broadcast %cst_0 : bf16 to vector<18x4xbf16>
    %c0 = arith.constant 0 : index
    %c0_1 = arith.constant 0 : index
    %c0_2 = arith.constant 0 : index
    %2 = vector.load %arg6[%c0, %c0_1, %c0_2] : memref<18x18x4xbf16, #tpu.memory_space<vmem>>, vector<1x18x4xbf16>
    %3 = vector.shape_cast %2 : vector<1x18x4xbf16> to vector<18x4xbf16>
    %4 = vector.shape_cast %0 : vector<18x4xbf16> to vector<1x18x4xbf16>
    tpu.vector_store %arg6[%c0, %c0_1, %c0_2], %4 {strides = array<i32>} : memref<18x18x4xbf16, #tpu.memory_space<vmem>>, vector<1x18x4xbf16>,
    %c17 = arith.constant 17 : index
    %c0_3 = arith.constant 0 : index
    %c0_4 = arith.constant 0 : index
    %5 = vector.load %arg6[%c17, %c0_3, %c0_4] : memref<18x18x4xbf16, #tpu.memory_space<vmem>>, vector<1x18x4xbf16>
    %6 = vector.shape_cast %5 : vector<1x18x4xbf16> to vector<18x4xbf16>
    %7 = vector.shape_cast %0 : vector<18x4xbf16> to vector<1x18x4xbf16>
    tpu.vector_store %arg6[%c17, %c0_3, %c0_4], %7 {strides = array<i32>} : memref<18x18x4xbf16, #tpu.memory_space<vmem>>, vector<1x18x4xbf16>,
    %c0_5 = arith.constant 0 : index
    %c0_6 = arith.constant 0 : index
    %c0_7 = arith.constant 0 : index
    %8 = vector.load %arg6[%c0_5, %c0_6, %c0_7] : memref<18x18x4xbf16, #tpu.memory_space<vmem>>, vector<18x1x4xbf16>
    %9 = vector.shape_cast %8 : vector<18x1x4xbf16> to vector<18x4xbf16>
    %10 = vector.shape_cast %1 : vector<18x4xbf16> to vector<18x1x4xbf16>
    tpu.vector_store %arg6[%c0_5, %c0_6, %c0_7], %10 {strides = array<i32>} : memref<18x18x4xbf16, #tpu.memory_space<vmem>>, vector<18x1x4xbf16>,
    %c0_8 = arith.constant 0 : index
    %c17_9 = arith.constant 17 : index
    %c0_10 = arith.constant 0 : index
    %11 = vector.load %arg6[%c0_8, %c17_9, %c0_10] : memref<18x18x4xbf16, #tpu.memory_space<vmem>>, vector<18x1x4xbf16>
    %12 = vector.shape_cast %11 : vector<18x1x4xbf16> to vector<18x4xbf16>
    %13 = vector.shape_cast %1 : vector<18x4xbf16> to vector<18x1x4xbf16>
    tpu.vector_store %arg6[%c0_8, %c17_9, %c0_10], %13 {strides = array<i32>} : memref<18x18x4xbf16, #tpu.memory_space<vmem>>, vector<18x1x4xbf16>,
    %c0_11 = arith.constant 0 : index
    %c0_12 = arith.constant 0 : index
    %c0_13 = arith.constant 0 : index
    %c0_14 = arith.constant 0 : index
    %14 = vector.load %arg1[%c0_11, %c0_12, %c0_13, %c0_14] : memref<1x16x16x4xbf16, #tpu.memory_space<vmem>>, vector<1x16x16x4xbf16>
    %15 = vector.shape_cast %14 : vector<1x16x16x4xbf16> to vector<16x16x4xbf16>
    %c1 = arith.constant 1 : index
    %c1_15 = arith.constant 1 : index
    %c0_16 = arith.constant 0 : index
    %16 = vector.load %arg6[%c1, %c1_15, %c0_16] : memref<18x18x4xbf16, #tpu.memory_space<vmem>>, vector<16x16x4xbf16>
    tpu.vector_store %arg6[%c1, %c1_15, %c0_16], %15 {strides = array<i32>} : memref<18x18x4xbf16, #tpu.memory_space<vmem>>, vector<16x16x4xbf16>,
    %c0_17 = arith.constant 0 : index
    %c0_18 = arith.constant 0 : index
    %c0_19 = arith.constant 0 : index
    %17 = vector.load %arg6[%c0_17, %c0_18, %c0_19] : memref<18x18x4xbf16, #tpu.memory_space<vmem>>, vector<18x16x4xbf16>
    %c0_20 = arith.constant 0 : index
    %c1_21 = arith.constant 1 : index
    %c0_22 = arith.constant 0 : index
    %18 = vector.load %arg6[%c0_20, %c1_21, %c0_22] : memref<18x18x4xbf16, #tpu.memory_space<vmem>>, vector<18x16x4xbf16>
    %c0_23 = arith.constant 0 : index
    %c2 = arith.constant 2 : index
    %c0_24 = arith.constant 0 : index
    %19 = vector.load %arg6[%c0_23, %c2, %c0_24] : memref<18x18x4xbf16, #tpu.memory_space<vmem>>, vector<18x16x4xbf16>
    %20 = vector.extract_strided_slice %17 {offsets = [0, 0, 0], sizes = [16, 16, 4], strides = [1, 1, 1]} : vector<18x16x4xbf16> to vector<16x16x4xbf16>
    %21 = vector.shape_cast %20 : vector<16x16x4xbf16> to vector<256x4xbf16>
    %c0_25 = arith.constant 0 : index
    %c0_26 = arith.constant 0 : index
    %c0_27 = arith.constant 0 : index
    %22 = vector.load %arg2[%c0_25, %c0_26, %c0_27] : memref<9x4x4xbf16, #tpu.memory_space<vmem>>, vector<1x4x4xbf16>
    %23 = vector.shape_cast %22 : vector<1x4x4xbf16> to vector<4x4xbf16>
    %cst_28 = arith.constant dense<0.000000e+00> : vector<256x4xf32>
    %24 = tpu.matmul %21, %23, %cst_28 {dimension_numbers = #tpu.dot_dimension_numbers<[1], [0], [0], [1], [0, 0, 1, 1], [], []>} : vector<256x4xbf16>, vector<4x4xbf16>, vector<256x4xf32> -> vector<256x4xf32>
    %25 = vector.extract_strided_slice %18 {offsets = [0, 0, 0], sizes = [16, 16, 4], strides = [1, 1, 1]} : vector<18x16x4xbf16> to vector<16x16x4xbf16>
    %26 = vector.shape_cast %25 : vector<16x16x4xbf16> to vector<256x4xbf16>
    %c1_29 = arith.constant 1 : index
    %c0_30 = arith.constant 0 : index
    %c0_31 = arith.constant 0 : index
    %27 = vector.load %arg2[%c1_29, %c0_30, %c0_31] : memref<9x4x4xbf16, #tpu.memory_space<vmem>>, vector<1x4x4xbf16>
    %28 = vector.shape_cast %27 : vector<1x4x4xbf16> to vector<4x4xbf16>
    %cst_32 = arith.constant dense<0.000000e+00> : vector<256x4xf32>
    %29 = tpu.matmul %26, %28, %cst_32 {dimension_numbers = #tpu.dot_dimension_numbers<[1], [0], [0], [1], [0, 0, 1, 1], [], []>} : vector<256x4xbf16>, vector<4x4xbf16>, vector<256x4xf32> -> vector<256x4xf32>
    %30 = arith.addf %24, %29 : vector<256x4xf32>
    %31 = vector.extract_strided_slice %19 {offsets = [0, 0, 0], sizes = [16, 16, 4], strides = [1, 1, 1]} : vector<18x16x4xbf16> to vector<16x16x4xbf16>
    %32 = vector.shape_cast %31 : vector<16x16x4xbf16> to vector<256x4xbf16>
    %c2_33 = arith.constant 2 : index
    %c0_34 = arith.constant 0 : index
    %c0_35 = arith.constant 0 : index
    %33 = vector.load %arg2[%c2_33, %c0_34, %c0_35] : memref<9x4x4xbf16, #tpu.memory_space<vmem>>, vector<1x4x4xbf16>
    %34 = vector.shape_cast %33 : vector<1x4x4xbf16> to vector<4x4xbf16>
    %cst_36 = arith.constant dense<0.000000e+00> : vector<256x4xf32>
    %35 = tpu.matmul %32, %34, %cst_36 {dimension_numbers = #tpu.dot_dimension_numbers<[1], [0], [0], [1], [0, 0, 1, 1], [], []>} : vector<256x4xbf16>, vector<4x4xbf16>, vector<256x4xf32> -> vector<256x4xf32>
    %36 = arith.addf %30, %35 : vector<256x4xf32>
    %37 = vector.extract_strided_slice %17 {offsets = [1, 0, 0], sizes = [16, 16, 4], strides = [1, 1, 1]} : vector<18x16x4xbf16> to vector<16x16x4xbf16>
    %38 = vector.shape_cast %37 : vector<16x16x4xbf16> to vector<256x4xbf16>
    %c3 = arith.constant 3 : index
    %c0_37 = arith.constant 0 : index
    %c0_38 = arith.constant 0 : index
    %39 = vector.load %arg2[%c3, %c0_37, %c0_38] : memref<9x4x4xbf16, #tpu.memory_space<vmem>>, vector<1x4x4xbf16>
    %40 = vector.shape_cast %39 : vector<1x4x4xbf16> to vector<4x4xbf16>
    %cst_39 = arith.constant dense<0.000000e+00> : vector<256x4xf32>
    %41 = tpu.matmul %38, %40, %cst_39 {dimension_numbers = #tpu.dot_dimension_numbers<[1], [0], [0], [1], [0, 0, 1, 1], [], []>} : vector<256x4xbf16>, vector<4x4xbf16>, vector<256x4xf32> -> vector<256x4xf32>
    %42 = arith.addf %36, %41 : vector<256x4xf32>
    %43 = vector.extract_strided_slice %18 {offsets = [1, 0, 0], sizes = [16, 16, 4], strides = [1, 1, 1]} : vector<18x16x4xbf16> to vector<16x16x4xbf16>
    %44 = vector.shape_cast %43 : vector<16x16x4xbf16> to vector<256x4xbf16>
    %c4 = arith.constant 4 : index
    %c0_40 = arith.constant 0 : index
    %c0_41 = arith.constant 0 : index
    %45 = vector.load %arg2[%c4, %c0_40, %c0_41] : memref<9x4x4xbf16, #tpu.memory_space<vmem>>, vector<1x4x4xbf16>
    %46 = vector.shape_cast %45 : vector<1x4x4xbf16> to vector<4x4xbf16>
    %cst_42 = arith.constant dense<0.000000e+00> : vector<256x4xf32>
    %47 = tpu.matmul %44, %46, %cst_42 {dimension_numbers = #tpu.dot_dimension_numbers<[1], [0], [0], [1], [0, 0, 1, 1], [], []>} : vector<256x4xbf16>, vector<4x4xbf16>, vector<256x4xf32> -> vector<256x4xf32>
    %48 = arith.addf %42, %47 : vector<256x4xf32>
    %49 = vector.extract_strided_slice %19 {offsets = [1, 0, 0], sizes = [16, 16, 4], strides = [1, 1, 1]} : vector<18x16x4xbf16> to vector<16x16x4xbf16>
    %50 = vector.shape_cast %49 : vector<16x16x4xbf16> to vector<256x4xbf16>
    %c5 = arith.constant 5 : index
    %c0_43 = arith.constant 0 : index
    %c0_44 = arith.constant 0 : index
    %51 = vector.load %arg2[%c5, %c0_43, %c0_44] : memref<9x4x4xbf16, #tpu.memory_space<vmem>>, vector<1x4x4xbf16>
    %52 = vector.shape_cast %51 : vector<1x4x4xbf16> to vector<4x4xbf16>
    %cst_45 = arith.constant dense<0.000000e+00> : vector<256x4xf32>
    %53 = tpu.matmul %50, %52, %cst_45 {dimension_numbers = #tpu.dot_dimension_numbers<[1], [0], [0], [1], [0, 0, 1, 1], [], []>} : vector<256x4xbf16>, vector<4x4xbf16>, vector<256x4xf32> -> vector<256x4xf32>
    %54 = arith.addf %48, %53 : vector<256x4xf32>
    %55 = vector.extract_strided_slice %17 {offsets = [2, 0, 0], sizes = [16, 16, 4], strides = [1, 1, 1]} : vector<18x16x4xbf16> to vector<16x16x4xbf16>
    %56 = vector.shape_cast %55 : vector<16x16x4xbf16> to vector<256x4xbf16>
    %c6 = arith.constant 6 : index
    %c0_46 = arith.constant 0 : index
    %c0_47 = arith.constant 0 : index
    %57 = vector.load %arg2[%c6, %c0_46, %c0_47] : memref<9x4x4xbf16, #tpu.memory_space<vmem>>, vector<1x4x4xbf16>
    %58 = vector.shape_cast %57 : vector<1x4x4xbf16> to vector<4x4xbf16>
    %cst_48 = arith.constant dense<0.000000e+00> : vector<256x4xf32>
    %59 = tpu.matmul %56, %58, %cst_48 {dimension_numbers = #tpu.dot_dimension_numbers<[1], [0], [0], [1], [0, 0, 1, 1], [], []>} : vector<256x4xbf16>, vector<4x4xbf16>, vector<256x4xf32> -> vector<256x4xf32>
    %60 = arith.addf %54, %59 : vector<256x4xf32>
    %61 = vector.extract_strided_slice %18 {offsets = [2, 0, 0], sizes = [16, 16, 4], strides = [1, 1, 1]} : vector<18x16x4xbf16> to vector<16x16x4xbf16>
    %62 = vector.shape_cast %61 : vector<16x16x4xbf16> to vector<256x4xbf16>
    %c7 = arith.constant 7 : index
    %c0_49 = arith.constant 0 : index
    %c0_50 = arith.constant 0 : index
    %63 = vector.load %arg2[%c7, %c0_49, %c0_50] : memref<9x4x4xbf16, #tpu.memory_space<vmem>>, vector<1x4x4xbf16>
    %64 = vector.shape_cast %63 : vector<1x4x4xbf16> to vector<4x4xbf16>
    %cst_51 = arith.constant dense<0.000000e+00> : vector<256x4xf32>
    %65 = tpu.matmul %62, %64, %cst_51 {dimension_numbers = #tpu.dot_dimension_numbers<[1], [0], [0], [1], [0, 0, 1, 1], [], []>} : vector<256x4xbf16>, vector<4x4xbf16>, vector<256x4xf32> -> vector<256x4xf32>
    %66 = arith.addf %60, %65 : vector<256x4xf32>
    %67 = vector.extract_strided_slice %19 {offsets = [2, 0, 0], sizes = [16, 16, 4], strides = [1, 1, 1]} : vector<18x16x4xbf16> to vector<16x16x4xbf16>
    %68 = vector.shape_cast %67 : vector<16x16x4xbf16> to vector<256x4xbf16>
    %c8 = arith.constant 8 : index
    %c0_52 = arith.constant 0 : index
    %c0_53 = arith.constant 0 : index
    %69 = vector.load %arg2[%c8, %c0_52, %c0_53] : memref<9x4x4xbf16, #tpu.memory_space<vmem>>, vector<1x4x4xbf16>
    %70 = vector.shape_cast %69 : vector<1x4x4xbf16> to vector<4x4xbf16>
    %cst_54 = arith.constant dense<0.000000e+00> : vector<256x4xf32>
    %71 = tpu.matmul %68, %70, %cst_54 {dimension_numbers = #tpu.dot_dimension_numbers<[1], [0], [0], [1], [0, 0, 1, 1], [], []>} : vector<256x4xbf16>, vector<4x4xbf16>, vector<256x4xf32> -> vector<256x4xf32>
    %72 = arith.addf %66, %71 : vector<256x4xf32>
    %c0_55 = arith.constant 0 : index
    %c0_56 = arith.constant 0 : index
    %73 = vector.load %arg3[%c0_55, %c0_56] : memref<1x4xf32, #tpu.memory_space<vmem>>, vector<1x4xf32>
    %74 = vector.broadcast %73 : vector<1x4xf32> to vector<256x4xf32>
    %75 = arith.mulf %72, %74 : vector<256x4xf32>
    %c0_57 = arith.constant 0 : index
    %c0_58 = arith.constant 0 : index
    %76 = vector.load %arg4[%c0_57, %c0_58] : memref<1x4xf32, #tpu.memory_space<vmem>>, vector<1x4xf32>
    %77 = vector.broadcast %76 : vector<1x4xf32> to vector<256x4xf32>
    %78 = arith.addf %75, %77 : vector<256x4xf32>
    %cst_59 = arith.constant 0.000000e+00 : f32
    %79 = vector.broadcast %cst_59 : f32 to vector<256x4xf32>
    %80 = arith.maximumf %78, %79 : vector<256x4xf32>
    %81 = vector.shape_cast %80 : vector<256x4xf32> to vector<16x16x4xf32>
    %c0_60 = arith.constant 0 : index
    %c0_61 = arith.constant 0 : index
    %c0_62 = arith.constant 0 : index
    %c0_63 = arith.constant 0 : index
    %82 = vector.load %arg5[%c0_60, %c0_61, %c0_62, %c0_63] : memref<1x16x16x4xf32, #tpu.memory_space<vmem>>, vector<1x16x16x4xf32>
    %83 = vector.shape_cast %82 : vector<1x16x16x4xf32> to vector<16x16x4xf32>
    %84 = vector.shape_cast %81 : vector<16x16x4xf32> to vector<1x16x16x4xf32>
    tpu.vector_store %arg5[%c0_60, %c0_61, %c0_62, %c0_63], %84 {strides = array<i32>} : memref<1x16x16x4xf32, #tpu.memory_space<vmem>>, vector<1x16x16x4xf32>,
    return
  }
  func.func @transform_0(%arg0: i32) -> (i32, i32, i32, i32) {
    %c0_i32 = arith.constant 0 : i32
    %c0_i32_0 = arith.constant 0 : i32
    %c0_i32_1 = arith.constant 0 : i32
    %c0_i32_2 = arith.constant 0 : i32
    return %arg0, %c0_i32, %c0_i32_0, %c0_i32_1 : i32, i32, i32, i32
  }
  func.func @transform_1(%arg0: i32) -> (i32, i32, i32) {
    %c0_i32 = arith.constant 0 : i32
    %c0_i32_0 = arith.constant 0 : i32
    %c0_i32_1 = arith.constant 0 : i32
    %c0_i32_2 = arith.constant 0 : i32
    return %c0_i32, %c0_i32_0, %c0_i32_1 : i32, i32, i32
  }
  func.func @transform_2(%arg0: i32) -> (i32, i32) {
    %c0_i32 = arith.constant 0 : i32
    %c0_i32_0 = arith.constant 0 : i32
    %c0_i32_1 = arith.constant 0 : i32
    return %c0_i32, %c0_i32_0 : i32, i32
  }
  func.func @transform_3(%arg0: i32) -> (i32, i32) {
    %c0_i32 = arith.constant 0 : i32
    %c0_i32_0 = arith.constant 0 : i32
    %c0_i32_1 = arith.constant 0 : i32
    return %c0_i32, %c0_i32_0 : i32, i32
  }
  func.func @transform_4(%arg0: i32) -> (i32, i32, i32, i32) {
    %c0_i32 = arith.constant 0 : i32
    %c0_i32_0 = arith.constant 0 : i32
    %c0_i32_1 = arith.constant 0 : i32
    %c0_i32_2 = arith.constant 0 : i32
    return %arg0, %c0_i32, %c0_i32_0, %c0_i32_1 : i32, i32, i32, i32
  }
}

</mosaic_0001>

<bundles_post_ra>
// kernel: tile.8
= control target key start
LH: loop header
LB: loop body
LE: loop exit
PB: predicated region body
PF: predicated region fallthrough
CT: control target
= control target key end

     0   :  { %s22_s0 = inlined_call_operand.vmem [shape: f32[4], index: 0, kind: input, shape index: {}]   ;;  %s23_s1 = inlined_call_operand.vmem [shape: f32[4,4], index: 1, kind: output, shape index: {}]  }
   0x1   :  { %v4_v0 = vld [vmem:[%s22_s0] ss:$0 sm:$0xff] }
   0x2   :  { %5 = vst [vmem:[%s23_s1] sm:$0xf] %v4_v0 }

// kernel: tile.9
= control target key start
LH: loop header
LB: loop body
LE: loop exit
PB: predicated region body
PF: predicated region fallthrough
CT: control target
= control target key end

     0   :  { %s37_s8 = smov 4   ;;  %s38_s9 = smov 8   ;;  %vm7_vm0 = vcmask 31744   ;;  %vm13_vm1 = vcmask 130144   ;;  %vm19_vm2 = vcmask 97344   ;;  %vm25_vm3 = vcmask 64544   ;;  %s55_s0 = inlined_call_operand.vmem [shape: f32[4,4], index: 0, kind: input, shape index: {}]   ;;  %s56_s1 = inlined_call_operand.vmem [shape: f32[1,16], index: 1, kind: output, shape index: {}]  }
   0x1   :  { %v4_v0 = vld [vmem:[%s55_s0] sm:$0xf]  ;;  %s36_s0 = smov 12  }
   0x2   :  { %5 = vst [vmem:[#allocation1] sm:$0xf] %v4_v0 }
   0x9   :  { %v10_v1 = vld [vmem:[#allocation1 + $0x3] sm:$0x1]   ;;  %v22_v2 = vld [vmem:[#allocation1 + $0x1] sm:$0x1]   ;;  %v16_v3 = vld [vmem:[#allocation1 + $0x2] sm:$0x1]  }
   0xa   :  { %11 = vrot.lane.b32.xlu0 %v10_v1, %s36_s0  ;;  %23 = vrot.lane.b32.xlu1 %v22_v2, %s37_s8  ;;  %v6_v4 = vld [vmem:[#allocation1] sm:$0x1]  }
   0xb   :  { %8 = vst.msk [vmem:[#allocation0] sm:$0x1] %vm7_vm0, %v6_v4  }
  0x12   :  { %17 = vrot.lane.b32.xlu0 %v16_v3, %s38_s9 }
  0x7c   :  { %v12_v5 = vpop.permute.xlu0 %11   ;;  %v24_v6 = vpop.permute.xlu1 %23  }
  0x7d   :  { %14 = vst.msk [vmem:[#allocation0] sm:$0x1] %vm13_vm1, %v12_v5  }
  0x84   :  { %v18_v7 = vpop.permute.xlu0 %17  }
  0x85   :  { %20 = vst.msk [vmem:[#allocation0] sm:$0x1] %vm19_vm2, %v18_v7  }
  0x86   :  { %26 = vst.msk [vmem:[#allocation0] sm:$0x1] %vm25_vm3, %v24_v6  }
  0x8d   :  { %v29_v8 = vld [vmem:[#allocation0] sm:$0x1] }
  0x8e   :  { %32 = vst [vmem:[%s56_s1] sm:$0x1] %v29_v8 }

// kernel: up_block.3
= control target key start
LH: loop header
LB: loop body
LE: loop exit
PB: predicated region body
PF: predicated region fallthrough
CT: control target
= control target key end

     0   :  { %s3421_s15 = smov 0   ;;  %s4690_s0 = inlined_call_operand.vmem [shape: bf16[2,16,16,4], index: 0, kind: input, shape index: {}]   ;;  %s4691_s1 = inlined_call_operand.vmem [shape: bf16[9,4,4], index: 1, kind: input, shape index: {}]   ;;  %s4692_s2 = inlined_call_operand.vmem [shape: f32[1,4], index: 2, kind: input, shape index: {}]   ;;  %s4693_s3 = inlined_call_operand.vmem [shape: f32[1,4], index: 3, kind: input, shape index: {}]   ;;  %s4694_s4 = inlined_call_operand.vmem [shape: f32[2,16,16,4], index: 4, kind: output, shape index: {}]  }
   0x1 LB: > { %s3084_s16 = sadd.s32 4294967295, %s3393_s15   ;;  %p3088_p0 = scmp.ge.s32.totalorder %s3393_s15, 1  ;;  %s3393_s15 = sphi %s3421_s15, %s14_s15  }
   0x2   : > { %p162_p1 = scmp.lt.s32.totalorder %s3393_s15, 3 }
   0x4   : > { %p163_p2 = pnand %p3088_p0, %p162_p1 }
   0x6   : > { %166 = sbr.rel (%p163_p2) target bundleno = 833 (0x341), region = 36 }
   0xb   : > { %v3093_v0 = vld [vmem:[%s4691_s1 + $0x2] sm:$0x3]  ;;  %vm1349_vm0 = vcmask 1041408   ;;  %p188_p3 = scmp.lt.s32.totalorder %s3084_s16, 1  ;;  %vm202_vm1 = vcmask 24576   ;;  %v4725_v6 = vmov 0 }
   0xc   : > { %v1351_v1 = vsel %vm1349_vm0, %v3093_v0, 0  ;;  %vm209_vm2 = vsmask.f32 256  ;;  %v223_v2 = vld [vmem:[#allocation2 + $0x30] sm:$0x1]  ;;  %vm199_vm7 = vcmask 27648  }
   0xd   : > { %3357 = vmatpush.bf16.msra.mxu1 %v1351_v1  ;;  %3358 = vmatpush.bf16.msra.mxu2 %v1351_v1  ;;  %s4816_s16 = smov (!%p188_p3, %s3084_s16), 1  ;;  %vm3437_vm3 = vmand %vm202_vm1, %vm209_vm2  ;;  %vm265_vm4 = vsmask.f32 7938  ;;  %v279_v4 = vld [vmem:[#allocation2 + $0x38] sm:$0x1]  ;;  %vm1300_vm12 = vcmask 31744  }
   0xe   : > { %3359 = vmatpush.bf16.msra.mxu3 %v1351_v1  ;;  %1360 = vmatpush.bf16.msra.mxu0 %v1351_v1  ;;  %v224_v5 = vsel %vm3437_vm3, 0, %v223_v2  ;;  %vm3445_vm5 = vmand %vm202_vm1, %vm265_vm4  ;;  %s3337_s19 = sshll.u32 %s4816_s16, 7  ;;  %vm353_vm6 = vsmask.f32 4368  ;;  %v235_v8 = vld [vmem:[#allocation2 + $0x60] sm:$0x1] }
   0xf   : > { %v4726_v6 = vsel %vm3445_vm5, 4294967295, %v4725_v6  ;;  %225 = vst [vmem:[#allocation2 + $0x30] sm:$0x1] %v224_v5  ;;  %v280_v7 = vsel %vm3445_vm5, 0, %v279_v4  ;;  %s3455_s22 = scalar_lea.vmem %s4690_s0, %s3337_s19  ;;  %v291_v9 = vld [vmem:[#allocation2 + $0x68] sm:$0x1]  ;;  %vm3467_vm8 = vmor %vm209_vm2, %vm353_vm6 }
  0x10   : > { %4727 = vst [vmem:[#allocation3_spill] sm:$0xff] %v4726_v6  ;;  %v327_v10 = vld [vmem:[%s3455_s22 + $0x18] sm:$0xf]  ;;  %v328_v11 = vld [vmem:[%s3455_s22 + $0x1c] sm:$0xf]  ;;  %v236_v12 = vsel %vm3437_vm3, 0, %v235_v8  ;;  %vm3473_vm9 = vmand %vm199_vm7, %vm265_vm4 }
  0x11   : > { %281 = vst [vmem:[#allocation2 + $0x38] sm:$0x1] %v280_v7  ;;  %v292_v13 = vsel %vm3445_vm5, 0, %v291_v9  ;;  %v407_v14 = vshrl.u32 %v327_v10, 16  ;;  %v410_v15 = vshll.u32 %v327_v10, 16  ;;  %v415_v16 = vshrl.u32 %v328_v11, 16 }
  0x12   : > { %v418_v17 = vshll.u32 %v328_v11, 16  ;;  %237 = vst [vmem:[#allocation2 + $0x60] sm:$0x1] %v236_v12  ;;  %v335_v18 = vld [vmem:[%s3455_s22 + $0x38] sm:$0xf]  ;;  %v3395_v4 = vmov 0  }
  0x13   : > { %293 = vst [vmem:[#allocation2 + $0x68] sm:$0x1] %v292_v13  ;;  %v336_v19 = vld [vmem:[%s3455_s22 + $0x3c] sm:$0xf]  ;;  %v409_v21 = vrot.slane %v407_v14, 7  ;;  %v417_v22 = vrot.slane %v415_v16, 7 }
  0x14   : > { %v475_v23 = vshrl.u32 %v335_v18, 16  ;;  %v247_v24 = vld [vmem:[#allocation2 + $0x90] sm:$0x1]  ;;  %v478_v26 = vshll.u32 %v335_v18, 16  ;;  %v483_v27 = vshrl.u32 %v336_v19, 16  ;;  %v486_v28 = vshll.u32 %v336_v19, 16 }
  0x15   : > { %v248_v29 = vsel %vm3437_vm3, 0, %v247_v24  ;;  %v303_v30 = vld [vmem:[#allocation2 + $0x98] sm:$0x1]  ;;  %v412_v31 = vor.u32 %v410_v15, %v409_v21  ;;  %v413_v32 = vrot.slane %v409_v21, 4  ;;  %v420_v33 = vor.u32 %v418_v17, %v417_v22  ;;  %v344_v44 = vld [vmem:[%s3455_s22 + $0x5c] sm:$0xf] }
  0x16   : > { %v422_v34 = vrot.slane %v417_v22, 4  ;;  %v699_v35 = vld [vmem:[#allocation2 + $0x30] sm:$0xf]  ;;  %249 = vst [vmem:[#allocation2 + $0x90] sm:$0x1] %v248_v29  ;;  %v477_v37 = vrot.slane %v475_v23, 7 }
  0x17   : > { %v485_v38 = vrot.slane %v483_v27, 7  ;;  %v304_v39 = vsel %vm3445_vm5, 0, %v303_v30  ;;  %v421_v40 = vsel %vm3467_vm8, %v413_v32, %v420_v33  ;;  %v700_v41 = vsel %vm3473_vm9, %v412_v31, %v699_v35  ;;  %v343_v43 = vld [vmem:[%s3455_s22 + $0x58] sm:$0xf]  ;;  %v3206_v57 = vld [vmem:[%s4691_s1 + $0x4] sm:$0x3] }
  0x18   : > { %v703_v36 = vld [vmem:[#allocation2 + $0x38] sm:$0x1]  ;;  %305 = vst [vmem:[#allocation2 + $0x98] sm:$0x1] %v304_v39  ;;  %v480_v45 = vor.u32 %v478_v26, %v477_v37  ;;  %v481_v46 = vrot.slane %v477_v37, 4  ;;  %v543_v51 = vshrl.u32 %v343_v43, 16 }
  0x19   : > { %v704_v42 = vsel %vm3437_vm3, %v422_v34, %v703_v36  ;;  %701 = vst [vmem:[#allocation2 + $0x30] sm:$0xf] %v700_v41  ;;  %v488_v47 = vor.u32 %v486_v28, %v485_v38  ;;  %v490_v48 = vrot.slane %v485_v38, 4  ;;  %v727_v49 = vld [vmem:[#allocation2 + $0x60] sm:$0xf]  ;;  %v546_v52 = vshll.u32 %v343_v43, 16 }
  0x1a   : > { %702 = vst.msk [vmem:[#allocation2 + $0x34] sm:$0xf] %vm199_vm7, %v421_v40  ;;  %v731_v50 = vld [vmem:[#allocation2 + $0x68] sm:$0x1]  ;;  %v728_v54 = vsel %vm3473_vm9, %v480_v45, %v727_v49  ;;  %v551_v56 = vshrl.u32 %v344_v44, 16  ;;  %v545_v58 = vrot.slane %v543_v51, 7 }
  0x1b   : > { %705 = vst [vmem:[#allocation2 + $0x38] sm:$0x1] %v704_v42  ;;  %v489_v53 = vsel %vm3467_vm8, %v481_v46, %v488_v47  ;;  %v732_v55 = vsel %vm3437_vm3, %v490_v48, %v731_v50  ;;  %v554_v59 = vshll.u32 %v344_v44, 16  ;;  %v1908_v60 = vsel %vm1349_vm0, %v3206_v57, 0  ;;  %v3510_v16 = vld [vmem:[#allocation2 + $0x3c] sm:$0x1] }
  0x1c   : > { %729 = vst [vmem:[#allocation2 + $0x60] sm:$0xf] %v728_v54  ;;  %v553_v61 = vrot.slane %v551_v56, 7  ;;  %1917 = vmatpush.bf16.msrb.mxu2 %v1908_v60  ;;  %vm863_vm10 = vsmask.f32 3328  ;;  %v548_v63 = vor.u32 %v546_v52, %v545_v58  ;;  %v549_v0 = vrot.slane %v545_v58, 4 }
  0x1d   : > { %730 = vst.msk [vmem:[#allocation2 + $0x64] sm:$0xf] %vm199_vm7, %v489_v53  ;;  %v755_v62 = vld [vmem:[#allocation2 + $0x90] sm:$0xf]  ;;  %vm864_vm11 = vsmask.f32 7440 }
  0x1e   : > { %733 = vst [vmem:[#allocation2 + $0x68] sm:$0x1] %v732_v55  ;;  %v556_v1 = vor.u32 %v554_v59, %v553_v61  ;;  %v558_v2 = vrot.slane %v553_v61, 4  ;;  %v756_v7 = vsel %vm3473_vm9, %v548_v63, %v755_v62  ;;  %v3514_v23 = vld [vmem:[#allocation2 + $0x44] sm:$0x1]  ;;  %vm3518_vm13 = vmor %vm863_vm10, %vm864_vm11  ;;  %v227_v43 = vsel %vm3437_vm3, 0, %v3510_v16 }
  0x1f   : > { %200 = vst.msk [vmem:[#allocation2] sm:$0xf] %vm199_vm7, %v3395_v4  ;;  %v759_v8 = vld [vmem:[#allocation2 + $0x98] sm:$0x1]  ;;  %v283_v48 = vsel %vm3445_vm5, 0, %v3514_v23  ;;  %vm1694_vm14 = vcmask 1042432  }
  0x20   : > { %v798_v5 = vld [vmem:[#allocation2 + $0x30] sm:$0xf]  ;;  %201 = vst.msk [vmem:[#allocation2 + $0x4] sm:$0xf] %vm199_vm7, %v3395_v4  ;;  %v557_v12 = vsel %vm3467_vm8, %v549_v0, %v556_v1  ;;  %v760_v22 = vsel %vm3437_vm3, %v558_v2, %v759_v8  ;;  %vm1695_vm15 = vcmask 1046532   ;;  %s3338_s19 = sshll.u32 %s4816_s16, 8 }
  0x21   : > { %v799_v9 = vld [vmem:[#allocation2 + $0x34] sm:$0xf]  ;;  %v963_v10 = vshrl.u32 %v798_v5, 16  ;;  %v966_v11 = vshll.u32 %v798_v5, 16  ;;  %757 = vst [vmem:[#allocation2 + $0x90] sm:$0xf] %v756_v7 }
  0x22   : > { %v830_v13 = vld [vmem:[#allocation2 + $0x38] sm:$0x1]  ;;  %v972_v14 = vshll.u32 %v799_v9, 16  ;;  %v976_v15 = vshrl.u32 %v799_v9, 16  ;;  %758 = vst.msk [vmem:[#allocation2 + $0x94] sm:$0xf] %vm199_vm7, %v557_v12 }
  0x23   : > { %v965_v17 = vrot.slane %v963_v10, 4  ;;  %v968_v18 = vrot.slane %v966_v11, 5  ;;  %v982_v19 = vshll.u32 %v830_v13, 16  ;;  %v806_v21 = vld [vmem:[#allocation2 + $0x60] sm:$0xf] }
  0x24   : > { %v974_v24 = vrot.slane %v972_v14, 5  ;;  %v978_v26 = vrot.slane %v976_v15, 4  ;;  %v807_v27 = vld [vmem:[#allocation2 + $0x64] sm:$0xf]  ;;  %v1059_v28 = vshrl.u32 %v806_v21, 16  ;;  %v1062_v29 = vshll.u32 %v806_v21, 16 }
  0x25   : > { %v969_v30 = vor.u32 %v968_v18, %v965_v17  ;;  %v984_v31 = vrot.slane %v982_v19, 5  ;;  %v834_v32 = vld [vmem:[#allocation2 + $0x68] sm:$0x1]  ;;  %v1068_v33 = vshll.u32 %v807_v27, 16  ;;  %v1072_v34 = vshrl.u32 %v807_v27, 16 }
  0x26   : > { %v979_v36 = vor.u32 %v978_v26, %v974_v24  ;;  %v1061_v37 = vrot.slane %v1059_v28, 4  ;;  %v1064_v38 = vrot.slane %v1062_v29, 5  ;;  %v1078_v39 = vshll.u32 %v834_v32, 16  ;;  %761 = vst [vmem:[#allocation2 + $0x98] sm:$0x1] %v760_v22 }
  0x27   : > { %v970_v40 = vrot.slane %v969_v30, 4  ;;  %v1070_v41 = vrot.slane %v1068_v33, 5  ;;  %v1074_v42 = vrot.slane %v1072_v34, 4  ;;  %203 = vst.msk [vmem:[#allocation2 + $0x8] sm:$0x1] %vm202_vm1, %v3395_v4 }
  0x28   : > { %v980_v44 = vrot.slane %v979_v36, 4  ;;  %v1065_v45 = vor.u32 %v1064_v38, %v1061_v37  ;;  %v1080_v46 = vrot.slane %v1078_v39, 5  ;;  %v814_v47 = vld [vmem:[#allocation2 + $0x90] sm:$0xf]  ;;  %v211_v54 = vld [vmem:[#allocation2] sm:$0x1] }
  0x29   : > { %v975_v49 = vsel %vm3518_vm13, %v970_v40, %v974_v24  ;;  %v1075_v50 = vor.u32 %v1074_v42, %v1070_v41  ;;  %v815_v51 = vld [vmem:[#allocation2 + $0x94] sm:$0xf]  ;;  %v1155_v52 = vshrl.u32 %v814_v47, 16  ;;  %v1158_v53 = vshll.u32 %v814_v47, 16  ;;  %v791_v59 = vld [vmem:[#allocation2 + $0x4] sm:$0xf] }
  0x2a   : > { %v985_v55 = vsel %vm3518_vm13, %v980_v44, %v984_v31  ;;  %v1260_v56 = vunpack.c.l.b16 %v975_v49  ;;  %v1066_v57 = vrot.slane %v1065_v45, 4  ;;  %v1164_v58 = vshll.u32 %v815_v51, 16  ;;  %205 = vst.msk [vmem:[#allocation2 + $0xcc] sm:$0xf] %vm199_vm7, %v3395_v4  ;;  %v3223_v12 = vld [vmem:[%s4691_s1 + $0x6] sm:$0x3] }
  0x2b   : > { %v1261_v60 = vunpack.c.l.b16 %v985_v55  ;;  %v1076_v61 = vrot.slane %v1075_v50, 4  ;;  %v1157_v62 = vrot.slane %v1155_v52, 4  ;;  %v1160_v63 = vrot.slane %v1158_v53, 5  ;;  %206 = vst.msk [vmem:[#allocation2 + $0xd0] sm:$0xf] %vm199_vm7, %v3395_v4 }
  0x2c   : > { %v1071_v0 = vsel %vm3518_vm13, %v1066_v57, %v1070_v41  ;;  %v1166_v1 = vrot.slane %v1164_v58, 5  ;;  %v1168_v2 = vshrl.u32 %v815_v51, 16  ;;  %v212_v5 = vsel %vm3437_vm3, 0, %v211_v54  ;;  %207 = vst.msk [vmem:[#allocation2 + $0xd4] sm:$0x1] %vm202_vm1, %v3395_v4  ;;  %vm3876_vm1 = vmor %vm1694_vm14, %vm1695_vm15 }
  0x2d   : > { %v3544_v7 = vpack.c.b16 %v1261_v60, %v1260_v56  ;;  %v1081_v8 = vsel %vm3518_vm13, %v1076_v61, %v1080_v46  ;;  %v1268_v9 = vunpack.c.l.b16 %v1071_v0  ;;  %v838_v10 = vld [vmem:[#allocation2 + $0x98] sm:$0x1]  ;;  %v1161_v11 = vor.u32 %v1160_v63, %v1157_v62  ;;  %213 = vst [vmem:[#allocation2] sm:$0x1] %v212_v5  ;;  %v862_v4 = vld [vmem:[%s4691_s1] sm:$0x3] }
  0x2e   : > { %v1269_v13 = vunpack.c.l.b16 %v1081_v8  ;;  %v1170_v14 = vrot.slane %v1168_v2, 4  ;;  %v1174_v15 = vshll.u32 %v838_v10, 16  ;;  %v267_v16 = vld [vmem:[#allocation2 + $0x8] sm:$0x1]  ;;  %v876_v19 = vshll.u32 %v791_v59, 16 }
  0x2f   : > { %4734 = vst [vmem:[#allocation4_spill] sm:$0xff] %v3544_v7  ;;  %3098 = vmatmul.msk.bf16.vlgmr.msra.gmra.mxu1 %vm1300_vm12, %v3544_v7  ;;  %v1162_v17 = vrot.slane %v1161_v11, 4  ;;  %v268_v18 = vsel %vm3445_vm5, 0, %v267_v16  ;;  %v880_v21 = vshrl.u32 %v791_v59, 16  ;;  %v3244_v22 = vld [vmem:[%s4691_s1 + $0x8] sm:$0x3] }
  0x30   : > { %v3561_v23 = vpack.c.b16 %v1269_v13, %v1268_v9  ;;  %v1171_v24 = vor.u32 %v1170_v14, %v1166_v1  ;;  %v1176_v26 = vrot.slane %v1174_v15, 5  ;;  %269 = vst [vmem:[#allocation2 + $0x8] sm:$0x1] %v268_v18  ;;  %v2042_v27 = vsel %vm1349_vm0, %v3223_v12, 0  ;;  %v329_v28 = vld [vmem:[%s3455_s22 + $0x20] sm:$0xf] }
  0x31   : > { %v1167_v29 = vsel %vm3518_vm13, %v1162_v17, %v1166_v1  ;;  %v3567_v30 = vrot.slane %v876_v19, 5  ;;  %v882_v31 = vrot.slane %v880_v21, 4  ;;  %2051 = vmatpush.bf16.msrb.mxu3 %v2042_v27  ;;  %v1571_v32 = vsel %vm1349_vm0, %v862_v4, 0  ;;  %228 = vst [vmem:[#allocation2 + $0x3c] sm:$0x1] %v227_v43 }
  0x32   : > { %4735 = vst [vmem:[#allocation5_spill] sm:$0xff] %v3561_v23  ;;  %3102 = vmatmul.msk.bf16.vlgmr.msra.gmra.mxu2 %vm1300_vm12, %v3561_v23  ;;  %v1172_v33 = vrot.slane %v1171_v24, 4  ;;  %1580 = vmatpush.bf16.msrb.mxu1 %v1571_v32  ;;  %v2198_v34 = vsel %vm1349_vm0, %v3244_v22, 0  ;;  %v330_v36 = vld [vmem:[%s3455_s22 + $0x24] sm:$0xf]  ;;  %v1276_v37 = vunpack.c.l.b16 %v1167_v29  ;;  %v424_v38 = vshrl.u32 %v329_v28, 16 }
  0x33   : > { %284 = vst [vmem:[#allocation2 + $0x44] sm:$0x1] %v283_v48  ;;  %2207 = vmatpush.bf16.msrb.mxu0 %v2198_v34  ;;  %v432_v39 = vshrl.u32 %v330_v36, 16  ;;  %v238_v40 = vld [vmem:[#allocation2 + $0x6c] sm:$0x1]  ;;  %v883_v43 = vor.u32 %v882_v31, %v3567_v30  ;;  %v427_v44 = vshll.u32 %v329_v28, 16 }
  0x34   : > { %v1177_v41 = vsel %vm3518_vm13, %v1172_v33, %v1176_v26  ;;  %v790_v42 = vld [vmem:[#allocation2] sm:$0xf]  ;;  %v239_v45 = vsel %vm3437_vm3, 0, %v238_v40  ;;  %v294_v46 = vld [vmem:[#allocation2 + $0x74] sm:$0x1]  ;;  %v435_v50 = vshll.u32 %v330_v36, 16 }
  0x35   : > { %v1277_v47 = vunpack.c.l.b16 %v1177_v41  ;;  %v867_v48 = vshrl.u32 %v790_v42, 16  ;;  %v870_v49 = vshll.u32 %v790_v42, 16  ;;  %240 = vst [vmem:[#allocation2 + $0x6c] sm:$0x1] %v239_v45  ;;  %v426_v51 = vrot.slane %v424_v38, 7 }
  0x36   : > { %v434_v52 = vrot.slane %v432_v39, 7  ;;  %v295_v53 = vsel %vm3445_vm5, 0, %v294_v46  ;;  %v337_v54 = vld [vmem:[%s3455_s22 + $0x40] sm:$0xf]  ;;  %v884_v59 = vrot.slane %v883_v43, 4 }
  0x37   : > { %v3582_v55 = vpack.c.b16 %v1277_v47, %v1276_v37  ;;  %v826_v56 = vld [vmem:[#allocation2 + $0x8] sm:$0x1]  ;;  %v869_v57 = vrot.slane %v867_v48, 4  ;;  %v872_v58 = vrot.slane %v870_v49, 5  ;;  %296 = vst [vmem:[#allocation2 + $0x74] sm:$0x1] %v295_v53  ;;  %v429_v61 = vor.u32 %v427_v44, %v426_v51 }
  0x38   : > { %v886_v60 = vshll.u32 %v826_v56, 16  ;;  %v430_v62 = vrot.slane %v426_v51, 4  ;;  %v706_v63 = vld [vmem:[#allocation2 + $0x3c] sm:$0xf]  ;;  %v437_v1 = vor.u32 %v435_v50, %v434_v52  ;;  %v439_v2 = vrot.slane %v434_v52, 4 }
  0x39   : > { %4736 = vst [vmem:[#allocation6_spill] sm:$0xff] %v3582_v55  ;;  %3106 = vmatmul.msk.bf16.vlgmr.msra.gmra.mxu3 %vm1300_vm12, %v3582_v55  ;;  %v873_v0 = vor.u32 %v872_v58, %v869_v57  ;;  %v338_v8 = vld [vmem:[%s3455_s22 + $0x44] sm:$0xf]  ;;  %v492_v9 = vshrl.u32 %v337_v54, 16  ;;  %v707_v11 = vsel %vm3473_vm9, %v429_v61, %v706_v63  ;;  %v495_v12 = vshll.u32 %v337_v54, 16 }
  0x3a   : > { %v710_v5 = vld [vmem:[#allocation2 + $0x44] sm:$0x1]  ;;  %v888_v10 = vrot.slane %v886_v60, 5  ;;  %v500_v13 = vshrl.u32 %v338_v8, 16  ;;  %v250_v14 = vld [vmem:[#allocation2 + $0x9c] sm:$0x1]  ;;  %v438_v16 = vsel %vm3467_vm8, %v430_v62, %v437_v1 }
  0x3b   : > { %v874_v15 = vrot.slane %v873_v0, 4  ;;  %708 = vst [vmem:[#allocation2 + $0x3c] sm:$0xf] %v707_v11  ;;  %v711_v4 = vsel %vm3437_vm3, %v439_v2, %v710_v5  ;;  %v494_v17 = vrot.slane %v492_v9, 7  ;;  %v306_v18 = vld [vmem:[#allocation2 + $0xa4] sm:$0x1] }
  0x3c   : > { %v889_v19 = vsel %vm3518_vm13, %v884_v59, %v888_v10  ;;  %709 = vst.msk [vmem:[#allocation2 + $0x40] sm:$0xf] %vm199_vm7, %v438_v16  ;;  %v502_v21 = vrot.slane %v500_v13, 7  ;;  %v503_v22 = vshll.u32 %v338_v8, 16  ;;  %v734_v24 = vld [vmem:[#allocation2 + $0x6c] sm:$0xf] }
  0x3d   : > { %v879_v26 = vsel %vm3518_vm13, %v874_v15, %v3567_v30  ;;  %v1253_v27 = vunpack.c.l.b16 %v889_v19  ;;  %712 = vst [vmem:[#allocation2 + $0x44] sm:$0x1] %v711_v4  ;;  %v497_v28 = vor.u32 %v495_v12, %v494_v17  ;;  %v498_v29 = vrot.slane %v494_v17, 4  ;;  %v345_v31 = vld [vmem:[%s3455_s22 + $0x60] sm:$0xf] }
  0x3e   : > { %v1252_v32 = vunpack.c.l.b16 %v879_v26  ;;  %v505_v33 = vor.u32 %v503_v22, %v502_v21  ;;  %v507_v34 = vrot.slane %v502_v21, 4  ;;  %v738_v36 = vld [vmem:[#allocation2 + $0x74] sm:$0x1]  ;;  %v251_v37 = vsel %vm3437_vm3, 0, %v250_v14  ;;  %v346_v38 = vld [vmem:[%s3455_s22 + $0x64] sm:$0xf] }
  0x3f   : > { %v735_v39 = vsel %vm3473_vm9, %v497_v28, %v734_v24  ;;  %252 = vst [vmem:[#allocation2 + $0x9c] sm:$0x1] %v251_v37  ;;  %v307_v30 = vsel %vm3445_vm5, 0, %v306_v18  ;;  %v560_v40 = vshrl.u32 %v345_v31, 16  ;;  %v563_v41 = vshll.u32 %v345_v31, 16 }
  0x40   : > { %v1284_v42 = vpack.c.b16 %v1253_v27, %v1252_v32  ;;  %v506_v43 = vsel %vm3467_vm8, %v498_v29, %v505_v33  ;;  %736 = vst [vmem:[#allocation2 + $0x6c] sm:$0xf] %v735_v39  ;;  %v739_v44 = vsel %vm3437_vm3, %v507_v34, %v738_v36  ;;  %v568_v45 = vshrl.u32 %v346_v38, 16  ;;  %v214_v46 = vld [vmem:[#allocation2 + $0xc] sm:$0x1] }
  0x41   : > { %737 = vst.msk [vmem:[#allocation2 + $0x70] sm:$0xf] %vm199_vm7, %v506_v43  ;;  %v562_v47 = vrot.slane %v560_v40, 7  ;;  %v571_v48 = vshll.u32 %v346_v38, 16  ;;  %v215_v51 = vsel %vm3437_vm3, 0, %v214_v46 }
  0x42   : > { %3094 = vmatmul.msk.bf16.vlgmr.msra.gmra.mxu0 %vm1300_vm12, %v1284_v42  ;;  %v800_v49 = vld [vmem:[#allocation2 + $0x3c] sm:$0xf]  ;;  %740 = vst [vmem:[#allocation2 + $0x74] sm:$0x1] %v739_v44  ;;  %v570_v50 = vrot.slane %v568_v45, 7 }
  0x43   : > { %v801_v52 = vld [vmem:[#allocation2 + $0x40] sm:$0xf]  ;;  %v987_v53 = vshrl.u32 %v800_v49, 16  ;;  %v990_v54 = vshll.u32 %v800_v49, 16  ;;  %308 = vst [vmem:[#allocation2 + $0xa4] sm:$0x1] %v307_v30  ;;  %v565_v56 = vor.u32 %v563_v41, %v562_v47 }
  0x44   : > { %v831_v57 = vld [vmem:[#allocation2 + $0x44] sm:$0x1]  ;;  %v996_v58 = vshll.u32 %v801_v52, 16  ;;  %v1000_v59 = vshrl.u32 %v801_v52, 16  ;;  %v566_v60 = vrot.slane %v562_v47, 4  ;;  %v573_v61 = vor.u32 %v571_v48, %v570_v50 }
  0x45   : > { %v989_v62 = vrot.slane %v987_v53, 4  ;;  %v992_v63 = vrot.slane %v990_v54, 5  ;;  %v1006_v0 = vshll.u32 %v831_v57, 16  ;;  %216 = vst [vmem:[#allocation2 + $0xc] sm:$0x1] %v215_v51  ;;  %v575_v24 = vrot.slane %v570_v50, 4 }
  0x46   : > { %v998_v1 = vrot.slane %v996_v58, 5  ;;  %v1002_v2 = vrot.slane %v1000_v59, 4  ;;  %v574_v5 = vsel %vm3467_vm8, %v566_v60, %v573_v61  ;;  %v762_v8 = vld [vmem:[#allocation2 + $0x9c] sm:$0xf]  ;;  %v270_v9 = vld [vmem:[#allocation2 + $0x14] sm:$0x1] }
  0x47   : > { %v993_v10 = vor.u32 %v992_v63, %v989_v62  ;;  %v1008_v11 = vrot.slane %v1006_v0, 5  ;;  %v808_v12 = vld [vmem:[#allocation2 + $0x6c] sm:$0xf]  ;;  %v763_v13 = vsel %vm3473_vm9, %v565_v56, %v762_v8  ;;  %765 = vst.msk [vmem:[#allocation2 + $0xa0] sm:$0xf] %vm199_vm7, %v574_v5  ;;  %v271_v14 = vsel %vm3445_vm5, 0, %v270_v9 }
  0x48   : > { %v1003_v15 = vor.u32 %v1002_v2, %v998_v1  ;;  %v809_v16 = vld [vmem:[#allocation2 + $0x70] sm:$0xf]  ;;  %v1083_v4 = vshrl.u32 %v808_v12, 16  ;;  %v1086_v17 = vshll.u32 %v808_v12, 16  ;;  %764 = vst [vmem:[#allocation2 + $0x9c] sm:$0xf] %v763_v13 }
  0x49   : > { %v994_v18 = vrot.slane %v993_v10, 4  ;;  %v835_v19 = vld [vmem:[#allocation2 + $0x74] sm:$0x1]  ;;  %v1092_v21 = vshll.u32 %v809_v16, 16  ;;  %v1096_v22 = vshrl.u32 %v809_v16, 16 }
  0x4a   : > { %v1004_v26 = vrot.slane %v1003_v15, 4  ;;  %v1085_v27 = vrot.slane %v1083_v4, 4  ;;  %v1088_v28 = vrot.slane %v1086_v17, 5  ;;  %v1102_v29 = vshll.u32 %v835_v19, 16  ;;  %v766_v31 = vld [vmem:[#allocation2 + $0xa4] sm:$0x1] }
  0x4b   : > { %v999_v32 = vsel %vm3518_vm13, %v994_v18, %v998_v1  ;;  %v1094_v33 = vrot.slane %v1092_v21, 5  ;;  %v1098_v34 = vrot.slane %v1096_v22, 4  ;;  %272 = vst [vmem:[#allocation2 + $0x14] sm:$0x1] %v271_v14  ;;  %v321_v30 = vld [vmem:[%s3455_s22] sm:$0xf]  ;;  %v767_v42 = vsel %vm3437_vm3, %v575_v24, %v766_v31 }
  0x4c   : > { %v1009_v36 = vsel %vm3518_vm13, %v1004_v26, %v1008_v11  ;;  %v1262_v37 = vunpack.c.l.b16 %v999_v32  ;;  %v1089_v38 = vor.u32 %v1088_v28, %v1085_v27  ;;  %v1104_v39 = vrot.slane %v1102_v29, 5  ;;  %768 = vst [vmem:[#allocation2 + $0xa4] sm:$0x1] %v767_v42  ;;  %v322_v56 = vld [vmem:[%s3455_s22 + $0x4] sm:$0xf] }
  0x4d   : > { %v1263_v40 = vunpack.c.l.b16 %v1009_v36  ;;  %v1099_v41 = vor.u32 %v1098_v34, %v1094_v33  ;;  %v356_v43 = vshrl.u32 %v321_v30, 16  ;;  %v359_v46 = vshll.u32 %v321_v30, 16  ;;  %v678_v62 = vld [vmem:[#allocation2 + $0xc] sm:$0xf]  ;;  %v229_v63 = vld [vmem:[#allocation2 + $0x48] sm:$0x1] }
  0x4e   : > { %v1090_v44 = vrot.slane %v1089_v38, 4  ;;  %v817_v45 = vld [vmem:[#allocation2 + $0xa0] sm:$0xf]  ;;  %v364_v9 = vshrl.u32 %v322_v56, 16  ;;  %v367_v10 = vshll.u32 %v322_v56, 16  ;;  %v230_v4 = vsel %vm3437_vm3, 0, %v229_v63 }
  0x4f   : > { %v3629_v47 = vpack.c.b16 %v1263_v40, %v1262_v37  ;;  %v1100_v48 = vrot.slane %v1099_v41, 4  ;;  %v816_v49 = vld [vmem:[#allocation2 + $0x9c] sm:$0xf]  ;;  %v1188_v50 = vshll.u32 %v817_v45, 16  ;;  %v1192_v51 = vshrl.u32 %v817_v45, 16 }
  0x50   : > { %v1095_v52 = vsel %vm3518_vm13, %v1090_v44, %v1094_v33  ;;  %v1179_v53 = vshrl.u32 %v816_v49, 16  ;;  %v1182_v54 = vshll.u32 %v816_v49, 16  ;;  %v358_v57 = vrot.slane %v356_v43, 7  ;;  %v285_v11 = vld [vmem:[#allocation2 + $0x50] sm:$0x1] }
  0x51   : > { %4737 = vst [vmem:[#allocation7_spill] sm:$0xff] %v3629_v47  ;;  %3099 = vmatmul.msk.bf16.gmra.mxu1 %vm1300_vm12, %v3629_v47  ;;  %v1105_v58 = vsel %vm3518_vm13, %v1100_v48, %v1104_v39  ;;  %v1270_v59 = vunpack.c.l.b16 %v1095_v52  ;;  %v1190_v60 = vrot.slane %v1188_v50, 5  ;;  %v1194_v61 = vrot.slane %v1192_v51, 4  ;;  %v331_v12 = vld [vmem:[%s3455_s22 + $0x28] sm:$0xf] }
  0x52   : > { %v1271_v0 = vunpack.c.l.b16 %v1105_v58  ;;  %v1181_v1 = vrot.slane %v1179_v53, 4  ;;  %v1184_v2 = vrot.slane %v1182_v54, 5  ;;  %v361_v5 = vor.u32 %v359_v46, %v358_v57  ;;  %v682_v16 = vld [vmem:[#allocation2 + $0x14] sm:$0x1]  ;;  %v332_v17 = vld [vmem:[%s3455_s22 + $0x2c] sm:$0xf] }
  0x53   : > { %v1195_v8 = vor.u32 %v1194_v61, %v1190_v60  ;;  %v839_v18 = vld [vmem:[#allocation2 + $0xa4] sm:$0x1]  ;;  %v362_v19 = vrot.slane %v358_v57, 4  ;;  %v366_v21 = vrot.slane %v364_v9, 7  ;;  %v241_v22 = vld [vmem:[#allocation2 + $0x78] sm:$0x1] }
  0x54   : > { %v3639_v13 = vpack.c.b16 %v1271_v0, %v1270_v59  ;;  %v1185_v14 = vor.u32 %v1184_v2, %v1181_v1  ;;  %v679_v15 = vsel %vm3473_vm9, %v361_v5, %v678_v62  ;;  %v297_v24 = vld [vmem:[#allocation2 + $0x80] sm:$0x1]  ;;  %v1198_v28 = vshll.u32 %v839_v18, 16  ;;  %231 = vst [vmem:[#allocation2 + $0x48] sm:$0x1] %v230_v4 }
  0x55   : > { %680 = vst [vmem:[#allocation2 + $0xc] sm:$0xf] %v679_v15  ;;  %v1196_v27 = vrot.slane %v1195_v8, 4  ;;  %v286_v29 = vsel %vm3445_vm5, 0, %v285_v11  ;;  %v369_v31 = vor.u32 %v367_v10, %v366_v21  ;;  %v371_v32 = vrot.slane %v366_v21, 4 }
  0x56   : > { %3103 = vmatmul.msk.bf16.gmra.mxu2 %vm1300_vm12, %v3639_v13  ;;  %v1186_v26 = vrot.slane %v1185_v14, 4  ;;  %287 = vst [vmem:[#allocation2 + $0x50] sm:$0x1] %v286_v29  ;;  %v441_v33 = vshrl.u32 %v331_v12, 16  ;;  %v444_v34 = vshll.u32 %v331_v12, 16  ;;  %v1200_v37 = vrot.slane %v1198_v28, 5 }
  0x57   : > { %v449_v38 = vshrl.u32 %v332_v17, 16  ;;  %v452_v39 = vshll.u32 %v332_v17, 16  ;;  %v339_v30 = vld [vmem:[%s3455_s22 + $0x48] sm:$0xf]  ;;  %v370_v41 = vsel %vm3467_vm8, %v362_v19, %v369_v31  ;;  %v683_v42 = vsel %vm3437_vm3, %v371_v32, %v682_v16  ;;  %v340_v44 = vld [vmem:[%s3455_s22 + $0x4c] sm:$0xf] }
  0x58   : > { %v1191_v36 = vsel %vm3518_vm13, %v1186_v26, %v1190_v60  ;;  %v443_v43 = vrot.slane %v441_v33, 7  ;;  %v1201_v45 = vsel %vm3518_vm13, %v1196_v27, %v1200_v37  ;;  %681 = vst.msk [vmem:[#allocation2 + $0x10] sm:$0xf] %vm199_vm7, %v370_v41  ;;  %v242_v48 = vsel %vm3437_vm3, 0, %v241_v22  ;;  %v253_v54 = vld [vmem:[#allocation2 + $0xa8] sm:$0x1] }
  0x59   : > { %v1278_v40 = vunpack.c.l.b16 %v1191_v36  ;;  %v451_v46 = vrot.slane %v449_v38, 7  ;;  %v298_v49 = vsel %vm3445_vm5, 0, %v297_v24  ;;  %v1279_v50 = vunpack.c.l.b16 %v1201_v45  ;;  %684 = vst [vmem:[#allocation2 + $0x14] sm:$0x1] %v683_v42  ;;  %v309_v60 = vld [vmem:[#allocation2 + $0xb0] sm:$0x1] }
  0x5a   : > { %v446_v51 = vor.u32 %v444_v34, %v443_v43  ;;  %v447_v52 = vrot.slane %v443_v43, 4  ;;  %v509_v53 = vshrl.u32 %v339_v30, 16  ;;  %243 = vst [vmem:[#allocation2 + $0x78] sm:$0x1] %v242_v48  ;;  %v512_v59 = vshll.u32 %v339_v30, 16 }
  0x5b   : > { %v454_v57 = vor.u32 %v452_v39, %v451_v46  ;;  %v456_v58 = vrot.slane %v451_v46, 4  ;;  %v3665_v61 = vpack.c.b16 %v1279_v50, %v1278_v40  ;;  %v713_v0 = vld [vmem:[#allocation2 + $0x48] sm:$0xf]  ;;  %299 = vst [vmem:[#allocation2 + $0x80] sm:$0x1] %v298_v49  ;;  %v517_v9 = vshrl.u32 %v340_v44, 16 }
  0x5c   : > { %v792_v56 = vld [vmem:[#allocation2 + $0xc] sm:$0xf]  ;;  %v714_v2 = vsel %vm3473_vm9, %v446_v51, %v713_v0  ;;  %v511_v8 = vrot.slane %v509_v53, 7  ;;  %v347_v10 = vld [vmem:[%s3455_s22 + $0x68] sm:$0xf]  ;;  %v520_v15 = vshll.u32 %v340_v44, 16 }
  0x5d   : > { %v891_v62 = vshrl.u32 %v792_v56, 16  ;;  %v894_v63 = vshll.u32 %v792_v56, 16  ;;  %v455_v1 = vsel %vm3467_vm8, %v447_v52, %v454_v57  ;;  %v717_v5 = vld [vmem:[#allocation2 + $0x50] sm:$0x1]  ;;  %3107 = vmatmul.msk.bf16.gmra.mxu3 %vm1300_vm12, %v3665_v61  ;;  %715 = vst [vmem:[#allocation2 + $0x48] sm:$0xf] %v714_v2 }
  0x5e   : > { %v718_v14 = vsel %vm3437_vm3, %v456_v58, %v717_v5  ;;  %716 = vst.msk [vmem:[#allocation2 + $0x4c] sm:$0xf] %vm199_vm7, %v455_v1  ;;  %v514_v16 = vor.u32 %v512_v59, %v511_v8  ;;  %v515_v4 = vrot.slane %v511_v8, 4  ;;  %v519_v17 = vrot.slane %v517_v9, 7  ;;  %v348_v24 = vld [vmem:[%s3455_s22 + $0x6c] sm:$0xf] }
  0x5f   : > { %v893_v11 = vrot.slane %v891_v62, 4  ;;  %v896_v12 = vrot.slane %v894_v63, 5  ;;  %v254_v18 = vsel %vm3437_vm3, 0, %v253_v54  ;;  %v3679_v19 = vld [vmem:[#allocation2 + $0x10] sm:$0xf]  ;;  %v310_v22 = vsel %vm3445_vm5, 0, %v309_v60 }
  0x60   : > { %719 = vst [vmem:[#allocation2 + $0x50] sm:$0x1] %v718_v14  ;;  %v577_v26 = vshrl.u32 %v347_v10, 16  ;;  %v3684_v27 = vld [vmem:[#allocation2 + $0x14] sm:$0x1]  ;;  %v900_v28 = vshll.u32 %v3679_v19, 16  ;;  %v522_v31 = vor.u32 %v520_v15, %v519_v17 }
  0x61   : > { %v897_v21 = vor.u32 %v896_v12, %v893_v11  ;;  %v904_v29 = vshrl.u32 %v3679_v19, 16  ;;  %v524_v32 = vrot.slane %v519_v17, 4  ;;  %v910_v34 = vshll.u32 %v3684_v27, 16  ;;  %v741_v36 = vld [vmem:[#allocation2 + $0x78] sm:$0xf] }
  0x62   : > { %255 = vst [vmem:[#allocation2 + $0xa8] sm:$0x1] %v254_v18  ;;  %v902_v37 = vrot.slane %v900_v28, 5  ;;  %v523_v39 = vsel %vm3467_vm8, %v515_v4, %v522_v31  ;;  %v742_v30 = vsel %vm3473_vm9, %v514_v16, %v741_v36  ;;  %v745_v40 = vld [vmem:[#allocation2 + $0x80] sm:$0x1]  ;;  %v579_v43 = vrot.slane %v577_v26, 7 }
  0x63   : > { %v898_v33 = vrot.slane %v897_v21, 4  ;;  %v906_v38 = vrot.slane %v904_v29, 4  ;;  %311 = vst [vmem:[#allocation2 + $0xb0] sm:$0x1] %v310_v22  ;;  %v912_v41 = vrot.slane %v910_v34, 5  ;;  %v746_v42 = vsel %vm3437_vm3, %v524_v32, %v745_v40 }
  0x64   : > { %743 = vst [vmem:[#allocation2 + $0x78] sm:$0xf] %v742_v30  ;;  %v580_v44 = vshll.u32 %v347_v10, 16  ;;  %v217_v45 = vld [vmem:[#allocation2 + $0x18] sm:$0x1]  ;;  %v585_v50 = vshrl.u32 %v348_v24, 16 }
  0x65   : > { %v903_v46 = vsel %vm3518_vm13, %v898_v33, %v902_v37  ;;  %v907_v48 = vor.u32 %v906_v38, %v902_v37  ;;  %v802_v49 = vld [vmem:[#allocation2 + $0x48] sm:$0xf]  ;;  %744 = vst.msk [vmem:[#allocation2 + $0x7c] sm:$0xf] %vm199_vm7, %v523_v39  ;;  %v588_v51 = vshll.u32 %v348_v24, 16  ;;  %v583_v63 = vrot.slane %v579_v43, 4 }
  0x66   : > { %v1254_v52 = vunpack.c.l.b16 %v903_v46  ;;  %v3698_v53 = vld [vmem:[#allocation2 + $0x4c] sm:$0xf]  ;;  %v1011_v54 = vshrl.u32 %v802_v49, 16  ;;  %v1014_v56 = vshll.u32 %v802_v49, 16  ;;  %747 = vst [vmem:[#allocation2 + $0x80] sm:$0x1] %v746_v42  ;;  %v582_v57 = vor.u32 %v580_v44, %v579_v43 }
  0x67   : > { %v908_v58 = vrot.slane %v907_v48, 4  ;;  %v3700_v59 = vld [vmem:[#allocation2 + $0x50] sm:$0x1]  ;;  %v1020_v60 = vshll.u32 %v3698_v53, 16  ;;  %v1024_v62 = vshrl.u32 %v3698_v53, 16  ;;  %v587_v5 = vrot.slane %v585_v50, 7 }
  0x68   : > { %v1013_v0 = vrot.slane %v1011_v54, 4  ;;  %v1016_v1 = vrot.slane %v1014_v56, 5  ;;  %v1030_v2 = vshll.u32 %v3700_v59, 16  ;;  %v273_v8 = vld [vmem:[#allocation2 + $0x20] sm:$0x1]  ;;  %v218_v14 = vsel %vm3437_vm3, 0, %v217_v45 }
  0x69   : > { %v913_v9 = vsel %vm3518_vm13, %v908_v58, %v912_v41  ;;  %v1022_v10 = vrot.slane %v1020_v60, 5  ;;  %v1026_v11 = vrot.slane %v1024_v62, 4  ;;  %v769_v12 = vld [vmem:[#allocation2 + $0xa8] sm:$0xf]  ;;  %v590_v17 = vor.u32 %v588_v51, %v587_v5  ;;  %219 = vst [vmem:[#allocation2 + $0x18] sm:$0x1] %v218_v14 }
  0x6a   : > { %v1255_v15 = vunpack.c.l.b16 %v913_v9  ;;  %v1017_v16 = vor.u32 %v1016_v1, %v1013_v0  ;;  %v1032_v4 = vrot.slane %v1030_v2, 5  ;;  %v592_v22 = vrot.slane %v587_v5, 4  ;;  %v773_v34 = vld [vmem:[#allocation2 + $0xb0] sm:$0x1]  ;;  %v323_v36 = vld [vmem:[%s3455_s22 + $0x8] sm:$0xf] }
  0x6b   : > { %v1027_v18 = vor.u32 %v1026_v11, %v1022_v10  ;;  %v810_v21 = vld [vmem:[#allocation2 + $0x78] sm:$0xf]  ;;  %v770_v24 = vsel %vm3473_vm9, %v582_v57, %v769_v12  ;;  %v274_v26 = vsel %vm3445_vm5, 0, %v273_v8  ;;  %v591_v40 = vsel %vm3467_vm8, %v583_v63, %v590_v17  ;;  %v324_v50 = vld [vmem:[%s3455_s22 + $0xc] sm:$0xf] }
  0x6c   : > { %v3713_v28 = vpack.c.b16 %v1255_v15, %v1254_v52  ;;  %v1018_v29 = vrot.slane %v1017_v16, 4  ;;  %v3715_v31 = vld [vmem:[#allocation2 + $0x7c] sm:$0xf]  ;;  %v1107_v32 = vshrl.u32 %v810_v21, 16  ;;  %v1110_v33 = vshll.u32 %v810_v21, 16 }
  0x6d   : > { %v1028_v37 = vrot.slane %v1027_v18, 4  ;;  %v3718_v38 = vld [vmem:[#allocation2 + $0x80] sm:$0x1]  ;;  %v1116_v39 = vshll.u32 %v3715_v31, 16  ;;  %v1120_v30 = vshrl.u32 %v3715_v31, 16  ;;  %v774_v58 = vsel %vm3437_vm3, %v592_v22, %v773_v34 }
  0x6e   : > { %3095 = vmatmul.msk.bf16.gmra.mxu0 %vm1300_vm12, %v3713_v28  ;;  %v1023_v41 = vsel %vm3518_vm13, %v1018_v29, %v1022_v10  ;;  %v1109_v42 = vrot.slane %v1107_v32, 4  ;;  %v1112_v43 = vrot.slane %v1110_v33, 5  ;;  %v1126_v44 = vshll.u32 %v3718_v38, 16  ;;  %771 = vst [vmem:[#allocation2 + $0xa8] sm:$0xf] %v770_v24 }
  0x6f   : > { %v1033_v45 = vsel %vm3518_vm13, %v1028_v37, %v1032_v4  ;;  %v1264_v46 = vunpack.c.l.b16 %v1023_v41  ;;  %v1118_v48 = vrot.slane %v1116_v39, 5  ;;  %v1122_v49 = vrot.slane %v1120_v30, 4  ;;  %772 = vst.msk [vmem:[#allocation2 + $0xac] sm:$0xf] %vm199_vm7, %v591_v40  ;;  %v232_v56 = vld [vmem:[#allocation2 + $0x54] sm:$0x1] }
  0x70   : > { %v1265_v51 = vunpack.c.l.b16 %v1033_v45  ;;  %v1113_v52 = vor.u32 %v1112_v43, %v1109_v42  ;;  %v1128_v54 = vrot.slane %v1126_v44, 5  ;;  %275 = vst [vmem:[#allocation2 + $0x20] sm:$0x1] %v274_v26  ;;  %v373_v60 = vshrl.u32 %v323_v36, 16  ;;  %v288_v63 = vld [vmem:[#allocation2 + $0x5c] sm:$0x1] }
  0x71   : > { %v1123_v57 = vor.u32 %v1122_v49, %v1118_v48  ;;  %v376_v62 = vshll.u32 %v323_v36, 16  ;;  %775 = vst [vmem:[#allocation2 + $0xb0] sm:$0x1] %v774_v58  ;;  %v381_v2 = vshrl.u32 %v324_v50, 16  ;;  %v384_v5 = vshll.u32 %v324_v50, 16 }
  0x72   : > { %v3735_v0 = vpack.c.b16 %v1265_v51, %v1264_v46  ;;  %v1114_v1 = vrot.slane %v1113_v52, 4  ;;  %v375_v9 = vrot.slane %v373_v60, 7  ;;  %v233_v10 = vsel %vm3437_vm3, 0, %v232_v56  ;;  %v333_v12 = vld [vmem:[%s3455_s22 + $0x30] sm:$0xf] }
  0x73   : > { %v1124_v8 = vrot.slane %v1123_v57, 4  ;;  %v289_v11 = vsel %vm3445_vm5, 0, %v288_v63  ;;  %v383_v15 = vrot.slane %v381_v2, 7  ;;  %v685_v16 = vld [vmem:[#allocation2 + $0x18] sm:$0xf]  ;;  %v458_v4 = vshrl.u32 %v333_v12, 16 }
  0x74   : > { %4738 = vst [vmem:[#allocation8_spill] sm:$0xff] %v3735_v0  ;;  %3100 = vmatmul.msk.bf16.gmra.mxu1 %vm1300_vm12, %v3735_v0  ;;  %v1119_v14 = vsel %vm3518_vm13, %v1114_v1, %v1118_v48  ;;  %v378_v22 = vor.u32 %v376_v62, %v375_v9  ;;  %v379_v24 = vrot.slane %v375_v9, 4  ;;  %v334_v36 = vld [vmem:[%s3455_s22 + $0x34] sm:$0xf]  ;;  %v244_v46 = vld [vmem:[#allocation2 + $0x84] sm:$0x1] }
  0x75   : > { %234 = vst [vmem:[#allocation2 + $0x54] sm:$0x1] %v233_v10  ;;  %v1129_v17 = vsel %vm3518_vm13, %v1124_v8, %v1128_v54  ;;  %v1272_v18 = vunpack.c.l.b16 %v1119_v14  ;;  %v818_v21 = vld [vmem:[#allocation2 + $0xa8] sm:$0xf]  ;;  %v386_v34 = vor.u32 %v384_v5, %v383_v15  ;;  %v388_v30 = vrot.slane %v383_v15, 4 }
  0x76   : > { %290 = vst [vmem:[#allocation2 + $0x5c] sm:$0x1] %v289_v11  ;;  %v1273_v26 = vunpack.c.l.b16 %v1129_v17  ;;  %v819_v29 = vld [vmem:[#allocation2 + $0xac] sm:$0xf]  ;;  %v1203_v32 = vshrl.u32 %v818_v21, 16  ;;  %v1206_v33 = vshll.u32 %v818_v21, 16  ;;  %v686_v40 = vsel %vm3473_vm9, %v378_v22, %v685_v16 }
  0x77   : > { %v1212_v37 = vshll.u32 %v819_v29, 16  ;;  %v1216_v39 = vshrl.u32 %v819_v29, 16  ;;  %v689_v41 = vld [vmem:[#allocation2 + $0x20] sm:$0x1]  ;;  %v387_v45 = vsel %vm3467_vm8, %v379_v24, %v386_v34  ;;  %687 = vst [vmem:[#allocation2 + $0x18] sm:$0xf] %v686_v40 }
  0x78   : > { %v3751_v42 = vpack.c.b16 %v1273_v26, %v1272_v18  ;;  %v1205_v43 = vrot.slane %v1203_v32, 4  ;;  %v1208_v44 = vrot.slane %v1206_v33, 5  ;;  %v840_v48 = vld [vmem:[#allocation2 + $0xb0] sm:$0x1]  ;;  %688 = vst.msk [vmem:[#allocation2 + $0x1c] sm:$0xf] %vm199_vm7, %v387_v45  ;;  %v690_v51 = vsel %vm3437_vm3, %v388_v30, %v689_v41 }
  0x79   : > { %v1214_v49 = vrot.slane %v1212_v37, 5  ;;  %v1218_v50 = vrot.slane %v1216_v39, 4  ;;  %v1222_v54 = vshll.u32 %v840_v48, 16  ;;  %691 = vst [vmem:[#allocation2 + $0x20] sm:$0x1] %v690_v51  ;;  %v460_v56 = vrot.slane %v458_v4, 7 }
  0x7a   : > { %3104 = vmatmul.msk.bf16.gmra.mxu2 %vm1300_vm12, %v3751_v42  ;;  %v1209_v52 = vor.u32 %v1208_v44, %v1205_v43  ;;  %v300_v57 = vld [vmem:[#allocation2 + $0x8c] sm:$0x1]  ;;  %v461_v60 = vshll.u32 %v333_v12, 16  ;;  %v466_v62 = vshrl.u32 %v334_v36, 16  ;;  %v469_v63 = vshll.u32 %v334_v36, 16 }
  0x7b   : > { %v1219_v58 = vor.u32 %v1218_v50, %v1214_v49  ;;  %v1224_v2 = vrot.slane %v1222_v54, 5  ;;  %v464_v5 = vrot.slane %v460_v56, 4  ;;  %v245_v9 = vsel %vm3437_vm3, 0, %v244_v46  ;;  %v341_v4 = vld [vmem:[%s3455_s22 + $0x50] sm:$0xf] }
  0x7c   : > { %v1210_v1 = vrot.slane %v1209_v52, 4  ;;  %v720_v8 = vld [vmem:[#allocation2 + $0x54] sm:$0xf]  ;;  %v463_v11 = vor.u32 %v461_v60, %v460_v56  ;;  %v468_v14 = vrot.slane %v466_v62, 7  ;;  %246 = vst [vmem:[#allocation2 + $0x84] sm:$0x1] %v245_v9 }
  0x7d   : > { %v1220_v10 = vrot.slane %v1219_v58, 4  ;;  %v301_v15 = vsel %vm3445_vm5, 0, %v300_v57  ;;  %v724_v16 = vld [vmem:[#allocation2 + $0x5c] sm:$0x1]  ;;  %v342_v26 = vld [vmem:[%s3455_s22 + $0x54] sm:$0xf] }
  0x7e   : > { %v1215_v12 = vsel %vm3518_vm13, %v1210_v1, %v1214_v49  ;;  %302 = vst [vmem:[#allocation2 + $0x8c] sm:$0x1] %v301_v15  ;;  %v794_v21 = vld [vmem:[#allocation2 + $0x18] sm:$0xf]  ;;  %v471_v22 = vor.u32 %v469_v63, %v468_v14  ;;  %v473_v24 = vrot.slane %v468_v14, 4  ;;  %v721_v36 = vsel %vm3473_vm9, %v463_v11, %v720_v8 }
  0x7f   : > { %v1225_v17 = vsel %vm3518_vm13, %v1220_v10, %v1224_v2  ;;  %v1280_v18 = vunpack.c.l.b16 %v1215_v12  ;;  %v3770_v32 = vld [vmem:[#allocation2 + $0x1c] sm:$0xf]  ;;  %v915_v33 = vshrl.u32 %v794_v21, 16  ;;  %v918_v34 = vshll.u32 %v794_v21, 16  ;;  %v256_v37 = vld [vmem:[#allocation2 + $0xb4] sm:$0x1] }
  0x80   : > { %v1281_v29 = vunpack.c.l.b16 %v1225_v17  ;;  %v312_v39 = vld [vmem:[#allocation2 + $0xbc] sm:$0x1]  ;;  %v3774_v30 = vld [vmem:[#allocation2 + $0x20] sm:$0x1]  ;;  %v924_v40 = vshll.u32 %v3770_v32, 16  ;;  %v928_v41 = vshrl.u32 %v3770_v32, 16  ;;  %v472_v43 = vsel %vm3467_vm8, %v464_v5, %v471_v22 }
  0x81   : > { %722 = vst [vmem:[#allocation2 + $0x54] sm:$0xf] %v721_v36  ;;  %v725_v44 = vsel %vm3437_vm3, %v473_v24, %v724_v16  ;;  %v917_v46 = vrot.slane %v915_v33, 4  ;;  %v920_v48 = vrot.slane %v918_v34, 5  ;;  %v934_v49 = vshll.u32 %v3774_v30, 16 }
  0x82   : > { %v3782_v45 = vpack.c.b16 %v1281_v29, %v1280_v18  ;;  %723 = vst.msk [vmem:[#allocation2 + $0x58] sm:$0xf] %vm199_vm7, %v472_v43  ;;  %v926_v50 = vrot.slane %v924_v40, 5  ;;  %v930_v51 = vrot.slane %v928_v41, 4  ;;  %v526_v52 = vshrl.u32 %v341_v4, 16 }
  0x83   : > { %726 = vst [vmem:[#allocation2 + $0x5c] sm:$0x1] %v725_v44  ;;  %v529_v54 = vshll.u32 %v341_v4, 16  ;;  %v921_v56 = vor.u32 %v920_v48, %v917_v46  ;;  %v936_v57 = vrot.slane %v934_v49, 5  ;;  %v534_v58 = vshrl.u32 %v342_v26, 16 }
  0x84   : > { %3108 = vmatmul.msk.bf16.gmra.mxu3 %vm1300_vm12, %v3782_v45  ;;  %v537_v60 = vshll.u32 %v342_v26, 16  ;;  %v931_v62 = vor.u32 %v930_v51, %v926_v50  ;;  %v528_v63 = vrot.slane %v526_v52, 7  ;;  %v257_v1 = vsel %vm3437_vm3, 0, %v256_v37  ;;  %v349_v9 = vld [vmem:[%s3455_s22 + $0x70] sm:$0xf] }
  0x85   : > { %v313_v2 = vsel %vm3445_vm5, 0, %v312_v39  ;;  %v922_v5 = vrot.slane %v921_v56, 4  ;;  %v536_v8 = vrot.slane %v534_v58, 7  ;;  %258 = vst [vmem:[#allocation2 + $0xb4] sm:$0x1] %v257_v1  ;;  %v594_v21 = vshrl.u32 %v349_v9, 16 }
  0x86   : > { %v932_v10 = vrot.slane %v931_v62, 4  ;;  %v531_v11 = vor.u32 %v529_v54, %v528_v63  ;;  %v532_v14 = vrot.slane %v528_v63, 4  ;;  %v748_v15 = vld [vmem:[#allocation2 + $0x84] sm:$0xf]  ;;  %314 = vst [vmem:[#allocation2 + $0xbc] sm:$0x1] %v313_v2 }
  0x87   : > { %v927_v12 = vsel %vm3518_vm13, %v922_v5, %v926_v50  ;;  %v539_v4 = vor.u32 %v537_v60, %v536_v8  ;;  %v541_v17 = vrot.slane %v536_v8, 4  ;;  %v752_v18 = vld [vmem:[#allocation2 + $0x8c] sm:$0x1]  ;;  %v350_v34 = vld [vmem:[%s3455_s22 + $0x74] sm:$0xf]  ;;  %v596_v60 = vrot.slane %v594_v21, 7 }
  0x88   : > { %v804_v16 = vld [vmem:[#allocation2 + $0x54] sm:$0xf]  ;;  %v937_v22 = vsel %vm3518_vm13, %v932_v10, %v936_v57  ;;  %v1256_v24 = vunpack.c.l.b16 %v927_v12  ;;  %v220_v43 = vld [vmem:[#allocation2 + $0x24] sm:$0x1]  ;;  %v749_v49 = vsel %vm3473_vm9, %v531_v11, %v748_v15  ;;  %v276_v50 = vld [vmem:[#allocation2 + $0x2c] sm:$0x1] }
  0x89   : > { %v3797_v26 = vld [vmem:[#allocation2 + $0x58] sm:$0xf]  ;;  %v1035_v29 = vshrl.u32 %v804_v16, 16  ;;  %v1038_v33 = vshll.u32 %v804_v16, 16  ;;  %v1257_v36 = vunpack.c.l.b16 %v937_v22  ;;  %v540_v41 = vsel %vm3467_vm8, %v532_v14, %v539_v4  ;;  %750 = vst [vmem:[#allocation2 + $0x84] sm:$0xf] %v749_v49 }
  0x8a   : > { %v3800_v37 = vld [vmem:[#allocation2 + $0x5c] sm:$0x1]  ;;  %v1044_v39 = vshll.u32 %v3797_v26, 16  ;;  %v1048_v40 = vshrl.u32 %v3797_v26, 16  ;;  %751 = vst.msk [vmem:[#allocation2 + $0x88] sm:$0xf] %vm199_vm7, %v540_v41  ;;  %v753_v56 = vsel %vm3437_vm3, %v541_v17, %v752_v18 }
  0x8b   : > { %v1037_v44 = vrot.slane %v1035_v29, 4  ;;  %v1040_v46 = vrot.slane %v1038_v33, 5  ;;  %v1054_v48 = vshll.u32 %v3800_v37, 16  ;;  %v3810_v51 = vpack.c.b16 %v1257_v36, %v1256_v24  ;;  %v325_v57 = vld [vmem:[%s3455_s22 + $0x10] sm:$0xf] }
  0x8c   : > { %v1046_v52 = vrot.slane %v1044_v39, 5  ;;  %v1050_v54 = vrot.slane %v1048_v40, 4  ;;  %754 = vst [vmem:[#allocation2 + $0x8c] sm:$0x1] %v753_v56  ;;  %v597_v62 = vshll.u32 %v349_v9, 16  ;;  %v602_v5 = vshrl.u32 %v350_v34, 16 }
  0x8d   : > { %v1041_v58 = vor.u32 %v1040_v46, %v1037_v44  ;;  %v3816_v63 = vld [vmem:[%s3455_s22 + $0x14] sm:$0xf]  ;;  %3096 = vmatmul.msk.bf16.gmra.mxu0 %vm1300_vm12, %v3810_v51  ;;  %v1056_v2 = vrot.slane %v1054_v48, 5  ;;  %v605_v8 = vshll.u32 %v350_v34, 16  ;;  %v600_v15 = vrot.slane %v596_v60, 4 }
  0x8e   : > { %v1051_v1 = vor.u32 %v1050_v54, %v1046_v52  ;;  %v776_v10 = vld [vmem:[#allocation2 + $0xb4] sm:$0xf]  ;;  %v599_v14 = vor.u32 %v597_v62, %v596_v60  ;;  %v780_v12 = vld [vmem:[#allocation2 + $0xbc] sm:$0x1]  ;;  %v221_v16 = vsel %vm3437_vm3, 0, %v220_v43  ;;  %v604_v17 = vrot.slane %v602_v5, 7 }
  0x8f   : > { %v1042_v11 = vrot.slane %v1041_v58, 4  ;;  %222 = vst [vmem:[#allocation2 + $0x24] sm:$0x1] %v221_v16  ;;  %v277_v9 = vsel %vm3445_vm5, 0, %v276_v50  ;;  %v390_v18 = vshrl.u32 %v325_v57, 16  ;;  %v393_v24 = vshll.u32 %v325_v57, 16 }
  0x90   : > { %v1052_v4 = vrot.slane %v1051_v1, 4  ;;  %v777_v22 = vsel %vm3473_vm9, %v599_v14, %v776_v10  ;;  %278 = vst [vmem:[#allocation2 + $0x2c] sm:$0x1] %v277_v9  ;;  %v398_v29 = vshrl.u32 %v3816_v63, 16  ;;  %v607_v39 = vor.u32 %v605_v8, %v604_v17  ;;  %v812_v43 = vld [vmem:[#allocation2 + $0x84] sm:$0xf] }
  0x91   : > { %v1047_v21 = vsel %vm3518_vm13, %v1042_v11, %v1046_v52  ;;  %v3831_v36 = vld [vmem:[#allocation2 + $0x88] sm:$0xf]  ;;  %v609_v40 = vrot.slane %v604_v17, 4  ;;  %778 = vst [vmem:[#allocation2 + $0xb4] sm:$0xf] %v777_v22  ;;  %v392_v48 = vrot.slane %v390_v18, 7 }
  0x92   : > { %v1057_v33 = vsel %vm3518_vm13, %v1052_v4, %v1056_v2  ;;  %v1266_v34 = vunpack.c.l.b16 %v1047_v21  ;;  %v1140_v44 = vshll.u32 %v3831_v36, 16  ;;  %v1144_v46 = vshrl.u32 %v3831_v36, 16 }
  0x93   : > { %v1267_v41 = vunpack.c.l.b16 %v1057_v33  ;;  %v3835_v49 = vld [vmem:[#allocation2 + $0x8c] sm:$0x1]  ;;  %v1131_v50 = vshrl.u32 %v812_v43, 16  ;;  %v1134_v52 = vshll.u32 %v812_v43, 16  ;;  %v608_v54 = vsel %vm3467_vm8, %v600_v15, %v607_v39 }
  0x94   : > { %v781_v56 = vsel %vm3437_vm3, %v609_v40, %v780_v12  ;;  %v1142_v58 = vrot.slane %v1140_v44, 5  ;;  %v1146_v60 = vrot.slane %v1144_v46, 4  ;;  %v1150_v62 = vshll.u32 %v3835_v49, 16  ;;  %779 = vst.msk [vmem:[#allocation2 + $0xb8] sm:$0xf] %vm199_vm7, %v608_v54 }
  0x95   : > { %v3841_v57 = vpack.c.b16 %v1267_v41, %v1266_v34  ;;  %v1133_v1 = vrot.slane %v1131_v50, 4  ;;  %v1136_v2 = vrot.slane %v1134_v52, 5  ;;  %782 = vst [vmem:[#allocation2 + $0xbc] sm:$0x1] %v781_v56  ;;  %v395_v5 = vor.u32 %v393_v24, %v392_v48 }
  0x96   : > { %v1147_v8 = vor.u32 %v1146_v60, %v1142_v58  ;;  %v1152_v10 = vrot.slane %v1150_v62, 5  ;;  %v400_v11 = vrot.slane %v398_v29, 7  ;;  %v692_v14 = vld [vmem:[#allocation2 + $0x24] sm:$0xf]  ;;  %v396_v12 = vrot.slane %v392_v48, 4 }
  0x97   : > { %4739 = vst [vmem:[#allocation9_spill] sm:$0xff] %v3841_v57  ;;  %3101 = vmatmul.msk.bf16.gmra.mxu1 %vm1300_vm12, %v3841_v57  ;;  %v1137_v15 = vor.u32 %v1136_v2, %v1133_v1  ;;  %v401_v16 = vshll.u32 %v3816_v63, 16  ;;  %v693_v4 = vsel %vm3473_vm9, %v395_v5, %v692_v14  ;;  %v696_v17 = vld [vmem:[#allocation2 + $0x2c] sm:$0x1]  ;;  %v844_v60 = vld [vmem:[#allocation2] sm:$0xe] }
  0x98   : > { %v1148_v9 = vrot.slane %v1147_v8, 4  ;;  %v820_v18 = vld [vmem:[#allocation2 + $0xb4] sm:$0xf]  ;;  %v405_v21 = vrot.slane %v400_v11, 4  ;;  %694 = vst [vmem:[#allocation2 + $0x24] sm:$0xf] %v693_v4 }
  0x99   : > { %v1138_v22 = vrot.slane %v1137_v15, 4  ;;  %v1227_v24 = vshrl.u32 %v820_v18, 16  ;;  %v1230_v33 = vshll.u32 %v820_v18, 16  ;;  %v403_v34 = vor.u32 %v401_v16, %v400_v11  ;;  %v3279_v63 = vld [vmem:[%s4691_s1 + $0xc] sm:$0x3] }
  0x9a   : > { %v1153_v29 = vsel %vm3518_vm13, %v1148_v9, %v1152_v10  ;;  %v697_v39 = vsel %vm3437_vm3, %v405_v21, %v696_v17  ;;  %v3371_v1 = vld [vmem:[#allocation2 + $0x4] sm:$0xf]  ;;  %v2473_v11 = vsel %vm1349_vm0, %v3279_v63, 0  ;;  %v3372_v14 = vld [vmem:[#allocation2 + $0x8] sm:$0x1] }
  0x9b   : > { %v1143_v40 = vsel %vm3518_vm13, %v1138_v22, %v1142_v58  ;;  %v1275_v41 = vunpack.c.l.b16 %v1153_v29  ;;  %v3859_v43 = vld [vmem:[#allocation2 + $0xb8] sm:$0xf]  ;;  %v1229_v44 = vrot.slane %v1227_v24, 4  ;;  %v1232_v46 = vrot.slane %v1230_v33, 5  ;;  %698 = vst [vmem:[#allocation2 + $0x2c] sm:$0x1] %v697_v39  ;;  %2482 = vmatpush.bf16.msra.mxu2 %v2473_v11 }
  0x9c   : > { %v1274_v48 = vunpack.c.l.b16 %v1143_v40  ;;  %v3861_v50 = vld [vmem:[#allocation2 + $0xbc] sm:$0x1]  ;;  %v1236_v52 = vshll.u32 %v3859_v43, 16  ;;  %v1240_v54 = vshrl.u32 %v3859_v43, 16  ;;  %v404_v56 = vsel %vm3467_vm8, %v396_v12, %v403_v34  ;;  %v3339_v40 = vld [vmem:[#allocation2] sm:$0xff] }
  0x9d   : > { %v1233_v62 = vor.u32 %v1232_v46, %v1229_v44  ;;  %v1246_v58 = vshll.u32 %v3861_v50, 16  ;;  %695 = vst.msk [vmem:[#allocation2 + $0x28] sm:$0xf] %vm199_vm7, %v404_v56  ;;  %v1699_v2 = vrot.slane %v3371_v1, 5  ;;  %v1702_v15 = vrot.slane %v3372_v14, 5 }
  0x9e   : > { %v3869_v5 = vpack.c.b16 %v1275_v41, %v1274_v48  ;;  %v1238_v8 = vrot.slane %v1236_v52, 5  ;;  %v1242_v10 = vrot.slane %v1240_v54, 4  ;;  %v3190_v12 = vrot.slane %v844_v60, 9  ;;  %v3300_v48 = vld [vmem:[%s4691_s1 + $0xe] sm:$0x3] }
  0x9f   : > { %v1234_v16 = vrot.slane %v1233_v62, 4  ;;  %v796_v4 = vld [vmem:[#allocation2 + $0x24] sm:$0xf]  ;;  %v1701_v17 = vrot.slane %v1699_v2, 4  ;;  %v1248_v18 = vrot.slane %v1246_v58, 5  ;;  %v2629_v62 = vsel %vm1349_vm0, %v3300_v48, 0 }
  0xa0   : > { %4740 = vst [vmem:[#allocation10_spill] sm:$0xff] %v3869_v5  ;;  %3105 = vmatmul.msk.bf16.gmra.mxu2 %vm1300_vm12, %v3869_v5  ;;  %v1243_v9 = vor.u32 %v1242_v10, %v1238_v8  ;;  %v939_v21 = vshrl.u32 %v796_v4, 16  ;;  %v942_v22 = vshll.u32 %v796_v4, 16  ;;  %v1700_v44 = vsel %vm3876_vm1, %v3190_v12, %v1699_v2  ;;  %v3262_v52 = vld [vmem:[%s4691_s1 + $0xa] sm:$0x3]  ;;  %2638 = vmatpush.bf16.msra.mxu3 %v2629_v62 }
  0xa1   : > { %v1239_v33 = vsel %vm3518_vm13, %v1234_v16, %v1238_v8  ;;  %v1703_v46 = vsel %vm3876_vm1, %v1701_v17, %v1702_v15  ;;  %v2339_v58 = vsel %vm1349_vm0, %v3262_v52, 0  ;;  %v3318_v1 = vld [vmem:[%s4691_s1 + $0x10] sm:$0x3]  ;;  %v1811_v17 = vunpack.c.l.b16 %v1700_v44  ;;  %v845_v48 = vld [vmem:[#allocation2 + $0xc] sm:$0xe] }
  0xa2   : > { %v1244_v34 = vrot.slane %v1243_v9, 4  ;;  %v3882_v29 = vld [vmem:[#allocation2 + $0x2c] sm:$0x1]  ;;  %v941_v39 = vrot.slane %v939_v21, 4  ;;  %v944_v63 = vrot.slane %v942_v22, 5  ;;  %v1282_v41 = vunpack.c.l.b16 %v1239_v33  ;;  %2348 = vmatpush.bf16.msra.mxu1 %v2339_v58 }
  0xa3   : > { %v958_v11 = vshll.u32 %v3882_v29, 16  ;;  %v2770_v15 = vsel %vm1349_vm0, %v3318_v1, 0  ;;  %v1812_v9 = vunpack.c.l.b16 %v1703_v46  ;;  %v3191_v46 = vrot.slane %v845_v48, 9 }
  0xa4   : > { %v1249_v54 = vsel %vm3518_vm13, %v1244_v34, %v1248_v18  ;;  %v3896_v56 = vld [vmem:[#allocation2 + $0x28] sm:$0xf]  ;;  %v945_v60 = vor.u32 %v944_v63, %v941_v39  ;;  %2779 = vmatpush.bf16.msra.mxu0 %v2770_v15  ;;  %v1713_v62 = vrot.slane %v3770_v32, 5  ;;  %v1716_v58 = vrot.slane %v3774_v30, 5 }
  0xa5   : > { %v1283_v2 = vunpack.c.l.b16 %v1249_v54  ;;  %v948_v8 = vshll.u32 %v3896_v56, 16  ;;  %v952_v10 = vshrl.u32 %v3896_v56, 16  ;;  %v960_v22 = vrot.slane %v958_v11, 5 }
  0xa6   : > { %v946_v14 = vrot.slane %v945_v60, 4  ;;  %v1843_v39 = vpack.c.b16 %v1812_v9, %v1811_v17  ;;  %v1709_v54 = vrot.slane %v3684_v27, 5  ;;  %v846_v60 = vld [vmem:[#allocation2 + $0x18] sm:$0xe]  ;;  %v1720_v9 = vrot.slane %v3896_v56, 5 }
  0xa7   : > { %3174 = vmatmul.msk.bf16.vlgmr.msrb.gmra.mxu1 %vm1300_vm12, %v3339_v40  ;;  %v3908_v16 = vpack.c.b16 %v1283_v2, %v1282_v41  ;;  %v950_v4 = vrot.slane %v948_v8, 5  ;;  %v954_v12 = vrot.slane %v952_v10, 4  ;;  %v1706_v40 = vrot.slane %v3679_v19, 5  ;;  %v3340_v19 = vld [vmem:[#allocation2 + $0xc] sm:$0xff]  ;;  %v3943_v17 = vld [vmem:[#allocation2 + $0x18] sm:$0xff] }
  0xa8   : > { %v3192_v1 = vrot.slane %v846_v60, 9  ;;  %v1715_v2 = vrot.slane %v1713_v62, 4  ;;  %v3374_v60 = vld [vmem:[#allocation2 + $0x38] sm:$0x1] }
  0xa9   : > { %3109 = vmatmul.msk.bf16.gmra.mxu3 %vm1300_vm12, %v3908_v16  ;;  %v951_v18 = vsel %vm3518_vm13, %v946_v14, %v950_v4  ;;  %v955_v21 = vor.u32 %v954_v12, %v950_v4  ;;  %v1708_v52 = vrot.slane %v1706_v40, 4  ;;  %v1707_v8 = vsel %vm3876_vm1, %v3191_v46, %v1706_v40  ;;  %v848_v46 = vld [vmem:[#allocation2 + $0x30] sm:$0xe] }
  0xaa   : > { %v1258_v34 = vunpack.c.l.b16 %v951_v18  ;;  %v1714_v27 = vsel %vm3876_vm1, %v3192_v1, %v1713_v62  ;;  %v1717_v11 = vsel %vm3876_vm1, %v1715_v2, %v1716_v58  ;;  %v1813_v30 = vunpack.c.l.b16 %v1707_v8  ;;  %v847_v18 = vld [vmem:[#allocation2 + $0x24] sm:$0xe]  ;;  %v3975_v1 = vld [vmem:[#allocation2 + $0x30] sm:$0xff] }
  0xab   : > { %v956_v33 = vrot.slane %v955_v21, 4  ;;  %v1710_v10 = vsel %vm3876_vm1, %v1708_v52, %v1709_v54  ;;  %v1815_v32 = vunpack.c.l.b16 %v1714_v27  ;;  %v1816_v14 = vunpack.c.l.b16 %v1717_v11 }
  0xac   : > { %v1814_v15 = vunpack.c.l.b16 %v1710_v10  ;;  %v3193_v21 = vrot.slane %v847_v18, 9  ;;  %v3194_v52 = vrot.slane %v848_v46, 9  ;;  %v1730_v62 = vrot.slane %v3374_v60, 5 }
  0xad   : > { %v961_v63 = vsel %vm3518_vm13, %v956_v33, %v960_v22  ;;  %v3935_v4 = vpack.c.b16 %v1816_v14, %v1815_v32  ;;  %v1722_v22 = vrot.slane %v1720_v9, 4  ;;  %v1723_v33 = vrot.slane %v3882_v29, 5  ;;  %v3965_v29 = vpop.f32.mrf.mxu1  ;;  %v3375_v14 = vld [vmem:[#allocation2 + $0x40] sm:$0xf] }
  0xae   : > { %v1259_v41 = vunpack.c.l.b16 %v961_v63  ;;  %v3937_v12 = vpack.c.b16 %v1814_v15, %v1813_v30  ;;  %v1734_v30 = vrot.slane %v3375_v14, 5  ;;  %v849_v15 = vld [vmem:[#allocation2 + $0x3c] sm:$0xe] }
  0xb0   : > { %v3917_v44 = vpack.c.b16 %v1259_v41, %v1258_v34  ;;  %3207 = vmatmul.msk.bf16.vlgmr.msrb.gmra.mxu2 %vm1300_vm12, %v1843_v39  ;;  %v1721_v34 = vsel %vm3876_vm1, %v3193_v21, %v1720_v9  ;;  %v1724_v39 = vsel %vm3876_vm1, %v1722_v22, %v1723_v33  ;;  %v3373_v41 = vld [vmem:[#allocation2 + $0x34] sm:$0xf]  ;;  %v3195_v21 = vrot.slane %v849_v15, 9  ;;  %v3376_v33 = vld [vmem:[#allocation2 + $0x44] sm:$0x1] }
  0xb1   : > { %v1817_v56 = vunpack.c.l.b16 %v1721_v34  ;;  %v1818_v63 = vunpack.c.l.b16 %v1724_v39  ;;  %v1727_v48 = vrot.slane %v3373_v41, 5  ;;  %v1736_v22 = vrot.slane %v1734_v30, 4 }
  0xb2   : > { %3097 = vmatmul.msk.bf16.gmra.mxu0 %vm1300_vm12, %v3917_v44  ;;  %v1737_v34 = vrot.slane %v3376_v33, 5  ;;  %v1744_v15 = vrot.slane %v3700_v59, 5 }
  0xb3   : > { %v3967_v40 = vpack.c.b16 %v1818_v63, %v1817_v56  ;;  %v1729_v54 = vrot.slane %v1727_v48, 4  ;;  %v4001_v56 = vld [vmem:[#allocation2 + $0x3c] sm:$0xff]  ;;  %v1735_v63 = vsel %vm3876_vm1, %v3195_v21, %v1734_v30  ;;  %v4029_v21 = vld [vmem:[#allocation2 + $0x48] sm:$0xff] }
  0xb4   : > { %4745 = vst [vmem:[#allocation13_spill] sm:$0xff] %v4001_v56  ;;  %v1738_v41 = vsel %vm3876_vm1, %v1736_v22, %v1737_v34  ;;  %v1821_v46 = vunpack.c.l.b16 %v1735_v63 }
  0xb5   : > { %v3973_v58 = vpop.f32.mrf.mxu1  ;;  %v1731_v2 = vsel %vm3876_vm1, %v1729_v54, %v1730_v62  ;;  %v3983_v8 = vpop.f32.mrf.mxu2  ;;  %4748 = vst [vmem:[#allocation16_spill] sm:$0xff] %v4029_v21 }
  0xb6   : > { %v1820_v27 = vunpack.c.l.b16 %v1731_v2  ;;  %v1741_v2 = vrot.slane %v3698_v53, 5 }
  0xb7   : > { %3175 = vmatmul.msk.bf16.gmra.mxu1 %vm1300_vm12, %v3340_v19 }
  0xb8   : > { %v1743_v30 = vrot.slane %v1741_v2, 4 }
  0xb9   : > { %3228 = vmatmul.msk.bf16.vlgmr.msrb.gmra.mxu3 %vm1300_vm12, %v3340_v19  ;;  %v1728_v19 = vsel %vm3876_vm1, %v3194_v52, %v1727_v48  ;;  %v1822_v52 = vunpack.c.l.b16 %v1738_v41 }
  0xba   : > { %v1819_v10 = vunpack.c.l.b16 %v1728_v19  ;;  %v1745_v34 = vsel %vm3876_vm1, %v1743_v30, %v1744_v15 }
  0xbb   : > { %v4017_v62 = vpack.c.b16 %v1822_v52, %v1821_v46  ;;  %v1824_v41 = vunpack.c.l.b16 %v1745_v34 }
  0xbc   : > { %v3989_v32 = vpack.c.b16 %v1820_v27, %v1819_v10  ;;  %v3993_v9 = vpop.f32.mrf.mxu3  ;;  %v850_v10 = vld [vmem:[#allocation2 + $0x48] sm:$0xe] }
  0xbd   : > { %4744 = vst [vmem:[#allocation12_spill] sm:$0xff] %v3993_v9  ;;  %v3995_v18 = vpop.f32.mrf.mxu2  ;;  %v3196_v14 = vrot.slane %v850_v10, 9  ;;  %v1748_v10 = vrot.slane %v3797_v26, 5  ;;  %v4063_v26 = vld [vmem:[#allocation2 + $0x54] sm:$0xff] }
  0xbe   : > { %4743 = vst [vmem:[#allocation11_spill] sm:$0xff] %v3989_v32 }
  0xbf   : > { %v3999_v39 = vpop.f32.mrf.mxu0  ;;  %4747 = vst [vmem:[#allocation15_spill] sm:$0xff] %v4017_v62  ;;  %v1742_v53 = vsel %vm3876_vm1, %v3196_v14, %v1741_v2  ;;  %v851_v14 = vld [vmem:[#allocation2 + $0x54] sm:$0xe]  ;;  %v1750_v34 = vrot.slane %v1748_v10, 4 }
  0xc0   : > { %3208 = vmatmul.msk.bf16.gmra.mxu2 %vm1300_vm12, %v3937_v12  ;;  %v1823_v59 = vunpack.c.l.b16 %v1742_v53  ;;  %v3197_v53 = vrot.slane %v851_v14, 9  ;;  %4753 = vst [vmem:[#allocation21_spill] sm:$0xff] %v4063_v26 }
  0xc2   : > { %3245 = vmatmul.msk.bf16.vlgmr.msrb.gmra.mxu0 %vm1300_vm12, %v3713_v28  ;;  %v3955_v28 = vld [vmem:[#allocation2 + $0x24] sm:$0xff]  ;;  %v4047_v52 = vpack.c.b16 %v1824_v41, %v1823_v59  ;;  %v1749_v41 = vsel %vm3876_vm1, %v3197_v53, %v1748_v10 }
  0xc3   : > { %v3377_v53 = vld [vmem:[#allocation2 + $0x64] sm:$0xf] }
  0xc4   : > { %v4013_v54 = vpop.f32.mrf.mxu3  ;;  %4750 = vst [vmem:[#allocation18_spill] sm:$0xff] %v4047_v52 }
  0xc5   : > { %4746 = vst [vmem:[#allocation14_spill] sm:$0xff] %v4013_v54  ;;  %v1825_v54 = vunpack.c.l.b16 %v1749_v41 }
  0xc7   : > { %3176 = vmatmul.msk.bf16.gmra.mxu1 %vm1300_vm12, %v3943_v17  ;;  %v4019_v19 = vpop.f32.mrf.mxu0 }
  0xc9   : > { %3229 = vmatmul.msk.bf16.gmra.mxu3 %vm1300_vm12, %v3943_v17 }
  0xce   : > { %v3987_v11 = vpop.f32.mrf.mxu1 }
  0xd0   : > { %3209 = vmatmul.msk.bf16.gmra.mxu2 %vm1300_vm12, %v3935_v4 }
  0xd2   : > { %3246 = vmatmul.msk.bf16.gmra.mxu0 %vm1300_vm12, %v3810_v51 }
  0xd6   : > { %v4007_v48 = vpop.f32.mrf.mxu1 }
  0xd7   : > { %3177 = vmatmul.msk.bf16.gmra.mxu1 %vm1300_vm12, %v3955_v28 }
  0xd9   : > { %3230 = vmatmul.msk.bf16.gmra.mxu3 %vm1300_vm12, %v3955_v28  ;;  %v4015_v60 = vpop.f32.mrf.mxu2 }
  0xe0   : > { %3210 = vmatmul.msk.bf16.gmra.mxu2 %vm1300_vm12, %v3967_v40  ;;  %v4031_v22 = vpop.f32.mrf.mxu3 }
  0xe1   : > { %4749 = vst [vmem:[#allocation17_spill] sm:$0xff] %v4031_v22  ;;  %v4033_v33 = vpop.f32.mrf.mxu2  ;;  %v1751_v22 = vrot.slane %v3800_v37, 5 }
  0xe2   : > { %3247 = vmatmul.msk.bf16.gmra.mxu0 %vm1300_vm12, %v3917_v44 }
  0xe7   : > { %3178 = vmatmul.msk.bf16.gmra.mxu1 %vm1300_vm12, %v3975_v1 }
  0xe8   : > { %v4050_v2 = vpop.f32.mrf.mxu3 }
  0xe9   : > { %3231 = vmatmul.msk.bf16.gmra.mxu3 %vm1300_vm12, %v3975_v1  ;;  %4751 = vst [vmem:[#allocation19_spill] sm:$0xff] %v4050_v2  ;;  %v1752_v2 = vsel %vm3876_vm1, %v1750_v34, %v1751_v22  ;;  %v1755_v22 = vrot.slane %v3377_v53, 5  ;;  %v852_v34 = vld [vmem:[#allocation2 + $0x60] sm:$0xe] }
  0xea   : > { %v1826_v37 = vunpack.c.l.b16 %v1752_v2  ;;  %v3198_v2 = vrot.slane %v852_v34, 9 }
  0xeb   : > { %v4041_v63 = vpop.f32.mrf.mxu0 }
  0xec   : > { %v4081_v10 = vpack.c.b16 %v1826_v37, %v1825_v54  ;;  %v4091_v54 = vld [vmem:[#allocation2 + $0x60] sm:$0xff]  ;;  %v1756_v53 = vsel %vm3876_vm1, %v3198_v2, %v1755_v22  ;;  %v853_v2 = vld [vmem:[#allocation2 + $0x6c] sm:$0xe] }
  0xed   : > { %4759 = vst [vmem:[#allocation27_spill] sm:$0xff] %v4091_v54  ;;  %v1827_v34 = vunpack.c.l.b16 %v1756_v53  ;;  %v3199_v53 = vrot.slane %v853_v2, 9 }
  0xee   : > { %4756 = vst [vmem:[#allocation24_spill] sm:$0xff] %v4081_v10 }
  0xf0   : > { %3211 = vmatmul.msk.bf16.gmra.mxu2 %vm1300_vm12, %v3989_v32 }
  0xf1   : > { %v4022_v27 = vpop.f32.mrf.mxu1 }
  0xf2   : > { %3248 = vmatmul.msk.bf16.gmra.mxu0 %vm1300_vm12, %v3544_v7 }
  0xf3   : > { %v4056_v15 = vpop.f32.mrf.mxu0 }
  0xf7   : > { %3179 = vmatmul.msk.bf16.gmra.mxu1 %vm1300_vm12, %v4001_v56 }
  0xf9   : > { %3232 = vmatmul.msk.bf16.gmra.mxu3 %vm1300_vm12, %v4001_v56  ;;  %v4045_v46 = vpop.f32.mrf.mxu1 }
  0xfd   : > { %v4052_v30 = vpop.f32.mrf.mxu2 }
  0xfe   : > { %4752 = vst [vmem:[#allocation20_spill] sm:$0xff] %v4052_v30 }
 0x100   : > { %3212 = vmatmul.msk.bf16.gmra.mxu2 %vm1300_vm12, %v4017_v62 }
 0x102   : > { %3249 = vmatmul.msk.bf16.gmra.mxu0 %vm1300_vm12, %v3629_v47 }
 0x107   : > { %3180 = vmatmul.msk.bf16.gmra.mxu1 %vm1300_vm12, %v4029_v21  ;;  %v4071_v14 = vpop.f32.mrf.mxu3 }
 0x108   : > { %4754 = vst [vmem:[#allocation22_spill] sm:$0xff] %v4071_v14  ;;  %v3378_v14 = vld [vmem:[#allocation2 + $0x68] sm:$0x1] }
 0x109   : > { %3233 = vmatmul.msk.bf16.gmra.mxu3 %vm1300_vm12, %v4029_v21  ;;  %v1758_v41 = vrot.slane %v3378_v14, 5  ;;  %v1757_v21 = vrot.slane %v1755_v22, 4 }
 0x10b   : > { %v1759_v14 = vsel %vm3876_vm1, %v1757_v21, %v1758_v41  ;;  %v3380_v21 = vld [vmem:[#allocation2 + $0x74] sm:$0x1] }
 0x10c   : > { %v1765_v41 = vrot.slane %v3380_v21, 5 }
 0x110   : > { %3213 = vmatmul.msk.bf16.gmra.mxu2 %vm1300_vm12, %v4047_v52  ;;  %v4077_v52 = vpop.f32.mrf.mxu0 }
 0x112   : > { %3250 = vmatmul.msk.bf16.gmra.mxu0 %vm1300_vm12, %v3735_v0  ;;  %v4075_v0 = vpop.f32.mrf.mxu2 }
 0x113   : > { %4755 = vst [vmem:[#allocation23_spill] sm:$0xff] %v4075_v0  ;;  %v3379_v0 = vld [vmem:[#allocation2 + $0x70] sm:$0xf] }
 0x114   : > { %v4061_v59 = vpop.f32.mrf.mxu1  ;;  %v1762_v22 = vrot.slane %v3379_v0, 5  ;;  %v4118_v0 = vld [vmem:[#allocation2 + $0x6c] sm:$0xff] }
 0x115   : > { %4764 = vst [vmem:[#allocation32_spill] sm:$0xff] %v4118_v0 }
 0x116   : > { %v1763_v32 = vsel %vm3876_vm1, %v3199_v53, %v1762_v22 }
 0x117   : > { %3181 = vmatmul.msk.bf16.gmra.mxu1 %vm1300_vm12, %v4063_v26 }
 0x118   : > { %v4093_v37 = vpop.f32.mrf.mxu0 }
 0x119   : > { %3234 = vmatmul.msk.bf16.gmra.mxu3 %vm1300_vm12, %v4063_v26  ;;  %v4087_v26 = vpop.f32.mrf.mxu3 }
 0x11a   : > { %4757 = vst [vmem:[#allocation25_spill] sm:$0xff] %v4087_v26 }
 0x11c   : > { %v4079_v9 = vpop.f32.mrf.mxu1 }
 0x120   : > { %3214 = vmatmul.msk.bf16.gmra.mxu2 %vm1300_vm12, %v4081_v10 }
 0x122   : > { %3251 = vmatmul.msk.bf16.gmra.mxu0 %vm1300_vm12, %v3841_v57  ;;  %v1828_v57 = vunpack.c.l.b16 %v1759_v14  ;;  %v1764_v14 = vrot.slane %v1762_v22, 4 }
 0x123   : > { %v4089_v47 = vpop.f32.mrf.mxu2 }
 0x124   : > { %4758 = vst [vmem:[#allocation26_spill] sm:$0xff] %v4089_v47  ;;  %v1582_v62 = vpop.f32.mrf.mxu1  ;;  %v4107_v56 = vpack.c.b16 %v1828_v57, %v1827_v34  ;;  %v1766_v21 = vsel %vm3876_vm1, %v1764_v14, %v1765_v41  ;;  %v1769_v41 = vrot.slane %v3715_v31, 5  ;;  %v854_v14 = vld [vmem:[#allocation2 + $0x78] sm:$0xe] }
 0x125   : > { %v4142_v31 = vld [vmem:[#allocation2 + $0x78] sm:$0xff] }
 0x126   : > { %4762 = vst [vmem:[#allocation30_spill] sm:$0xff] %v4107_v56 }
 0x127   : > { %3182 = vmatmul.msk.bf16.gmra.mxu1 %vm1300_vm12, %v4091_v54 }
 0x129   : > { %3235 = vmatmul.msk.bf16.gmra.mxu3 %vm1300_vm12, %v4091_v54  ;;  %v1583_v54 = vadd.f32 %v1582_v62, %v3999_v39  ;;  %v1830_v39 = vunpack.c.l.b16 %v1766_v21  ;;  %v1772_v21 = vrot.slane %v3718_v38, 5 }
 0x12b   : > { %v4103_v26 = vpop.f32.mrf.mxu2 }
 0x12c   : > { %4760 = vst [vmem:[#allocation28_spill] sm:$0xff] %v4103_v26  ;;  %v1584_v10 = vpop.f32.mrf.mxu1  ;;  %v4105_v47 = vpop.f32.mrf.mxu3 }
 0x12d   : > { %4761 = vst [vmem:[#allocation29_spill] sm:$0xff] %v4105_v47  ;;  %v1585_v62 = vadd.f32 %v1584_v10, %v4019_v19  ;;  %v1771_v19 = vrot.slane %v1769_v41, 4 }
 0x12f   : > { %v4109_v7 = vpop.f32.mrf.mxu0  ;;  %v1773_v38 = vsel %vm3876_vm1, %v1771_v19, %v1772_v21 }
 0x130   : > { %3215 = vmatmul.msk.bf16.gmra.mxu2 %vm1300_vm12, %v4107_v56 }
 0x132   : > { %3252 = vmatmul.msk.bf16.gmra.mxu0 %vm1300_vm12, %v3561_v23  ;;  %v1829_v23 = vunpack.c.l.b16 %v1763_v32 }
 0x133   : > { %v1919_v47 = vpop.f32.mrf.mxu2 }
 0x134   : > { %v1587_v57 = vpop.f32.mrf.mxu1  ;;  %v4116_v34 = vpop.f32.mrf.mxu3  ;;  %v1999_v26 = vadd.f32 %v1919_v47, %v1583_v54  ;;  %v4131_v22 = vpack.c.b16 %v1830_v39, %v1829_v23 }
 0x135   : > { %4763 = vst [vmem:[#allocation31_spill] sm:$0xff] %v4116_v34  ;;  %v1588_v23 = vadd.f32 %v1587_v57, %v4041_v63  ;;  %v1832_v57 = vunpack.c.l.b16 %v1773_v38 }
 0x137   : > { %3183 = vmatmul.msk.bf16.gmra.mxu1 %vm1300_vm12, %v4118_v0  ;;  %v4126_v2 = vpop.f32.mrf.mxu0 }
 0x139   : > { %3236 = vmatmul.msk.bf16.gmra.mxu3 %vm1300_vm12, %v4118_v0  ;;  %v3200_v0 = vrot.slane %v854_v14, 9 }
 0x13b   : > { %v1921_v34 = vpop.f32.mrf.mxu2 }
 0x13c   : > { %v1589_v47 = vpop.f32.mrf.mxu1  ;;  %v2053_v54 = vpop.f32.mrf.mxu3  ;;  %v2000_v56 = vadd.f32 %v1921_v34, %v1585_v62 }
 0x13d   : > { %v2133_v53 = vadd.f32 %v2053_v54, %v1999_v26 }
 0x13f   : > { %v2209_v30 = vpop.f32.mrf.mxu0 }
 0x140   : > { %3216 = vmatmul.msk.bf16.gmra.mxu2 %vm1300_vm12, %v4131_v22  ;;  %v4136_v32 = vadd.f32 %v2209_v30, %v2133_v53  ;;  %v1770_v30 = vsel %vm3876_vm1, %v3200_v0, %v1769_v41 }
 0x141   : > { %v1831_v63 = vunpack.c.l.b16 %v1770_v30 }
 0x142   : > { %3253 = vmatmul.msk.bf16.gmra.mxu0 %vm1300_vm12, %v3639_v13 }
 0x143   : > { %v1924_v10 = vpop.f32.mrf.mxu2  ;;  %v4156_v41 = vpack.c.b16 %v1832_v57, %v1831_v63 }
 0x144   : > { %v1592_v26 = vpop.f32.mrf.mxu1  ;;  %v2055_v34 = vpop.f32.mrf.mxu3  ;;  %v2001_v39 = vadd.f32 %v1924_v10, %v1588_v23 }
 0x145   : > { %v1593_v62 = vadd.f32 %v1592_v26, %v4077_v52  ;;  %v2134_v54 = vadd.f32 %v2055_v34, %v2000_v56  ;;  %v1590_v52 = vadd.f32 %v1589_v47, %v4056_v15  ;;  %v1776_v26 = vrot.slane %v3831_v36, 5  ;;  %v855_v34 = vld [vmem:[#allocation2 + $0x84] sm:$0xe] }
 0x146   : > { %v1779_v15 = vrot.slane %v3835_v49, 5  ;;  %v3201_v47 = vrot.slane %v855_v34, 9 }
 0x147   : > { %3184 = vmatmul.msk.bf16.gmra.mxu1 %vm1300_vm12, %v4142_v31  ;;  %v2211_v53 = vpop.f32.mrf.mxu0  ;;  %v1778_v38 = vrot.slane %v1776_v26, 4 }
 0x148   : > { %v4151_v14 = vadd.f32 %v2211_v53, %v2134_v54 }
 0x149   : > { %3237 = vmatmul.msk.bf16.gmra.mxu3 %vm1300_vm12, %v4142_v31  ;;  %v1780_v49 = vsel %vm3876_vm1, %v1778_v38, %v1779_v15 }
 0x14b   : > { %v1926_v56 = vpop.f32.mrf.mxu2 }
 0x14c   : > { %v1594_v23 = vpop.f32.mrf.mxu1  ;;  %v2058_v10 = vpop.f32.mrf.mxu3  ;;  %v2002_v0 = vadd.f32 %v1926_v56, %v1590_v52  ;;  %v1777_v56 = vsel %vm3876_vm1, %v3201_v47, %v1776_v26  ;;  %v3381_v47 = vld [vmem:[#allocation2 + $0x94] sm:$0xf] }
 0x14d   : > { %v1595_v21 = vadd.f32 %v1594_v23, %v4093_v37  ;;  %v2135_v19 = vadd.f32 %v2058_v10, %v2001_v39  ;;  %v4167_v39 = vld [vmem:[#allocation2 + $0x84] sm:$0xff]  ;;  %v1833_v10 = vunpack.c.l.b16 %v1777_v56  ;;  %v1783_v38 = vrot.slane %v3381_v47, 5  ;;  %v3382_v56 = vld [vmem:[#allocation2 + $0x98] sm:$0x1] }
 0x14f   : > { %v2214_v30 = vpop.f32.mrf.mxu0 }
 0x150   : > { %3217 = vmatmul.msk.bf16.gmra.mxu2 %vm1300_vm12, %v4156_v41  ;;  %v4162_v54 = vadd.f32 %v2214_v30, %v2135_v19  ;;  %v1834_v19 = vunpack.c.l.b16 %v1780_v49  ;;  %v1786_v49 = vrot.slane %v3382_v56, 5 }
 0x152   : > { %4765 = vst [vmem:[#allocation33_spill] sm:$0xff] %v4162_v54  ;;  %3254 = vmatmul.msk.bf16.gmra.mxu0 %vm1300_vm12, %v3751_v42 }
 0x153   : > { %v1929_v53 = vpop.f32.mrf.mxu2 }
 0x154   : > { %v1597_v63 = vpop.f32.mrf.mxu1  ;;  %v2060_v37 = vpop.f32.mrf.mxu3  ;;  %v2003_v36 = vadd.f32 %v1929_v53, %v1593_v62  ;;  %v4180_v53 = vpack.c.b16 %v1834_v19, %v1833_v10 }
 0x155   : > { %v1598_v57 = vadd.f32 %v1597_v63, %v4109_v7  ;;  %v2136_v52 = vadd.f32 %v2060_v37, %v2002_v0  ;;  %v856_v63 = vld [vmem:[#allocation2 + $0x90] sm:$0xe] }
 0x156   : > { %4767 = vst [vmem:[#allocation35_spill] sm:$0xff] %v4180_v53 }
 0x157   : > { %3185 = vmatmul.msk.bf16.gmra.mxu1 %vm1300_vm12, %v4167_v39  ;;  %v2216_v23 = vpop.f32.mrf.mxu0 }
 0x158   : > { %v4176_v34 = vadd.f32 %v2216_v23, %v2136_v52  ;;  %v3202_v23 = vrot.slane %v856_v63, 9 }
 0x159   : > { %3238 = vmatmul.msk.bf16.gmra.mxu3 %vm1300_vm12, %v4167_v39 }
 0x15a   : > { %4766 = vst [vmem:[#allocation34_spill] sm:$0xff] %v4176_v34  ;;  %v1785_v34 = vrot.slane %v1783_v38, 4 }
 0x15b   : > { %v1931_v62 = vpop.f32.mrf.mxu2 }
 0x15c   : > { %v1599_v7 = vpop.f32.mrf.mxu1  ;;  %v2063_v0 = vpop.f32.mrf.mxu3  ;;  %v2004_v30 = vadd.f32 %v1931_v62, %v1595_v21 }
 0x15d   : > { %v1600_v26 = vadd.f32 %v1599_v7, %v4126_v2  ;;  %v2137_v15 = vadd.f32 %v2063_v0, %v2003_v36  ;;  %v4189_v36 = vld [vmem:[#allocation2 + $0x90] sm:$0xff]  ;;  %v1784_v7 = vsel %vm3876_vm1, %v3202_v23, %v1783_v38  ;;  %v1787_v0 = vsel %vm3876_vm1, %v1785_v34, %v1786_v49  ;;  %v3383_v38 = vld [vmem:[#allocation2 + $0xa0] sm:$0xf]  ;;  %v857_v49 = vld [vmem:[#allocation2 + $0x9c] sm:$0xe] }
 0x15e   : > { %4769 = vst [vmem:[#allocation37_spill] sm:$0xff] %v4189_v36  ;;  %v1835_v47 = vunpack.c.l.b16 %v1784_v7  ;;  %v1836_v63 = vunpack.c.l.b16 %v1787_v0  ;;  %v1790_v23 = vrot.slane %v3383_v38, 5 }
 0x15f   : > { %v2219_v37 = vpop.f32.mrf.mxu0 }
 0x160   : > { %3218 = vmatmul.msk.bf16.gmra.mxu2 %vm1300_vm12, %v4180_v53  ;;  %v4185_v52 = vadd.f32 %v2219_v37, %v2137_v15  ;;  %v1792_v7 = vrot.slane %v1790_v23, 4 }
 0x162   : > { %4768 = vst [vmem:[#allocation36_spill] sm:$0xff] %v4185_v52  ;;  %3255 = vmatmul.msk.bf16.gmra.mxu0 %vm1300_vm12, %v3869_v5  ;;  %v3384_v5 = vld [vmem:[#allocation2 + $0xa4] sm:$0x1] }
 0x163   : > { %v1934_v21 = vpop.f32.mrf.mxu2  ;;  %v1793_v54 = vrot.slane %v3384_v5, 5 }
 0x164   : > { %v1602_v10 = vpop.f32.mrf.mxu1  ;;  %v2065_v2 = vpop.f32.mrf.mxu3  ;;  %v2005_v19 = vadd.f32 %v1934_v21, %v1598_v57 }
 0x165   : > { %v2138_v62 = vadd.f32 %v2065_v2, %v2004_v30  ;;  %v4201_v2 = vpack.c.b16 %v1836_v63, %v1835_v47 }
 0x167   : > { %3186 = vmatmul.msk.bf16.gmra.mxu1 %vm1300_vm12, %v4189_v36  ;;  %v2221_v15 = vpop.f32.mrf.mxu0  ;;  %4771 = vst [vmem:[#allocation39_spill] sm:$0xff] %v4201_v2 }
 0x168   : > { %v4197_v37 = vadd.f32 %v2221_v15, %v2138_v62  ;;  %v3203_v62 = vrot.slane %v857_v49, 9  ;;  %v259_v15 = vld [vmem:[#allocation2 + $0xc0] sm:$0x1]  ;;  %v351_v49 = vld [vmem:[%s3455_s22 + $0x78] sm:$0xf] }
 0x169   : > { %3239 = vmatmul.msk.bf16.gmra.mxu3 %vm1300_vm12, %v4189_v36  ;;  %v260_v5 = vsel %vm3437_vm3, 0, %v259_v15  ;;  %v315_v15 = vld [vmem:[#allocation2 + $0xc8] sm:$0x1] }
 0x16a   : > { %4770 = vst [vmem:[#allocation38_spill] sm:$0xff] %v4197_v37  ;;  %v1791_v38 = vsel %vm3876_vm1, %v3203_v62, %v1790_v23  ;;  %v614_v62 = vshll.u32 %v351_v49, 16 }
 0x16b   : > { %v1936_v56 = vpop.f32.mrf.mxu2  ;;  %261 = vst [vmem:[#allocation2 + $0xc0] sm:$0x1] %v260_v5 }
 0x16c   : > { %v1604_v57 = vpop.f32.mrf.mxu1  ;;  %v2068_v30 = vpop.f32.mrf.mxu3  ;;  %v2006_v21 = vadd.f32 %v1936_v56, %v1600_v26  ;;  %v1603_v26 = vadd.f32 %v1602_v10, %v3965_v29  ;;  %v4212_v56 = vld [vmem:[#allocation2 + $0x9c] sm:$0xff]  ;;  %v611_v10 = vshrl.u32 %v351_v49, 16  ;;  %v3385_v49 = vld [vmem:[#allocation2 + $0xac] sm:$0xf] }
 0x16d   : > { %v2139_v34 = vadd.f32 %v2068_v30, %v2005_v19  ;;  %v352_v29 = vld [vmem:[%s3455_s22 + $0x7c] sm:$0xf]  ;;  %s4459_s22 = scalar_lea.vmem %s4694_s4, %s3338_s19 }
 0x16e   : > { %v613_v23 = vrot.slane %v611_v10, 7 }
 0x16f   : > { %v2224_v52 = vpop.f32.mrf.mxu0 }
 0x170   : > { %3219 = vmatmul.msk.bf16.gmra.mxu2 %vm1300_vm12, %v4201_v2  ;;  %v4205_v0 = vadd.f32 %v2224_v52, %v2139_v34  ;;  %v1794_v52 = vsel %vm3876_vm1, %v1792_v7, %v1793_v54  ;;  %v622_v54 = vshll.u32 %v352_v29, 16  ;;  %v1605_v7 = vadd.f32 %v1604_v57, %v3973_v58  ;;  %v858_v58 = vld [vmem:[#allocation2 + $0xa8] sm:$0xe] }
 0x171   : > { %v1838_v2 = vunpack.c.l.b16 %v1794_v52  ;;  %v616_v5 = vor.u32 %v614_v62, %v613_v23 }
 0x172   : > { %4772 = vst [vmem:[#allocation40_spill] sm:$0xff] %v4205_v0  ;;  %3256 = vmatmul.msk.bf16.gmra.mxu0 %vm1300_vm12, %v3582_v55  ;;  %v619_v0 = vshrl.u32 %v352_v29, 16  ;;  %v1837_v55 = vunpack.c.l.b16 %v1791_v38  ;;  %v783_v53 = vld [vmem:[#allocation2 + $0xc0] sm:$0xf]  ;;  %v1797_v29 = vrot.slane %v3385_v49, 5 }
 0x173   : > { %v1939_v19 = vpop.f32.mrf.mxu2 }
 0x174   : > { %v1607_v47 = vpop.f32.mrf.mxu1  ;;  %v2070_v63 = vpop.f32.mrf.mxu3  ;;  %v2007_v30 = vadd.f32 %v1939_v19, %v1603_v26  ;;  %v316_v26 = vsel %vm3445_vm5, 0, %v315_v15  ;;  %v621_v19 = vrot.slane %v619_v0, 7  ;;  %v4229_v10 = vpack.c.b16 %v1838_v2, %v1837_v55 }
 0x175   : > { %v2140_v34 = vadd.f32 %v2070_v63, %v2006_v21  ;;  %317 = vst [vmem:[#allocation2 + $0xc8] sm:$0x1] %v316_v26  ;;  %v617_v63 = vrot.slane %v613_v23, 4  ;;  %v3204_v23 = vrot.slane %v858_v58, 9  ;;  %v1799_v20 = vrot.slane %v1797_v29, 4 }
 0x176   : > { %v624_v36 = vor.u32 %v622_v54, %v621_v19  ;;  %v626_v57 = vrot.slane %v621_v19, 4  ;;  %v4245_v54 = vld [vmem:[#allocation2 + $0xa8] sm:$0xff] }
 0x177   : > { %3187 = vmatmul.msk.bf16.gmra.mxu1 %vm1300_vm12, %v4212_v56  ;;  %v2226_v37 = vpop.f32.mrf.mxu0 }
 0x178   : > { %v4226_v21 = vadd.f32 %v2226_v37, %v2140_v34  ;;  %v625_v26 = vsel %vm3467_vm8, %v617_v63, %v624_v36  ;;  %v784_v37 = vsel %vm3473_vm9, %v616_v5, %v783_v53  ;;  %v1608_v53 = vadd.f32 %v1607_v47, %v3987_v11 }
 0x179   : > { %3240 = vmatmul.msk.bf16.gmra.mxu3 %vm1300_vm12, %v4212_v56  ;;  %785 = vst [vmem:[#allocation2 + $0xc0] sm:$0xf] %v784_v37  ;;  %v1798_v63 = vsel %vm3876_vm1, %v3204_v23, %v1797_v29 }
 0x17a   : > { %786 = vst.msk [vmem:[#allocation2 + $0xc4] sm:$0xf] %vm199_vm7, %v625_v26  ;;  %v1839_v49 = vunpack.c.l.b16 %v1798_v63 }
 0x17b   : > { %v1941_v38 = vpop.f32.mrf.mxu2 }
 0x17c   : > { %v1609_v52 = vpop.f32.mrf.mxu1  ;;  %v2073_v6 = vpop.f32.mrf.mxu3  ;;  %v2008_v15 = vadd.f32 %v1941_v38, %v1605_v7  ;;  %v787_v55 = vld [vmem:[#allocation2 + $0xc8] sm:$0x1] }
 0x17d   : > { %v2141_v0 = vadd.f32 %v2073_v6, %v2007_v30  ;;  %v3386_v6 = vld [vmem:[#allocation2 + $0xb0] sm:$0x1]  ;;  %v788_v25 = vsel %vm3437_vm3, %v626_v57, %v787_v55  ;;  %v1610_v26 = vadd.f32 %v1609_v52, %v4007_v48  ;;  %v1804_v55 = vrot.slane %v3859_v43, 5  ;;  %v4269_v43 = vld [vmem:[#allocation2 + $0xb4] sm:$0xff] }
 0x17e   : > { %v1800_v30 = vrot.slane %v3386_v6, 5  ;;  %789 = vst [vmem:[#allocation2 + $0xc8] sm:$0x1] %v788_v25  ;;  %v859_v6 = vld [vmem:[#allocation2 + $0xb4] sm:$0xe] }
 0x17f   : > { %v2229_v34 = vpop.f32.mrf.mxu0  ;;  %v3205_v25 = vrot.slane %v859_v6, 9  ;;  %v1806_v48 = vrot.slane %v1804_v55, 4 }
 0x180   : > { %3220 = vmatmul.msk.bf16.gmra.mxu2 %vm1300_vm12, %v4229_v10  ;;  %v4238_v2 = vadd.f32 %v2229_v34, %v2141_v0  ;;  %v1801_v38 = vsel %vm3876_vm1, %v1799_v20, %v1800_v30  ;;  %v1807_v20 = vrot.slane %v3861_v50, 5 }
 0x181   : > { %v1840_v11 = vunpack.c.l.b16 %v1801_v38  ;;  %v4271_v63 = vld [vmem:[#allocation2 + $0xc4] sm:$0xf]  ;;  %v1805_v50 = vsel %vm3876_vm1, %v3205_v25, %v1804_v55 }
 0x182   : > { %3257 = vmatmul.msk.bf16.gmra.mxu0 %vm1300_vm12, %v3665_v61 }
 0x183   : > { %v1944_v36 = vpop.f32.mrf.mxu2  ;;  %v4258_v57 = vpack.c.b16 %v1840_v11, %v1839_v49  ;;  %v2175_v11 = vshll.u32 %v4271_v63, 16 }
 0x184   : > { %v1612_v62 = vpop.f32.mrf.mxu1  ;;  %v2075_v19 = vpop.f32.mrf.mxu3  ;;  %v2009_v7 = vadd.f32 %v1944_v36, %v1608_v53 }
 0x185   : > { %v2142_v5 = vadd.f32 %v2075_v19, %v2008_v15  ;;  %v1613_v52 = vadd.f32 %v1612_v62, %v4022_v27 }
 0x187   : > { %3188 = vmatmul.msk.bf16.gmra.mxu1 %vm1300_vm12, %v4245_v54  ;;  %v2231_v0 = vpop.f32.mrf.mxu0 }
 0x188   : > { %v4253_v47 = vadd.f32 %v2231_v0, %v2142_v5  ;;  %v822_v5 = vld [vmem:[#allocation2 + $0xc0] sm:$0xf]  ;;  %v1808_v0 = vsel %vm3876_vm1, %v1806_v48, %v1807_v20  ;;  %v2177_v20 = vrot.slane %v2175_v11, 5 }
 0x189   : > { %3241 = vmatmul.msk.bf16.gmra.mxu3 %vm1300_vm12, %v4245_v54  ;;  %v2166_v62 = vshrl.u32 %v822_v5, 16  ;;  %v2169_v49 = vshll.u32 %v822_v5, 16  ;;  %v4288_v5 = vld [vmem:[#allocation2 + $0xc8] sm:$0x1] }
 0x18b   : > { %v1946_v15 = vpop.f32.mrf.mxu2  ;;  %v2168_v6 = vrot.slane %v2166_v62, 4 }
 0x18c   : > { %v1614_v37 = vpop.f32.mrf.mxu1  ;;  %v2078_v58 = vpop.f32.mrf.mxu3  ;;  %v2010_v29 = vadd.f32 %v1946_v15, %v1610_v26  ;;  %v2179_v26 = vshrl.u32 %v4271_v63, 16  ;;  %v1841_v15 = vunpack.c.l.b16 %v1805_v50 }
 0x18d   : > { %v2143_v34 = vadd.f32 %v2078_v58, %v2009_v7  ;;  %v1842_v58 = vunpack.c.l.b16 %v1808_v0 }
 0x18e   : > { %v2181_v25 = vrot.slane %v2179_v26, 4 }
 0x18f   : > { %v2234_v30 = vpop.f32.mrf.mxu0 }
 0x190   : > { %3221 = vmatmul.msk.bf16.gmra.mxu2 %vm1300_vm12, %v4258_v57  ;;  %v4263_v23 = vadd.f32 %v2234_v30, %v2143_v34  ;;  %v2171_v30 = vrot.slane %v2169_v49, 5 }
 0x192   : > { %3258 = vmatmul.msk.bf16.gmra.mxu0 %vm1300_vm12, %v3782_v45  ;;  %v2172_v0 = vor.u32 %v2171_v30, %v2168_v6 }
 0x193   : > { %v1949_v53 = vpop.f32.mrf.mxu2 }
 0x194   : > { %v1617_v36 = vpop.f32.mrf.mxu1  ;;  %v2080_v19 = vpop.f32.mrf.mxu3  ;;  %v2011_v7 = vadd.f32 %v1949_v53, %v1613_v52  ;;  %v2173_v62 = vrot.slane %v2172_v0, 4 }
 0x195   : > { %v2144_v38 = vadd.f32 %v2080_v19, %v2010_v29  ;;  %v1615_v29 = vadd.f32 %v1614_v37, %v4045_v46  ;;  %v4286_v19 = vpack.c.b16 %v1842_v58, %v1841_v15  ;;  %v1618_v37 = vadd.f32 %v1617_v36, %v4061_v59 }
 0x196   : > { %v2178_v30 = vsel %vm3518_vm13, %v2173_v62, %v2177_v20 }
 0x197   : > { %3189 = vmatmul.msk.bf16.gmra.mxu1 %vm1300_vm12, %v4269_v43  ;;  %v2236_v27 = vpop.f32.mrf.mxu0 }
 0x198   : > { %v4281_v34 = vadd.f32 %v2236_v27, %v2144_v38  ;;  %v2182_v27 = vor.u32 %v2181_v25, %v2177_v20 }
 0x199   : > { %3242 = vmatmul.msk.bf16.gmra.mxu3 %vm1300_vm12, %v4269_v43 }
 0x19a   : > { %4773 = vst [vmem:[#allocation41_spill] sm:$0xff] %v4281_v34  ;;  %v2185_v34 = vshll.u32 %v4288_v5, 16  ;;  %v2183_v49 = vrot.slane %v2182_v27, 4 }
 0x19b   : > { %v1951_v55 = vpop.f32.mrf.mxu2 }
 0x19c   : > { %v1619_v48 = vpop.f32.mrf.mxu1  ;;  %v2083_v52 = vpop.f32.mrf.mxu3  ;;  %v2012_v53 = vadd.f32 %v1951_v55, %v1615_v29  ;;  %v2187_v11 = vrot.slane %v2185_v34, 5  ;;  %v4298_v55 = vld [vmem:[#allocation2 + $0xc0] sm:$0xff]  ;;  %v2191_v34 = vunpack.c.l.b16 %v2178_v30 }
 0x19d   : > { %v2145_v50 = vadd.f32 %v2083_v52, %v2011_v7  ;;  %v1620_v52 = vadd.f32 %v1619_v48, %v4079_v9 }
 0x19e   : > { %v2188_v59 = vsel %vm3518_vm13, %v2183_v49, %v2187_v11 }
 0x19f   : > { %v2239_v38 = vpop.f32.mrf.mxu0  ;;  %v2192_v25 = vunpack.c.l.b16 %v2188_v59 }
 0x1a0   : > { %3222 = vmatmul.msk.bf16.gmra.mxu2 %vm1300_vm12, %v4286_v19  ;;  %v4293_v46 = vadd.f32 %v2239_v38, %v2145_v50 }
 0x1a1   : > { %v4311_v27 = vpack.c.b16 %v2192_v25, %v2191_v34 }
 0x1a2   : > { %3259 = vmatmul.msk.bf16.gmra.mxu0 %vm1300_vm12, %v3908_v16 }
 0x1a3   : > { %v1954_v26 = vpop.f32.mrf.mxu2 }
 0x1a4   : > { %v1622_v7 = vpop.f32.mrf.mxu1  ;;  %v2085_v15 = vpop.f32.mrf.mxu3  ;;  %v2013_v58 = vadd.f32 %v1954_v26, %v1618_v37 }
 0x1a5   : > { %v2146_v29 = vadd.f32 %v2085_v15, %v2012_v53  ;;  %v1623_v62 = vadd.f32 %v1622_v7, %v3983_v8 }
 0x1a7   : > { %3263 = vmatmul.msk.bf16.vlgmr.msra.gmra.mxu1 %vm1300_vm12, %v3937_v12  ;;  %v2241_v6 = vpop.f32.mrf.mxu0 }
 0x1a8   : > { %v4306_v36 = vadd.f32 %v2241_v6, %v2146_v29 }
 0x1a9   : > { %3243 = vmatmul.msk.bf16.gmra.mxu3 %vm1300_vm12, %v4298_v55 }
 0x1ab   : > { %v1956_v53 = vpop.f32.mrf.mxu2 }
 0x1ac   : > { %v1624_v50 = vpop.f32.mrf.mxu1  ;;  %v2088_v38 = vpop.f32.mrf.mxu3  ;;  %v2014_v12 = vadd.f32 %v1956_v53, %v1620_v52 }
 0x1ad   : > { %v2147_v0 = vadd.f32 %v2088_v38, %v2013_v58 }
 0x1af   : > { %v2244_v20 = vpop.f32.mrf.mxu0 }
 0x1b0   : > { %3284 = vmatmul.msk.bf16.vlgmr.msra.gmra.mxu2 %vm1300_vm12, %v3943_v17  ;;  %v4315_v37 = vadd.f32 %v2244_v20, %v2147_v0  ;;  %v1625_v17 = vadd.f32 %v1624_v50, %v3995_v18 }
 0x1b2   : > { %3260 = vmatmul.msk.bf16.gmra.mxu0 %vm1300_vm12, %v4311_v27 }
 0x1b3   : > { %v1959_v49 = vpop.f32.mrf.mxu2 }
 0x1b4   : > { %v1627_v9 = vpop.f32.mrf.mxu1  ;;  %v2090_v48 = vpop.f32.mrf.mxu3  ;;  %v2015_v11 = vadd.f32 %v1959_v49, %v1623_v62 }
 0x1b5   : > { %v2148_v26 = vadd.f32 %v2090_v48, %v2014_v12  ;;  %v1628_v25 = vadd.f32 %v1627_v9, %v4015_v60  ;;  %v4774_v48 = vld [vmem:[#allocation20_spill] sm:$0xff] }
 0x1b7   : > { %3264 = vmatmul.msk.bf16.gmra.mxu1 %vm1300_vm12, %v3935_v4  ;;  %v2246_v15 = vpop.f32.mrf.mxu0 }
 0x1b8   : > { %v4322_v58 = vadd.f32 %v2246_v15, %v2148_v26 }
 0x1b9   : > { %3301 = vmatmul.msk.bf16.vlgmr.msra.gmra.mxu3 %vm1300_vm12, %v3810_v51 }
 0x1bb   : > { %v1961_v29 = vpop.f32.mrf.mxu2 }
 0x1bc   : > { %v1629_v6 = vpop.f32.mrf.mxu1  ;;  %v2093_v30 = vpop.f32.mrf.mxu3  ;;  %v2016_v8 = vadd.f32 %v1961_v29, %v1625_v17  ;;  %v4775_v29 = vld [vmem:[#allocation11_spill] sm:$0xff] }
 0x1bd   : > { %v2149_v7 = vadd.f32 %v2093_v30, %v2015_v11 }
 0x1bf   : > { %v2249_v59 = vpop.f32.mrf.mxu0 }
 0x1c0   : > { %3285 = vmatmul.msk.bf16.gmra.mxu2 %vm1300_vm12, %v3955_v28  ;;  %v4329_v34 = vadd.f32 %v2249_v59, %v2149_v7  ;;  %v1630_v28 = vadd.f32 %v1629_v6, %v4033_v33 }
 0x1c2   : > { %3319 = vmatmul.msk.bf16.vlgmr.msra.gmra.mxu0 %vm1300_vm12, %v3935_v4 }
 0x1c3   : > { %v1964_v52 = vpop.f32.mrf.mxu2 }
 0x1c4   : > { %v1632_v51 = vpop.f32.mrf.mxu1  ;;  %v2095_v53 = vpop.f32.mrf.mxu3  ;;  %v2017_v18 = vadd.f32 %v1964_v52, %v1628_v25 }
 0x1c5   : > { %v2150_v50 = vadd.f32 %v2095_v53, %v2016_v8  ;;  %v1633_v11 = vadd.f32 %v1632_v51, %v4774_v48  ;;  %v4776_v8 = vld [vmem:[#allocation4_spill] sm:$0xff] }
 0x1c7   : > { %3265 = vmatmul.msk.bf16.gmra.mxu1 %vm1300_vm12, %v3967_v40  ;;  %v2251_v38 = vpop.f32.mrf.mxu0 }
 0x1c8   : > { %v4336_v12 = vadd.f32 %v2251_v38, %v2150_v50  ;;  %v4779_v38 = vld [vmem:[#allocation26_spill] sm:$0xff] }
 0x1c9   : > { %3302 = vmatmul.msk.bf16.gmra.mxu3 %vm1300_vm12, %v3917_v44 }
 0x1cb   : > { %v1966_v0 = vpop.f32.mrf.mxu2 }
 0x1cc   : > { %v1634_v4 = vpop.f32.mrf.mxu1  ;;  %v2098_v20 = vpop.f32.mrf.mxu3  ;;  %v2018_v60 = vadd.f32 %v1966_v0, %v1630_v28 }
 0x1cd   : > { %v2151_v62 = vadd.f32 %v2098_v20, %v2017_v18  ;;  %v4778_v18 = vld [vmem:[#allocation13_spill] sm:$0xff] }
 0x1cf   : > { %v2254_v49 = vpop.f32.mrf.mxu0 }
 0x1d0   : > { %3286 = vmatmul.msk.bf16.gmra.mxu2 %vm1300_vm12, %v3975_v1  ;;  %v4343_v9 = vadd.f32 %v2254_v49, %v2151_v62  ;;  %v4777_v1 = vld [vmem:[#allocation23_spill] sm:$0xff] }
 0x1d1   : > { %v1635_v7 = vadd.f32 %v1634_v4, %v4777_v1  ;;  %v4780_v49 = vld [vmem:[#allocation15_spill] sm:$0xff] }
 0x1d2   : > { %3320 = vmatmul.msk.bf16.gmra.mxu0 %vm1300_vm12, %v3967_v40 }
 0x1d3   : > { %v1969_v26 = vpop.f32.mrf.mxu2 }
 0x1d4   : > { %v1637_v44 = vpop.f32.mrf.mxu1  ;;  %v2100_v15 = vpop.f32.mrf.mxu3  ;;  %v2019_v33 = vadd.f32 %v1969_v26, %v1633_v11  ;;  %v4781_v26 = vld [vmem:[#allocation7_spill] sm:$0xff] }
 0x1d5   : > { %v2152_v17 = vadd.f32 %v2100_v15, %v2018_v60  ;;  %v1638_v28 = vadd.f32 %v1637_v44, %v4779_v38  ;;  %v4782_v15 = vld [vmem:[#allocation28_spill] sm:$0xff] }
 0x1d7   : > { %3266 = vmatmul.msk.bf16.gmra.mxu1 %vm1300_vm12, %v4775_v29  ;;  %v2256_v6 = vpop.f32.mrf.mxu0 }
 0x1d8   : > { %v4350_v30 = vadd.f32 %v2256_v6, %v2152_v17 }
 0x1d9   : > { %3303 = vmatmul.msk.bf16.gmra.mxu3 %vm1300_vm12, %v4776_v8 }
 0x1db   : > { %v1971_v59 = vpop.f32.mrf.mxu2 }
 0x1dc   : > { %v1639_v40 = vpop.f32.mrf.mxu1  ;;  %v2103_v25 = vpop.f32.mrf.mxu3  ;;  %v2020_v52 = vadd.f32 %v1971_v59, %v1635_v7  ;;  %v4783_v7 = vld [vmem:[#allocation16_spill] sm:$0xff] }
 0x1dd   : > { %v2153_v51 = vadd.f32 %v2103_v25, %v2019_v33  ;;  %v1640_v33 = vadd.f32 %v1639_v40, %v4782_v15  ;;  %v4784_v25 = vld [vmem:[#allocation12_spill] sm:$0xff] }
 0x1df   : > { %v2259_v53 = vpop.f32.mrf.mxu0 }
 0x1e0   : > { %3287 = vmatmul.msk.bf16.gmra.mxu2 %vm1300_vm12, %v4778_v18  ;;  %v4357_v50 = vadd.f32 %v2259_v53, %v2153_v51 }
 0x1e2   : > { %3321 = vmatmul.msk.bf16.gmra.mxu0 %vm1300_vm12, %v4775_v29 }
 0x1e3   : > { %v1974_v0 = vpop.f32.mrf.mxu2 }
 0x1e4   : > { %v1642_v20 = vpop.f32.mrf.mxu1  ;;  %v2105_v60 = vpop.f32.mrf.mxu3  ;;  %v2021_v4 = vadd.f32 %v1974_v0, %v1638_v28  ;;  %v4785_v28 = vld [vmem:[#allocation18_spill] sm:$0xff] }
 0x1e5   : > { %v2154_v62 = vadd.f32 %v2105_v60, %v2020_v52  ;;  %v1643_v52 = vadd.f32 %v1642_v20, %v4784_v25 }
 0x1e7   : > { %3267 = vmatmul.msk.bf16.gmra.mxu1 %vm1300_vm12, %v4780_v49  ;;  %v2261_v48 = vpop.f32.mrf.mxu0 }
 0x1e8   : > { %v4364_v11 = vadd.f32 %v2261_v48, %v2154_v62  ;;  %v4787_v62 = vld [vmem:[#allocation14_spill] sm:$0xff] }
 0x1e9   : > { %3304 = vmatmul.msk.bf16.gmra.mxu3 %vm1300_vm12, %v4781_v26 }
 0x1eb   : > { %v1976_v17 = vpop.f32.mrf.mxu2 }
 0x1ec   : > { %v1644_v29 = vpop.f32.mrf.mxu1  ;;  %v2108_v6 = vpop.f32.mrf.mxu3  ;;  %v2022_v44 = vadd.f32 %v1976_v17, %v1640_v33 }
 0x1ed   : > { %v2155_v8 = vadd.f32 %v2108_v6, %v2021_v4  ;;  %v4786_v4 = vld [vmem:[#allocation8_spill] sm:$0xff]  ;;  %v1645_v48 = vadd.f32 %v1644_v29, %v4787_v62  ;;  %v4788_v6 = vld [vmem:[#allocation21_spill] sm:$0xff] }
 0x1ef   : > { %v2264_v1 = vpop.f32.mrf.mxu0 }
 0x1f0   : > { %3288 = vmatmul.msk.bf16.gmra.mxu2 %vm1300_vm12, %v4783_v7  ;;  %v4371_v59 = vadd.f32 %v2264_v1, %v2155_v8  ;;  %v4789_v8 = vld [vmem:[#allocation17_spill] sm:$0xff] }
 0x1f2   : > { %3322 = vmatmul.msk.bf16.gmra.mxu0 %vm1300_vm12, %v4780_v49 }
 0x1f3   : > { %v1979_v51 = vpop.f32.mrf.mxu2 }
 0x1f4   : > { %v1647_v53 = vpop.f32.mrf.mxu1  ;;  %v2110_v18 = vpop.f32.mrf.mxu3  ;;  %v2023_v40 = vadd.f32 %v1979_v51, %v1643_v52 }
 0x1f5   : > { %v2156_v38 = vadd.f32 %v2110_v18, %v2022_v44  ;;  %v1648_v1 = vadd.f32 %v1647_v53, %v4789_v8  ;;  %v4790_v18 = vld [vmem:[#allocation24_spill] sm:$0xff] }
 0x1f7   : > { %3268 = vmatmul.msk.bf16.gmra.mxu1 %vm1300_vm12, %v4785_v28  ;;  %v2266_v0 = vpop.f32.mrf.mxu0 }
 0x1f8   : > { %v4378_v60 = vadd.f32 %v2266_v0, %v2156_v38  ;;  %v4791_v0 = vld [vmem:[#allocation9_spill] sm:$0xff] }
 0x1f9   : > { %3305 = vmatmul.msk.bf16.gmra.mxu3 %vm1300_vm12, %v4786_v4  ;;  %v4792_v4 = vld [vmem:[#allocation19_spill] sm:$0xff] }
 0x1fb   : > { %v1981_v26 = vpop.f32.mrf.mxu2 }
 0x1fc   : > { %v1649_v49 = vpop.f32.mrf.mxu1  ;;  %v2113_v15 = vpop.f32.mrf.mxu3  ;;  %v2024_v20 = vadd.f32 %v1981_v26, %v1645_v48 }
 0x1fd   : > { %v2157_v33 = vadd.f32 %v2113_v15, %v2023_v40  ;;  %v1650_v62 = vadd.f32 %v1649_v49, %v4792_v4  ;;  %v4796_v4 = vld [vmem:[#allocation5_spill] sm:$0xff] }
 0x1ff   : > { %v2269_v17 = vpop.f32.mrf.mxu0 }
 0x200   : > { %3289 = vmatmul.msk.bf16.gmra.mxu2 %vm1300_vm12, %v4788_v6  ;;  %v4385_v44 = vadd.f32 %v2269_v17, %v2157_v33  ;;  %v4793_v17 = vld [vmem:[#allocation27_spill] sm:$0xff]  ;;  %v4794_v6 = vld [vmem:[#allocation22_spill] sm:$0xff] }
 0x202   : > { %3323 = vmatmul.msk.bf16.gmra.mxu0 %vm1300_vm12, %v4785_v28 }
 0x203   : > { %v1984_v7 = vpop.f32.mrf.mxu2 }
 0x204   : > { %v1652_v25 = vpop.f32.mrf.mxu1  ;;  %v2115_v52 = vpop.f32.mrf.mxu3  ;;  %v2025_v29 = vadd.f32 %v1984_v7, %v1648_v1 }
 0x205   : > { %v2158_v51 = vadd.f32 %v2115_v52, %v2024_v20  ;;  %v1653_v8 = vadd.f32 %v1652_v25, %v4794_v6  ;;  %v4798_v6 = vld [vmem:[#allocation32_spill] sm:$0xff] }
 0x207   : > { %3269 = vmatmul.msk.bf16.gmra.mxu1 %vm1300_vm12, %v4790_v18  ;;  %v2271_v40 = vpop.f32.mrf.mxu0 }
 0x208   : > { %v4392_v38 = vadd.f32 %v2271_v40, %v2158_v51  ;;  %v4795_v40 = vld [vmem:[#allocation30_spill] sm:$0xff] }
 0x209   : > { %3306 = vmatmul.msk.bf16.gmra.mxu3 %vm1300_vm12, %v4791_v0 }
 0x20b   : > { %v1986_v48 = vpop.f32.mrf.mxu2 }
 0x20c   : > { %v1654_v28 = vpop.f32.mrf.mxu1  ;;  %v2118_v26 = vpop.f32.mrf.mxu3  ;;  %v2026_v53 = vadd.f32 %v1986_v48, %v1650_v62  ;;  %v4797_v62 = vld [vmem:[#allocation25_spill] sm:$0xff] }
 0x20d   : > { %v2159_v15 = vadd.f32 %v2118_v26, %v2025_v29  ;;  %v1655_v48 = vadd.f32 %v1654_v28, %v4797_v62 }
 0x20f   : > { %v2274_v33 = vpop.f32.mrf.mxu0 }
 0x210   : > { %3290 = vmatmul.msk.bf16.gmra.mxu2 %vm1300_vm12, %v4793_v17  ;;  %v4399_v20 = vadd.f32 %v2274_v33, %v2159_v15 }
 0x212   : > { %3324 = vmatmul.msk.bf16.gmra.mxu0 %vm1300_vm12, %v4790_v18 }
 0x213   : > { %v1989_v1 = vpop.f32.mrf.mxu2 }
 0x214   : > { %v1657_v7 = vpop.f32.mrf.mxu1  ;;  %v2120_v52 = vpop.f32.mrf.mxu3  ;;  %v2027_v49 = vadd.f32 %v1989_v1, %v1653_v8  ;;  %v4799_v8 = vld [vmem:[#allocation29_spill] sm:$0xff] }
 0x215   : > { %v2160_v51 = vadd.f32 %v2120_v52, %v2026_v53  ;;  %v1658_v1 = vadd.f32 %v1657_v7, %v4799_v8 }
 0x217   : > { %3270 = vmatmul.msk.bf16.gmra.mxu1 %vm1300_vm12, %v4795_v40  ;;  %v2276_v29 = vpop.f32.mrf.mxu0 }
 0x218   : > { %v4406_v0 = vadd.f32 %v2276_v29, %v2160_v51 }
 0x219   : > { %3307 = vmatmul.msk.bf16.gmra.mxu3 %vm1300_vm12, %v4796_v4 }
 0x21b   : > { %v1991_v26 = vpop.f32.mrf.mxu2 }
 0x21c   : > { %v1659_v18 = vpop.f32.mrf.mxu1  ;;  %v2123_v15 = vpop.f32.mrf.mxu3  ;;  %v2028_v25 = vadd.f32 %v1991_v26, %v1655_v48  ;;  %v4800_v48 = vld [vmem:[#allocation31_spill] sm:$0xff] }
 0x21d   : > { %v2161_v33 = vadd.f32 %v2123_v15, %v2027_v49  ;;  %v1660_v26 = vadd.f32 %v1659_v18, %v4800_v48 }
 0x21f   : > { %v2279_v17 = vpop.f32.mrf.mxu0 }
 0x220   : > { %3291 = vmatmul.msk.bf16.gmra.mxu2 %vm1300_vm12, %v4798_v6  ;;  %v4413_v53 = vadd.f32 %v2279_v17, %v2161_v33 }
 0x222   : > { %3325 = vmatmul.msk.bf16.gmra.mxu0 %vm1300_vm12, %v4795_v40 }
 0x223   : > { %v1994_v52 = vpop.f32.mrf.mxu2 }
 0x224   : > { %v2350_v51 = vpop.f32.mrf.mxu1  ;;  %v2125_v29 = vpop.f32.mrf.mxu3  ;;  %v2029_v28 = vadd.f32 %v1994_v52, %v1658_v1 }
 0x225   : > { %v2162_v4 = vadd.f32 %v2125_v29, %v2028_v25  ;;  %v2430_v29 = vadd.f32 %v2350_v51, %v4136_v32  ;;  %v4447_v51 = vld [vmem:[%s4693_s3] ss:$0 sm:$0xff] }
 0x227   : > { %3271 = vmatmul.msk.bf16.gmra.mxu1 %vm1300_vm12, %v4131_v22  ;;  %v2281_v49 = vpop.f32.mrf.mxu0 }
 0x228   : > { %v4420_v62 = vadd.f32 %v2281_v49, %v2162_v4 }
 0x229   : > { %3308 = vmatmul.msk.bf16.gmra.mxu3 %vm1300_vm12, %v3639_v13 }
 0x22b   : > { %v1996_v15 = vpop.f32.mrf.mxu2 }
 0x22c   : > { %v2352_v40 = vpop.f32.mrf.mxu1  ;;  %v2128_v33 = vpop.f32.mrf.mxu3  ;;  %v2030_v7 = vadd.f32 %v1996_v15, %v1660_v26  ;;  %v4441_v26 = vld [vmem:[%s4692_s2] ss:$0 sm:$0xff] }
 0x22d   : > { %v2163_v17 = vadd.f32 %v2128_v33, %v2029_v28  ;;  %v2431_v33 = vadd.f32 %v2352_v40, %v4151_v14 }
 0x22f   : > { %v2284_v6 = vpop.f32.mrf.mxu0 }
 0x230   : > { %3292 = vmatmul.msk.bf16.gmra.mxu2 %vm1300_vm12, %v4142_v31  ;;  %v4427_v25 = vadd.f32 %v2284_v6, %v2163_v17 }
 0x232   : > { %3326 = vmatmul.msk.bf16.gmra.mxu0 %vm1300_vm12, %v4131_v22 }
 0x233   : > { %v2484_v8 = vpop.f32.mrf.mxu2 }
 0x234   : > { %v2355_v1 = vpop.f32.mrf.mxu1  ;;  %v2130_v52 = vpop.f32.mrf.mxu3  ;;  %v2564_v31 = vadd.f32 %v2484_v8, %v2430_v29 }
 0x235   : > { %v2164_v13 = vadd.f32 %v2130_v52, %v2030_v7  ;;  %v4802_v52 = vld [vmem:[#allocation35_spill] sm:$0xff] }
 0x237   : > { %3272 = vmatmul.msk.bf16.gmra.mxu1 %vm1300_vm12, %v4156_v41  ;;  %v2286_v18 = vpop.f32.mrf.mxu0 }
 0x238   : > { %v4434_v28 = vadd.f32 %v2286_v18, %v2164_v13  ;;  %v4803_v13 = vld [vmem:[#allocation33_spill] sm:$0xff] }
 0x239   : > { %3309 = vmatmul.msk.bf16.gmra.mxu3 %vm1300_vm12, %v3751_v42  ;;  %v2432_v18 = vadd.f32 %v2355_v1, %v4803_v13 }
 0x23a   : > { %4801 = vst [vmem:[#allocation20_spill] sm:$0xff] %v4434_v28 }
 0x23b   : > { %v2486_v4 = vpop.f32.mrf.mxu2 }
 0x23c   : > { %v2357_v49 = vpop.f32.mrf.mxu1  ;;  %v2640_v22 = vpop.f32.mrf.mxu3  ;;  %v2565_v42 = vadd.f32 %v2486_v4, %v2431_v33 }
 0x23d   : > { %v2720_v48 = vadd.f32 %v2640_v22, %v2564_v31  ;;  %v4804_v31 = vld [vmem:[#allocation10_spill] sm:$0xff] }
 0x23f   : > { %v2781_v15 = vpop.f32.mrf.mxu0 }
 0x240   : > { %v2861_v32 = vadd.f32 %v2781_v15, %v2720_v48  ;;  %3293 = vmatmul.msk.bf16.gmra.mxu2 %vm1300_vm12, %v4167_v39 }
 0x242   : > { %3327 = vmatmul.msk.bf16.gmra.mxu0 %vm1300_vm12, %v4156_v41  ;;  %v2897_v7 = vmul.f32 %v4441_v26, %v2861_v32 }
 0x243   : > { %v2489_v17 = vpop.f32.mrf.mxu2 }
 0x244   : > { %v2360_v6 = vpop.f32.mrf.mxu1  ;;  %v2933_v14 = vadd.f32 %v4447_v51, %v2897_v7  ;;  %v2642_v40 = vpop.f32.mrf.mxu3  ;;  %v2566_v4 = vadd.f32 %v2489_v17, %v2432_v18 }
 0x245   : > { %v2721_v8 = vadd.f32 %v2642_v40, %v2565_v42  ;;  %v4805_v40 = vld [vmem:[#allocation34_spill] sm:$0xff] }
 0x246   : > { %v2965_v39 = vmax.f32 %v2933_v14, 0.0  ;;  %v2433_v28 = vadd.f32 %v2357_v49, %v4805_v40 }
 0x247   : > { %3273 = vmatmul.msk.bf16.gmra.mxu1 %vm1300_vm12, %v4802_v52  ;;  %v2783_v41 = vpop.f32.mrf.mxu0 }
 0x248   : > { %2997 = vst.msk [vmem:[%s4459_s22] sm:$0xff] %vm1300_vm12, %v2965_v39  ;;  %v2862_v29 = vadd.f32 %v2783_v41, %v2721_v8  ;;  %v4806_v8 = vld [vmem:[#allocation37_spill] sm:$0xff] }
 0x249   : > { %3310 = vmatmul.msk.bf16.gmra.mxu3 %vm1300_vm12, %v4804_v31 }
 0x24a   : > { %v2898_v22 = vmul.f32 %v4441_v26, %v2862_v29 }
 0x24b   : > { %v2491_v48 = vpop.f32.mrf.mxu2 }
 0x24c   : > { %v2362_v15 = vpop.f32.mrf.mxu1  ;;  %v2934_v33 = vadd.f32 %v4447_v51, %v2898_v22  ;;  %v2645_v32 = vpop.f32.mrf.mxu3  ;;  %v2567_v17 = vadd.f32 %v2491_v48, %v2433_v28 }
 0x24d   : > { %v2722_v42 = vadd.f32 %v2645_v32, %v2566_v4  ;;  %v4807_v4 = vld [vmem:[#allocation39_spill] sm:$0xff] }
 0x24e   : > { %v2966_v7 = vmax.f32 %v2934_v33, 0.0  ;;  %v4808_v33 = vld [vmem:[#allocation36_spill] sm:$0xff] }
 0x24f   : > { %v2786_v14 = vpop.f32.mrf.mxu0  ;;  %v2434_v32 = vadd.f32 %v2360_v6, %v4808_v33 }
 0x250   : > { %2998 = vst.msk [vmem:[%s4459_s22 + $0x8] sm:$0xff] %vm1300_vm12, %v2966_v7  ;;  %v2863_v1 = vadd.f32 %v2786_v14, %v2722_v42  ;;  %3294 = vmatmul.msk.bf16.gmra.mxu2 %vm1300_vm12, %v4806_v8 }
 0x252   : > { %3328 = vmatmul.msk.bf16.gmra.mxu0 %vm1300_vm12, %v4802_v52  ;;  %v2899_v39 = vmul.f32 %v4441_v26, %v2863_v1  ;;  %v4809_v52 = vld [vmem:[#allocation6_spill] sm:$0xff] }
 0x253   : > { %v2494_v41 = vpop.f32.mrf.mxu2 }
 0x254   : > { %v2365_v13 = vpop.f32.mrf.mxu1  ;;  %v2935_v18 = vadd.f32 %v4447_v51, %v2899_v39  ;;  %v2647_v29 = vpop.f32.mrf.mxu3  ;;  %v2568_v48 = vadd.f32 %v2494_v41, %v2434_v32 }
 0x255   : > { %v2723_v31 = vadd.f32 %v2647_v29, %v2567_v17 }
 0x256   : > { %v2967_v49 = vmax.f32 %v2935_v18, 0.0  ;;  %v4810_v18 = vld [vmem:[#allocation38_spill] sm:$0xff] }
 0x257   : > { %3274 = vmatmul.msk.bf16.gmra.mxu1 %vm1300_vm12, %v4807_v4  ;;  %v2788_v22 = vpop.f32.mrf.mxu0  ;;  %v2435_v29 = vadd.f32 %v2362_v15, %v4810_v18 }
 0x258   : > { %2999 = vst.msk [vmem:[%s4459_s22 + $0x10] sm:$0xff] %vm1300_vm12, %v2967_v49  ;;  %v2864_v28 = vadd.f32 %v2788_v22, %v2723_v31 }
 0x259   : > { %3311 = vmatmul.msk.bf16.gmra.mxu3 %vm1300_vm12, %v4809_v52 }
 0x25a   : > { %v2900_v42 = vmul.f32 %v4441_v26, %v2864_v28 }
 0x25b   : > { %v2496_v7 = vpop.f32.mrf.mxu2 }
 0x25c   : > { %v2367_v14 = vpop.f32.mrf.mxu1  ;;  %v2936_v40 = vadd.f32 %v4447_v51, %v2900_v42  ;;  %v2650_v1 = vpop.f32.mrf.mxu3  ;;  %v2569_v41 = vadd.f32 %v2496_v7, %v2435_v29 }
 0x25d   : > { %v2724_v8 = vadd.f32 %v2650_v1, %v2568_v48  ;;  %v4811_v48 = vld [vmem:[#allocation40_spill] sm:$0xff] }
 0x25e   : > { %v2968_v17 = vmax.f32 %v2936_v40, 0.0 }
 0x25f   : > { %v2791_v39 = vpop.f32.mrf.mxu0 }
 0x260   : > { %3000 = vst.msk [vmem:[%s4459_s22 + $0x18] sm:$0xff] %vm1300_vm12, %v2968_v17  ;;  %v2865_v6 = vadd.f32 %v2791_v39, %v2724_v8  ;;  %3295 = vmatmul.msk.bf16.gmra.mxu2 %vm1300_vm12, %v4212_v56  ;;  %v2436_v56 = vadd.f32 %v2365_v13, %v4811_v48 }
 0x262   : > { %3329 = vmatmul.msk.bf16.gmra.mxu0 %vm1300_vm12, %v4807_v4  ;;  %v2901_v31 = vmul.f32 %v4441_v26, %v2865_v6  ;;  %v2437_v6 = vadd.f32 %v2367_v14, %v4226_v21 }
 0x263   : > { %v2499_v49 = vpop.f32.mrf.mxu2 }
 0x264   : > { %v2370_v22 = vpop.f32.mrf.mxu1  ;;  %v2937_v33 = vadd.f32 %v4447_v51, %v2901_v31  ;;  %v2652_v32 = vpop.f32.mrf.mxu3  ;;  %v2570_v4 = vadd.f32 %v2499_v49, %v2436_v56 }
 0x265   : > { %v2725_v28 = vadd.f32 %v2652_v32, %v2569_v41 }
 0x266   : > { %v2969_v15 = vmax.f32 %v2937_v33, 0.0 }
 0x267   : > { %3275 = vmatmul.msk.bf16.gmra.mxu1 %vm1300_vm12, %v4229_v10  ;;  %v2793_v52 = vpop.f32.mrf.mxu0 }
 0x268   : > { %3001 = vst.msk [vmem:[%s4459_s22 + $0x20] sm:$0xff] %vm1300_vm12, %v2969_v15  ;;  %v2866_v42 = vadd.f32 %v2793_v52, %v2725_v28  ;;  %v2438_v15 = vadd.f32 %v2370_v22, %v4238_v2  ;;  %v262_v52 = vld [vmem:[#allocation2 + $0xcc] sm:$0x1] }
 0x269   : > { %3312 = vmatmul.msk.bf16.gmra.mxu3 %vm1300_vm12, %v3665_v61  ;;  %v263_v56 = vsel %vm3437_vm3, 0, %v262_v52 }
 0x26a   : > { %v2902_v7 = vmul.f32 %v4441_v26, %v2866_v42  ;;  %264 = vst [vmem:[#allocation2 + $0xcc] sm:$0x1] %v263_v56  ;;  %v4547_v56 = vld [vmem:[#allocation2 + $0xd0] sm:$0xf] }
 0x26b   : > { %v2501_v40 = vpop.f32.mrf.mxu2 }
 0x26c   : > { %v2372_v1 = vpop.f32.mrf.mxu1  ;;  %v2938_v8 = vadd.f32 %v4447_v51, %v2902_v7  ;;  %v2655_v17 = vpop.f32.mrf.mxu3  ;;  %v2571_v61 = vadd.f32 %v2501_v40, %v2437_v6  ;;  %v318_v40 = vld [vmem:[#allocation2 + $0xd4] sm:$0x1] }
 0x26d   : > { %v2726_v39 = vadd.f32 %v2655_v17, %v2570_v4 }
 0x26e   : > { %v2970_v18 = vmax.f32 %v2938_v8, 0.0 }
 0x26f   : > { %v2796_v29 = vpop.f32.mrf.mxu0 }
 0x270   : > { %3002 = vst.msk [vmem:[%s4459_s22 + $0x28] sm:$0xff] %vm1300_vm12, %v2970_v18  ;;  %v2867_v13 = vadd.f32 %v2796_v29, %v2726_v39  ;;  %3296 = vmatmul.msk.bf16.gmra.mxu2 %vm1300_vm12, %v4245_v54  ;;  %v2439_v18 = vadd.f32 %v2372_v1, %v4253_v47  ;;  %v2325_v1 = vrot.slane %v4271_v63, 5 }
 0x272   : > { %3330 = vmatmul.msk.bf16.gmra.mxu0 %vm1300_vm12, %v4229_v10  ;;  %v2903_v41 = vmul.f32 %v4441_v26, %v2867_v13 }
 0x273   : > { %v2504_v31 = vpop.f32.mrf.mxu2 }
 0x274   : > { %v2375_v49 = vpop.f32.mrf.mxu1  ;;  %v2939_v33 = vadd.f32 %v4447_v51, %v2903_v41  ;;  %v2657_v32 = vpop.f32.mrf.mxu3  ;;  %v2572_v10 = vadd.f32 %v2504_v31, %v2438_v15  ;;  %v2327_v15 = vrot.slane %v2325_v1, 4 }
 0x275   : > { %v2727_v28 = vadd.f32 %v2657_v32, %v2571_v61  ;;  %v860_v32 = vld [vmem:[#allocation2 + $0xc0] sm:$0xe] }
 0x276   : > { %v2971_v21 = vmax.f32 %v2939_v33, 0.0 }
 0x277   : > { %3276 = vmatmul.msk.bf16.gmra.mxu1 %vm1300_vm12, %v4258_v57  ;;  %v2798_v14 = vpop.f32.mrf.mxu0 }
 0x278   : > { %3003 = vst.msk [vmem:[%s4459_s22 + $0x30] sm:$0xff] %vm1300_vm12, %v2971_v21  ;;  %v2868_v54 = vadd.f32 %v2798_v14, %v2727_v28  ;;  %v2440_v28 = vadd.f32 %v2375_v49, %v4263_v23  ;;  %v3261_v14 = vrot.slane %v860_v32, 9 }
 0x279   : > { %3313 = vmatmul.msk.bf16.gmra.mxu3 %vm1300_vm12, %v3782_v45  ;;  %v319_v45 = vsel %vm3445_vm5, 0, %v318_v40  ;;  %v2606_v40 = vshll.u32 %v4547_v56, 16 }
 0x27a   : > { %v2904_v48 = vmul.f32 %v4441_v26, %v2868_v54  ;;  %320 = vst [vmem:[#allocation2 + $0xd4] sm:$0x1] %v319_v45  ;;  %v2328_v54 = vrot.slane %v4288_v5, 5  ;;  %v4813_v45 = vld [vmem:[#allocation41_spill] sm:$0xff] }
 0x27b   : > { %v2506_v42 = vpop.f32.mrf.mxu2 }
 0x27c   : > { %v2377_v4 = vpop.f32.mrf.mxu1  ;;  %v2940_v7 = vadd.f32 %v4447_v51, %v2904_v48  ;;  %v2660_v2 = vpop.f32.mrf.mxu3  ;;  %v2573_v29 = vadd.f32 %v2506_v42, %v2439_v18 }
 0x27d   : > { %v2728_v22 = vadd.f32 %v2660_v2, %v2572_v10  ;;  %v824_v10 = vld [vmem:[#allocation2 + $0xcc] sm:$0xf] }
 0x27e   : > { %v2972_v8 = vmax.f32 %v2940_v7, 0.0  ;;  %v2329_v7 = vsel %vm3876_vm1, %v2327_v15, %v2328_v54  ;;  %v2597_v2 = vshrl.u32 %v824_v10, 16 }
 0x27f   : > { %v2801_v39 = vpop.f32.mrf.mxu0 }
 0x280   : > { %3004 = vst.msk [vmem:[%s4459_s22 + $0x38] sm:$0xff] %vm1300_vm12, %v2972_v8  ;;  %v2869_v3 = vadd.f32 %v2801_v39, %v2728_v22  ;;  %3297 = vmatmul.msk.bf16.gmra.mxu2 %vm1300_vm12, %v4269_v43  ;;  %v2600_v22 = vshll.u32 %v824_v10, 16  ;;  %v2610_v8 = vshrl.u32 %v4547_v56, 16  ;;  %v2441_v39 = vadd.f32 %v2377_v4, %v4813_v45 }
 0x281   : > { %v843_v32 = vld [vmem:[#allocation2 + $0xd4] sm:$0x1] }
 0x282   : > { %3331 = vmatmul.msk.bf16.gmra.mxu0 %vm1300_vm12, %v4258_v57  ;;  %v2905_v6 = vmul.f32 %v4441_v26, %v2869_v3 }
 0x283   : > { %v2509_v13 = vpop.f32.mrf.mxu2 }
 0x284   : > { %v2380_v61 = vpop.f32.mrf.mxu1  ;;  %v2941_v41 = vadd.f32 %v4447_v51, %v2905_v6  ;;  %v2662_v31 = vpop.f32.mrf.mxu3  ;;  %v2574_v21 = vadd.f32 %v2509_v13, %v2440_v28  ;;  %v2599_v13 = vrot.slane %v2597_v2, 4 }
 0x285   : > { %v2729_v47 = vadd.f32 %v2662_v31, %v2573_v29  ;;  %v2333_v29 = vunpack.c.l.b16 %v2329_v7  ;;  %v2602_v31 = vrot.slane %v2600_v22, 5 }
 0x286   : > { %v2973_v33 = vmax.f32 %v2941_v41, 0.0 }
 0x287   : > { %3277 = vmatmul.msk.bf16.gmra.mxu1 %vm1300_vm12, %v4286_v19  ;;  %v2803_v43 = vpop.f32.mrf.mxu0 }
 0x288   : > { %3005 = vst.msk [vmem:[%s4459_s22 + $0x40] sm:$0xff] %vm1300_vm12, %v2973_v33  ;;  %v2870_v57 = vadd.f32 %v2803_v43, %v2729_v47  ;;  %v2608_v47 = vrot.slane %v2606_v40, 5  ;;  %v3356_v40 = vld [vmem:[#allocation2 + $0xcc] sm:$0xff] }
 0x289   : > { %3314 = vmatmul.msk.bf16.gmra.mxu3 %vm1300_vm12, %v3908_v16  ;;  %v2326_v16 = vsel %vm3876_vm1, %v3261_v14, %v2325_v1  ;;  %v2612_v1 = vrot.slane %v2610_v8, 4  ;;  %v2603_v14 = vor.u32 %v2602_v31, %v2599_v13 }
 0x28a   : > { %v2906_v63 = vmul.f32 %v4441_v26, %v2870_v57  ;;  %v2332_v3 = vunpack.c.l.b16 %v2326_v16 }
 0x28b   : > { %v2511_v52 = vpop.f32.mrf.mxu2  ;;  %v2613_v15 = vor.u32 %v2612_v1, %v2608_v47 }
 0x28c   : > { %v2382_v48 = vpop.f32.mrf.mxu1  ;;  %v2942_v23 = vadd.f32 %v4447_v51, %v2906_v63  ;;  %v2665_v49 = vpop.f32.mrf.mxu3  ;;  %v2575_v6 = vadd.f32 %v2511_v52, %v2441_v39  ;;  %v2442_v63 = vadd.f32 %v2380_v61, %v4293_v46  ;;  %v2756_v39 = vrot.slane %v4547_v56, 5 }
 0x28d   : > { %v2730_v42 = vadd.f32 %v2665_v49, %v2574_v21  ;;  %v2604_v49 = vrot.slane %v2603_v14, 4  ;;  %v2443_v45 = vadd.f32 %v2382_v48, %v4306_v36 }
 0x28e   : > { %v2974_v5 = vmax.f32 %v2942_v23, 0.0  ;;  %v2758_v31 = vrot.slane %v2756_v39, 4 }
 0x28f   : > { %v2806_v17 = vpop.f32.mrf.mxu0  ;;  %v2609_v8 = vsel %vm3518_vm13, %v2604_v49, %v2608_v47  ;;  %v2759_v47 = vrot.slane %v843_v32, 5 }
 0x290   : > { %3006 = vst.msk [vmem:[%s4459_s22 + $0x48] sm:$0xff] %vm1300_vm12, %v2974_v5  ;;  %v2871_v18 = vadd.f32 %v2806_v17, %v2730_v42  ;;  %3298 = vmatmul.msk.bf16.gmra.mxu2 %vm1300_vm12, %v4298_v55  ;;  %v2334_v55 = vpack.c.b16 %v2333_v29, %v2332_v3  ;;  %v2614_v42 = vrot.slane %v2613_v15, 4  ;;  %v861_v3 = vld [vmem:[#allocation2 + $0xcc] sm:$0xe] }
 0x291   : > { %v2760_v14 = vsel %vm3876_vm1, %v2758_v31, %v2759_v47 }
 0x292   : > { %3332 = vmatmul.msk.bf16.gmra.mxu0 %vm1300_vm12, %v4286_v19  ;;  %v2907_v41 = vmul.f32 %v4441_v26, %v2871_v18  ;;  %v2616_v19 = vshll.u32 %v843_v32, 16 }
 0x293   : > { %v2514_v4 = vpop.f32.mrf.mxu2 }
 0x294   : > { %v2385_v33 = vpop.f32.mrf.mxu1  ;;  %v2943_v43 = vadd.f32 %v4447_v51, %v2907_v41  ;;  %v2667_v28 = vpop.f32.mrf.mxu3  ;;  %v2576_v52 = vadd.f32 %v2514_v4, %v2442_v63  ;;  %v2618_v16 = vrot.slane %v2616_v19, 5  ;;  %v3317_v41 = vrot.slane %v861_v3, 9 }
 0x295   : > { %v2731_v57 = vadd.f32 %v2667_v28, %v2575_v6  ;;  %v2622_v6 = vunpack.c.l.b16 %v2609_v8  ;;  %v2764_v63 = vunpack.c.l.b16 %v2760_v14 }
 0x296   : > { %v2975_v21 = vmax.f32 %v2943_v43, 0.0 }
 0x297   : > { %3278 = vmatmul.msk.bf16.gmra.mxu1 %vm1300_vm12, %v2334_v55  ;;  %v2808_v54 = vpop.f32.mrf.mxu0 }
 0x298   : > { %3007 = vst.msk [vmem:[%s4459_s22 + $0x50] sm:$0xff] %vm1300_vm12, %v2975_v21  ;;  %v2872_v10 = vadd.f32 %v2808_v54, %v2731_v57  ;;  %v2444_v21 = vadd.f32 %v2385_v33, %v4315_v37 }
 0x299   : > { %3315 = vmatmul.msk.bf16.gmra.mxu3 %vm1300_vm12, %v4311_v27  ;;  %v2619_v27 = vsel %vm3518_vm13, %v2614_v42, %v2618_v16 }
 0x29a   : > { %v2908_v23 = vmul.f32 %v4441_v26, %v2872_v10  ;;  %v2623_v13 = vunpack.c.l.b16 %v2619_v27 }
 0x29b   : > { %v2516_v7 = vpop.f32.mrf.mxu2 }
 0x29c   : > { %v2387_v2 = vpop.f32.mrf.mxu1  ;;  %v2944_v5 = vadd.f32 %v4447_v51, %v2908_v23  ;;  %v2670_v22 = vpop.f32.mrf.mxu3  ;;  %v2577_v29 = vadd.f32 %v2516_v7, %v2443_v45  ;;  %v2624_v43 = vpack.c.b16 %v2623_v13, %v2622_v6 }
 0x29d   : > { %v2732_v46 = vadd.f32 %v2670_v22, %v2576_v52  ;;  %v2445_v16 = vadd.f32 %v2387_v2, %v4322_v58 }
 0x29e   : > { %v2976_v61 = vmax.f32 %v2944_v5, 0.0 }
 0x29f   : > { %v2811_v17 = vpop.f32.mrf.mxu0 }
 0x2a0   : > { %3008 = vst.msk [vmem:[%s4459_s22 + $0x58] sm:$0xff] %vm1300_vm12, %v2976_v61  ;;  %v2873_v18 = vadd.f32 %v2811_v17, %v2732_v46  ;;  %3299 = vmatmul.msk.bf16.gmra.mxu2 %vm1300_vm12, %v3356_v40 }
 0x2a2   : > { %3333 = vmatmul.msk.bf16.gmra.mxu0 %vm1300_vm12, %v2334_v55  ;;  %v2909_v35 = vmul.f32 %v4441_v26, %v2873_v18  ;;  %v2757_v55 = vsel %vm3876_vm1, %v3317_v41, %v2756_v39 }
 0x2a3   : > { %v2519_v36 = vpop.f32.mrf.mxu2  ;;  %v2763_v54 = vunpack.c.l.b16 %v2757_v55 }
 0x2a4   : > { %v2390_v48 = vpop.f32.mrf.mxu1  ;;  %v2945_v56 = vadd.f32 %v4447_v51, %v2909_v35  ;;  %v2672_v1 = vpop.f32.mrf.mxu3  ;;  %v2578_v15 = vadd.f32 %v2519_v36, %v2444_v21 }
 0x2a5   : > { %v2733_v4 = vadd.f32 %v2672_v1, %v2577_v29  ;;  %v2765_v24 = vpack.c.b16 %v2764_v63, %v2763_v54  ;;  %v2446_v39 = vadd.f32 %v2390_v48, %v4329_v34 }
 0x2a6   : > { %v2977_v28 = vmax.f32 %v2945_v56, 0.0 }
 0x2a7   : > { %v2813_v57 = vpop.f32.mrf.mxu0 }
 0x2a8   : > { %3009 = vst.msk [vmem:[%s4459_s22 + $0x60] sm:$0xff] %vm1300_vm12, %v2977_v28  ;;  %v2874_v32 = vadd.f32 %v2813_v57, %v2733_v4 }
 0x2a9   : > { %3316 = vmatmul.msk.bf16.gmra.mxu3 %vm1300_vm12, %v2624_v43 }
 0x2aa   : > { %v2910_v19 = vmul.f32 %v4441_v26, %v2874_v32 }
 0x2ab   : > { %v2521_v10 = vpop.f32.mrf.mxu2 }
 0x2ac   : > { %v2392_v52 = vpop.f32.mrf.mxu1  ;;  %v2946_v37 = vadd.f32 %v4447_v51, %v2910_v19  ;;  %v2675_v33 = vpop.f32.mrf.mxu3  ;;  %v2579_v5 = vadd.f32 %v2521_v10, %v2445_v16 }
 0x2ad   : > { %v2734_v23 = vadd.f32 %v2675_v33, %v2578_v15  ;;  %v2447_v47 = vadd.f32 %v2392_v52, %v4336_v12 }
 0x2ae   : > { %v2978_v49 = vmax.f32 %v2946_v37, 0.0 }
 0x2af   : > { %v2816_v42 = vpop.f32.mrf.mxu0 }
 0x2b0   : > { %3010 = vst.msk [vmem:[%s4459_s22 + $0x68] sm:$0xff] %vm1300_vm12, %v2978_v49  ;;  %v2875_v7 = vadd.f32 %v2816_v42, %v2734_v23 }
 0x2b2   : > { %3334 = vmatmul.msk.bf16.gmra.mxu0 %vm1300_vm12, %v2765_v24  ;;  %v2911_v22 = vmul.f32 %v4441_v26, %v2875_v7 }
 0x2b3   : > { %v2524_v40 = vpop.f32.mrf.mxu2 }
 0x2b4   : > { %v2395_v46 = vpop.f32.mrf.mxu1  ;;  %v2947_v61 = vadd.f32 %v4447_v51, %v2911_v22  ;;  %v2677_v8 = vpop.f32.mrf.mxu3  ;;  %v2580_v2 = vadd.f32 %v2524_v40, %v2446_v39 }
 0x2b5   : > { %v2735_v27 = vadd.f32 %v2677_v8, %v2579_v5  ;;  %v2448_v55 = vadd.f32 %v2395_v46, %v4343_v9 }
 0x2b6   : > { %v2979_v17 = vmax.f32 %v2947_v61, 0.0 }
 0x2b7   : > { %v2818_v45 = vpop.f32.mrf.mxu0 }
 0x2b8   : > { %3011 = vst.msk [vmem:[%s4459_s22 + $0x70] sm:$0xff] %vm1300_vm12, %v2979_v17  ;;  %v2876_v58 = vadd.f32 %v2818_v45, %v2735_v27 }
 0x2ba   : > { %v2912_v18 = vmul.f32 %v4441_v26, %v2876_v58 }
 0x2bb   : > { %v2526_v3 = vpop.f32.mrf.mxu2 }
 0x2bc   : > { %v2397_v29 = vpop.f32.mrf.mxu1  ;;  %v2948_v6 = vadd.f32 %v4447_v51, %v2912_v18  ;;  %v2680_v13 = vpop.f32.mrf.mxu3  ;;  %v2581_v36 = vadd.f32 %v2526_v3, %v2447_v47 }
 0x2bd   : > { %v2736_v35 = vadd.f32 %v2680_v13, %v2580_v2  ;;  %v2449_v33 = vadd.f32 %v2397_v29, %v4350_v30 }
 0x2be   : > { %v2980_v41 = vmax.f32 %v2948_v6, 0.0 }
 0x2bf   : > { %v2821_v31 = vpop.f32.mrf.mxu0 }
 0x2c0   : > { %3012 = vst.msk [vmem:[%s4459_s22 + $0x78] sm:$0xff] %vm1300_vm12, %v2980_v41  ;;  %v2877_v34 = vadd.f32 %v2821_v31, %v2736_v35 }
 0x2c2   : > { %v2913_v48 = vmul.f32 %v4441_v26, %v2877_v34 }
 0x2c3   : > { %v2529_v56 = vpop.f32.mrf.mxu2 }
 0x2c4   : > { %v2400_v1 = vpop.f32.mrf.mxu1  ;;  %v2949_v4 = vadd.f32 %v4447_v51, %v2913_v48  ;;  %v2682_v43 = vpop.f32.mrf.mxu3  ;;  %v2582_v14 = vadd.f32 %v2529_v56, %v2448_v55 }
 0x2c5   : > { %v2737_v28 = vadd.f32 %v2682_v43, %v2581_v36  ;;  %v2450_v46 = vadd.f32 %v2400_v1, %v4357_v50 }
 0x2c6   : > { %v2981_v57 = vmax.f32 %v2949_v4, 0.0 }
 0x2c7   : > { %v2823_v21 = vpop.f32.mrf.mxu0 }
 0x2c8   : > { %3013 = vst.msk [vmem:[%s4459_s22 + $0x80] sm:$0xff] %vm1300_vm12, %v2981_v57  ;;  %v2878_v12 = vadd.f32 %v2823_v21, %v2737_v28 }
 0x2ca   : > { %v2914_v32 = vmul.f32 %v4441_v26, %v2878_v12 }
 0x2cb   : > { %v2531_v15 = vpop.f32.mrf.mxu2 }
 0x2cc   : > { %v2402_v19 = vpop.f32.mrf.mxu1  ;;  %v2950_v54 = vadd.f32 %v4447_v51, %v2914_v32  ;;  %v2685_v63 = vpop.f32.mrf.mxu3  ;;  %v2583_v23 = vadd.f32 %v2531_v15, %v2449_v33 }
 0x2cd   : > { %v2738_v10 = vadd.f32 %v2685_v63, %v2582_v14  ;;  %v2451_v3 = vadd.f32 %v2402_v19, %v4364_v11 }
 0x2ce   : > { %v2982_v52 = vmax.f32 %v2950_v54, 0.0 }
 0x2cf   : > { %v2826_v37 = vpop.f32.mrf.mxu0 }
 0x2d0   : > { %3014 = vst.msk [vmem:[%s4459_s22 + $0x88] sm:$0xff] %vm1300_vm12, %v2982_v52  ;;  %v2879_v9 = vadd.f32 %v2826_v37, %v2738_v10 }
 0x2d2   : > { %v2915_v49 = vmul.f32 %v4441_v26, %v2879_v9 }
 0x2d3   : > { %v2534_v24 = vpop.f32.mrf.mxu2 }
 0x2d4   : > { %v2405_v42 = vpop.f32.mrf.mxu1  ;;  %v2951_v16 = vadd.f32 %v4447_v51, %v2915_v49  ;;  %v2687_v7 = vpop.f32.mrf.mxu3  ;;  %v2584_v61 = vadd.f32 %v2534_v24, %v2450_v46 }
 0x2d5   : > { %v2739_v5 = vadd.f32 %v2687_v7, %v2583_v23  ;;  %v2452_v48 = vadd.f32 %v2405_v42, %v4371_v59 }
 0x2d6   : > { %v2983_v22 = vmax.f32 %v2951_v16, 0.0 }
 0x2d7   : > { %v2828_v40 = vpop.f32.mrf.mxu0 }
 0x2d8   : > { %3015 = vst.msk [vmem:[%s4459_s22 + $0x90] sm:$0xff] %vm1300_vm12, %v2983_v22  ;;  %v2880_v30 = vadd.f32 %v2828_v40, %v2739_v5 }
 0x2da   : > { %v2916_v8 = vmul.f32 %v4441_v26, %v2880_v30 }
 0x2db   : > { %v2536_v27 = vpop.f32.mrf.mxu2 }
 0x2dc   : > { %v2952_v17 = vadd.f32 %v4447_v51, %v2916_v8  ;;  %v2690_v45 = vpop.f32.mrf.mxu3  ;;  %v2407_v39 = vpop.f32.mrf.mxu1  ;;  %v2585_v29 = vadd.f32 %v2536_v27, %v2451_v3 }
 0x2dd   : > { %v2740_v58 = vadd.f32 %v2690_v45, %v2584_v61  ;;  %v2453_v12 = vadd.f32 %v2407_v39, %v4378_v60 }
 0x2de   : > { %v2984_v2 = vmax.f32 %v2952_v17, 0.0 }
 0x2df   : > { %v2831_v18 = vpop.f32.mrf.mxu0 }
 0x2e0   : > { %3016 = vst.msk [vmem:[%s4459_s22 + $0x98] sm:$0xff] %vm1300_vm12, %v2984_v2  ;;  %v2881_v50 = vadd.f32 %v2831_v18, %v2740_v58 }
 0x2e2   : > { %v2917_v6 = vmul.f32 %v4441_v26, %v2881_v50 }
 0x2e3   : > { %v2539_v13 = vpop.f32.mrf.mxu2 }
 0x2e4   : > { %v2953_v35 = vadd.f32 %v4447_v51, %v2917_v6  ;;  %v2692_v41 = vpop.f32.mrf.mxu3  ;;  %v2410_v34 = vpop.f32.mrf.mxu1  ;;  %v2586_v56 = vadd.f32 %v2539_v13, %v2452_v48 }
 0x2e5   : > { %v2741_v31 = vadd.f32 %v2692_v41, %v2585_v29  ;;  %v2454_v33 = vadd.f32 %v2410_v34, %v4385_v44 }
 0x2e6   : > { %v2985_v47 = vmax.f32 %v2953_v35, 0.0 }
 0x2e7   : > { %v2833_v36 = vpop.f32.mrf.mxu0 }
 0x2e8   : > { %3017 = vst.msk [vmem:[%s4459_s22 + $0xa0] sm:$0xff] %vm1300_vm12, %v2985_v47  ;;  %v2882_v11 = vadd.f32 %v2833_v36, %v2741_v31 }
 0x2ea   : > { %v2918_v1 = vmul.f32 %v4441_v26, %v2882_v11 }
 0x2eb   : > { %v2541_v4 = vpop.f32.mrf.mxu2 }
 0x2ec   : > { %v2954_v43 = vadd.f32 %v4447_v51, %v2918_v1  ;;  %v2695_v28 = vpop.f32.mrf.mxu3  ;;  %v2412_v59 = vpop.f32.mrf.mxu1  ;;  %v2587_v32 = vadd.f32 %v2541_v4, %v2453_v12 }
 0x2ed   : > { %v2742_v57 = vadd.f32 %v2695_v28, %v2586_v56  ;;  %v2455_v40 = vadd.f32 %v2412_v59, %v4392_v38 }
 0x2ee   : > { %v2986_v21 = vmax.f32 %v2954_v43, 0.0 }
 0x2ef   : > { %v2836_v55 = vpop.f32.mrf.mxu0 }
 0x2f0   : > { %3018 = vst.msk [vmem:[%s4459_s22 + $0xa8] sm:$0xff] %vm1300_vm12, %v2986_v21  ;;  %v2883_v14 = vadd.f32 %v2836_v55, %v2742_v57 }
 0x2f2   : > { %v2919_v15 = vmul.f32 %v4441_v26, %v2883_v14 }
 0x2f3   : > { %v2544_v19 = vpop.f32.mrf.mxu2 }
 0x2f4   : > { %v2955_v54 = vadd.f32 %v4447_v51, %v2919_v15  ;;  %v2697_v63 = vpop.f32.mrf.mxu3  ;;  %v2588_v9 = vadd.f32 %v2544_v19, %v2454_v33  ;;  %v2415_v49 = vpop.f32.mrf.mxu1 }
 0x2f5   : > { %v2743_v10 = vadd.f32 %v2697_v63, %v2587_v32  ;;  %v2456_v2 = vadd.f32 %v2415_v49, %v4399_v20 }
 0x2f6   : > { %v2987_v52 = vmax.f32 %v2955_v54, 0.0 }
 0x2f7   : > { %v2838_v37 = vpop.f32.mrf.mxu0 }
 0x2f8   : > { %3019 = vst.msk [vmem:[%s4459_s22 + $0xb0] sm:$0xff] %vm1300_vm12, %v2987_v52  ;;  %v2884_v60 = vadd.f32 %v2838_v37, %v2743_v10 }
 0x2fa   : > { %v2920_v23 = vmul.f32 %v4441_v26, %v2884_v60 }
 0x2fb   : > { %v2546_v24 = vpop.f32.mrf.mxu2 }
 0x2fc   : > { %v2956_v42 = vadd.f32 %v4447_v51, %v2920_v23  ;;  %v2700_v16 = vpop.f32.mrf.mxu3  ;;  %v2589_v46 = vadd.f32 %v2546_v24, %v2455_v40  ;;  %v2417_v17 = vpop.f32.mrf.mxu1 }
 0x2fd   : > { %v2744_v7 = vadd.f32 %v2700_v16, %v2588_v9  ;;  %v2457_v47 = vadd.f32 %v2417_v17, %v4406_v0 }
 0x2fe   : > { %v2988_v5 = vmax.f32 %v2956_v42, 0.0 }
 0x2ff   : > { %v2841_v22 = vpop.f32.mrf.mxu0 }
 0x300   : > { %3020 = vst.msk [vmem:[%s4459_s22 + $0xb8] sm:$0xff] %vm1300_vm12, %v2988_v5  ;;  %v2885_v44 = vadd.f32 %v2841_v22, %v2744_v7 }
 0x302   : > { %v2921_v30 = vmul.f32 %v4441_v26, %v2885_v44 }
 0x303   : > { %v2549_v61 = vpop.f32.mrf.mxu2 }
 0x304   : > { %v2957_v8 = vadd.f32 %v4447_v51, %v2921_v30  ;;  %v2702_v27 = vpop.f32.mrf.mxu3  ;;  %v2590_v18 = vadd.f32 %v2549_v61, %v2456_v2  ;;  %v2420_v41 = vpop.f32.mrf.mxu1  ;;  %v4814_v61 = vld [vmem:[#allocation20_spill] sm:$0xff] }
 0x305   : > { %v2745_v45 = vadd.f32 %v2702_v27, %v2589_v46  ;;  %v2458_v28 = vadd.f32 %v2420_v41, %v4413_v53 }
 0x306   : > { %v2989_v39 = vmax.f32 %v2957_v8, 0.0 }
 0x307   : > { %v2843_v58 = vpop.f32.mrf.mxu0 }
 0x308   : > { %3021 = vst.msk [vmem:[%s4459_s22 + $0xc0] sm:$0xff] %vm1300_vm12, %v2989_v39  ;;  %v2886_v38 = vadd.f32 %v2843_v58, %v2745_v45 }
 0x30a   : > { %v2922_v3 = vmul.f32 %v4441_v26, %v2886_v38 }
 0x30b   : > { %v2551_v50 = vpop.f32.mrf.mxu2 }
 0x30c   : > { %v2958_v29 = vadd.f32 %v4447_v51, %v2922_v3  ;;  %v2705_v6 = vpop.f32.mrf.mxu3  ;;  %v2591_v34 = vadd.f32 %v2551_v50, %v2457_v47  ;;  %v2422_v0 = vpop.f32.mrf.mxu1 }
 0x30d   : > { %v2746_v13 = vadd.f32 %v2705_v6, %v2590_v18  ;;  %v2459_v54 = vadd.f32 %v2422_v0, %v4420_v62 }
 0x30e   : > { %v2990_v35 = vmax.f32 %v2958_v29, 0.0 }
 0x30f   : > { %v2846_v31 = vpop.f32.mrf.mxu0 }
 0x310   : > { %3022 = vst.msk [vmem:[%s4459_s22 + $0xc8] sm:$0xff] %vm1300_vm12, %v2990_v35  ;;  %v2887_v20 = vadd.f32 %v2846_v31, %v2746_v13 }
 0x312   : > { %v2923_v36 = vmul.f32 %v4441_v26, %v2887_v20 }
 0x313   : > { %v2554_v48 = vpop.f32.mrf.mxu2 }
 0x314   : > { %v2959_v11 = vadd.f32 %v4447_v51, %v2923_v36  ;;  %v2707_v56 = vpop.f32.mrf.mxu3  ;;  %v2592_v21 = vadd.f32 %v2554_v48, %v2458_v28  ;;  %v2425_v52 = vpop.f32.mrf.mxu1 }
 0x315   : > { %v2747_v1 = vadd.f32 %v2707_v56, %v2591_v34  ;;  %v2460_v24 = vadd.f32 %v2425_v52, %v4427_v25 }
 0x316   : > { %v2991_v4 = vmax.f32 %v2959_v11, 0.0 }
 0x317   : > { %v2848_v43 = vpop.f32.mrf.mxu0 }
 0x318   : > { %3023 = vst.msk [vmem:[%s4459_s22 + $0xd0] sm:$0xff] %vm1300_vm12, %v2991_v4  ;;  %v2888_v57 = vadd.f32 %v2848_v43, %v2747_v1 }
 0x31a   : > { %v2924_v55 = vmul.f32 %v4441_v26, %v2888_v57 }
 0x31b   : > { %v2556_v12 = vpop.f32.mrf.mxu2 }
 0x31c   : > { %v2960_v14 = vadd.f32 %v4447_v51, %v2924_v55  ;;  %v2710_v59 = vpop.f32.mrf.mxu3  ;;  %v2593_v63 = vadd.f32 %v2556_v12, %v2459_v54  ;;  %v2427_v22 = vpop.f32.mrf.mxu1 }
 0x31d   : > { %v2748_v32 = vadd.f32 %v2710_v59, %v2592_v21  ;;  %v2461_v8 = vadd.f32 %v2427_v22, %v4814_v61 }
 0x31e   : > { %v2992_v15 = vmax.f32 %v2960_v14, 0.0 }
 0x31f   : > { %v2851_v19 = vpop.f32.mrf.mxu0 }
 0x320   : > { %3024 = vst.msk [vmem:[%s4459_s22 + $0xd8] sm:$0xff] %vm1300_vm12, %v2992_v15  ;;  %v2889_v53 = vadd.f32 %v2851_v19, %v2748_v32 }
 0x322   : > { %v2925_v10 = vmul.f32 %v4441_v26, %v2889_v53 }
 0x323   : > { %v2559_v60 = vpop.f32.mrf.mxu2 }
 0x324   : > { %v2961_v37 = vadd.f32 %v4447_v51, %v2925_v10  ;;  %v2712_v33 = vpop.f32.mrf.mxu3  ;;  %v2594_v42 = vadd.f32 %v2559_v60, %v2460_v24 }
 0x325   : > { %v2749_v9 = vadd.f32 %v2712_v33, %v2593_v63 }
 0x326   : > { %v2993_v23 = vmax.f32 %v2961_v37, 0.0 }
 0x327   : > { %v2853_v49 = vpop.f32.mrf.mxu0 }
 0x328   : > { %3025 = vst.msk [vmem:[%s4459_s22 + $0xe0] sm:$0xff] %vm1300_vm12, %v2993_v23  ;;  %v2890_v62 = vadd.f32 %v2853_v49, %v2749_v9 }
 0x32a   : > { %v2926_v16 = vmul.f32 %v4441_v26, %v2890_v62 }
 0x32b   : > { %v2561_v46 = vpop.f32.mrf.mxu2 }
 0x32c   : > { %v2962_v7 = vadd.f32 %v4447_v51, %v2926_v16  ;;  %v2715_v5 = vpop.f32.mrf.mxu3  ;;  %v2595_v27 = vadd.f32 %v2561_v46, %v2461_v8 }
 0x32d   : > { %v2750_v40 = vadd.f32 %v2715_v5, %v2594_v42 }
 0x32e   : > { %v2994_v44 = vmax.f32 %v2962_v7, 0.0 }
 0x32f   : > { %v2856_v30 = vpop.f32.mrf.mxu0 }
 0x330   : > { %3026 = vst.msk [vmem:[%s4459_s22 + $0xe8] sm:$0xff] %vm1300_vm12, %v2994_v44  ;;  %v2891_v25 = vadd.f32 %v2856_v30, %v2750_v40 }
 0x332   : > { %v2927_v17 = vmul.f32 %v4441_v26, %v2891_v25 }
 0x334   : > { %v2963_v45 = vadd.f32 %v4447_v51, %v2927_v17  ;;  %v2717_v39 = vpop.f32.mrf.mxu3 }
 0x335   : > { %v2751_v58 = vadd.f32 %v2717_v39, %v2595_v27 }
 0x336   : > { %v2995_v2 = vmax.f32 %v2963_v45, 0.0 }
 0x337   : > { %v2858_v38 = vpop.f32.mrf.mxu0 }
 0x338   : > { %3027 = vst.msk [vmem:[%s4459_s22 + $0xf0] sm:$0xff] %vm1300_vm12, %v2995_v2  ;;  %v2892_v18 = vadd.f32 %v2858_v38, %v2751_v58 }
 0x33a   : > { %v2928_v3 = vmul.f32 %v4441_v26, %v2892_v18 }
 0x33c   : > { %v2964_v50 = vadd.f32 %v4447_v51, %v2928_v3 }
 0x33e   : > { %v2996_v29 = vmax.f32 %v2964_v50, 0.0 }
 0x340   : > { %3028 = vst.msk [vmem:[%s4459_s22 + $0xf8] sm:$0xff] %vm1300_vm12, %v2996_v29 }
 0x341 PF: > { %s14_s15 = sadd.s32 1, %s3393_s15  }
 0x342   : > { %p11_p4 = scmp.ge.s32.totalorder %s14_s15, 4  }
 0x344   :  { %13 = sbr.rel (!%p11_p4) target bundleno = 1 (0x1), region = 76 }

// kernel: up_block.2
= control target key start
LH: loop header
LB: loop body
LE: loop exit
PB: predicated region body
PF: predicated region fallthrough
CT: control target
= control target key end

     0   :  { %s4606_s24 = smov 0   ;;  %s6782_s0 = inlined_call_operand.vmem [shape: bf16[2,8,8,8], index: 0, kind: input, shape index: {}]   ;;  %s6783_s1 = inlined_call_operand.vmem [shape: bf16[2,8,2,8,8], index: 1, kind: input, shape index: {}]   ;;  %s6784_s2 = inlined_call_operand.vmem [shape: bf16[8,16], index: 2, kind: input, shape index: {}]   ;;  %s6785_s3 = inlined_call_operand.vmem [shape: f32[1,16], index: 3, kind: input, shape index: {}]   ;;  %s6786_s4 = inlined_call_operand.vmem [shape: bf16[9,8,4], index: 4, kind: input, shape index: {}]   ;;  %s6787_s5 = inlined_call_operand.vmem [shape: f32[1,4], index: 5, kind: input, shape index: {}]   ;;  %s6788_s6 = inlined_call_operand.vmem [shape: f32[1,4], index: 6, kind: input, shape index: {}]   ;;  %s6789_s7 = inlined_call_operand.vmem [shape: bf16[2,8,2,8,8], index: 7, kind: output, shape index: {}]  }
   0x1 LB: > { %s4182_s25 = sadd.s32 4294967295, %s4555_s24   ;;  %p4186_p0 = scmp.ge.s32.totalorder %s4555_s24, 1  ;;  %s4555_s24 = sphi %s4606_s24, %s17_s24  }
   0x2   : > { %p247_p1 = scmp.lt.s32.totalorder %s4555_s24, 3 }
   0x4   : > { %p248_p2 = pnand %p4186_p0, %p247_p1 }
   0x6   : > { %251 = sbr.rel (%p248_p2) target bundleno = 1414 (0x586), region = 48 }
   0xb   : > { %v380_v0 = vld [vmem:[%s6784_s2] sm:$0xf]  ;;  %vm6791_vm0 = vcmask 1043456   ;;  %p284_p3 = scmp.lt.s32.totalorder %s4182_s25, 1  ;;  %vm6790_vm1 = vcmask 64512   ;;  %s4557_s13 = smov 4  }
   0xc   : > { %v420_v1 = vsel %vm6791_vm0, %v380_v0, 0  ;;  %s4558_s14 = smov 8   ;;  %s4559_s15 = smov 20   ;;  %vm6792_vm2 = vcmask 253952   ;;  %vm308_vm3 = vsmask.f32 256 }
   0xd   : > { %429 = vmatpush.bf16.msra.mxu0 %v420_v1  ;;  %4482 = vmatpush.bf16.msra.mxu1 %v420_v1  ;;  %s7001_s25 = smov (!%p284_p3, %s4182_s25), 1  ;;  %vm4676_vm4 = vmand %vm6792_vm2, %vm308_vm3  ;;  %vm6793_vm5 = vsmask.f32 7938  ;;  %s4560_s16 = smov 24   ;;  %vm540_vm7 = vcmask 27648   ;;  %vm545_vm8 = vcmask 24576  }
   0xe   : > { %4483 = vmatpush.bf16.msra.mxu2 %v420_v1  ;;  %4484 = vmatpush.bf16.msra.mxu3 %v420_v1  ;;  %s4463_s28 = sshll.u32 %s7001_s25, 5  ;;  %s4464_s29 = sshll.u32 %s7001_s25, 6  ;;  %vm4684_vm6 = vmand %vm6792_vm2, %vm6793_vm5  ;;  %vm712_vm11 = vcmask 60448   ;;  %vm717_vm12 = vcmask 57376   ;;  %vm812_vm15 = vcmask 93248  }
   0xf   : > { %s288_s9 = scalar_lea.vmem %s6782_s0, %s4463_s28  ;;  %s4630_s12 = scalar_lea.vmem %s6783_s1, %s4464_s29  ;;  %vm4745_vm9 = vmand %vm540_vm7, %vm6793_vm5 }
  0x10   : > { %v4466_v2 = vld [vmem:[%s288_s9] sm:$0xff]  ;;  %v4467_v3 = vld [vmem:[%s288_s9 + $0x8] sm:$0xff]  ;;  %v4468_v7 = vld [vmem:[%s288_s9 + $0x10] sm:$0xff]  ;;  %s4561_s19 = smov 12   ;;  %s4563_s20 = smov 112  }
  0x11   : > { %v592_v4 = vld [vmem:[%s4630_s12] sm:$0xf]  ;;  %v593_v8 = vld [vmem:[%s4630_s12 + $0x8] sm:$0xf]  ;;  %v4469_v9 = vld [vmem:[%s288_s9 + $0x18] sm:$0xff]  ;;  %4209 = vmatmul.msk.bf16.vlgmr.msra.gmra.mxu0 %vm6790_vm1, %v4466_v2  ;;  %4210 = vmatmul.msk.bf16.vlgmr.msra.gmra.mxu1 %vm6790_vm1, %v4467_v3  ;;  %s4564_s21 = smov 104   ;;  %s6660_s10 = scalar_lea.vmem %s6789_s7, %s4464_s29 }
  0x12   : > { %v601_v5 = vshrl.u32 %v592_v4, 16  ;;  %v604_v6 = vshll.u32 %v592_v4, 16  ;;  %v609_v10 = vshrl.u32 %v593_v8, 16  ;;  %v595_v11 = vld [vmem:[%s4630_s12 + $0x18] sm:$0xf]  ;;  %v612_v12 = vshll.u32 %v593_v8, 16  ;;  %4211 = vmatmul.msk.bf16.vlgmr.msra.gmra.mxu2 %vm6790_vm1, %v4468_v7  ;;  %4212 = vmatmul.msk.bf16.vlgmr.msra.gmra.mxu3 %vm6790_vm1, %v4469_v9  ;;  %vm4753_vm10 = vmand %vm545_vm8, %vm308_vm3 }
  0x13   : > { %v625_v15 = vshrl.u32 %v595_v11, 16  ;;  %v594_v16 = vld [vmem:[%s4630_s12 + $0x10] sm:$0xf]  ;;  %v864_v21 = vld [vmem:[%s4630_s12] sm:$0xf]  ;;  %v628_v23 = vshll.u32 %v595_v11, 16  ;;  %vm4807_vm13 = vmand %vm712_vm11, %vm6793_vm5 }
  0x14   : > { %v603_v13 = vrot.slane %v601_v5, 7  ;;  %v611_v14 = vrot.slane %v609_v10, 7  ;;  %v617_v20 = vshrl.u32 %v594_v16, 16  ;;  %v620_v25 = vshll.u32 %v594_v16, 16  ;;  %v866_v26 = vld [vmem:[%s4630_s12 + $0x10] sm:$0xf]  ;;  %vm4820_vm14 = vmand %vm717_vm12, %vm308_vm3 }
  0x15   : > { %v627_v22 = vrot.slane %v625_v15, 7  ;;  %v873_v28 = vshrl.u32 %v864_v21, 16  ;;  %v889_v30 = vshrl.u32 %v866_v26, 16  ;;  %v876_v33 = vshll.u32 %v864_v21, 16  ;;  %v4213_v36 = vld [vmem:[%s4630_s12 + $0x4] sm:$0xf]  ;;  %vm5013_vm7 = vmand %vm812_vm15, %vm6793_vm5 }
  0x16   : > { %v606_v17 = vor.u32 %v604_v6, %v603_v13  ;;  %v615_v18 = vrot.slane %v611_v14, 4  ;;  %v614_v19 = vor.u32 %v612_v12, %v611_v14  ;;  %v619_v24 = vrot.slane %v617_v20, 7  ;;  %v596_v38 = vld [vmem:[%s4630_s12 + $0x20] sm:$0xf]  ;;  %v865_v43 = vld [vmem:[%s4630_s12 + $0x8] sm:$0xf] }
  0x17   : > { %v607_v27 = vrot.slane %v603_v13, 4  ;;  %v630_v29 = vor.u32 %v628_v23, %v627_v22  ;;  %v875_v32 = vrot.slane %v873_v28, 7  ;;  %v891_v34 = vrot.slane %v889_v30, 7  ;;  %v597_v54 = vld [vmem:[%s4630_s12 + $0x28] sm:$0xf]  ;;  %s4565_s28 = smov 120  }
  0x18   : > { %664 = vrot.lane.b32.xlu0 %v606_v17, %s4557_s13  ;;  %670 = vrot.lane.b32.xlu1 %v615_v18, %s4557_s13  ;;  %v622_v31 = vor.u32 %v620_v25, %v619_v24  ;;  %v892_v35 = vshll.u32 %v866_v26, 16  ;;  %v1146_v40 = vshrl.u32 %v4213_v36, 16  ;;  %v623_v41 = vrot.slane %v619_v24, 4  ;;  %v598_v63 = vld [vmem:[%s4630_s12 + $0x30] sm:$0xf] }
  0x19   : > { %668 = vrot.lane.b32.xlu2 %v614_v19, %s4557_s13  ;;  %v878_v37 = vor.u32 %v876_v33, %v875_v32  ;;  %v633_v42 = vshrl.u32 %v596_v38, 16  ;;  %v1149_v45 = vshll.u32 %v4213_v36, 16  ;;  %v636_v46 = vshll.u32 %v596_v38, 16  ;;  %v867_v1 = vld [vmem:[%s4630_s12 + $0x18] sm:$0xf] }
  0x1a   : > { %v894_v39 = vor.u32 %v892_v35, %v891_v34  ;;  %v1148_v44 = vrot.slane %v1146_v40, 7  ;;  %v879_v48 = vrot.slane %v875_v32, 4  ;;  %v881_v49 = vshrl.u32 %v865_v43, 16  ;;  %v4215_v8 = vld [vmem:[%s4630_s12 + $0x14] sm:$0xf] }
  0x1b   : > { %v635_v47 = vrot.slane %v633_v42, 7  ;;  %v884_v53 = vshll.u32 %v865_v43, 16  ;;  %v641_v57 = vshrl.u32 %v597_v54, 16  ;;  %v631_v58 = vrot.slane %v627_v22, 4  ;;  %v868_v11 = vld [vmem:[%s4630_s12 + $0x20] sm:$0xf] }
  0x1c   : > { %v1151_v50 = vor.u32 %v1149_v45, %v1148_v44  ;;  %v883_v52 = vrot.slane %v881_v49, 7  ;;  %v1152_v56 = vrot.slane %v1148_v44, 4  ;;  %v644_v0 = vshll.u32 %v597_v54, 16  ;;  %v4214_v21 = vld [vmem:[%s4630_s12 + $0xc] sm:$0xf] }
  0x1d   : > { %v638_v51 = vor.u32 %v636_v46, %v635_v47  ;;  %v643_v59 = vrot.slane %v641_v57, 7  ;;  %v639_v60 = vrot.slane %v635_v47, 4  ;;  %v895_v2 = vrot.slane %v891_v34, 4  ;;  %v313_v22 = vld [vmem:[#allocation2 + $0x8] sm:$0x1] }
  0x1e   : > { %v886_v55 = vor.u32 %v884_v53, %v883_v52  ;;  %v887_v62 = vrot.slane %v883_v52, 4  ;;  %v649_v3 = vshrl.u32 %v598_v63, 16  ;;  %v897_v5 = vshrl.u32 %v867_v1, 16  ;;  %v345_v26 = vld [vmem:[#allocation2 + $0xc] sm:$0x1] }
  0x1f   : > { %v647_v61 = vrot.slane %v643_v59, 4  ;;  %v646_v4 = vor.u32 %v644_v0, %v643_v59  ;;  %v652_v7 = vshll.u32 %v598_v63, 16  ;;  %v900_v10 = vshll.u32 %v867_v1, 16  ;;  %v316_v45 = vld [vmem:[#allocation2 + $0x10] sm:$0x1] }
  0x20   : > { %666 = vrot.lane.b32.xlu0 %v607_v27, %s4557_s13  ;;  %676 = vrot.lane.b32.xlu1 %v630_v29, %s4557_s13  ;;  %v651_v6 = vrot.slane %v649_v3, 7  ;;  %v899_v9 = vrot.slane %v897_v5, 7  ;;  %v1162_v12 = vshrl.u32 %v4215_v8, 16  ;;  %v1165_v13 = vshll.u32 %v4215_v8, 16  ;;  %v354_v57 = vld [vmem:[#allocation2 + $0x24] sm:$0x1] }
  0x21   : > { %672 = vrot.lane.b32.xlu2 %v622_v31, %s4557_s13  ;;  %v905_v16 = vshrl.u32 %v868_v11, 16  ;;  %v908_v20 = vshll.u32 %v868_v11, 16  ;;  %v1154_v24 = vshrl.u32 %v4214_v21, 16  ;;  %v6802_v25 = vmov 0  ;;  %v357_v11 = vld [vmem:[#allocation2 + $0x2c] sm:$0x1] }
  0x22   : > { %v1164_v14 = vrot.slane %v1162_v12, 7  ;;  %v654_v15 = vor.u32 %v652_v7, %v651_v6  ;;  %v902_v17 = vor.u32 %v900_v10, %v899_v9  ;;  %v6803_v25 = vsel %vm4676_vm4, 4294967295, %v6802_v25  ;;  %v325_v7 = vld [vmem:[#allocation2 + $0x28] sm:$0x1] }
  0x23   : > { %v907_v19 = vrot.slane %v905_v16, 7  ;;  %v655_v27 = vrot.slane %v651_v6, 4  ;;  %v314_v28 = vsel %vm4676_vm4, 0, %v313_v22  ;;  %v6804_v29 = vmov 0 }
  0x24   : > { %v1167_v18 = vor.u32 %v1165_v13, %v1164_v14  ;;  %v6805_v29 = vsel %vm4684_vm6, 4294967295, %v6804_v29  ;;  %315 = vst [vmem:[#allocation2 + $0x8] sm:$0x1] %v314_v28  ;;  %v346_v30 = vsel %vm4684_vm6, 0, %v345_v26  ;;  %v1156_v31 = vrot.slane %v1154_v24, 7 }
  0x25   : > { %v910_v23 = vor.u32 %v908_v20, %v907_v19  ;;  %347 = vst [vmem:[#allocation2 + $0xc] sm:$0x1] %v346_v30  ;;  %v1157_v32 = vshll.u32 %v4214_v21, 16  ;;  %v903_v34 = vrot.slane %v899_v9, 4  ;;  %v911_v35 = vrot.slane %v907_v19, 4 }
  0x26   : > { %v1168_v36 = vrot.slane %v1164_v14, 4  ;;  %v1160_v42 = vrot.slane %v1156_v31, 4  ;;  %v317_v47 = vsel %vm4676_vm4, 0, %v316_v45  ;;  %v328_v9 = vld [vmem:[#allocation2 + $0x30] sm:$0x1]  ;;  %v326_v10 = vsel %vm4676_vm4, 0, %v325_v7 }
  0x27   : > { %v1159_v33 = vor.u32 %v1157_v32, %v1156_v31  ;;  %318 = vst [vmem:[#allocation2 + $0x10] sm:$0x1] %v317_v47  ;;  %v329_v12 = vsel %vm4676_vm4, 0, %v328_v9  ;;  %vm817_vm8 = vcmask 90176   ;;  %vm989_vm12 = vcmask 122976  }
  0x28   : > { %936 = vrot.lane.b32.xlu0 %v878_v37, %s4558_s14  ;;  %944 = vrot.lane.b32.xlu1 %v894_v39, %s4558_s14  ;;  %v4221_v37 = vld [vmem:[%s4630_s12 + $0x4] sm:$0xf]  ;;  %327 = vst [vmem:[#allocation2 + $0x28] sm:$0x1] %v326_v10  ;;  %vm1084_vm15 = vcmask 158848   ;;  %vm1089_vm1 = vcmask 155776  }
  0x29   : > { %674 = vrot.lane.b32.xlu2 %v623_v41, %s4557_s13  ;;  %v1418_v38 = vshrl.u32 %v4221_v37, 16  ;;  %v1421_v40 = vshll.u32 %v4221_v37, 16  ;;  %330 = vst [vmem:[#allocation2 + $0x30] sm:$0x1] %v329_v12  ;;  %vm5125_vm2 = vmand %vm1089_vm1, %vm308_vm3  ;;  %vm300_vm1 = vcmask 257024  }
  0x2b   : > { %v1420_v39 = vrot.slane %v1418_v38, 7  ;;  %v542_v16 = vld [vmem:[#allocation2 + $0x8] sm:$0xf] }
  0x2c   : > { %v547_v28 = vld [vmem:[#allocation2 + $0xc] sm:$0x1] }
  0x2d   : > { %v1423_v41 = vor.u32 %v1421_v40, %v1420_v39  ;;  %v1424_v44 = vrot.slane %v1420_v39, 4 }
  0x30   : > { %938 = vrot.lane.b32.xlu0 %v879_v48, %s4558_s14  ;;  %1209 = vrot.lane.b32.xlu1 %v1151_v50, %s4559_s15  ;;  %v348_v48 = vld [vmem:[#allocation2 + $0x14] sm:$0x1]  ;;  %v319_v50 = vld [vmem:[#allocation2 + $0x18] sm:$0x1] }
  0x31   : > { %680 = vrot.lane.b32.xlu2 %v638_v51, %s4557_s13  ;;  %v349_v49 = vsel %vm4684_vm6, 0, %v348_v48  ;;  %v351_v51 = vld [vmem:[#allocation2 + $0x1c] sm:$0x1]  ;;  %v320_v52 = vsel %vm4676_vm4, 0, %v319_v50 }
  0x32   : > { %350 = vst [vmem:[#allocation2 + $0x14] sm:$0x1] %v349_v49  ;;  %v352_v53 = vsel %vm4684_vm6, 0, %v351_v51  ;;  %v363_v51 = vld [vmem:[#allocation2 + $0x3c] sm:$0x1] }
  0x33   : > { %321 = vst [vmem:[#allocation2 + $0x18] sm:$0x1] %v320_v52 }
  0x34   : > { %353 = vst [vmem:[#allocation2 + $0x1c] sm:$0x1] %v352_v53 }
  0x38   : > { %940 = vrot.lane.b32.xlu0 %v886_v55, %s4558_s14  ;;  %1211 = vrot.lane.b32.xlu1 %v1152_v56, %s4559_s15  ;;  %v322_v55 = vld [vmem:[#allocation2 + $0x20] sm:$0x1] }
  0x39   : > { %678 = vrot.lane.b32.xlu2 %v631_v58, %s4557_s13  ;;  %v323_v56 = vsel %vm4676_vm4, 0, %v322_v55  ;;  %v355_v58 = vsel %vm4684_vm6, 0, %v354_v57  ;;  %v334_v57 = vld [vmem:[#allocation2 + $0x40] sm:$0x1] }
  0x3a   : > { %324 = vst [vmem:[#allocation2 + $0x20] sm:$0x1] %v323_v56  ;;  %v556_v30 = vld [vmem:[#allocation2 + $0x18] sm:$0xf]  ;;  %v335_v9 = vsel %vm4676_vm4, 0, %v334_v57 }
  0x3b   : > { %356 = vst [vmem:[#allocation2 + $0x24] sm:$0x1] %v355_v58  ;;  %v559_v37 = vld [vmem:[#allocation2 + $0x1c] sm:$0x1] }
  0x3c   : > { %336 = vst [vmem:[#allocation2 + $0x40] sm:$0x1] %v335_v9 }
  0x40   : > { %682 = vrot.lane.b32.xlu0 %v639_v60, %s4557_s13  ;;  %686 = vrot.lane.b32.xlu1 %v647_v61, %s4557_s13 }
  0x41   : > { %942 = vrot.lane.b32.xlu2 %v887_v62, %s4558_s14  ;;  %v4727_v62 = vld [vmem:[%s6785_s3] ss:$0 sm:$0xff] }
  0x48   : > { %946 = vrot.lane.b32.xlu0 %v895_v2, %s4558_s14  ;;  %1217 = vrot.lane.b32.xlu1 %v1167_v18, %s4559_s15  ;;  %v360_v18 = vld [vmem:[#allocation2 + $0x34] sm:$0x1] }
  0x49   : > { %684 = vrot.lane.b32.xlu2 %v646_v4, %s4557_s13  ;;  %v361_v24 = vsel %vm4684_vm6, 0, %v360_v18 }
  0x4a   : > { %362 = vst [vmem:[#allocation2 + $0x34] sm:$0x1] %v361_v24  ;;  %v6812_v24 = vmov 0 }
  0x4b   : > { %v6813_v24 = vsel %vm4820_vm14, 4294967295, %v6812_v24 }
  0x50   : > { %688 = vrot.lane.b32.xlu0 %v654_v15, %s4557_s13  ;;  %1481 = vrot.lane.b32.xlu1 %v1423_v41, %s4560_s16 }
  0x51   : > { %948 = vrot.lane.b32.xlu2 %v902_v17, %s4558_s14  ;;  %v358_v17 = vsel %vm4684_vm6, 0, %v357_v11 }
  0x52   : > { %359 = vst [vmem:[#allocation2 + $0x2c] sm:$0x1] %v358_v17 }
  0x58   : > { %952 = vrot.lane.b32.xlu0 %v910_v23, %s4558_s14 }
  0x59   : > { %690 = vrot.lane.b32.xlu2 %v655_v27, %s4557_s13  ;;  %v870_v27 = vld [vmem:[%s4630_s12 + $0x30] sm:$0xf] }
  0x60   : > { %1213 = vrot.lane.b32.xlu0 %v1159_v33, %s4559_s15 }
  0x61   : > { %950 = vrot.lane.b32.xlu2 %v903_v34, %s4558_s14 }
  0x68   : > { %954 = vrot.lane.b32.xlu0 %v911_v35, %s4558_s14 }
  0x69   : > { %1215 = vrot.lane.b32.xlu2 %v1160_v42, %s4559_s15  ;;  %v331_v42 = vld [vmem:[#allocation2 + $0x38] sm:$0x1] }
  0x6a   : > { %v332_v58 = vsel %vm4676_vm4, 0, %v331_v42  ;;  %v562_v42 = vld [vmem:[#allocation2 + $0x20] sm:$0xf] }
  0x6b   : > { %333 = vst [vmem:[#allocation2 + $0x38] sm:$0x1] %v332_v58 }
  0x70   : > { %1219 = vrot.lane.b32.xlu0 %v1168_v36, %s4559_s15 }
  0x73   : > { %v4697_v43 = vpop.permute.xlu2 %668 }
  0x78   : > { %1483 = vrot.lane.b32.xlu0 %v1424_v44, %s4560_s16 }
  0x7b   : > { %v4702_v46 = vpop.permute.xlu2 %672 }
  0x83   : > { %v4712_v54 = vpop.permute.xlu2 %674 }
  0x8a   : > { %v4718_v59 = vpop.permute.xlu0 %664  ;;  %v4720_v60 = vpop.permute.xlu1 %670 }
  0x8b   : > { %v4722_v61 = vpop.permute.xlu2 %680 }
  0x8e   : > { %v431_v63 = vpop.f32.mrf.mxu0  ;;  %v436_v0 = vpop.f32.mrf.mxu1 }
  0x8f   : > { %v432_v1 = vadd.f32 %v4727_v62, %v431_v63  ;;  %v437_v2 = vadd.f32 %v4727_v62, %v436_v0 }
  0x91   : > { %v451_v4 = vpack.c.bf16 %v432_v1, %v432_v1  ;;  %v453_v5 = vpack.c.bf16 %v437_v2, %v437_v2  ;;  %v364_v1 = vsel %vm4684_vm6, 0, %v363_v51 }
  0x92   : > { %v4731_v3 = vpop.permute.xlu0 %666  ;;  %v4733_v6 = vpop.permute.xlu1 %676  ;;  %365 = vst [vmem:[#allocation2 + $0x3c] sm:$0x1] %v364_v1 }
  0x93   : > { %v4735_v8 = vpop.permute.xlu2 %678  ;;  %v460_v13 = vshrl.u32 %v451_v4, 16  ;;  %v476_v14 = vshrl.u32 %v453_v5, 16  ;;  %v479_v15 = vshll.u32 %v453_v5, 16  ;;  %v463_v20 = vshll.u32 %v451_v4, 16 }
  0x95   : > { %v462_v19 = vrot.slane %v460_v13, 7  ;;  %v478_v22 = vrot.slane %v476_v14, 7  ;;  %v441_v23 = vpop.f32.mrf.mxu2  ;;  %v446_v26 = vpop.f32.mrf.mxu3 }
  0x96   : > { %v433_v31 = vpop.f32.mrf.mxu0  ;;  %v438_v32 = vpop.f32.mrf.mxu1  ;;  %v442_v33 = vadd.f32 %v4727_v62, %v441_v23  ;;  %v447_v44 = vadd.f32 %v4727_v62, %v446_v26 }
  0x97   : > { %v4758_v34 = vor.u32 %v463_v20, %v462_v19  ;;  %v4760_v35 = vrot.slane %v462_v19, 4  ;;  %v4762_v36 = vor.u32 %v479_v15, %v478_v22  ;;  %v4764_v38 = vrot.slane %v478_v22, 4  ;;  %v553_v19 = vld [vmem:[#allocation2 + $0x14] sm:$0x1] }
  0x98   : > { %v434_v39 = vadd.f32 %v4727_v62, %v433_v31  ;;  %v439_v40 = vadd.f32 %v4727_v62, %v438_v32  ;;  %v4782_v49 = vpack.c.bf16 %v442_v33, %v442_v33  ;;  %v4800_v7 = vpack.c.bf16 %v447_v44, %v447_v44 }
  0x99   : > { %v543_v45 = vsel %vm4745_vm9, %v4758_v34, %v542_v16  ;;  %v548_v47 = vsel %vm4753_vm10, %v4760_v35, %v547_v28  ;;  %v557_v48 = vsel %vm4745_vm9, %v4762_v36, %v556_v30  ;;  %772 = vrot.lane.b32.xlu2 %v4762_v36, %s4557_s13  ;;  %v560_v53 = vsel %vm4753_vm10, %v4764_v38, %v559_v37  ;;  %v550_v16 = vld [vmem:[#allocation2 + $0x10] sm:$0xf] }
  0x9a   : > { %v4768_v41 = vpop.permute.xlu0 %936  ;;  %v4784_v50 = vpop.permute.xlu1 %944  ;;  %544 = vst [vmem:[#allocation2 + $0x8] sm:$0xf] %v543_v45  ;;  %v452_v55 = vpack.c.bf16 %v434_v39, %v434_v39  ;;  %1036 = vrot.lane.b32.xlu0 %v4758_v34, %s4558_s14  ;;  %764 = vrot.lane.b32.xlu1 %v4758_v34, %s4557_s13  ;;  %v454_v56 = vpack.c.bf16 %v439_v40, %v439_v40  ;;  %v492_v4 = vshrl.u32 %v4782_v49, 16  ;;  %v6810_v15 = vmov 0 }
  0x9b   : > { %v4786_v52 = vpop.permute.xlu2 %942  ;;  %549 = vst [vmem:[#allocation2 + $0xc] sm:$0x1] %v548_v47  ;;  %v6811_v15 = vsel %vm4807_vm13, 4294967295, %v6810_v15  ;;  %v495_v28 = vshll.u32 %v4782_v49, 16  ;;  %v508_v31 = vshrl.u32 %v4800_v7, 16 }
  0x9c   : > { %558 = vst [vmem:[#allocation2 + $0x18] sm:$0xf] %v557_v48  ;;  %v468_v63 = vshrl.u32 %v452_v55, 16  ;;  %v484_v0 = vshrl.u32 %v454_v56, 16  ;;  %v471_v2 = vshll.u32 %v452_v55, 16  ;;  %v487_v13 = vshll.u32 %v454_v56, 16 }
  0x9d   : > { %561 = vst [vmem:[#allocation2 + $0x1c] sm:$0x1] %v560_v53  ;;  %v443_v5 = vpop.f32.mrf.mxu2  ;;  %v448_v10 = vpop.f32.mrf.mxu3  ;;  %v494_v26 = vrot.slane %v492_v4, 7  ;;  %v565_v55 = vld [vmem:[#allocation2 + $0x24] sm:$0x1] }
  0x9e   : > { %v470_v11 = vrot.slane %v468_v63, 7  ;;  %v486_v12 = vrot.slane %v484_v0, 7  ;;  %v444_v14 = vadd.f32 %v4727_v62, %v443_v5  ;;  %v449_v22 = vadd.f32 %v4727_v62, %v448_v10  ;;  %v568_v63 = vld [vmem:[#allocation2 + $0x28] sm:$0xf]  ;;  %v574_v10 = vld [vmem:[#allocation2 + $0x30] sm:$0xf] }
  0x9f   : > { %v4858_v58 = vrot.slane %v494_v26, 4  ;;  %v4863_v1 = vor.u32 %v495_v28, %v494_v26 }
  0xa0   : > { %v4811_v17 = vor.u32 %v471_v2, %v470_v11  ;;  %v4813_v18 = vrot.slane %v470_v11, 4  ;;  %v456_v30 = vpack.c.bf16 %v444_v14, %v444_v14  ;;  %v4836_v39 = vor.u32 %v487_v13, %v486_v12  ;;  %v577_v13 = vld [vmem:[#allocation2 + $0x34] sm:$0x1] }
  0xa1   : > { %v714_v23 = vld [vmem:[#allocation2 + $0x8] sm:$0xf]  ;;  %774 = vrot.lane.b32.xlu2 %v4764_v38, %s4557_s13  ;;  %v4838_v40 = vrot.slane %v486_v12, 4  ;;  %v458_v56 = vpack.c.bf16 %v449_v22, %v449_v22  ;;  %v510_v2 = vrot.slane %v508_v31, 7  ;;  %v511_v11 = vshll.u32 %v4800_v7, 16 }
  0xa2   : > { %v4815_v20 = vpop.permute.xlu0 %938  ;;  %v4828_v32 = vpop.permute.xlu1 %1209  ;;  %v715_v62 = vsel %vm4807_vm13, %v4718_v59, %v714_v23  ;;  %v551_v33 = vsel %vm4745_vm9, %v4811_v17, %v550_v16  ;;  %v719_v37 = vld [vmem:[#allocation2 + $0xc] sm:$0x1]  ;;  %1038 = vrot.lane.b32.xlu0 %v4760_v35, %s4558_s14  ;;  %v554_v59 = vsel %vm4753_vm10, %v4813_v18, %v553_v19  ;;  %766 = vrot.lane.b32.xlu1 %v4760_v35, %s4557_s13  ;;  %v500_v47 = vshrl.u32 %v456_v30, 16  ;;  %v580_v23 = vld [vmem:[#allocation2 + $0x38] sm:$0xf] }
  0xa3   : > { %v4842_v44 = vpop.permute.xlu2 %684  ;;  %716 = vst [vmem:[#allocation2 + $0x8] sm:$0xf] %v715_v62  ;;  %v728_v45 = vld [vmem:[#allocation2 + $0x18] sm:$0xf]  ;;  %v503_v48 = vshll.u32 %v456_v30, 16  ;;  %v720_v51 = vsel %vm4820_vm14, %v4731_v3, %v719_v37  ;;  %v516_v4 = vshrl.u32 %v458_v56, 16  ;;  %v566_v5 = vsel %vm4753_vm10, %v4838_v40, %v565_v55 }
  0xa4   : > { %v729_v49 = vsel %vm4807_vm13, %v4702_v46, %v728_v45  ;;  %552 = vst [vmem:[#allocation2 + $0x10] sm:$0xf] %v551_v33  ;;  %v731_v53 = vld [vmem:[#allocation2 + $0x1c] sm:$0x1]  ;;  %v502_v0 = vrot.slane %v500_v47, 7  ;;  %v563_v46 = vsel %vm4745_vm9, %v4836_v39, %v562_v42  ;;  %v569_v12 = vsel %vm4745_vm9, %v4863_v1, %v568_v63 }
  0xa5   : > { %730 = vst [vmem:[#allocation2 + $0x18] sm:$0xf] %v729_v49  ;;  %v732_v57 = vsel %vm4820_vm14, %v4712_v54, %v731_v53  ;;  %v571_v3 = vld [vmem:[#allocation2 + $0x2c] sm:$0x1]  ;;  %v4883_v19 = vrot.slane %v510_v2, 4  ;;  %v518_v26 = vrot.slane %v516_v4, 7  ;;  %v4897_v31 = vor.u32 %v511_v11, %v510_v2 }
  0xa6   : > { %555 = vst [vmem:[#allocation2 + $0x14] sm:$0x1] %v554_v59  ;;  %v4868_v54 = vor.u32 %v503_v48, %v502_v0  ;;  %v4870_v9 = vrot.slane %v502_v0, 4  ;;  %v572_v16 = vsel %vm4753_vm10, %v4858_v58, %v571_v3  ;;  %v519_v28 = vshll.u32 %v458_v56, 16  ;;  %v583_v62 = vld [vmem:[#allocation2 + $0x3c] sm:$0x1] }
  0xa7   : > { %721 = vst [vmem:[#allocation2 + $0xc] sm:$0x1] %v720_v51  ;;  %v581_v37 = vsel %vm4745_vm9, %v4897_v31, %v580_v23  ;;  %v584_v45 = vsel %vm4753_vm10, %v4883_v19, %v583_v62  ;;  %v366_v59 = vld [vmem:[#allocation2 + $0x44] sm:$0x1]  ;;  %v586_v48 = vld [vmem:[#allocation2 + $0x40] sm:$0xf] }
  0xa8   : > { %733 = vst [vmem:[#allocation2 + $0x1c] sm:$0x1] %v732_v57  ;;  %v575_v7 = vsel %vm4745_vm9, %v4868_v54, %v574_v10  ;;  %v578_v30 = vsel %vm4753_vm10, %v4870_v9, %v577_v13  ;;  %v4910_v47 = vor.u32 %v519_v28, %v518_v26  ;;  %v921_v23 = vshrl.u32 %v870_v27, 16 }
  0xa9   : > { %564 = vst [vmem:[#allocation2 + $0x20] sm:$0xf] %v563_v46  ;;  %1044 = vrot.lane.b32.xlu2 %v4762_v36, %s4558_s14  ;;  %v924_v28 = vshll.u32 %v870_v27, 16 }
  0xaa   : > { %v4876_v14 = vpop.permute.xlu0 %940  ;;  %v4885_v22 = vpop.permute.xlu1 %1211  ;;  %567 = vst [vmem:[#allocation2 + $0x24] sm:$0x1] %v566_v5  ;;  %1317 = vrot.lane.b32.xlu0 %v4762_v36, %s4561_s19  ;;  %1046 = vrot.lane.b32.xlu1 %v4764_v38, %s4558_s14  ;;  %v4939_v5 = vrot.slane %v518_v26, 4  ;;  %v4976_v26 = vrot.slane %v921_v23, 7 }
  0xab   : > { %570 = vst [vmem:[#allocation2 + $0x28] sm:$0xf] %v569_v12  ;;  %v4899_v36 = vpop.permute.xlu2 %948  ;;  %v722_v21 = vld [vmem:[#allocation2 + $0x10] sm:$0xf] }
  0xac   : > { %573 = vst [vmem:[#allocation2 + $0x2c] sm:$0x1] %v572_v16 }
  0xad   : > { %v725_v33 = vld [vmem:[#allocation2 + $0x14] sm:$0x1]  ;;  %576 = vst [vmem:[#allocation2 + $0x30] sm:$0xf] %v575_v7 }
  0xae   : > { %v726_v42 = vsel %vm4820_vm14, %v4720_v60, %v725_v33  ;;  %579 = vst [vmem:[#allocation2 + $0x34] sm:$0x1] %v578_v30  ;;  %v367_v60 = vsel %vm4684_vm6, 0, %v366_v59  ;;  %v869_v30 = vld [vmem:[%s4630_s12 + $0x28] sm:$0xf]  ;;  %v926_v33 = vor.u32 %v924_v28, %v4976_v26 }
  0xaf   : > { %727 = vst [vmem:[#allocation2 + $0x14] sm:$0x1] %v726_v42  ;;  %v913_v62 = vshrl.u32 %v869_v30, 16  ;;  %v916_v42 = vshll.u32 %v869_v30, 16  ;;  %v4217_v59 = vld [vmem:[%s4630_s12 + $0x24] sm:$0xf] }
  0xb0   : > { %v734_v49 = vld [vmem:[#allocation2 + $0x20] sm:$0xf]  ;;  %582 = vst [vmem:[#allocation2 + $0x38] sm:$0xf] %v581_v37  ;;  %v831_v30 = vld [vmem:[#allocation2 + $0x1c] sm:$0x1] }
  0xb1   : > { %v735_v53 = vsel %vm4807_vm13, %v4733_v6, %v734_v49  ;;  %v737_v55 = vld [vmem:[#allocation2 + $0x24] sm:$0x1]  ;;  %585 = vst [vmem:[#allocation2 + $0x3c] sm:$0x1] %v584_v45  ;;  %1309 = vrot.lane.b32.xlu2 %v4758_v34, %s4561_s19  ;;  %v587_v6 = vsel %vm4745_vm9, %v4910_v47, %v586_v48  ;;  %v915_v37 = vrot.slane %v913_v62, 7  ;;  %vm984_vm9 = vcmask 126048  }
  0xb2   : > { %v683_v51 = vpop.permute.xlu0 %682  ;;  %736 = vst [vmem:[#allocation2 + $0x20] sm:$0xf] %v735_v53  ;;  %v738_v56 = vsel %vm4820_vm14, %v4735_v8, %v737_v55  ;;  %780 = vrot.lane.b32.xlu0 %v4863_v1, %s4557_s13  ;;  %1311 = vrot.lane.b32.xlu1 %v4760_v35, %s4561_s19  ;;  %v687_v57 = vpop.permute.xlu1 %686  ;;  %v740_v63 = vld [vmem:[#allocation2 + $0x28] sm:$0xf]  ;;  %v4223_v48 = vld [vmem:[%s4630_s12 + $0x14] sm:$0xf]  ;;  %vm5032_vm11 = vmand %vm984_vm9, %vm6793_vm5 }
  0xb3   : > { %739 = vst [vmem:[#allocation2 + $0x24] sm:$0x1] %v738_v56  ;;  %v743_v34 = vld [vmem:[#allocation2 + $0x2c] sm:$0x1]  ;;  %v691_v35 = vpop.permute.xlu2 %690  ;;  %v741_v4 = vsel %vm4807_vm13, %v4722_v61, %v740_v63  ;;  %v918_v49 = vor.u32 %v916_v42, %v915_v37  ;;  %v1434_v53 = vshrl.u32 %v4223_v48, 16  ;;  %v1181_v56 = vshll.u32 %v4217_v59, 16  ;;  %vm5060_vm9 = vmand %vm1084_vm15, %vm6793_vm5 }
  0xb4   : > { %368 = vst [vmem:[#allocation2 + $0x44] sm:$0x1] %v367_v60  ;;  %v744_v0 = vsel %vm4820_vm14, %v683_v51, %v743_v34  ;;  %v746_v46 = vld [vmem:[#allocation2 + $0x30] sm:$0xf]  ;;  %v919_v51 = vrot.slane %v915_v37, 4  ;;  %v1437_v34 = vshll.u32 %v4223_v48, 16 }
  0xb5   : > { %588 = vst [vmem:[#allocation2 + $0x40] sm:$0xf] %v587_v6  ;;  %v747_v8 = vsel %vm4807_vm13, %v4842_v44, %v746_v46  ;;  %v749_v3 = vld [vmem:[#allocation2 + $0x34] sm:$0x1]  ;;  %v723_v44 = vsel %vm4807_vm13, %v4697_v43, %v722_v21  ;;  %v4995_v6 = vrot.slane %v1434_v53, 7 }
  0xb6   : > { %745 = vst [vmem:[#allocation2 + $0x2c] sm:$0x1] %v744_v0  ;;  %v750_v2 = vsel %vm4820_vm14, %v687_v57, %v749_v3  ;;  %v4222_v57 = vld [vmem:[%s4630_s12 + $0xc] sm:$0xf] }
  0xb7   : > { %748 = vst [vmem:[#allocation2 + $0x30] sm:$0xf] %v747_v8  ;;  %v752_v13 = vld [vmem:[#allocation2 + $0x38] sm:$0xf]  ;;  %v1426_v0 = vshrl.u32 %v4222_v57, 16  ;;  %v1439_v46 = vor.u32 %v1437_v34, %v4995_v6  ;;  %v1429_v21 = vshll.u32 %v4222_v57, 16 }
  0xb8   : > { %751 = vst [vmem:[#allocation2 + $0x34] sm:$0x1] %v750_v2  ;;  %v755_v11 = vld [vmem:[#allocation2 + $0x3c] sm:$0x1] }
  0xb9   : > { %788 = vrot.lane.b32.xlu2 %v4897_v31, %s4557_s13  ;;  %v756_v12 = vsel %vm4820_vm14, %v691_v35, %v755_v11  ;;  %742 = vst [vmem:[#allocation2 + $0x28] sm:$0xf] %v741_v4  ;;  %v1428_v3 = vrot.slane %v1426_v0, 7 }
  0xba   : > { %v4941_v10 = vpop.permute.xlu0 %946  ;;  %778 = vrot.lane.b32.xlu0 %v4838_v40, %s4557_s13  ;;  %757 = vst [vmem:[#allocation2 + $0x3c] sm:$0x1] %v756_v12  ;;  %782 = vrot.lane.b32.xlu1 %v4858_v58, %s4557_s13  ;;  %v828_v12 = vld [vmem:[#allocation2 + $0x18] sm:$0xf] }
  0xbb   : > { %v589_v61 = vld [vmem:[#allocation2 + $0x44] sm:$0x1]  ;;  %724 = vst [vmem:[#allocation2 + $0x10] sm:$0xf] %v723_v44  ;;  %v4991_v55 = vpop.permute.xlu2 %950  ;;  %v1431_v2 = vor.u32 %v1429_v21, %v1428_v3  ;;  %v1432_v35 = vrot.slane %v1428_v3, 4 }
  0xbc   : > { %v590_v43 = vsel %vm4753_vm10, %v4939_v5, %v589_v61  ;;  %vm5027_vm10 = vmand %vm817_vm8, %vm308_vm3 }
  0xbd   : > { %591 = vst [vmem:[#allocation2 + $0x44] sm:$0x1] %v590_v43  ;;  %v4216_v43 = vld [vmem:[%s4630_s12 + $0x1c] sm:$0xf]  ;;  %vm5048_vm8 = vmand %vm989_vm12, %vm308_vm3  ;;  %vm1257_vm12 = vcmask 191648  }
  0xbe   : > { %v1173_v37 = vshll.u32 %v4216_v43, 16  ;;  %vm5082_vm15 = vmand %vm1257_vm12, %vm6793_vm5  ;;  %vm1357_vm12 = vcmask 224448  }
  0xbf   : > { %vm5114_vm0 = vmand %vm1357_vm12, %vm6793_vm5  ;;  %vm1262_vm12 = vcmask 188576   ;;  %vm6830_vm5 = vcmask 253952  }
  0xc0   : > { %vm5154_vm14 = vmand %vm1262_vm12, %vm308_vm3 }
  0xc1   : > { %1052 = vrot.lane.b32.xlu2 %v4863_v1, %s4558_s14 }
  0xc2   : > { %v689_v16 = vpop.permute.xlu0 %688  ;;  %1042 = vrot.lane.b32.xlu0 %v4813_v18, %s4558_s14  ;;  %790 = vrot.lane.b32.xlu1 %v4883_v19, %s4557_s13 }
  0xc3   : > { %v753_v7 = vsel %vm4807_vm13, %v689_v16, %v752_v13  ;;  %v5004_v8 = vpop.permute.xlu2 %1215  ;;  %v1170_v16 = vshrl.u32 %v4216_v43, 16  ;;  %vm6833_vm13 = vmmov %vm6830_vm5 }
  0xc4   : > { %754 = vst [vmem:[#allocation2 + $0x38] sm:$0xf] %v753_v7  ;;  %v1218_v7 = vpop.permute.xlu1 %1217 }
  0xc9   : > { %1054 = vrot.lane.b32.xlu2 %v4858_v58, %s4558_s14 }
  0xca   : > { %786 = vrot.lane.b32.xlu0 %v4870_v9, %s4557_s13  ;;  %768 = vrot.lane.b32.xlu1 %v4811_v17, %s4557_s13  ;;  %v4985_v45 = vpop.permute.xlu0 %952 }
  0xd1   : > { %776 = vrot.lane.b32.xlu2 %v4836_v39, %s4557_s13 }
  0xd2   : > { %1315 = vrot.lane.b32.xlu0 %v4813_v18, %s4561_s19  ;;  %770 = vrot.lane.b32.xlu1 %v4813_v18, %s4557_s13  ;;  %v1178_v18 = vshrl.u32 %v4217_v59, 16 }
  0xd4   : > { %v1180_v60 = vrot.slane %v1178_v18, 7  ;;  %v5054_v18 = vpop.permute.xlu1 %1481 }
  0xd6   : > { %v1183_v63 = vor.u32 %v1181_v56, %v1180_v60  ;;  %v1184_v13 = vrot.slane %v1180_v60, 4  ;;  %v4224_v60 = vld [vmem:[%s4630_s12 + $0x1c] sm:$0xf] }
  0xd7   : > { %v1442_v0 = vshrl.u32 %v4224_v60, 16  ;;  %v1445_v21 = vshll.u32 %v4224_v60, 16 }
  0xd9   : > { %1313 = vrot.lane.b32.xlu2 %v4811_v17, %s4561_s19  ;;  %v5075_v3 = vrot.slane %v1442_v0, 7 }
  0xda   : > { %960 = vrot.lane.b32.xlu0 %v926_v33, %s4558_s14  ;;  %1040 = vrot.lane.b32.xlu1 %v4811_v17, %s4558_s14  ;;  %v5000_v17 = vpop.permute.xlu0 %1213  ;;  %v1172_v33 = vrot.slane %v1170_v16, 7 }
  0xdb   : > { %v1447_v43 = vor.u32 %v1445_v21, %v5075_v3 }
  0xdc   : > { %v1176_v16 = vrot.slane %v1172_v33, 4 }
  0xe1   : > { %956 = vrot.lane.b32.xlu2 %v918_v49, %s4558_s14  ;;  %v1175_v49 = vor.u32 %v1173_v37, %v1172_v33  ;;  %v5095_v37 = vld [vmem:[%s4630_s12 + $0x2c] sm:$0xf] }
  0xe2   : > { %958 = vrot.lane.b32.xlu0 %v919_v51, %s4558_s14  ;;  %1048 = vrot.lane.b32.xlu1 %v4836_v39, %s4558_s14  ;;  %v5009_v4 = vpop.permute.xlu0 %954  ;;  %v1186_v60 = vshrl.u32 %v5095_v37, 16 }
  0xe4   : > { %v5110_v0 = vrot.slane %v1186_v60, 7 }
  0xe9   : > { %1225 = vrot.lane.b32.xlu2 %v1183_v63, %s4559_s15 }
  0xea   : > { %1489 = vrot.lane.b32.xlu0 %v1439_v46, %s4560_s16  ;;  %1050 = vrot.lane.b32.xlu1 %v4838_v40, %s4558_s14  ;;  %v5023_v27 = vpop.permute.xlu0 %1219  ;;  %v927_v46 = vrot.slane %v4976_v26, 4 }
  0xf1   : > { %1485 = vrot.lane.b32.xlu2 %v1431_v2, %s4560_s16 }
  0xf2   : > { %1487 = vrot.lane.b32.xlu0 %v1432_v35, %s4560_s16  ;;  %784 = vrot.lane.b32.xlu1 %v4868_v54, %s4557_s13  ;;  %v5056_v51 = vpop.permute.xlu0 %1483  ;;  %v4279_v35 = vld [vmem:[%s6786_s4 + $0xc] sm:$0xf] }
  0xf3   : > { %v773_v44 = vpop.permute.xlu2 %772 }
  0xf4   : > { %v829_v61 = vsel %vm5013_vm7, %v773_v44, %v828_v12 }
  0xf5   : > { %830 = vst [vmem:[#allocation2 + $0x18] sm:$0xf] %v829_v61 }
  0xf9   : > { %1227 = vrot.lane.b32.xlu2 %v1184_v13, %s4559_s15 }
  0xfa   : > { %1060 = vrot.lane.b32.xlu0 %v4897_v31, %s4558_s14  ;;  %1319 = vrot.lane.b32.xlu1 %v4764_v38, %s4561_s19 }
  0xfb   : > { %v775_v62 = vpop.permute.xlu2 %774 }
  0xfc   : > { %v1000_v42 = vld [vmem:[#allocation2 + $0x18] sm:$0xf]  ;;  %v832_v59 = vsel %vm5027_vm10, %v775_v62, %v831_v30 }
  0xfd   : > { %v1001_v48 = vsel %vm5032_vm11, %v4784_v50, %v1000_v42  ;;  %833 = vst [vmem:[#allocation2 + $0x1c] sm:$0x1] %v832_v59  ;;  %v852_v42 = vld [vmem:[#allocation2 + $0x38] sm:$0xf] }
  0xfe   : > { %1002 = vst [vmem:[#allocation2 + $0x18] sm:$0xf] %v1001_v48 }
 0x101   : > { %1056 = vrot.lane.b32.xlu2 %v4868_v54, %s4558_s14 }
 0x102   : > { %1058 = vrot.lane.b32.xlu0 %v4870_v9, %s4558_s14  ;;  %1221 = vrot.lane.b32.xlu1 %v1175_v49, %s4559_s15 }
 0x103   : > { %v1045_v53 = vpop.permute.xlu2 %1044 }
 0x104   : > { %v1003_v56 = vld [vmem:[#allocation2 + $0x1c] sm:$0x1] }
 0x105   : > { %v1004_v34 = vsel %vm5048_vm8, %v4941_v10, %v1003_v56  ;;  %v1100_v57 = vld [vmem:[#allocation2 + $0x18] sm:$0xf]  ;;  %v4219_v10 = vld [vmem:[%s4630_s12 + $0x34] sm:$0xf] }
 0x106   : > { %1005 = vst [vmem:[#allocation2 + $0x1c] sm:$0x1] %v1004_v34  ;;  %v1101_v63 = vsel %vm5060_vm9, %v1045_v53, %v1100_v57  ;;  %v1194_v12 = vshrl.u32 %v4219_v10, 16  ;;  %v1197_v62 = vshll.u32 %v4219_v10, 16 }
 0x107   : > { %1102 = vst [vmem:[#allocation2 + $0x18] sm:$0xf] %v1101_v63  ;;  %v1440_v63 = vrot.slane %v4995_v6, 4 }
 0x108   : > { %v1196_v30 = vrot.slane %v1194_v12, 7 }
 0x109   : > { %1325 = vrot.lane.b32.xlu2 %v4863_v1, %s4561_s19  ;;  %v814_v1 = vld [vmem:[#allocation2 + $0x8] sm:$0xf] }
 0x10a   : > { %1327 = vrot.lane.b32.xlu0 %v4858_v58, %s4561_s19  ;;  %962 = vrot.lane.b32.xlu1 %v927_v46, %s4558_s14  ;;  %v1199_v53 = vor.u32 %v1197_v62, %v1196_v30  ;;  %v1200_v57 = vrot.slane %v1196_v30, 4 }
 0x10b   : > { %v5079_v2 = vpop.permute.xlu2 %1309 }
 0x10c   : > { %v1037_v26 = vpop.permute.xlu0 %1036  ;;  %v765_v44 = vpop.permute.xlu1 %764 }
 0x10d   : > { %v815_v58 = vsel %vm5013_vm7, %v765_v44, %v814_v1 }
 0x10e   : > { %v1273_v61 = vld [vmem:[#allocation2 + $0x18] sm:$0xf]  ;;  %816 = vst [vmem:[#allocation2 + $0x8] sm:$0xf] %v815_v58  ;;  %v1103_v58 = vld [vmem:[#allocation2 + $0x1c] sm:$0x1] }
 0x10f   : > { %v1274_v13 = vsel %vm5082_vm15, %v1218_v7, %v1273_v61  ;;  %v819_v7 = vld [vmem:[#allocation2 + $0xc] sm:$0x1]  ;;  %v1192_v61 = vrot.slane %v5110_v0, 4 }
 0x110   : > { %1275 = vst [vmem:[#allocation2 + $0x18] sm:$0xf] %v1274_v13 }
 0x111   : > { %1323 = vrot.lane.b32.xlu2 %v4838_v40, %s4561_s19 }
 0x112   : > { %1493 = vrot.lane.b32.xlu0 %v1447_v43, %s4560_s16  ;;  %1223 = vrot.lane.b32.xlu1 %v1176_v16, %s4559_s15 }
 0x113   : > { %v789_v59 = vpop.permute.xlu2 %788 }
 0x114   : > { %v853_v48 = vsel %vm5013_vm7, %v789_v59, %v852_v42  ;;  %v5100_v49 = vpop.permute.xlu0 %1038  ;;  %v767_v40 = vpop.permute.xlu1 %766 }
 0x115   : > { %v986_v33 = vld [vmem:[#allocation2 + $0x8] sm:$0xf]  ;;  %854 = vst [vmem:[#allocation2 + $0x38] sm:$0xf] %v853_v48  ;;  %v820_v34 = vsel %vm5027_vm10, %v767_v40, %v819_v7  ;;  %v4562_v48 = vmov 0  }
 0x116   : > { %v987_v56 = vsel %vm5032_vm11, %v4768_v41, %v986_v33  ;;  %821 = vst [vmem:[#allocation2 + $0xc] sm:$0x1] %v820_v34  ;;  %v5119_v41 = vld [vmem:[%s4630_s12 + $0x24] sm:$0xf]  ;;  %v5150_v7 = vld [vmem:[%s4630_s12 + $0x2c] sm:$0xf] }
 0x117   : > { %988 = vst [vmem:[#allocation2 + $0x8] sm:$0xf] %v987_v56  ;;  %v1373_v10 = vld [vmem:[#allocation2 + $0x18] sm:$0xf]  ;;  %v1450_v43 = vshrl.u32 %v5119_v41, 16  ;;  %v1458_v56 = vshrl.u32 %v5150_v7, 16 }
 0x118   : > { %301 = vst.msk [vmem:[#allocation2] sm:$0xf] %vm300_vm1, %v4562_v48  ;;  %v840_v33 = vld [vmem:[#allocation2 + $0x28] sm:$0xf] }
 0x119   : > { %1233 = vrot.lane.b32.xlu2 %v1199_v53, %s4559_s15  ;;  %v5141_v59 = vrot.slane %v1450_v43, 7  ;;  %303 = vst.msk [vmem:[#allocation2 + $0x4] sm:$0x1] %vm6830_vm5, %v4562_v48  ;;  %v837_v43 = vld [vmem:[#allocation2 + $0x24] sm:$0x1]  ;;  %vm1529_vm5 = vcmask 257248  }
 0x11a   : > { %1235 = vrot.lane.b32.xlu0 %v1200_v57, %s4559_s15  ;;  %1491 = vrot.lane.b32.xlu1 %v1440_v63, %s4560_s16  ;;  %305 = vst.msk [vmem:[#allocation2 + $0x48] sm:$0xf] %vm300_vm1, %v4562_v48  ;;  %vm6834_vm1 = vsmask.f32 7938 }
 0x11b   : > { %v5122_v21 = vpop.permute.xlu2 %1052  ;;  %306 = vst.msk [vmem:[#allocation2 + $0x4c] sm:$0x1] %vm6833_vm13, %v4562_v48  ;;  %vm1362_vm13 = vcmask 221376   ;;  %vm5222_vm12 = vmand %vm1529_vm5, %vm6834_vm1  ;;  %vm1534_vm5 = vcmask 254176  }
 0x11c   : > { %v1318_v44 = vpop.permute.xlu0 %1317  ;;  %v1047_v12 = vpop.permute.xlu1 %1046 }
 0x11d   : > { %v1374_v1 = vsel %vm5114_vm0, %v1318_v44, %v1373_v10  ;;  %v1104_v16 = vsel %vm5125_vm2, %v1047_v12, %v1103_v58  ;;  %v991_v62 = vld [vmem:[#allocation2 + $0xc] sm:$0x1]  ;;  %v5177_v58 = vrot.slane %v1458_v56, 7  ;;  %v1453_v56 = vshll.u32 %v5119_v41, 16 }
 0x11e   : > { %v1086_v13 = vld [vmem:[#allocation2 + $0x8] sm:$0xf]  ;;  %1375 = vst [vmem:[#allocation2 + $0x18] sm:$0xf] %v1374_v1  ;;  %v992_v42 = vsel %vm5048_vm8, %v4815_v20, %v991_v62  ;;  %v843_v62 = vld [vmem:[#allocation2 + $0x2c] sm:$0x1] }
 0x11f   : > { %v1087_v30 = vsel %vm5060_vm9, %v1037_v26, %v1086_v13  ;;  %1105 = vst [vmem:[#allocation2 + $0x1c] sm:$0x1] %v1104_v16  ;;  %v310_v1 = vld [vmem:[#allocation2] sm:$0x1]  ;;  %v1464_v48 = vrot.slane %v5177_v58, 4 }
 0x120   : > { %1088 = vst [vmem:[#allocation2 + $0x8] sm:$0xf] %v1087_v30 }
 0x121   : > { %993 = vst [vmem:[#allocation2 + $0xc] sm:$0x1] %v992_v42  ;;  %1231 = vrot.lane.b32.xlu2 %v1192_v61, %s4559_s15  ;;  %v1189_v61 = vshll.u32 %v5095_v37, 16 }
 0x122   : > { %1329 = vrot.lane.b32.xlu0 %v4868_v54, %s4561_s19  ;;  %1321 = vrot.lane.b32.xlu1 %v4836_v39, %s4561_s19  ;;  %v1456_v39 = vrot.slane %v5141_v59, 4 }
 0x123   : > { %v5147_v26 = vpop.permute.xlu2 %1054 }
 0x124   : > { %v781_v40 = vpop.permute.xlu0 %780  ;;  %v5160_v53 = vpop.permute.xlu1 %1311 }
 0x125   : > { %v841_v54 = vsel %vm5013_vm7, %v781_v40, %v840_v33  ;;  %v1191_v33 = vor.u32 %v1189_v61, %v5110_v0 }
 0x126   : > { %v1276_v60 = vld [vmem:[#allocation2 + $0x1c] sm:$0x1]  ;;  %842 = vst [vmem:[#allocation2 + $0x28] sm:$0xf] %v841_v54  ;;  %v342_v54 = vld [vmem:[#allocation2 + $0x4] sm:$0x1] }
 0x127   : > { %v1259_v34 = vld [vmem:[#allocation2 + $0x8] sm:$0xf]  ;;  %v1277_v57 = vsel %vm5154_vm14, %v5023_v27, %v1276_v60  ;;  %v311_v27 = vsel %vm4676_vm4, 0, %v310_v1  ;;  %vm1599_vm4 = vsmask.f32 7440 }
 0x128   : > { %v1260_v63 = vsel %vm5082_vm15, %v4828_v32, %v1259_v34  ;;  %v1091_v10 = vld [vmem:[#allocation2 + $0xc] sm:$0x1]  ;;  %1278 = vst [vmem:[#allocation2 + $0x1c] sm:$0x1] %v1277_v57  ;;  %v834_v32 = vld [vmem:[#allocation2 + $0x20] sm:$0xf] }
 0x129   : > { %1261 = vst [vmem:[#allocation2 + $0x8] sm:$0xf] %v1260_v63  ;;  %v1092_v44 = vsel %vm5125_vm2, %v5100_v49, %v1091_v10  ;;  %1499 = vrot.lane.b32.xlu2 %v1456_v39, %s4560_s16  ;;  %v4227_v57 = vld [vmem:[%s4630_s12 + $0x34] sm:$0xf] }
 0x12a   : > { %1093 = vst [vmem:[#allocation2 + $0xc] sm:$0x1] %v1092_v44  ;;  %1335 = vrot.lane.b32.xlu0 %v4883_v19, %s4561_s19  ;;  %1062 = vrot.lane.b32.xlu1 %v4883_v19, %s4558_s14  ;;  %v1466_v44 = vshrl.u32 %v4227_v57, 16 }
 0x12b   : > { %v777_v12 = vpop.permute.xlu2 %776  ;;  %312 = vst [vmem:[#allocation2] sm:$0x1] %v311_v27  ;;  %v855_v27 = vld [vmem:[#allocation2 + $0x3c] sm:$0x1] }
 0x12c   : > { %v835_v49 = vsel %vm5013_vm7, %v777_v12, %v834_v32  ;;  %v779_v13 = vpop.permute.xlu0 %778  ;;  %v783_v42 = vpop.permute.xlu1 %782  ;;  %v1455_v32 = vor.u32 %v1453_v56, %v5141_v59  ;;  %v6837_v59 = vmov 0 }
 0x12d   : > { %v1012_v16 = vld [vmem:[#allocation2 + $0x28] sm:$0xf]  ;;  %836 = vst [vmem:[#allocation2 + $0x20] sm:$0xf] %v835_v49  ;;  %v838_v30 = vsel %vm5027_vm10, %v779_v13, %v837_v43  ;;  %v844_v37 = vsel %vm5027_vm10, %v783_v42, %v843_v62  ;;  %v5231_v43 = vrot.slane %v1466_v44, 7 }
 0x12e   : > { %v1013_v19 = vsel %vm5032_vm11, %v4985_v45, %v1012_v16  ;;  %839 = vst [vmem:[#allocation2 + $0x24] sm:$0x1] %v838_v30  ;;  %v343_v45 = vsel %vm4684_vm6, 0, %v342_v54  ;;  %vm5235_vm6 = vmand %vm1362_vm13, %vm308_vm3 }
 0x12f   : > { %1014 = vst [vmem:[#allocation2 + $0x28] sm:$0xf] %v1013_v19  ;;  %v6838_v59 = vsel %vm5235_vm6, 4294967295, %v6837_v59  ;;  %vm5259_vm13 = vmand %vm1534_vm5, %vm308_vm3  ;;  %vm1995_vm3 = vcmask 1042432   ;;  %vm1996_vm5 = vcmask 1046532  }
 0x130   : > { %v1359_v40 = vld [vmem:[#allocation2 + $0x8] sm:$0xf]  ;;  %845 = vst [vmem:[#allocation2 + $0x2c] sm:$0x1] %v844_v37  ;;  %vm5280_vm1 = vmor %vm1995_vm3, %vm1996_vm5  ;;  %vm6848_vm3 = vcmask 1043456  }
 0x131   : > { %v1360_v39 = vsel %vm5114_vm0, %v5079_v2, %v1359_v40  ;;  %v1264_v60 = vld [vmem:[#allocation2 + $0xc] sm:$0x1]  ;;  %1331 = vrot.lane.b32.xlu2 %v4870_v9, %s4561_s19  ;;  %344 = vst [vmem:[#allocation2 + $0x4] sm:$0x1] %v343_v45  ;;  %vm6849_vm5 = vmmov %vm6848_vm3 }
 0x132   : > { %1361 = vst [vmem:[#allocation2 + $0x8] sm:$0xf] %v1360_v39  ;;  %v1265_v0 = vsel %vm5154_vm14, %v4885_v22, %v1264_v60  ;;  %1503 = vrot.lane.b32.xlu0 %v1464_v48, %s4560_s16  ;;  %1229 = vrot.lane.b32.xlu1 %v1191_v33, %s4559_s15  ;;  %v849_v33 = vld [vmem:[#allocation2 + $0x34] sm:$0x1]  ;;  %v1448_v60 = vrot.slane %v5075_v3, 4 }
 0x133   : > { %1266 = vst [vmem:[#allocation2 + $0xc] sm:$0x1] %v1265_v0  ;;  %v5208_v2 = vpop.permute.xlu2 %1313 }
 0x134   : > { %v1006_v34 = vld [vmem:[#allocation2 + $0x20] sm:$0xf]  ;;  %v5210_v9 = vpop.permute.xlu0 %1042  ;;  %v791_v10 = vpop.permute.xlu1 %790 }
 0x135   : > { %v1007_v22 = vsel %vm5032_vm11, %v4899_v36, %v1006_v34  ;;  %v1009_v63 = vld [vmem:[#allocation2 + $0x24] sm:$0x1]  ;;  %v856_v49 = vsel %vm5027_vm10, %v791_v10, %v855_v27  ;;  %v6839_v34 = vmov 0  ;;  %v1971_v10 = vld [vmem:[#allocation2] sm:$0xe] }
 0x136   : > { %v1112_v41 = vld [vmem:[#allocation2 + $0x28] sm:$0xf]  ;;  %1008 = vst [vmem:[#allocation2 + $0x20] sm:$0xf] %v1007_v22  ;;  %v1010_v1 = vsel %vm5048_vm8, %v4991_v55, %v1009_v63  ;;  %v1469_v55 = vshll.u32 %v4227_v57, 16  ;;  %v6840_v34 = vsel %vm5259_vm13, 4294967295, %v6839_v34 }
 0x137   : > { %v1113_v36 = vsel %vm5060_vm9, %v5122_v21, %v1112_v41  ;;  %1011 = vst [vmem:[#allocation2 + $0x24] sm:$0x1] %v1010_v1  ;;  %v1015_v61 = vld [vmem:[#allocation2 + $0x2c] sm:$0x1]  ;;  %v1581_v21 = vld [vmem:[#allocation2] sm:$0xf] }
 0x138   : > { %1114 = vst [vmem:[#allocation2 + $0x28] sm:$0xf] %v1113_v36  ;;  %v1016_v13 = vsel %vm5048_vm8, %v5009_v4, %v1015_v61  ;;  %v1471_v16 = vor.u32 %v1469_v55, %v5231_v43  ;;  %v1602_v4 = vshrl.u32 %v1581_v21, 16  ;;  %v1605_v48 = vshll.u32 %v1581_v21, 16  ;;  %v1590_v22 = vld [vmem:[#allocation2 + $0x4] sm:$0x1] }
 0x139   : > { %1017 = vst [vmem:[#allocation2 + $0x2c] sm:$0x1] %v1016_v13  ;;  %v1531_v30 = vld [vmem:[#allocation2 + $0x8] sm:$0xf]  ;;  %v1611_v55 = vshll.u32 %v1590_v22, 16  ;;  %v4267_v21 = vrot.slane %v1971_v10, 9 }
 0x13a   : > { %v1364_v62 = vld [vmem:[#allocation2 + $0xc] sm:$0x1]  ;;  %857 = vst [vmem:[#allocation2 + $0x3c] sm:$0x1] %v856_v49  ;;  %v1532_v42 = vsel %vm5222_vm12, %v5054_v18, %v1531_v30  ;;  %1497 = vrot.lane.b32.xlu1 %v1455_v32, %s4560_s16  ;;  %1505 = vrot.lane.b32.xlu2 %v1471_v16, %s4560_s16  ;;  %v822_v18 = vld [vmem:[#allocation2 + $0x10] sm:$0xf] }
 0x13b   : > { %v1365_v19 = vsel %vm5235_vm6, %v5160_v53, %v1364_v62  ;;  %v5250_v37 = vpop.permute.xlu2 %956  ;;  %1533 = vst [vmem:[#allocation2 + $0x8] sm:$0xf] %v1532_v42  ;;  %v1604_v45 = vrot.slane %v1602_v4, 4  ;;  %v1607_v0 = vrot.slane %v1605_v48, 5  ;;  %v825_v49 = vld [vmem:[#allocation2 + $0x14] sm:$0x1] }
 0x13c   : > { %1366 = vst [vmem:[#allocation2 + $0xc] sm:$0x1] %v1365_v19  ;;  %v787_v40 = vpop.permute.xlu0 %786  ;;  %v769_v39 = vpop.permute.xlu1 %768  ;;  %v2000_v19 = vrot.slane %v1590_v22, 5  ;;  %v1613_v48 = vrot.slane %v1611_v55, 5 }
 0x13d   : > { %v850_v54 = vsel %vm5027_vm10, %v787_v40, %v849_v33  ;;  %v823_v53 = vsel %vm5013_vm7, %v769_v39, %v822_v18  ;;  %v1608_v1 = vor.u32 %v1607_v0, %v1604_v45 }
 0x13e   : > { %851 = vst [vmem:[#allocation2 + $0x34] sm:$0x1] %v850_v54  ;;  %v1461_v54 = vshll.u32 %v5150_v7, 16 }
 0x13f   : > { %824 = vst [vmem:[#allocation2 + $0x10] sm:$0xf] %v823_v53  ;;  %v1285_v41 = vld [vmem:[#allocation2 + $0x28] sm:$0xf]  ;;  %v1609_v4 = vrot.slane %v1608_v1, 4  ;;  %v2001_v53 = vsel %vm5280_vm1, %v4267_v21, %v2000_v19 }
 0x140   : > { %v1115_v56 = vld [vmem:[#allocation2 + $0x2c] sm:$0x1]  ;;  %v599_v19 = vld [vmem:[%s4630_s12 + $0x38] sm:$0xf] }
 0x141   : > { %v1116_v57 = vsel %vm5125_vm2, %v5147_v26, %v1115_v56 }
 0x142   : > { %1117 = vst [vmem:[#allocation2 + $0x2c] sm:$0x1] %v1116_v57  ;;  %v1582_v63 = vld [vmem:[#allocation2 + $0x8] sm:$0xf]  ;;  %1495 = vrot.lane.b32.xlu1 %v1448_v60, %s4560_s16  ;;  %v1024_v60 = vld [vmem:[#allocation2 + $0x38] sm:$0xf] }
 0x143   : > { %v1536_v44 = vld [vmem:[#allocation2 + $0xc] sm:$0x1]  ;;  %v1226_v3 = vpop.permute.xlu2 %1225  ;;  %v1616_v27 = vshrl.u32 %v1582_v63, 16  ;;  %v1619_v32 = vshll.u32 %v1582_v63, 16 }
 0x144   : > { %v1537_v36 = vsel %vm5259_vm13, %v5056_v51, %v1536_v44  ;;  %v1286_v61 = vsel %vm5082_vm15, %v1226_v3, %v1285_v41  ;;  %v5272_v26 = vpop.permute.xlu0 %1315  ;;  %v771_v13 = vpop.permute.xlu1 %770  ;;  %vm6843_vm13 = vsmask.f32 3328  ;;  %v1463_v44 = vor.u32 %v1461_v54, %v5177_v58 }
 0x145   : > { %1538 = vst [vmem:[#allocation2 + $0xc] sm:$0x1] %v1537_v36  ;;  %v826_v30 = vsel %vm5027_vm10, %v771_v13, %v825_v49  ;;  %v1618_v62 = vrot.slane %v1616_v27, 4  ;;  %v1621_v42 = vrot.slane %v1619_v32, 5  ;;  %vm5285_vm6 = vmor %vm6843_vm13, %vm1599_vm4  ;;  %v2030_v3 = vunpack.c.l.b16 %v2001_v53 }
 0x146   : > { %v994_v16 = vld [vmem:[#allocation2 + $0x10] sm:$0xf]  ;;  %1287 = vst [vmem:[#allocation2 + $0x28] sm:$0xf] %v1286_v61  ;;  %v1614_v56 = vsel %vm5285_vm6, %v1609_v4, %v1613_v48  ;;  %v1106_v48 = vld [vmem:[#allocation2 + $0x20] sm:$0xf]  ;;  %vm6846_vm4 = vnez %v6838_v59  ;;  %vm6847_vm13 = vnez %v6840_v34 }
 0x147   : > { %v995_v51 = vsel %vm5032_vm11, %v4876_v14, %v994_v16  ;;  %827 = vst [vmem:[#allocation2 + $0x14] sm:$0x1] %v826_v30  ;;  %v1972_v14 = vld [vmem:[#allocation2 + $0x8] sm:$0xe]  ;;  %v1622_v39 = vor.u32 %v1621_v42, %v1618_v62  ;;  %v1715_v49 = vunpack.c.l.b16 %v1614_v56  ;;  %v1472_v53 = vrot.slane %v5231_v43, 4 }
 0x148   : > { %996 = vst [vmem:[#allocation2 + $0x10] sm:$0xf] %v995_v51  ;;  %v4268_v63 = vrot.slane %v1972_v14, 9  ;;  %v1021_v51 = vld [vmem:[#allocation2 + $0x34] sm:$0x1] }
 0x149   : > { %v1623_v27 = vrot.slane %v1622_v39, 4  ;;  %v1288_v16 = vld [vmem:[#allocation2 + $0x2c] sm:$0x1]  ;;  %v1545_v43 = vld [vmem:[#allocation2 + $0x18] sm:$0xf] }
 0x14a   : > { %1333 = vrot.lane.b32.xlu1 %v4897_v31, %s4561_s19 }
 0x14b   : > { %v5292_v18 = vpop.permute.xlu2 %1485 }
 0x14c   : > { %v961_v45 = vpop.permute.xlu0 %960  ;;  %v1591_v0 = vld [vmem:[#allocation2 + $0xc] sm:$0x1]  ;;  %v1041_v7 = vpop.permute.xlu1 %1040 }
 0x14d   : > { %v1025_v57 = vsel %vm5032_vm11, %v961_v45, %v1024_v60  ;;  %v1625_v22 = vshll.u32 %v1591_v0, 16  ;;  %v2004_v10 = vrot.slane %v1591_v0, 5  ;;  %v657_v60 = vshrl.u32 %v599_v19, 16 }
 0x14e   : > { %v997_v31 = vld [vmem:[#allocation2 + $0x14] sm:$0x1]  ;;  %1026 = vst [vmem:[#allocation2 + $0x38] sm:$0xf] %v1025_v57 }
 0x14f   : > { %v998_v41 = vsel %vm5048_vm8, %v4786_v52, %v997_v31  ;;  %v1094_v1 = vld [vmem:[#allocation2 + $0x10] sm:$0xf]  ;;  %v1627_v32 = vrot.slane %v1625_v22, 5  ;;  %v2005_v36 = vsel %vm5280_vm1, %v4268_v63, %v2004_v10  ;;  %v660_v22 = vshll.u32 %v599_v19, 16  ;;  %v1376_v19 = vld [vmem:[#allocation2 + $0x1c] sm:$0x1] }
 0x150   : > { %999 = vst [vmem:[#allocation2 + $0x14] sm:$0x1] %v998_v41  ;;  %v1095_v61 = vsel %vm5060_vm9, %v1041_v7, %v1094_v1  ;;  %v2031_v55 = vunpack.c.l.b16 %v2005_v36  ;;  %v5332_v7 = vrot.slane %v657_v60, 7  ;;  %v1385_v36 = vld [vmem:[#allocation2 + $0x28] sm:$0xf] }
 0x151   : > { %1096 = vst [vmem:[#allocation2 + $0x10] sm:$0xf] %v1095_v61  ;;  %v1628_v58 = vsel %vm5285_vm6, %v1623_v27, %v1627_v32 }
 0x152   : > { %v1716_v13 = vunpack.c.l.b16 %v1628_v58  ;;  %v5310_v21 = vpack.c.b16 %v2031_v55, %v2030_v3  ;;  %1501 = vrot.lane.b32.xlu1 %v1463_v44, %s4560_s16  ;;  %v846_v55 = vld [vmem:[#allocation2 + $0x30] sm:$0xf] }
 0x153   : > { %v1228_v52 = vpop.permute.xlu2 %1227 }
 0x154   : > { %v1289_v30 = vsel %vm5154_vm14, %v1228_v52, %v1288_v16  ;;  %v959_v62 = vpop.permute.xlu0 %958  ;;  %v1723_v42 = vpack.c.b16 %v1716_v13, %v1715_v49  ;;  %v1049_v54 = vpop.permute.xlu1 %1048 }
 0x155   : > { %1290 = vst [vmem:[#allocation2 + $0x2c] sm:$0x1] %v1289_v30  ;;  %v1022_v4 = vsel %vm5048_vm8, %v959_v62, %v1021_v51  ;;  %v1107_v14 = vsel %vm5060_vm9, %v1049_v54, %v1106_v48  ;;  %v1124_v51 = vld [vmem:[#allocation2 + $0x38] sm:$0xf] }
 0x156   : > { %1023 = vst [vmem:[#allocation2 + $0x34] sm:$0x1] %v1022_v4  ;;  %1727 = vrot.lane.b32.xlu0 %v1723_v42, %s4563_s20  ;;  %1853 = vrot.lane.b32.xlu2 %v1723_v42, %s4564_s21 }
 0x157   : > { %v1097_v39 = vld [vmem:[#allocation2 + $0x14] sm:$0x1]  ;;  %1108 = vst [vmem:[#allocation2 + $0x20] sm:$0xf] %v1107_v14 }
 0x158   : > { %v1098_v45 = vsel %vm5125_vm2, %v5210_v9, %v1097_v39  ;;  %v1267_v0 = vld [vmem:[#allocation2 + $0x10] sm:$0xf]  ;;  %v1109_v9 = vld [vmem:[#allocation2 + $0x24] sm:$0x1] }
 0x159   : > { %1099 = vst [vmem:[#allocation2 + $0x14] sm:$0x1] %v1098_v45  ;;  %v1268_v56 = vsel %vm5082_vm15, %v5000_v17, %v1267_v0  ;;  %v662_v17 = vor.u32 %v660_v22, %v5332_v7 }
 0x15a   : > { %1269 = vst [vmem:[#allocation2 + $0x10] sm:$0xf] %v1268_v56  ;;  %1507 = vrot.lane.b32.xlu1 %v1472_v53, %s4560_s16 }
 0x15b   : > { %v5330_v57 = vpop.permute.xlu2 %1056 }
 0x15c   : > { %v1490_v63 = vpop.permute.xlu0 %1489  ;;  %v1051_v31 = vpop.permute.xlu1 %1050 }
 0x15d   : > { %v1546_v10 = vsel %vm5222_vm12, %v1490_v63, %v1545_v43  ;;  %v1110_v44 = vsel %vm5125_vm2, %v1051_v31, %v1109_v9  ;;  %v1121_v53 = vld [vmem:[#allocation2 + $0x34] sm:$0x1]  ;;  %v5375_v63 = vld [vmem:[#allocation2 + $0xc] sm:$0x1]  ;;  %v2672_v31 = vld [vmem:[#allocation2 + $0x8] sm:$0xe] }
 0x15e   : > { %1547 = vst [vmem:[#allocation2 + $0x18] sm:$0xf] %v1546_v10  ;;  %792 = vrot.lane.b32.xlu0 %v4910_v47, %s4557_s13  ;;  %v1279_v56 = vld [vmem:[#allocation2 + $0x20] sm:$0xf] }
 0x15f   : > { %1111 = vst [vmem:[#allocation2 + $0x24] sm:$0x1] %v1110_v44  ;;  %v2698_v44 = vrot.slane %v5375_v63, 5 }
 0x160   : > { %v1270_v3 = vld [vmem:[#allocation2 + $0x14] sm:$0x1] }
 0x161   : > { %v1271_v41 = vsel %vm5154_vm14, %v5004_v8, %v1270_v3  ;;  %v1367_v1 = vld [vmem:[#allocation2 + $0x10] sm:$0xf] }
 0x162   : > { %1272 = vst [vmem:[#allocation2 + $0x14] sm:$0x1] %v1271_v41  ;;  %v1368_v27 = vsel %vm5114_vm0, %v5208_v2, %v1367_v1  ;;  %692 = vrot.lane.b32.xlu1 %v662_v17, %s4557_s13  ;;  %v4338_v1 = vrot.slane %v2672_v31, 9 }
 0x163   : > { %1369 = vst [vmem:[#allocation2 + $0x10] sm:$0xf] %v1368_v27  ;;  %v1326_v32 = vpop.permute.xlu2 %1325 }
 0x164   : > { %v1386_v61 = vsel %vm5114_vm0, %v1326_v32, %v1385_v36  ;;  %v1488_v49 = vpop.permute.xlu0 %1487  ;;  %v785_v58 = vpop.permute.xlu1 %784  ;;  %v1388_v32 = vld [vmem:[#allocation2 + $0x2c] sm:$0x1] }
 0x165   : > { %1387 = vst [vmem:[#allocation2 + $0x28] sm:$0xf] %v1386_v61  ;;  %v847_v8 = vsel %vm5013_vm7, %v785_v58, %v846_v55  ;;  %v1027_v55 = vld [vmem:[#allocation2 + $0x3c] sm:$0x1]  ;;  %v2699_v58 = vsel %vm5280_vm1, %v4338_v1, %v2698_v44 }
 0x166   : > { %848 = vst [vmem:[#allocation2 + $0x30] sm:$0xf] %v847_v8 }
 0x169   : > { %v1370_v13 = vld [vmem:[#allocation2 + $0x14] sm:$0x1] }
 0x16a   : > { %v1539_v52 = vld [vmem:[#allocation2 + $0x10] sm:$0xf]  ;;  %v1371_v2 = vsel %vm6846_vm4, %v5272_v26, %v1370_v13 }
 0x16b   : > { %v1540_v16 = vsel %vm5222_vm12, %v5292_v18, %v1539_v52  ;;  %1372 = vst [vmem:[#allocation2 + $0x14] sm:$0x1] %v1371_v2  ;;  %v5358_v30 = vpop.permute.xlu2 %1323 }
 0x16c   : > { %1541 = vst [vmem:[#allocation2 + $0x10] sm:$0xf] %v1540_v16  ;;  %v1061_v62 = vpop.permute.xlu0 %1060  ;;  %v1320_v4 = vpop.permute.xlu1 %1319  ;;  %v2728_v16 = vunpack.c.l.b16 %v2699_v58  ;;  %v4229_v58 = vld [vmem:[%s6786_s4 + $0x4] sm:$0xf] }
 0x16d   : > { %v1125_v42 = vsel %vm5060_vm9, %v1061_v62, %v1124_v51  ;;  %v1018_v48 = vld [vmem:[#allocation2 + $0x30] sm:$0xf]  ;;  %v1377_v26 = vsel %vm6846_vm4, %v1320_v4, %v1376_v19 }
 0x16e   : > { %1126 = vst [vmem:[#allocation2 + $0x38] sm:$0xf] %v1125_v42  ;;  %v1019_v18 = vsel %vm5032_vm11, %v5250_v37, %v1018_v48  ;;  %v1282_v48 = vld [vmem:[#allocation2 + $0x24] sm:$0x1] }
 0x16f   : > { %1378 = vst [vmem:[#allocation2 + $0x1c] sm:$0x1] %v1377_v26 }
 0x170   : > { %1020 = vst [vmem:[#allocation2 + $0x30] sm:$0xf] %v1019_v18 }
 0x172   : > { %v1542_v54 = vld [vmem:[#allocation2 + $0x14] sm:$0x1] }
 0x173   : > { %v1543_v14 = vsel %vm6847_vm13, %v1488_v49, %v1542_v54  ;;  %v1234_v39 = vpop.permute.xlu2 %1233  ;;  %v2673_v17 = vld [vmem:[#allocation2 + $0x10] sm:$0xe] }
 0x174   : > { %1544 = vst [vmem:[#allocation2 + $0x14] sm:$0x1] %v1543_v14  ;;  %v1059_v60 = vpop.permute.xlu0 %1058  ;;  %v1222_v22 = vpop.permute.xlu1 %1221  ;;  %v4339_v8 = vrot.slane %v2673_v17, 9  ;;  %v1583_v14 = vld [vmem:[#allocation2 + $0x10] sm:$0xf] }
 0x175   : > { %v1297_v45 = vld [vmem:[#allocation2 + $0x38] sm:$0xf]  ;;  %v1122_v0 = vsel %vm5125_vm2, %v1059_v60, %v1121_v53  ;;  %v1280_v37 = vsel %vm5082_vm15, %v1222_v22, %v1279_v56  ;;  %v1630_v53 = vshrl.u32 %v1583_v14, 16  ;;  %v1633_v60 = vshll.u32 %v1583_v14, 16 }
 0x176   : > { %v1298_v43 = vsel %vm5082_vm15, %v1234_v39, %v1297_v45  ;;  %1123 = vst [vmem:[#allocation2 + $0x34] sm:$0x1] %v1122_v0  ;;  %v1584_v39 = vld [vmem:[#allocation2 + $0x18] sm:$0xf] }
 0x177   : > { %v1118_v10 = vld [vmem:[#allocation2 + $0x30] sm:$0xf]  ;;  %1299 = vst [vmem:[#allocation2 + $0x38] sm:$0xf] %v1298_v43  ;;  %v1644_v43 = vshrl.u32 %v1584_v39, 16  ;;  %v1632_v17 = vrot.slane %v1630_v53, 4 }
 0x178   : > { %v1119_v9 = vsel %vm5060_vm9, %v5330_v57, %v1118_v10  ;;  %1281 = vst [vmem:[#allocation2 + $0x20] sm:$0xf] %v1280_v37  ;;  %v1647_v37 = vshll.u32 %v1584_v39, 16  ;;  %v1548_v10 = vld [vmem:[#allocation2 + $0x1c] sm:$0x1] }
 0x179   : > { %1120 = vst [vmem:[#allocation2 + $0x30] sm:$0xf] %v1119_v9 }
 0x17b   : > { %v1232_v3 = vpop.permute.xlu2 %1231  ;;  %v5381_v41 = vld [vmem:[#allocation2 + $0x14] sm:$0x1] }
 0x17c   : > { %v1328_v27 = vpop.permute.xlu0 %1327  ;;  %v2702_v36 = vrot.slane %v5381_v41, 5  ;;  %v963_v57 = vpop.permute.xlu1 %962  ;;  %v1592_v31 = vld [vmem:[#allocation2 + $0x14] sm:$0x1] }
 0x17d   : > { %v1294_v61 = vld [vmem:[#allocation2 + $0x34] sm:$0x1]  ;;  %v1389_v49 = vsel %vm6846_vm4, %v1328_v27, %v1388_v32  ;;  %v1028_v52 = vsel %vm5048_vm8, %v963_v57, %v1027_v55  ;;  %v1639_v32 = vshll.u32 %v1592_v31, 16 }
 0x17e   : > { %v1295_v13 = vsel %vm5154_vm14, %v1232_v3, %v1294_v61  ;;  %1390 = vst [vmem:[#allocation2 + $0x2c] sm:$0x1] %v1389_v49  ;;  %v2703_v2 = vsel %vm5280_vm1, %v4339_v8, %v2702_v36  ;;  %v1635_v3 = vrot.slane %v1633_v60, 5  ;;  %v1646_v36 = vrot.slane %v1644_v43, 4  ;;  %v4254_v49 = vld [vmem:[%s6786_s4 + $0x8] sm:$0xf] }
 0x17f   : > { %1296 = vst [vmem:[#allocation2 + $0x34] sm:$0x1] %v1295_v13  ;;  %v2729_v51 = vunpack.c.l.b16 %v2703_v2  ;;  %v1649_v61 = vrot.slane %v1647_v37, 5  ;;  %v5415_v57 = vsel %vm6848_vm3, %v4254_v49, 0  ;;  %v1973_v8 = vld [vmem:[#allocation2 + $0x10] sm:$0xe] }
 0x180   : > { %1029 = vst [vmem:[#allocation2 + $0x3c] sm:$0x1] %v1028_v52  ;;  %v1636_v55 = vor.u32 %v1635_v3, %v1632_v17  ;;  %1883 = vmatpush.bf16.msrb.mxu3 %v5415_v57  ;;  %v2008_v13 = vrot.slane %v1592_v31, 5  ;;  %v3452_v52 = vld [vmem:[#allocation2 + $0x14] sm:$0x1]  ;;  %vm6850_vm3 = vcmask 64512  }
 0x181   : > { %v5394_v62 = vpack.c.b16 %v2729_v51, %v2728_v16  ;;  %v1641_v16 = vrot.slane %v1639_v32, 5  ;;  %v1974_v51 = vld [vmem:[#allocation2 + $0x18] sm:$0xe]  ;;  %v3797_v53 = vrot.slane %v3452_v52, 5 }
 0x182   : > { %v1637_v39 = vrot.slane %v1636_v55, 4  ;;  %v3772_v60 = vld [vmem:[#allocation2 + $0x18] sm:$0xe] }
 0x183   : > { %v1500_v42 = vpop.permute.xlu2 %1499  ;;  %v871_v17 = vld [vmem:[%s4630_s12 + $0x38] sm:$0xf] }
 0x184   : > { %v5396_v19 = vpop.permute.xlu0 %1493  ;;  %v1224_v26 = vpop.permute.xlu1 %1223  ;;  %v1642_v37 = vsel %vm5285_vm6, %v1637_v39, %v1641_v16 }
 0x185   : > { %v1560_v4 = vld [vmem:[#allocation2 + $0x2c] sm:$0x1]  ;;  %v1283_v54 = vsel %vm5154_vm14, %v1224_v26, %v1282_v48  ;;  %v1650_v48 = vor.u32 %v1649_v61, %v1646_v36  ;;  %v4269_v26 = vrot.slane %v1973_v8, 9  ;;  %v1717_v55 = vunpack.c.l.b16 %v1642_v37 }
 0x186   : > { %v1561_v18 = vsel %vm6847_vm13, %v1500_v42, %v1560_v4  ;;  %1284 = vst [vmem:[#allocation2 + $0x24] sm:$0x1] %v1283_v54  ;;  %v1394_v0 = vld [vmem:[#allocation2 + $0x34] sm:$0x1]  ;;  %v1379_v42 = vld [vmem:[#allocation2 + $0x20] sm:$0xf] }
 0x187   : > { %1562 = vst [vmem:[#allocation2 + $0x2c] sm:$0x1] %v1561_v18  ;;  %v3771_v18 = vld [vmem:[#allocation2 + $0x10] sm:$0xe]  ;;  %v1651_v31 = vrot.slane %v1650_v48, 4 }
 0x18b   : > { %v1332_v45 = vpop.permute.xlu2 %1331 }
 0x18c   : > { %v1395_v56 = vsel %vm6846_vm4, %v1332_v45, %v1394_v0  ;;  %v5404_v22 = vpop.permute.xlu0 %1235  ;;  %v1492_v9 = vpop.permute.xlu1 %1491  ;;  %v2009_v0 = vsel %vm5280_vm1, %v4269_v26, %v2008_v13  ;;  %v929_v13 = vshrl.u32 %v871_v17, 16 }
 0x18d   : > { %1396 = vst [vmem:[#allocation2 + $0x34] sm:$0x1] %v1395_v56  ;;  %v1549_v44 = vsel %vm6847_vm13, %v1492_v9, %v1548_v10  ;;  %v1382_v1 = vld [vmem:[#allocation2 + $0x24] sm:$0x1]  ;;  %v4270_v56 = vrot.slane %v1974_v51, 9  ;;  %v4441_v9 = vrot.slane %v3771_v18, 9 }
 0x18e   : > { %1550 = vst [vmem:[#allocation2 + $0x1c] sm:$0x1] %v1549_v44  ;;  %v1383_v27 = vsel %vm6846_vm4, %v5358_v30, %v1382_v1  ;;  %v5422_v30 = vsel %vm6849_vm5, %v4229_v58, 0  ;;  %v4442_v1 = vrot.slane %v3772_v60, 9  ;;  %v1127_v51 = vld [vmem:[#allocation2 + $0x3c] sm:$0x1]  ;;  %vm6851_vm5 = vmmov %vm6850_vm3 }
 0x18f   : > { %1384 = vst [vmem:[#allocation2 + $0x24] sm:$0x1] %v1383_v27  ;;  %1920 = vmatpush.bf16.msrb.mxu0 %v5422_v30  ;;  %1757 = vmatpush.bf16.msrb.mxu1 %v5422_v30  ;;  %v2032_v27 = vunpack.c.l.b16 %v2009_v0  ;;  %v3798_v61 = vsel %vm5280_vm1, %v4441_v9, %v3797_v53  ;;  %v5454_v53 = vrot.slane %v929_v13, 7  ;;  %v932_v60 = vshll.u32 %v871_v17, 16 }
 0x194   : > { %v5424_v2 = vpop.permute.xlu0 %1329  ;;  %v1322_v4 = vpop.permute.xlu1 %1321  ;;  %v1566_v0 = vld [vmem:[#allocation2 + $0x34] sm:$0x1] }
 0x195   : > { %v1380_v54 = vsel %vm5114_vm0, %v1322_v4, %v1379_v42  ;;  %v1593_v14 = vld [vmem:[#allocation2 + $0x1c] sm:$0x1]  ;;  %v3827_v4 = vunpack.c.l.b16 %v3798_v61 }
 0x196   : > { %1381 = vst [vmem:[#allocation2 + $0x20] sm:$0xf] %v1380_v54  ;;  %v1653_v45 = vshll.u32 %v1593_v14, 16  ;;  %v2012_v43 = vrot.slane %v1593_v14, 5  ;;  %v3454_v10 = vld [vmem:[#allocation2 + $0x1c] sm:$0x1] }
 0x197   : > { %v3801_v36 = vrot.slane %v3454_v10, 5  ;;  %v1291_v10 = vld [vmem:[#allocation2 + $0x30] sm:$0xf] }
 0x198   : > { %v1655_v44 = vrot.slane %v1653_v45, 5  ;;  %v2013_v3 = vsel %vm5280_vm1, %v4270_v56, %v2012_v43  ;;  %v4220_v45 = vld [vmem:[%s4630_s12 + $0x3c] sm:$0xf]  ;;  %v934_v43 = vor.u32 %v932_v60, %v5454_v53 }
 0x199   : > { %v2033_v32 = vunpack.c.l.b16 %v2013_v3  ;;  %v3802_v16 = vsel %vm5280_vm1, %v4442_v1, %v3801_v36  ;;  %v1202_v37 = vshrl.u32 %v4220_v45, 16  ;;  %v5462_v3 = vpop.permute.xlu2 %1505  ;;  %v1557_v36 = vld [vmem:[#allocation2 + $0x28] sm:$0xf] }
 0x19a   : > { %v1656_v49 = vsel %vm5285_vm6, %v1651_v31, %v1655_v44  ;;  %v3828_v48 = vunpack.c.l.b16 %v3802_v16 }
 0x19b   : > { %v1718_v8 = vunpack.c.l.b16 %v1656_v49  ;;  %v5441_v52 = vpack.c.b16 %v2033_v32, %v2032_v27  ;;  %v5470_v1 = vrot.slane %v1202_v37, 7  ;;  %v1205_v27 = vshll.u32 %v4220_v45, 16 }
 0x19c   : > { %v1336_v58 = vpop.permute.xlu0 %1335  ;;  %v1063_v42 = vpop.permute.xlu1 %1062  ;;  %v5450_v39 = vpack.c.b16 %v3828_v48, %v3827_v4 }
 0x19d   : > { %v1551_v26 = vld [vmem:[#allocation2 + $0x20] sm:$0xf]  ;;  %v1128_v18 = vsel %vm5125_vm2, %v1063_v42, %v1127_v51  ;;  %v1724_v54 = vpack.c.b16 %v1718_v8, %v1717_v55  ;;  %v1207_v32 = vor.u32 %v1205_v27, %v5470_v1  ;;  %v1554_v42 = vld [vmem:[#allocation2 + $0x24] sm:$0x1] }
 0x19e   : > { %v1552_v14 = vsel %vm5222_vm12, %v5396_v19, %v1551_v26  ;;  %1129 = vst [vmem:[#allocation2 + $0x3c] sm:$0x1] %v1128_v18 }
 0x19f   : > { %1553 = vst [vmem:[#allocation2 + $0x20] sm:$0xf] %v1552_v14  ;;  %1729 = vrot.lane.b32.xlu1 %v1724_v54, %s4563_s20  ;;  %1855 = vrot.lane.b32.xlu2 %v1724_v54, %s4564_s21  ;;  %v1595_v14 = vld [vmem:[#allocation2 + $0x2c] sm:$0x1] }
 0x1a4   : > { %v1504_v56 = vpop.permute.xlu0 %1503  ;;  %v1230_v9 = vpop.permute.xlu1 %1229 }
 0x1a5   : > { %v1567_v19 = vsel %vm6847_vm13, %v1504_v56, %v1566_v0  ;;  %v1300_v31 = vld [vmem:[#allocation2 + $0x3c] sm:$0x1]  ;;  %v1292_v44 = vsel %vm5082_vm15, %v1230_v9, %v1291_v10 }
 0x1a6   : > { %1568 = vst [vmem:[#allocation2 + $0x34] sm:$0x1] %v1567_v19  ;;  %v1301_v17 = vsel %vm5154_vm14, %v5404_v22, %v1300_v31  ;;  %v1585_v51 = vld [vmem:[#allocation2 + $0x20] sm:$0xf]  ;;  %v1681_v19 = vshll.u32 %v1595_v14, 16 }
 0x1a7   : > { %1293 = vst [vmem:[#allocation2 + $0x30] sm:$0xf] %v1292_v44  ;;  %1064 = vrot.lane.b32.xlu1 %v4910_v47, %s4558_s14  ;;  %964 = vrot.lane.b32.xlu2 %v934_v43, %s4558_s14  ;;  %v1658_v48 = vshrl.u32 %v1585_v51, 16  ;;  %v1661_v26 = vshll.u32 %v1585_v51, 16  ;;  %v5485_v10 = vld [vmem:[#allocation2 + $0x1c] sm:$0x1] }
 0x1a8   : > { %1302 = vst [vmem:[#allocation2 + $0x3c] sm:$0x1] %v1301_v17  ;;  %v1975_v9 = vld [vmem:[#allocation2 + $0x20] sm:$0xe]  ;;  %v2674_v44 = vld [vmem:[#allocation2 + $0x18] sm:$0xe] }
 0x1a9   : > { %v1660_v60 = vrot.slane %v1658_v48, 4  ;;  %v1663_v45 = vrot.slane %v1661_v26, 5  ;;  %v1397_v17 = vld [vmem:[#allocation2 + $0x38] sm:$0xf]  ;;  %v1683_v51 = vrot.slane %v1681_v19, 5 }
 0x1aa   : > { %v5505_v19 = vld [vmem:[#allocation2 + $0x2c] sm:$0x1] }
 0x1ac   : > { %v1498_v61 = vpop.permute.xlu1 %1497 }
 0x1ad   : > { %v1558_v55 = vsel %vm5222_vm12, %v1498_v61, %v1557_v36  ;;  %v2675_v61 = vld [vmem:[#allocation2 + $0x20] sm:$0xe] }
 0x1ae   : > { %v1391_v49 = vld [vmem:[#allocation2 + $0x30] sm:$0xf]  ;;  %1559 = vst [vmem:[#allocation2 + $0x28] sm:$0xf] %v1558_v55 }
 0x1af   : > { %v1400_v8 = vld [vmem:[#allocation2 + $0x3c] sm:$0x1]  ;;  %v1392_v22 = vsel %vm5114_vm0, %v5424_v2, %v1391_v49  ;;  %1237 = vrot.lane.b32.xlu1 %v1207_v32, %s4559_s15  ;;  %v1664_v32 = vor.u32 %v1663_v45, %v1660_v60 }
 0x1b0   : > { %v1401_v13 = vsel %vm6846_vm4, %v1336_v58, %v1400_v8  ;;  %1393 = vst [vmem:[#allocation2 + $0x30] sm:$0xf] %v1392_v22  ;;  %v1854_v16 = vpop.permute.xlu2 %1853  ;;  %v2020_v22 = vrot.slane %v1595_v14, 5 }
 0x1b1   : > { %1402 = vst [vmem:[#allocation2 + $0x3c] sm:$0x1] %v1401_v13  ;;  %4255 = vmatmul.msk.bf16.vlgmr.msrb.gmra.mxu3 %vm6850_vm3, %v1854_v16  ;;  %4259 = vmatmul.msk.bf16.vlgmr.msrb.gmra.mxu0 %vm6851_vm5, %v1854_v16  ;;  %v2706_v13 = vrot.slane %v5485_v10, 5  ;;  %vm6853_vm5 = vnez %v6811_v15 }
 0x1b4   : > { %v1496_v4 = vpop.permute.xlu1 %1495 }
 0x1b5   : > { %v1555_v2 = vsel %vm6847_vm13, %v1496_v4, %v1554_v42  ;;  %v1586_v18 = vld [vmem:[#allocation2 + $0x28] sm:$0xf]  ;;  %v4271_v42 = vrot.slane %v1975_v9, 9  ;;  %v4340_v4 = vrot.slane %v2674_v44, 9 }
 0x1b6   : > { %1556 = vst [vmem:[#allocation2 + $0x24] sm:$0x1] %v1555_v2  ;;  %v1672_v58 = vshrl.u32 %v1586_v18, 16  ;;  %v1675_v54 = vshll.u32 %v1586_v18, 16  ;;  %v1976_v43 = vld [vmem:[#allocation2 + $0x28] sm:$0xe] }
 0x1b7   : > { %v4272_v31 = vrot.slane %v1976_v43, 9  ;;  %v4341_v2 = vrot.slane %v2675_v61, 9  ;;  %v2676_v15 = vld [vmem:[#allocation2 + $0x28] sm:$0xe] }
 0x1b8   : > { %v1674_v0 = vrot.slane %v1672_v58, 4  ;;  %v1677_v56 = vrot.slane %v1675_v54, 5  ;;  %v3774_v58 = vld [vmem:[#allocation2 + $0x28] sm:$0xe]  ;;  %v1665_v54 = vrot.slane %v1664_v32, 4 }
 0x1b9   : > { %v2021_v26 = vsel %vm5280_vm1, %v4272_v31, %v2020_v22  ;;  %v4444_v9 = vrot.slane %v3774_v58, 9  ;;  %v1563_v32 = vld [vmem:[#allocation2 + $0x30] sm:$0xf] }
 0x1ba   : > { %v1678_v37 = vor.u32 %v1677_v56, %v1674_v0  ;;  %v2707_v0 = vsel %vm5280_vm1, %v4340_v4, %v2706_v13 }
 0x1bb   : > { %v2730_v61 = vunpack.c.l.b16 %v2707_v0  ;;  %v663_v0 = vrot.slane %v5332_v7, 4 }
 0x1bc   : > { %v1334_v27 = vpop.permute.xlu1 %1333  ;;  %v1679_v36 = vrot.slane %v1678_v37, 4  ;;  %v2035_v37 = vunpack.c.l.b16 %v2021_v26 }
 0x1bd   : > { %v1398_v49 = vsel %vm5114_vm0, %v1334_v27, %v1397_v17  ;;  %v1594_v55 = vld [vmem:[#allocation2 + $0x24] sm:$0x1] }
 0x1be   : > { %v5489_v8 = vld [vmem:[#allocation2 + $0x24] sm:$0x1]  ;;  %1399 = vst [vmem:[#allocation2 + $0x38] sm:$0xf] %v1398_v49  ;;  %v1667_v16 = vshll.u32 %v1594_v55, 16  ;;  %v2016_v48 = vrot.slane %v1594_v55, 5  ;;  %v1684_v14 = vsel %vm5285_vm6, %v1679_v36, %v1683_v51 }
 0x1bf   : > { %v2710_v18 = vrot.slane %v5489_v8, 5  ;;  %v1720_v44 = vunpack.c.l.b16 %v1684_v14  ;;  %v5507_v49 = vld [vmem:[#allocation2 + $0x24] sm:$0x1]  ;;  %v3773_v55 = vld [vmem:[#allocation2 + $0x20] sm:$0xe] }
 0x1c0   : > { %v1669_v60 = vrot.slane %v1667_v16, 5  ;;  %v2017_v45 = vsel %vm5280_vm1, %v4271_v42, %v2016_v48  ;;  %v3809_v42 = vrot.slane %v5505_v19, 5 }
 0x1c1   : > { %v2711_v56 = vsel %vm5280_vm1, %v4341_v2, %v2710_v18  ;;  %v2034_v17 = vunpack.c.l.b16 %v2017_v45  ;;  %v4443_v2 = vrot.slane %v3773_v55, 9  ;;  %v3805_v18 = vrot.slane %v5507_v49, 5 }
 0x1c2   : > { %v1670_v43 = vsel %vm5285_vm6, %v1665_v54, %v1669_v60  ;;  %v2731_v27 = vunpack.c.l.b16 %v2711_v56  ;;  %v3810_v58 = vsel %vm5280_vm1, %v4444_v9, %v3809_v42  ;;  %v4236_v54 = vld [vmem:[#allocation2] sm:$0xf]  ;;  %v4470_v60 = vld [vmem:[#allocation2 + $0x4] sm:$0xf0]  ;;  %v1572_v56 = vld [vmem:[#allocation2 + $0x3c] sm:$0x1] }
 0x1c3   : > { %v1719_v31 = vunpack.c.l.b16 %v1670_v43  ;;  %v5511_v51 = vpack.c.b16 %v2035_v37, %v2034_v17  ;;  %v3830_v45 = vunpack.c.l.b16 %v3810_v58  ;;  %v4237_v9 = vor.u32 %v4470_v60, %v4236_v54  ;;  %v4228_v42 = vld [vmem:[%s4630_s12 + $0x3c] sm:$0xf] }
 0x1c4   : > { %v1502_v36 = vpop.permute.xlu1 %1501  ;;  %v5517_v48 = vpack.c.b16 %v2731_v27, %v2730_v61  ;;  %v1474_v60 = vshrl.u32 %v4228_v42, 16 }
 0x1c5   : > { %v1569_v22 = vld [vmem:[#allocation2 + $0x38] sm:$0xf]  ;;  %v1564_v13 = vsel %vm5222_vm12, %v1502_v36, %v1563_v32  ;;  %v1725_v16 = vpack.c.b16 %v1720_v44, %v1719_v31  ;;  %v5537_v36 = vld [vmem:[#allocation2 + $0x34] sm:$0x1] }
 0x1c6   : > { %v1570_v4 = vsel %vm5222_vm12, %v5462_v3, %v1569_v22  ;;  %1565 = vst [vmem:[#allocation2 + $0x30] sm:$0xf] %v1564_v13  ;;  %v3806_v3 = vsel %vm5280_vm1, %v4443_v2, %v3805_v18  ;;  %v1695_v2 = vshll.u32 %v5537_v36, 16  ;;  %v758_v18 = vld [vmem:[#allocation2 + $0x40] sm:$0xf] }
 0x1c7   : > { %1571 = vst [vmem:[#allocation2 + $0x38] sm:$0xf] %v1570_v4  ;;  %1857 = vrot.lane.b32.xlu0 %v1725_v16, %s4564_s21  ;;  %1731 = vrot.lane.b32.xlu2 %v1725_v16, %s4563_s20  ;;  %v3829_v14 = vunpack.c.l.b16 %v3806_v3 }
 0x1c8   : > { %v5519_v26 = vpop.permute.xlu0 %1727 }
 0x1c9   : > { %4230 = vmatmul.msk.bf16.vlgmr.msrb.gmra.mxu1 %vm6850_vm3, %v5519_v26  ;;  %v5531_v37 = vpack.c.b16 %v3830_v45, %v3829_v14 }
 0x1cb   : > { %6852 = vst [vmem:[#allocation3_spill] sm:$0xff] %v5531_v37 }
 0x1cc   : > { %v1508_v43 = vpop.permute.xlu1 %1507 }
 0x1cd   : > { %v1573_v31 = vsel %vm6847_vm13, %v1508_v43, %v1572_v56  ;;  %v1587_v44 = vld [vmem:[#allocation2 + $0x30] sm:$0xf]  ;;  %v1477_v43 = vshll.u32 %v4228_v42, 16 }
 0x1ce   : > { %1574 = vst [vmem:[#allocation2 + $0x3c] sm:$0x1] %v1573_v31  ;;  %v1588_v17 = vld [vmem:[#allocation2 + $0x38] sm:$0xf]  ;;  %v1686_v27 = vshrl.u32 %v1587_v44, 16  ;;  %v1689_v32 = vshll.u32 %v1587_v44, 16 }
 0x1cf   : > { %1799 = vrot.lane.b32.xlu0 %v4237_v9, %s4564_s21  ;;  %694 = vrot.lane.b32.xlu2 %v663_v0, %s4557_s13  ;;  %v1700_v7 = vshrl.u32 %v1588_v17, 16  ;;  %v1703_v61 = vshll.u32 %v1588_v17, 16  ;;  %v1697_v0 = vrot.slane %v1695_v2, 5  ;;  %v5548_v31 = vld [vmem:[#allocation2 + $0x2c] sm:$0x1] }
 0x1d0   : > { %v1688_v55 = vrot.slane %v1686_v27, 4  ;;  %v1691_v22 = vrot.slane %v1689_v32, 5  ;;  %v5552_v27 = vrot.slane %v1474_v60, 7  ;;  %v793_v2 = vpop.permute.xlu0 %792  ;;  %v2271_v12 = vshll.u32 %v5548_v31, 16 }
 0x1d1   : > { %v1702_v13 = vrot.slane %v1700_v7, 4  ;;  %v1705_v16 = vrot.slane %v1703_v61, 5 }
 0x1d2   : > { %v1692_v4 = vor.u32 %v1691_v22, %v1688_v55  ;;  %v5556_v55 = vld [vmem:[#allocation2 + $0x34] sm:$0x1]  ;;  %v4342_v22 = vrot.slane %v2676_v15, 9  ;;  %v4240_v15 = vld [vmem:[#allocation2 + $0x10] sm:$0xf] }
 0x1d3   : > { %v1706_v54 = vor.u32 %v1705_v16, %v1702_v13  ;;  %v1479_v13 = vor.u32 %v1477_v43, %v5552_v27  ;;  %v5560_v16 = vld [vmem:[#allocation2 + $0x34] sm:$0x1] }
 0x1d4   : > { %v693_v58 = vpop.permute.xlu1 %692  ;;  %v1693_v3 = vrot.slane %v1692_v4, 4  ;;  %v2677_v4 = vld [vmem:[#allocation2 + $0x30] sm:$0xe] }
 0x1d5   : > { %v759_v14 = vsel %vm6853_vm5, %v693_v58, %v758_v18  ;;  %v5543_v45 = vld [vmem:[#allocation2 + $0x3c] sm:$0x1]  ;;  %v1707_v44 = vrot.slane %v1706_v54, 4  ;;  %v3776_v54 = vld [vmem:[#allocation2 + $0x38] sm:$0xe]  ;;  %vm6857_vm5 = vcmask 1043456  }
 0x1d6   : > { %760 = vst [vmem:[#allocation2 + $0x40] sm:$0xf] %v759_v14  ;;  %v1709_v56 = vshll.u32 %v5543_v45, 16  ;;  %v1698_v9 = vsel %vm5285_vm6, %v1693_v3, %v1697_v0  ;;  %v5562_v42 = vld [vmem:[#allocation2 + $0x3c] sm:$0x1]  ;;  %v4343_v0 = vrot.slane %v2677_v4, 9 }
 0x1d7   : > { %1337 = vrot.lane.b32.xlu2 %v4910_v47, %s4561_s19  ;;  %v1721_v7 = vunpack.c.l.b16 %v1698_v9  ;;  %v2714_v47 = vrot.slane %v5548_v31, 5  ;;  %v3775_v3 = vld [vmem:[#allocation2 + $0x30] sm:$0xe]  ;;  %v3813_v9 = vrot.slane %v5560_v16, 5  ;;  %v3817_v11 = vrot.slane %v5562_v42, 5 }
 0x1d8   : > { %v1711_v17 = vrot.slane %v1709_v56, 5  ;;  %v2718_v56 = vrot.slane %v5556_v55, 5  ;;  %v4445_v43 = vrot.slane %v3775_v3, 9  ;;  %v4244_v3 = vld [vmem:[#allocation2 + $0x20] sm:$0xf] }
 0x1d9   : > { %v2715_v14 = vsel %vm5280_vm1, %v4342_v22, %v2714_v47  ;;  %v4472_v47 = vld [vmem:[#allocation2 + $0x24] sm:$0xf0]  ;;  %v5788_v59 = vld [vmem:[#allocation2 + $0x3c] sm:$0x1] }
 0x1da   : > { %v1712_v32 = vsel %vm5285_vm6, %v1707_v44, %v1711_v17  ;;  %v4446_v44 = vrot.slane %v3776_v54, 9  ;;  %v2719_v17 = vsel %vm5280_vm1, %v4343_v0, %v2718_v56  ;;  %v935_v0 = vrot.slane %v5454_v53, 4  ;;  %v4282_v56 = vld [vmem:[#allocation2 + $0x8] sm:$0xf]  ;;  %v2191_v53 = vld [vmem:[#allocation2 + $0x10] sm:$0xf] }
 0x1db   : > { %v1722_v61 = vunpack.c.l.b16 %v1712_v32  ;;  %v2732_v32 = vunpack.c.l.b16 %v2715_v14  ;;  %v4474_v14 = vld [vmem:[#allocation2 + $0xc] sm:$0xf0] }
 0x1dc   : > { %v3818_v22 = vsel %vm5280_vm1, %v4446_v44, %v3817_v11  ;;  %v4475_v44 = vld [vmem:[#allocation2 + $0x1c] sm:$0xf0]  ;;  %v4476_v11 = vld [vmem:[#allocation2 + $0x2c] sm:$0xf0] }
 0x1dd   : > { %v858_v18 = vld [vmem:[#allocation2 + $0x40] sm:$0xf]  ;;  %v1726_v58 = vpack.c.b16 %v1722_v61, %v1721_v7  ;;  %v2733_v7 = vunpack.c.l.b16 %v2719_v17  ;;  %v3814_v61 = vsel %vm5280_vm1, %v4445_v43, %v3813_v9  ;;  %v3832_v4 = vunpack.c.l.b16 %v3818_v22  ;;  %v4286_v17 = vld [vmem:[#allocation2 + $0x18] sm:$0xf] }
 0x1de   : > { %v859_v60 = vsel %vm5013_vm7, %v793_v2, %v858_v18  ;;  %v4471_v2 = vld [vmem:[#allocation2 + $0x14] sm:$0xf0]  ;;  %v1208_v43 = vrot.slane %v5470_v1, 4  ;;  %v5590_v9 = vor.u32 %v4474_v14, %v4282_v56  ;;  %v2189_v1 = vld [vmem:[#allocation2 + $0x8] sm:$0xf]  ;;  %v2223_v22 = vshll.u32 %v2191_v53, 16  ;;  %vm6855_vm7 = vmmov %vm6850_vm3 }
 0x1df   : > { %860 = vst [vmem:[#allocation2 + $0x40] sm:$0xf] %v859_v60  ;;  %1733 = vrot.lane.b32.xlu1 %v1726_v58, %s4563_s20  ;;  %1859 = vrot.lane.b32.xlu0 %v1726_v58, %s4564_s21  ;;  %v5580_v18 = vpack.c.b16 %v2733_v7, %v2732_v32  ;;  %v4241_v58 = vor.u32 %v4471_v2, %v4240_v15  ;;  %v4290_v32 = vld [vmem:[#allocation2 + $0x28] sm:$0xf]  ;;  %v4248_v2 = vld [vmem:[#allocation2 + $0x30] sm:$0xf] }
 0x1e0   : > { %1509 = vrot.lane.b32.xlu2 %v1479_v13, %s4560_s16  ;;  %v3831_v13 = vunpack.c.l.b16 %v3814_v61  ;;  %v4245_v60 = vor.u32 %v4472_v47, %v4244_v3  ;;  %v5596_v15 = vor.u32 %v4475_v44, %v4286_v17  ;;  %v5598_v7 = vor.u32 %v4476_v11, %v4290_v32  ;;  %v2193_v11 = vld [vmem:[#allocation2 + $0x18] sm:$0xf] }
 0x1e1   : > { %v2220_v61 = vshrl.u32 %v2191_v53, 16  ;;  %v2229_v44 = vshll.u32 %v5381_v41, 16  ;;  %v2215_v17 = vshll.u32 %v5375_v63, 16  ;;  %v2237_v41 = vshll.u32 %v2193_v11, 16 }
 0x1e2   : > { %v5582_v54 = vpack.c.b16 %v3832_v4, %v3831_v13  ;;  %v2206_v13 = vshrl.u32 %v2189_v1, 16  ;;  %v2209_v4 = vshll.u32 %v2189_v1, 16 }
 0x1e3   : > { %v2222_v3 = vrot.slane %v2220_v61, 4 }
 0x1e4   : > { %6854 = vst [vmem:[#allocation4_spill] sm:$0xff] %v5582_v54  ;;  %v2211_v56 = vrot.slane %v2209_v4, 5  ;;  %v2231_v4 = vrot.slane %v2229_v44, 5 }
 0x1e7   : > { %1801 = vrot.lane.b32.xlu1 %v4241_v58, %s4564_s21  ;;  %794 = vrot.lane.b32.xlu0 %v4939_v5, %s4557_s13  ;;  %v4473_v58 = vld [vmem:[#allocation2 + $0x34] sm:$0xf0] }
 0x1e8   : > { %1803 = vrot.lane.b32.xlu2 %v4245_v60, %s4564_s21  ;;  %v2225_v60 = vrot.slane %v2223_v22, 5  ;;  %v4249_v14 = vor.u32 %v4473_v58, %v4248_v2  ;;  %v2234_v2 = vshrl.u32 %v2193_v11, 16  ;;  %v2217_v58 = vrot.slane %v2215_v17, 5  ;;  %v1977_v11 = vld [vmem:[#allocation2 + $0x30] sm:$0xe] }
 0x1e9   : > { %v1978_v17 = vld [vmem:[#allocation2 + $0x38] sm:$0xe] }
 0x1ea   : > { %v2226_v32 = vor.u32 %v2225_v60, %v2222_v3  ;;  %v2236_v60 = vrot.slane %v2234_v2, 4 }
 0x1ef   : > { %966 = vrot.lane.b32.xlu1 %v935_v0, %s4558_s14  ;;  %2129 = vrot.lane.b32.xlu0 %v5590_v9, %s4565_s28  ;;  %v2208_v0 = vrot.slane %v2206_v13, 4 }
 0x1f0   : > { %1239 = vrot.lane.b32.xlu2 %v1208_v43, %s4559_s15  ;;  %v2195_v43 = vld [vmem:[#allocation2 + $0x20] sm:$0xf] }
 0x1f1   : > { %v2248_v53 = vshrl.u32 %v2195_v43, 16  ;;  %v2251_v1 = vshll.u32 %v2195_v43, 16  ;;  %v2212_v22 = vor.u32 %v2211_v56, %v2208_v0  ;;  %v2239_v43 = vrot.slane %v2237_v41, 5 }
 0x1f2   : > { %v2257_v0 = vshll.u32 %v5489_v8, 16  ;;  %v4273_v8 = vrot.slane %v1977_v11, 9  ;;  %v337_v11 = vld [vmem:[#allocation2 + $0x48] sm:$0x1] }
 0x1f3   : > { %v2250_v54 = vrot.slane %v2248_v53, 4  ;;  %v2253_v37 = vrot.slane %v2251_v1, 5  ;;  %v2213_v63 = vrot.slane %v2212_v22, 4  ;;  %v2240_v53 = vor.u32 %v2239_v43, %v2236_v60 }
 0x1f4   : > { %v2259_v1 = vrot.slane %v2257_v0, 5  ;;  %v1589_v0 = vld [vmem:[%s6786_s4] sm:$0xf] }
 0x1f5   : > { %v2218_v28 = vsel %vm5285_vm6, %v2213_v63, %v2217_v58  ;;  %v2254_v56 = vor.u32 %v2253_v37, %v2250_v54  ;;  %v2241_v37 = vrot.slane %v2240_v53, 4 }
 0x1f7   : > { %2131 = vrot.lane.b32.xlu1 %v5596_v15, %s4565_s28  ;;  %1066 = vrot.lane.b32.xlu0 %v4939_v5, %s4558_s14 }
 0x1f8   : > { %2133 = vrot.lane.b32.xlu2 %v5598_v7, %s4565_s28 }
 0x1f9   : > { %v1856_v47 = vpop.permute.xlu2 %1855 }
 0x1fa   : > { %4256 = vmatmul.msk.bf16.gmra.mxu3 %vm6855_vm7, %v1856_v47  ;;  %4260 = vmatmul.msk.bf16.gmra.mxu0 %vm6850_vm3, %v1856_v47  ;;  %v1030_v47 = vld [vmem:[#allocation2 + $0x40] sm:$0xf]  ;;  %vm6859_vm7 = vnez %v6803_v25 }
 0x1fb   : > { %v338_v53 = vsel %vm6859_vm7, 0, %v337_v11 }
 0x1fc   : > { %339 = vst [vmem:[#allocation2 + $0x48] sm:$0x1] %v338_v53  ;;  %v2273_v53 = vrot.slane %v2271_v12, 5 }
 0x1ff   : > { %1339 = vrot.lane.b32.xlu1 %v4939_v5, %s4561_s19  ;;  %1805 = vrot.lane.b32.xlu0 %v4249_v14, %s4564_s21  ;;  %v1480_v5 = vrot.slane %v5552_v27, 4  ;;  %v2227_v14 = vrot.slane %v2226_v32, 4  ;;  %v2243_v27 = vshll.u32 %v5485_v10, 16  ;;  %v2028_v32 = vrot.slane %v5543_v45, 5 }
 0x201   : > { %v965_v61 = vpop.permute.xlu2 %964  ;;  %v2232_v3 = vsel %vm5285_vm6, %v2227_v14, %v2231_v4  ;;  %v2245_v22 = vrot.slane %v2243_v27, 5  ;;  %v2024_v4 = vrot.slane %v5537_v36, 5 }
 0x202   : > { %v1031_v13 = vsel %vm5032_vm11, %v965_v61, %v1030_v47  ;;  %v2320_v44 = vunpack.c.l.b16 %v2232_v3  ;;  %v2319_v47 = vunpack.c.l.b16 %v2218_v28  ;;  %v4274_v61 = vrot.slane %v1978_v17, 9  ;;  %vm6856_vm11 = vmmov %vm6850_vm3  ;;  %v761_v17 = vld [vmem:[#allocation2 + $0x44] sm:$0x1] }
 0x203   : > { %1032 = vst [vmem:[#allocation2 + $0x40] sm:$0xf] %v1031_v13  ;;  %v2025_v45 = vsel %vm5280_vm1, %v4273_v8, %v2024_v4  ;;  %v2246_v2 = vsel %vm5285_vm6, %v2241_v37, %v2245_v22  ;;  %v5656_v28 = vsel %vm6857_vm5, %v1589_v0, 0  ;;  %v2197_v22 = vld [vmem:[#allocation2 + $0x28] sm:$0xf] }
 0x204   : > { %v5626_v13 = vpack.c.b16 %v2320_v44, %v2319_v47  ;;  %v2029_v10 = vsel %vm5280_vm1, %v4274_v61, %v2028_v32  ;;  %v2036_v58 = vunpack.c.l.b16 %v2025_v45  ;;  %v2321_v14 = vunpack.c.l.b16 %v2246_v2  ;;  %1829 = vmatpush.bf16.msrb.mxu2 %v5656_v28  ;;  %1949 = vmatpush.bf16.msra.mxu1 %v5656_v28  ;;  %v2199_v61 = vld [vmem:[#allocation2 + $0x30] sm:$0xf] }
 0x205   : > { %v2037_v41 = vunpack.c.l.b16 %v2029_v10  ;;  %v2262_v46 = vshrl.u32 %v2197_v22, 16  ;;  %v2265_v4 = vshll.u32 %v2197_v22, 16 }
 0x207   : > { %2042 = vrot.lane.b32.xlu1 %v5310_v21, %s4563_s20  ;;  %1511 = vrot.lane.b32.xlu0 %v1480_v5, %s4560_s16  ;;  %v2255_v21 = vrot.slane %v2254_v56, 4  ;;  %v2041_v63 = vpack.c.b16 %v2037_v41, %v2036_v58  ;;  %v2267_v58 = vrot.slane %v2265_v4, 5  ;;  %v3455_v4 = vld [vmem:[#allocation2 + $0x20] sm:$0xf] }
 0x208   : > { %2069 = vmatpush.bf16.msra.mxu2 %v5415_v57 }
 0x209   : > { %v2260_v54 = vsel %vm5285_vm6, %v2255_v21, %v2259_v1  ;;  %v2276_v21 = vshrl.u32 %v2199_v61, 16 }
 0x20a   : > { %v2322_v5 = vunpack.c.l.b16 %v2260_v54  ;;  %v1130_v60 = vld [vmem:[#allocation2 + $0x40] sm:$0xf] }
 0x20b   : > { %v2278_v37 = vrot.slane %v2276_v21, 4 }
 0x20c   : > { %v5645_v3 = vpack.c.b16 %v2322_v5, %v2321_v14  ;;  %v2264_v5 = vrot.slane %v2262_v46, 4  ;;  %v4300_v14 = vld [vmem:[%s6786_s4 + $0x10] sm:$0xf]  ;;  %v4478_v46 = vld [vmem:[#allocation2 + $0x14] sm:$0xf0] }
 0x20f   : > { %2480 = vrot.lane.b32.xlu1 %v5626_v13, %s4565_s28  ;;  %2044 = vrot.lane.b32.xlu0 %v5441_v52, %s4563_s20 }
 0x211   : > { %v5641_v36 = vpop.permute.xlu1 %1729 }
 0x212   : > { %4231 = vmatmul.msk.bf16.gmra.mxu1 %vm6856_vm11, %v5641_v36 }
 0x217   : > { %2048 = vrot.lane.b32.xlu1 %v2041_v63, %s4563_s20  ;;  %2482 = vrot.lane.b32.xlu0 %v5645_v3, %s4565_s28  ;;  %v5692_v63 = vsel %vm6857_vm5, %v4300_v14, 0 }
 0x218   : > { %2353 = vmatpush.bf16.msra.mxu0 %v5692_v63 }
 0x219   : > { %v1065_v52 = vpop.permute.xlu1 %1064 }
 0x21a   : > { %v1131_v43 = vsel %vm5060_vm9, %v1065_v52, %v1130_v60  ;;  %vm6858_vm9 = vmmov %vm6850_vm3  ;;  %vm6860_vm3 = vnez %v6813_v24  ;;  %v2279_v24 = vshll.u32 %v2199_v61, 16  ;;  %v2268_v60 = vor.u32 %v2267_v58, %v2264_v5 }
 0x21b   : > { %1132 = vst [vmem:[#allocation2 + $0x40] sm:$0xf] %v1131_v43  ;;  %v2285_v43 = vshll.u32 %v5556_v55, 16 }
 0x21c   : > { %v2281_v54 = vrot.slane %v2279_v24, 5  ;;  %v2269_v11 = vrot.slane %v2268_v60, 4 }
 0x21e   : > { %v2282_v52 = vor.u32 %v2281_v54, %v2278_v37  ;;  %v2274_v31 = vsel %vm5285_vm6, %v2269_v11, %v2273_v53  ;;  %v3457_v37 = vld [vmem:[#allocation2 + $0x28] sm:$0xf]  ;;  %v3496_v54 = vshrl.u32 %v3455_v4, 16  ;;  %v3519_v11 = vshll.u32 %v5505_v19, 16 }
 0x21f   : > { %2828 = vrot.lane.b32.xlu1 %v5590_v9, %s4564_s21 }
 0x220   : > { %v3498_v14 = vrot.slane %v3496_v54, 4 }
 0x221   : > { %v5663_v27 = vpop.permute.xlu2 %1731  ;;  %v1238_v50 = vpop.permute.xlu1 %1237 }
 0x222   : > { %v1303_v56 = vld [vmem:[#allocation2 + $0x40] sm:$0xf]  ;;  %4232 = vmatmul.msk.bf16.gmra.mxu1 %vm6858_vm9, %v5663_v27 }
 0x223   : > { %v1304_v44 = vsel %vm5082_vm15, %v1238_v50, %v1303_v56  ;;  %vm6861_vm15 = vmmov %vm6857_vm5  ;;  %v2283_v50 = vrot.slane %v2282_v52, 4  ;;  %v4294_v56 = vld [vmem:[#allocation2 + $0x38] sm:$0xf] }
 0x224   : > { %1305 = vst [vmem:[#allocation2 + $0x40] sm:$0xf] %v1304_v44  ;;  %v5679_v25 = vsel %vm6861_vm15, %v4279_v35, 0 }
 0x225   : > { %2159 = vmatpush.bf16.msra.mxu3 %v5679_v25  ;;  %2390 = vmatpush.bf16.msrb.mxu1 %v5679_v25 }
 0x229   : > { %v695_v32 = vpop.permute.xlu2 %694  ;;  %2456 = vmatpush.bf16.msrb.mxu3 %v5656_v28 }
 0x22a   : > { %v762_v9 = vsel %vm6860_vm3, %v695_v32, %v761_v17  ;;  %v2287_v17 = vrot.slane %v2285_v43, 5 }
 0x22b   : > { %763 = vst [vmem:[#allocation2 + $0x44] sm:$0x1] %v762_v9  ;;  %v1403_v1 = vld [vmem:[#allocation2 + $0x40] sm:$0xf] }
 0x22c   : > { %v2288_v9 = vsel %vm5285_vm6, %v2283_v50, %v2287_v17 }
 0x22d   : > { %v2324_v55 = vunpack.c.l.b16 %v2288_v9 }
 0x231   : > { %v1338_v47 = vpop.permute.xlu2 %1337 }
 0x232   : > { %v1404_v8 = vsel %vm5114_vm0, %v1338_v47, %v1403_v1  ;;  %vm6862_vm0 = vmmov %vm6858_vm9  ;;  %v2323_v1 = vunpack.c.l.b16 %v2274_v31  ;;  %v861_v21 = vld [vmem:[#allocation2 + $0x44] sm:$0x1] }
 0x233   : > { %1405 = vst [vmem:[#allocation2 + $0x40] sm:$0xf] %v1404_v8  ;;  %vm6863_vm11 = vmmov %vm6862_vm0 }
 0x234   : > { %v5705_v47 = vpack.c.b16 %v2324_v55, %v2323_v1  ;;  %vm6865_vm9 = vmmov %vm6862_vm0  ;;  %v3521_v55 = vrot.slane %v3519_v11, 5 }
 0x235   : > { %vm6866_vm7 = vmmov %vm6862_vm0 }
 0x236   : > { %vm6867_vm3 = vmmov %vm6862_vm0 }
 0x237   : > { %vm6868_vm15 = vmmov %vm6862_vm0 }
 0x238   : > { %vm6872_vm5 = vmmov %vm6862_vm0 }
 0x239   : > { %v1858_v10 = vpop.permute.xlu0 %1857 }
 0x23a   : > { %v1575_v45 = vld [vmem:[#allocation2 + $0x40] sm:$0xf]  ;;  %v1510_v2 = vpop.permute.xlu2 %1509  ;;  %4257 = vmatmul.msk.bf16.gmra.mxu3 %vm6862_vm0, %v1858_v10  ;;  %4261 = vmatmul.msk.bf16.gmra.mxu0 %vm6863_vm11, %v1858_v10  ;;  %vm6870_vm11 = vmmov %vm6862_vm0 }
 0x23b   : > { %v1576_v41 = vsel %vm5222_vm12, %v1510_v2, %v1575_v45  ;;  %vm6864_vm12 = vmmov %vm6862_vm0  ;;  %v3499_v45 = vshll.u32 %v3455_v4, 16  ;;  %v3510_v2 = vshrl.u32 %v3457_v37, 16  ;;  %v4317_v4 = vld [vmem:[%s6786_s4 + $0x14] sm:$0xf] }
 0x23c   : > { %1577 = vst [vmem:[#allocation2 + $0x40] sm:$0xf] %v1576_v41  ;;  %v3513_v41 = vshll.u32 %v3457_v37, 16 }
 0x23d   : > { %v3512_v60 = vrot.slane %v3510_v2, 4 }
 0x23e   : > { %v3515_v43 = vrot.slane %v3513_v41, 5 }
 0x241   : > { %v1800_v0 = vpop.permute.xlu0 %1799 }
 0x242   : > { %4250 = vmatmul.msk.bf16.vlgmr.msrb.gmra.mxu2 %vm6864_vm12, %v1800_v0  ;;  %v3516_v0 = vor.u32 %v3515_v43, %v3512_v60  ;;  %v1804_v12 = vpop.permute.xlu2 %1803  ;;  %vm6873_vm12 = vmmov %vm6862_vm0 }
 0x243   : > { %v4477_v44 = vld [vmem:[#allocation2 + $0x3c] sm:$0xf0]  ;;  %2427 = vmatpush.bf16.msrb.mxu2 %v5422_v30 }
 0x244   : > { %v4295_v32 = vor.u32 %v4477_v44, %v4294_v56  ;;  %v4419_v50 = vld [vmem:[#allocation2 + $0x40] sm:$0xf]  ;;  %v4481_v56 = vld [vmem:[#allocation2 + $0x44] sm:$0xf0] }
 0x245   : > { %v4420_v9 = vor.u32 %v4481_v56, %v4419_v50  ;;  %v2203_v2 = vld [vmem:[#allocation2 + $0x40] sm:$0xf] }
 0x246   : > { %2834 = vrot.lane.b32.xlu1 %v4295_v32, %s4564_s21  ;;  %2135 = vrot.lane.b32.xlu2 %v4295_v32, %s4565_s28  ;;  %v3777_v11 = vld [vmem:[#allocation2 + $0x40] sm:$0xe] }
 0x24e   : > { %2931 = vrot.lane.b32.xlu1 %v5705_v47, %s4563_s20  ;;  %2046 = vrot.lane.b32.xlu2 %v5511_v51, %s4563_s20  ;;  %v4407_v51 = vld [vmem:[#allocation2 + $0x10] sm:$0xf] }
 0x24f   : > { %v4408_v10 = vor.u32 %v4478_v46, %v4407_v51 }
 0x251   : > { %v5711_v8 = vpop.permute.xlu1 %1733  ;;  %v1860_v61 = vpop.permute.xlu0 %1859 }
 0x252   : > { %4233 = vmatmul.msk.bf16.gmra.mxu1 %vm6865_vm9, %v5711_v8  ;;  %4258 = vmatmul.msk.bf16.gmra.mxu3 %vm6866_vm7, %v1860_v61  ;;  %vm6875_vm9 = vnez %v6805_v29  ;;  %vm6876_vm7 = vmmov %vm6862_vm0 }
 0x253   : > { %4262 = vmatmul.msk.bf16.gmra.mxu0 %vm6867_vm3, %v1860_v61  ;;  %vm6877_vm3 = vcmask 1043456  }
 0x256   : > { %3102 = vrot.lane.b32.xlu1 %v5645_v3, %s4564_s21  ;;  %2484 = vrot.lane.b32.xlu2 %v5705_v47, %s4565_s28 }
 0x259   : > { %v1802_v35 = vpop.permute.xlu1 %1801  ;;  %v795_v22 = vpop.permute.xlu0 %794 }
 0x25a   : > { %v862_v24 = vsel %vm5027_vm10, %v795_v22, %v861_v21  ;;  %4251 = vmatmul.msk.bf16.gmra.mxu2 %vm6868_vm15, %v1802_v35  ;;  %vm6869_vm10 = vmmov %vm6862_vm0  ;;  %v1240_v35 = vpop.permute.xlu2 %1239 }
 0x25b   : > { %863 = vst [vmem:[#allocation2 + $0x44] sm:$0x1] %v862_v24  ;;  %v369_v24 = vld [vmem:[#allocation2 + $0x4c] sm:$0x1]  ;;  %vm6879_vm15 = vmmov %vm6862_vm0 }
 0x25e   : > { %3394 = vrot.lane.b32.xlu1 %v4408_v10, %s4565_s28  ;;  %2830 = vrot.lane.b32.xlu2 %v5596_v15, %s4564_s21  ;;  %v3501_v15 = vrot.slane %v3499_v45, 5  ;;  %v5774_v10 = vsel %vm6877_vm3, %v4317_v4, 0  ;;  %v2201_v45 = vld [vmem:[#allocation2 + $0x38] sm:$0xf]  ;;  %vm6892_vm3 = vmmov %vm6862_vm0 }
 0x25f   : > { %2510 = vmatpush.bf16.msrb.mxu0 %v5774_v10  ;;  %v2290_v41 = vshrl.u32 %v2201_v45, 16 }
 0x260   : > { %v3502_v38 = vor.u32 %v3501_v15, %v3498_v14  ;;  %v2304_v14 = vshrl.u32 %v2203_v2, 16 }
 0x261   : > { %v967_v5 = vpop.permute.xlu1 %966  ;;  %v5727_v58 = vpop.permute.xlu0 %2129  ;;  %v2292_v43 = vrot.slane %v2290_v41, 4 }
 0x262   : > { %v1033_v23 = vld [vmem:[#allocation2 + $0x44] sm:$0x1]  ;;  %4263 = vmatmul.msk.bf16.vlgmr.msra.gmra.mxu1 %vm6869_vm10, %v5519_v26  ;;  %4296 = vmatmul.msk.bf16.vlgmr.msra.gmra.mxu3 %vm6862_vm0, %v5727_v58  ;;  %v3505_v26 = vshll.u32 %v5507_v49, 16  ;;  %v3503_v32 = vrot.slane %v3502_v38, 4  ;;  %v3517_v49 = vrot.slane %v3516_v0, 4  ;;  %v5780_v54 = vpop.permute.xlu2 %2133  ;;  %vm6880_vm10 = vmmov %vm6862_vm0  ;;  %v2299_v0 = vshll.u32 %v5788_v59, 16 }
 0x263   : > { %v1034_v52 = vsel %vm5048_vm8, %v967_v5, %v1033_v23  ;;  %4301 = vmatmul.msk.bf16.vlgmr.msra.gmra.mxu0 %vm6870_vm11, %v5626_v13  ;;  %2621 = vmatpush.bf16.msra.mxu3 %v5422_v30  ;;  %vm6871_vm8 = vmmov %vm6862_vm0  ;;  %v2293_v5 = vshll.u32 %v2201_v45, 16  ;;  %v5824_v45 = vpop.f32.mrf.mxu0 }
 0x264   : > { %1035 = vst [vmem:[#allocation2 + $0x44] sm:$0x1] %v1034_v52  ;;  %2547 = vmatpush.bf16.msra.mxu1 %v5692_v63  ;;  %v3507_v44 = vrot.slane %v3505_v26, 5  ;;  %v3522_v19 = vsel %vm5285_vm6, %v3517_v49, %v3521_v55  ;;  %2650 = vmatpush.bf16.msra.mxu0 %v5656_v28  ;;  %v2307_v52 = vshll.u32 %v2203_v2, 16  ;;  %v4447_v55 = vrot.slane %v3777_v11, 9  ;;  %vm6884_vm11 = vmmov %vm6862_vm0  ;;  %v5829_v2 = vpop.f32.mrf.mxu3 }
 0x265   : > { %v3582_v6 = vunpack.c.l.b16 %v3522_v19  ;;  %v2295_v26 = vrot.slane %v2293_v5, 5  ;;  %v2678_v11 = vld [vmem:[#allocation2 + $0x38] sm:$0xe] }
 0x266   : > { %3273 = vrot.lane.b32.xlu1 %v5517_v48, %s4563_s20  ;;  %2927 = vrot.lane.b32.xlu2 %v5626_v13, %s4563_s20  ;;  %v3508_v31 = vsel %vm5285_vm6, %v3503_v32, %v3507_v44  ;;  %v2309_v50 = vrot.slane %v2307_v52, 5 }
 0x267   : > { %v3581_v1 = vunpack.c.l.b16 %v3508_v31  ;;  %v2296_v34 = vor.u32 %v2295_v26, %v2292_v43 }
 0x269   : > { %v1067_v30 = vpop.permute.xlu0 %1066  ;;  %v5753_v61 = vpop.permute.xlu1 %2131  ;;  %v5761_v21 = vpack.c.b16 %v3582_v6, %v3581_v1 }
 0x26a   : > { %4252 = vmatmul.msk.bf16.gmra.mxu2 %vm6871_vm8, %v1804_v12  ;;  %v2306_v12 = vrot.slane %v2304_v14, 4  ;;  %vm6885_vm8 = vmmov %vm6862_vm0  ;;  %v3461_v14 = vld [vmem:[#allocation2 + $0x38] sm:$0xf] }
 0x26b   : > { %v1133_v17 = vld [vmem:[#allocation2 + $0x44] sm:$0x1] }
 0x26c   : > { %v1134_v53 = vsel %vm5125_vm2, %v1067_v30, %v1133_v17  ;;  %vm6874_vm2 = vmmov %vm6862_vm0  ;;  %v2301_v30 = vrot.slane %v2299_v0, 5  ;;  %v2310_v17 = vor.u32 %v2309_v50, %v2306_v12  ;;  %v5846_v52 = vpop.f32.mrf.mxu3  ;;  %v3541_v0 = vshll.u32 %v3461_v14, 16  ;;  %v2679_v12 = vld [vmem:[#allocation2 + $0x40] sm:$0xe] }
 0x26d   : > { %1135 = vst [vmem:[#allocation2 + $0x44] sm:$0x1] %v1134_v53 }
 0x26e   : > { %3400 = vrot.lane.b32.xlu1 %v4420_v9, %s4565_s28  ;;  %v2297_v9 = vrot.slane %v2296_v34, 4 }
 0x270   : > { %v2302_v6 = vsel %vm5285_vm6, %v2297_v9, %v2301_v30  ;;  %v2722_v30 = vrot.slane %v5788_v59, 5 }
 0x271   : > { %v1806_v46 = vpop.permute.xlu0 %1805  ;;  %v1340_v20 = vpop.permute.xlu1 %1339 }
 0x272   : > { %4264 = vmatmul.msk.bf16.gmra.mxu1 %vm6872_vm5, %v5641_v36  ;;  %4297 = vmatmul.msk.bf16.gmra.mxu3 %vm6873_vm12, %v5753_v61  ;;  %v370_v36 = vsel %vm6875_vm9, 0, %v369_v24  ;;  %vm6886_vm5 = vmmov %vm6862_vm0 }
 0x273   : > { %4302 = vmatmul.msk.bf16.gmra.mxu0 %vm6874_vm2, %v5645_v3  ;;  %371 = vst [vmem:[#allocation2 + $0x4c] sm:$0x1] %v370_v36  ;;  %vm6887_vm12 = vmmov %vm6862_vm0 }
 0x274   : > { %v1306_v22 = vld [vmem:[#allocation2 + $0x44] sm:$0x1]  ;;  %vm6888_vm2 = vmmov %vm6862_vm0 }
 0x275   : > { %v1307_v51 = vsel %vm5154_vm14, %v1240_v35, %v1306_v22  ;;  %vm6878_vm14 = vmmov %vm6862_vm0  ;;  %v2311_v35 = vrot.slane %v2310_v17, 4 }
 0x276   : > { %1308 = vst [vmem:[#allocation2 + $0x44] sm:$0x1] %v1307_v51  ;;  %3679 = vrot.lane.b32.xlu1 %v5761_v21, %s4565_s28  ;;  %vm6889_vm9 = vmmov %vm6862_vm0 }
 0x279   : > { %v1512_v28 = vpop.permute.xlu0 %1511  ;;  %v2043_v38 = vpop.permute.xlu1 %2042 }
 0x27a   : > { %4253 = vmatmul.msk.bf16.gmra.mxu2 %vm6876_vm7, %v1806_v46  ;;  %v5792_v60 = vld [vmem:[#allocation2 + $0x4c] sm:$0x1]  ;;  %v2325_v46 = vunpack.c.l.b16 %v2302_v6  ;;  %vm6890_vm7 = vmmov %vm6862_vm0 }
 0x27b   : > { %v3825_v44 = vrot.slane %v5792_v60, 5 }
 0x27d   : > { %v1406_v37 = vld [vmem:[#allocation2 + $0x44] sm:$0x1] }
 0x27e   : > { %v1407_v29 = vsel %vm6846_vm4, %v1340_v20, %v1406_v37  ;;  %vm6881_vm4 = vmmov %vm6862_vm0  ;;  %v5816_v37 = vpop.f32.mrf.mxu1 }
 0x27f   : > { %1408 = vst [vmem:[#allocation2 + $0x44] sm:$0x1] %v1407_v29 }
 0x282   : > { %4265 = vmatmul.msk.bf16.gmra.mxu1 %vm6878_vm14, %v5663_v27  ;;  %4298 = vmatmul.msk.bf16.gmra.mxu3 %vm6879_vm15, %v5780_v54  ;;  %v3778_v27 = vld [vmem:[#allocation2 + $0x48] sm:$0xe]  ;;  %vm6893_vm14 = vmmov %vm6862_vm0 }
 0x283   : > { %4303 = vmatmul.msk.bf16.gmra.mxu0 %vm6880_vm10, %v5705_v47  ;;  %v4448_v56 = vrot.slane %v3778_v27, 9  ;;  %v5848_v27 = vpop.permute.xlu1 %2480  ;;  %vm6894_vm15 = vmmov %vm6862_vm0 }
 0x284   : > { %vm6895_vm10 = vmmov %vm6862_vm0 }
 0x285   : > { %v3826_v32 = vsel %vm5280_vm1, %v4448_v56, %v3825_v44  ;;  %v4415_v56 = vld [vmem:[#allocation2 + $0x30] sm:$0xf]  ;;  %v4480_v44 = vld [vmem:[#allocation2 + $0x34] sm:$0xf0] }
 0x286   : > { %v1578_v23 = vld [vmem:[#allocation2 + $0x44] sm:$0x1]  ;;  %v3834_v1 = vunpack.c.l.b16 %v3826_v32  ;;  %v5833_v5 = vpop.f32.mrf.mxu1  ;;  %v4345_v32 = vrot.slane %v2679_v12, 9 }
 0x287   : > { %v1579_v15 = vsel %vm6847_vm13, %v1512_v28, %v1578_v23  ;;  %vm6882_vm13 = vmmov %vm6862_vm0  ;;  %v5844_v28 = vpop.f32.mrf.mxu0  ;;  %v3459_v23 = vld [vmem:[#allocation2 + $0x30] sm:$0xf] }
 0x288   : > { %1580 = vst [vmem:[#allocation2 + $0x44] sm:$0x1] %v1579_v15  ;;  %v3527_v26 = vshll.u32 %v3459_v23, 16 }
 0x28a   : > { %4275 = vmatmul.msk.bf16.vlgmr.msra.gmra.mxu2 %vm6881_vm4, %v2043_v38  ;;  %v3538_v38 = vshrl.u32 %v3461_v14, 16  ;;  %v3529_v9 = vrot.slane %v3527_v26, 5  ;;  %v3451_v26 = vld [vmem:[#allocation2 + $0x10] sm:$0xf]  ;;  %vm6896_vm4 = vmmov %vm6862_vm0 }
 0x28b   : > { %2584 = vmatpush.bf16.msra.mxu2 %v5415_v57 }
 0x28f   : > { %v5800_v49 = vld [vmem:[#allocation2 + $0x44] sm:$0x1]  ;;  %v5850_v43 = vpop.f32.mrf.mxu1  ;;  %v5860_v50 = vpop.f32.mrf.mxu0 }
 0x290   : > { %v5802_v53 = vld [vmem:[#allocation2 + $0x44] sm:$0x1]  ;;  %v2313_v31 = vshll.u32 %v5800_v49, 16  ;;  %v2726_v34 = vrot.slane %v5800_v49, 5 }
 0x291   : > { %v3821_v19 = vrot.slane %v5802_v53, 5 }
 0x292   : > { %4266 = vmatmul.msk.bf16.gmra.mxu1 %vm6882_vm13, %v5711_v8  ;;  %v2315_v22 = vrot.slane %v2313_v31, 5  ;;  %v2045_v8 = vpop.permute.xlu0 %2044  ;;  %v3540_v31 = vrot.slane %v3538_v38, 4  ;;  %v2727_v6 = vsel %vm5280_vm1, %v4345_v32, %v2726_v34  ;;  %v2049_v38 = vpop.permute.xlu1 %2048  ;;  %vm6897_vm13 = vmmov %vm6862_vm0 }
 0x293   : > { %v3822_v51 = vsel %vm5280_vm1, %v4447_v55, %v3821_v19  ;;  %v3543_v55 = vrot.slane %v3541_v0, 5  ;;  %v4416_v19 = vor.u32 %v4480_v44, %v4415_v56 }
 0x294   : > { %v3833_v24 = vunpack.c.l.b16 %v3822_v51  ;;  %v2316_v36 = vsel %vm5285_vm6, %v2311_v35, %v2315_v22  ;;  %v3547_v35 = vshll.u32 %v5562_v42, 16  ;;  %v5867_v22 = vpop.f32.mrf.mxu3  ;;  %v2735_v42 = vunpack.c.l.b16 %v2727_v6 }
 0x295   : > { %v2326_v4 = vunpack.c.l.b16 %v2316_v36  ;;  %v3544_v51 = vor.u32 %v3543_v55, %v3540_v31  ;;  %v3533_v36 = vshll.u32 %v5560_v16, 16  ;;  %v3465_v31 = vld [vmem:[#allocation2 + $0x48] sm:$0xf] }
 0x296   : > { %v5814_v20 = vpack.c.b16 %v3834_v1, %v3833_v24  ;;  %v4344_v1 = vrot.slane %v2678_v11, 9  ;;  %v3468_v11 = vshrl.u32 %v3451_v26, 16 }
 0x297   : > { %v5818_v29 = vpack.c.b16 %v2326_v4, %v2325_v46  ;;  %v5878_v24 = vpop.f32.mrf.mxu1  ;;  %v3549_v46 = vrot.slane %v3547_v35, 5  ;;  %v3545_v14 = vrot.slane %v3544_v51, 4 }
 0x298   : > { %6883 = vst [vmem:[#allocation5_spill] sm:$0xff] %v5814_v20  ;;  %v2723_v59 = vsel %vm5280_vm1, %v4344_v1, %v2722_v30  ;;  %vm6891_vm1 = vmmov %vm6862_vm0  ;;  %v3471_v30 = vshll.u32 %v3451_v26, 16 }
 0x299   : > { %2933 = vrot.lane.b32.xlu2 %v5818_v29, %s4563_s20  ;;  %2486 = vrot.lane.b32.xlu0 %v5818_v29, %s4565_s28  ;;  %v2734_v4 = vunpack.c.l.b16 %v2723_v59  ;;  %v3550_v33 = vsel %vm5285_vm6, %v3545_v14, %v3549_v46  ;;  %v4548_v14 = vld [vmem:[#allocation2 + $0x14] sm:$0x1] }
 0x29a   : > { %4304 = vmatmul.msk.bf16.gmra.mxu0 %vm6862_vm0, %v5818_v29  ;;  %4276 = vmatmul.msk.bf16.gmra.mxu2 %vm6884_vm11, %v2045_v8  ;;  %v5881_v8 = vpop.f32.mrf.mxu0  ;;  %v5887_v0 = vpop.permute.xlu0 %2482  ;;  %v3584_v34 = vunpack.c.l.b16 %v3550_v33  ;;  %v3473_v51 = vrot.slane %v3471_v30, 5  ;;  %vm6899_vm11 = vmmov %vm6862_vm0 }
 0x29c   : > { %v5898_v44 = vpop.f32.mrf.mxu3 }
 0x29f   : > { %v5900_v32 = vpop.f32.mrf.mxu1 }
 0x2a0   : > { %v5831_v41 = vpop.permute.xlu2 %2135 }
 0x2a1   : > { %3104 = vrot.lane.b32.xlu2 %v5705_v47, %s4564_s21  ;;  %2832 = vrot.lane.b32.xlu0 %v5598_v7, %s4564_s21  ;;  %v3524_v7 = vshrl.u32 %v3459_v23, 16 }
 0x2a2   : > { %4299 = vmatmul.msk.bf16.gmra.mxu3 %vm6885_vm8, %v5831_v41  ;;  %4305 = vmatmul.msk.bf16.vlgmr.msrb.gmra.mxu1 %vm6886_vm5, %v5626_v13  ;;  %vm6900_vm8 = vmmov %vm6862_vm0 }
 0x2a3   : > { %2759 = vmatpush.bf16.msrb.mxu1 %v5774_v10  ;;  %v3526_v17 = vrot.slane %v3524_v7, 4  ;;  %v3535_v7 = vrot.slane %v3533_v36, 5  ;;  %v4547_v36 = vld [vmem:[#allocation2 + $0x1c] sm:$0x1]  ;;  %vm6901_vm5 = vmmov %vm6862_vm0 }
 0x2a4   : > { %v3491_v46 = vshll.u32 %v4547_v36, 16 }
 0x2a5   : > { %v3530_v49 = vor.u32 %v3529_v9, %v3526_v17  ;;  %v4479_v17 = vld [vmem:[#allocation2 + $0x24] sm:$0xf0] }
 0x2a7   : > { %v3531_v23 = vrot.slane %v3530_v49, 4  ;;  %v3470_v49 = vrot.slane %v3468_v11, 4 }
 0x2a8   : > { %v2047_v15 = vpop.permute.xlu2 %2046 }
 0x2a9   : > { %3271 = vrot.lane.b32.xlu2 %v5394_v62, %s4563_s20  ;;  %2929 = vrot.lane.b32.xlu0 %v5645_v3, %s4563_s20  ;;  %v3536_v16 = vsel %vm5285_vm6, %v3531_v23, %v3535_v7  ;;  %v3569_v23 = vshll.u32 %v3465_v31, 16 }
 0x2aa   : > { %4318 = vmatmul.msk.bf16.vlgmr.msrb.gmra.mxu0 %vm6887_vm12, %v5848_v27  ;;  %4277 = vmatmul.msk.bf16.gmra.mxu2 %vm6888_vm2, %v2047_v15  ;;  %v3453_v15 = vld [vmem:[#allocation2 + $0x18] sm:$0xf]  ;;  %v3583_v9 = vunpack.c.l.b16 %v3536_v16  ;;  %v3474_v16 = vor.u32 %v3473_v51, %v3470_v49  ;;  %v3575_v49 = vshll.u32 %v5792_v60, 16  ;;  %vm6902_vm12 = vmmov %vm6862_vm0 }
 0x2ab   : > { %2895 = vmatpush.bf16.msrb.mxu0 %v5679_v25  ;;  %v3482_v12 = vshrl.u32 %v3453_v15, 16  ;;  %v3485_v56 = vshll.u32 %v3453_v15, 16  ;;  %v3477_v15 = vshll.u32 %v4548_v14, 16  ;;  %vm6903_vm2 = vmmov %vm6862_vm0 }
 0x2ac   : > { %v5904_v35 = vpack.c.b16 %v3584_v34, %v3583_v9  ;;  %v3571_v34 = vrot.slane %v3569_v23, 5  ;;  %v3577_v23 = vrot.slane %v3575_v49, 5 }
 0x2ad   : > { %v3484_v1 = vrot.slane %v3482_v12, 4  ;;  %v3487_v6 = vrot.slane %v3485_v56, 5  ;;  %v3493_v12 = vrot.slane %v3491_v46, 5  ;;  %v3479_v11 = vrot.slane %v3477_v15, 5 }
 0x2af   : > { %v3488_v7 = vor.u32 %v3487_v6, %v3484_v1  ;;  %v3561_v6 = vshll.u32 %v5802_v53, 16 }
 0x2b0   : > { %v5923_v51 = vpop.permute.xlu2 %2484 }
 0x2b1   : > { %3398 = vrot.lane.b32.xlu2 %v4416_v19, %s4565_s28  ;;  %3100 = vrot.lane.b32.xlu0 %v5626_v13, %s4564_s21  ;;  %v4411_v19 = vld [vmem:[#allocation2 + $0x20] sm:$0xf]  ;;  %v3489_v30 = vrot.slane %v3488_v7, 4  ;;  %v3563_v60 = vrot.slane %v3561_v6, 5 }
 0x2b2   : > { %4313 = vmatmul.msk.bf16.vlgmr.msrb.gmra.mxu3 %vm6889_vm9, %v5727_v58  ;;  %4306 = vmatmul.msk.bf16.gmra.mxu1 %vm6890_vm7, %v5645_v3  ;;  %v5883_v58 = vpack.c.b16 %v2735_v42, %v2734_v4  ;;  %v4412_v59 = vor.u32 %v4479_v17, %v4411_v19  ;;  %v3463_v42 = vld [vmem:[#allocation2 + $0x40] sm:$0xf]  ;;  %v3566_v4 = vshrl.u32 %v3465_v31, 16  ;;  %v5915_v31 = vpop.f32.mrf.mxu1  ;;  %vm6904_vm9 = vcmask 1043456   ;;  %vm6905_vm7 = vmmov %vm6862_vm0 }
 0x2b3   : > { %v3552_v33 = vshrl.u32 %v3463_v42, 16  ;;  %v3555_v26 = vshll.u32 %v3463_v42, 16  ;;  %v3494_v1 = vsel %vm5285_vm6, %v3489_v30, %v3493_v12 }
 0x2b4   : > { %v3568_v56 = vrot.slane %v3566_v4, 4  ;;  %v3580_v53 = vunpack.c.l.b16 %v3494_v1 }
 0x2b5   : > { %v3554_v17 = vrot.slane %v3552_v33, 4  ;;  %v3557_v9 = vrot.slane %v3555_v26, 5 }
 0x2b7   : > { %v5902_v55 = vpop.f32.mrf.mxu0  ;;  %v3558_v36 = vor.u32 %v3557_v9, %v3554_v17 }
 0x2b9   : > { %3277 = vrot.lane.b32.xlu2 %v5883_v58, %s4563_s20  ;;  %3106 = vrot.lane.b32.xlu0 %v5818_v29, %s4564_s21  ;;  %v3559_v7 = vrot.slane %v3558_v36, 4 }
 0x2ba   : > { %4319 = vmatmul.msk.bf16.gmra.mxu0 %vm6891_vm1, %v5887_v0  ;;  %4278 = vmatmul.msk.bf16.gmra.mxu2 %vm6892_vm3, %v2049_v38  ;;  %vm6906_vm1 = vmmov %vm6862_vm0 }
 0x2bb   : > { %v3564_v12 = vsel %vm5285_vm6, %v3559_v7, %v3563_v60  ;;  %vm6907_vm3 = vmmov %vm6862_vm0 }
 0x2bd   : > { %v5913_v38 = vpop.f32.mrf.mxu3 }
 0x2bf   : > { %v5917_v19 = vpop.f32.mrf.mxu0 }
 0x2c1   : > { %3681 = vrot.lane.b32.xlu2 %v5904_v35, %s4565_s28  ;;  %3396 = vrot.lane.b32.xlu0 %v4412_v59, %s4565_s28  ;;  %v3572_v59 = vor.u32 %v3571_v34, %v3568_v56 }
 0x2c2   : > { %4314 = vmatmul.msk.bf16.gmra.mxu3 %vm6893_vm14, %v5753_v61  ;;  %4307 = vmatmul.msk.bf16.gmra.mxu1 %vm6894_vm15, %v5705_v47  ;;  %v3475_v61 = vrot.slane %v3474_v16, 4  ;;  %vm6908_vm14 = vmmov %vm6862_vm0 }
 0x2c3   : > { %v3573_v4 = vrot.slane %v3572_v59, 4  ;;  %vm6909_vm15 = vmmov %vm6862_vm0 }
 0x2c4   : > { %v3480_v42 = vsel %vm5285_vm6, %v3475_v61, %v3479_v11 }
 0x2c5   : > { %v1831_v46 = vpop.f32.mrf.mxu2  ;;  %v1897_v14 = vpop.f32.mrf.mxu3  ;;  %v3579_v15 = vunpack.c.l.b16 %v3480_v42  ;;  %v3578_v56 = vsel %vm5285_vm6, %v3573_v4, %v3577_v23  ;;  %vm6898_vm6 = vmmov %vm6862_vm0 }
 0x2c6   : > { %v3586_v34 = vunpack.c.l.b16 %v3578_v56  ;;  %v1832_v6 = vadd.f32 %v1831_v46, %v5816_v37  ;;  %v4354_v56 = vld [vmem:[%s6786_s4 + $0x18] sm:$0xf] }
 0x2c7   : > { %v5934_v26 = vpack.c.b16 %v3580_v53, %v3579_v15 }
 0x2c8   : > { %v1905_v49 = vadd.f32 %v5829_v2, %v1832_v6 }
 0x2c9   : > { %3275 = vrot.lane.b32.xlu0 %v5580_v18, %s4563_s20 }
 0x2ca   : > { %4320 = vmatmul.msk.bf16.gmra.mxu0 %vm6895_vm10, %v5923_v51  ;;  %4309 = vmatmul.msk.bf16.vlgmr.msrb.gmra.mxu2 %vm6896_vm4, %v5626_v13  ;;  %vm6910_vm10 = vmmov %vm6862_vm0 }
 0x2cb   : > { %2796 = vmatpush.bf16.msrb.mxu2 %v5415_v57  ;;  %v3585_v57 = vunpack.c.l.b16 %v3564_v12  ;;  %vm6911_vm4 = vmmov %vm6862_vm0 }
 0x2cd   : > { %v5948_v11 = vpop.f32.mrf.mxu2  ;;  %v5950_v9 = vpack.c.b16 %v3586_v34, %v3585_v57 }
 0x2cf   : > { %v1774_v33 = vpop.f32.mrf.mxu1 }
 0x2d0   : > { %v5936_v16 = vpop.f32.mrf.mxu0 }
 0x2d1   : > { %3677 = vrot.lane.b32.xlu0 %v5934_v26, %s4565_s28 }
 0x2d2   : > { %4315 = vmatmul.msk.bf16.gmra.mxu3 %vm6897_vm13, %v5780_v54  ;;  %4308 = vmatmul.msk.bf16.gmra.mxu1 %vm6862_vm0, %v5818_v29  ;;  %vm6912_vm13 = vmmov %vm6862_vm0 }
 0x2d5   : > { %v1900_v30 = vpop.f32.mrf.mxu3 }
 0x2d7   : > { %v1776_v17 = vpop.f32.mrf.mxu1 }
 0x2d8   : > { %v5952_v61 = vpop.f32.mrf.mxu0 }
 0x2d9   : > { %3683 = vrot.lane.b32.xlu0 %v5950_v9, %s4565_s28 }
 0x2da   : > { %4310 = vmatmul.msk.bf16.gmra.mxu2 %vm6898_vm6, %v5645_v3  ;;  %vm6913_vm6 = vmmov %vm6862_vm0 }
 0x2dd   : > { %v1836_v40 = vpop.f32.mrf.mxu2  ;;  %v1902_v54 = vpop.f32.mrf.mxu3 }
 0x2de   : > { %v1837_v2 = vadd.f32 %v1836_v40, %v5850_v43 }
 0x2df   : > { %v1951_v1 = vpop.f32.mrf.mxu1 }
 0x2e0   : > { %v2355_v59 = vpop.f32.mrf.mxu0  ;;  %v1907_v57 = vadd.f32 %v5867_v22, %v1837_v2 }
 0x2e2   : > { %4316 = vmatmul.msk.bf16.gmra.mxu3 %vm6899_vm11, %v5831_v41  ;;  %4322 = vmatmul.msk.bf16.vlgmr.msra.gmra.mxu1 %vm6900_vm8, %v5848_v27  ;;  %vm6914_vm11 = vmmov %vm6862_vm0 }
 0x2e3   : > { %vm6915_vm8 = vmmov %vm6862_vm0 }
 0x2e5   : > { %v5964_v42 = vpop.f32.mrf.mxu2  ;;  %v2161_v36 = vpop.f32.mrf.mxu3 }
 0x2e6   : > { %v2181_v53 = vadd.f32 %v2161_v36, %v1905_v49 }
 0x2e7   : > { %v1953_v60 = vpop.f32.mrf.mxu1 }
 0x2e8   : > { %v5966_v4 = vpop.f32.mrf.mxu0  ;;  %v5968_v23 = vadd.f32 %v2355_v59, %v2181_v53 }
 0x2ea   : > { %4311 = vmatmul.msk.bf16.gmra.mxu2 %vm6901_vm5, %v5705_v47  ;;  %vm6916_vm5 = vmmov %vm6862_vm0 }
 0x2ed   : > { %v1841_v37 = vpop.f32.mrf.mxu2  ;;  %v5972_v46 = vpop.f32.mrf.mxu3 }
 0x2ee   : > { %v1842_v41 = vadd.f32 %v1841_v37, %v5900_v32  ;;  %v5986_v32 = vsel %vm6904_vm9, %v4354_v56, 0 }
 0x2ef   : > { %v1956_v15 = vpop.f32.mrf.mxu1  ;;  %2858 = vmatpush.bf16.msrb.mxu3 %v5986_v32 }
 0x2f0   : > { %v2360_v7 = vpop.f32.mrf.mxu0  ;;  %v1909_v12 = vadd.f32 %v5913_v38, %v1842_v41 }
 0x2f2   : > { %4330 = vmatmul.msk.bf16.vlgmr.msra.gmra.mxu3 %vm6902_vm12, %v5848_v27  ;;  %4323 = vmatmul.msk.bf16.gmra.mxu1 %vm6903_vm2, %v5887_v0  ;;  %vm6917_vm12 = vmmov %vm6862_vm0 }
 0x2f3   : > { %3031 = vmatpush.bf16.msra.mxu3 %v5692_v63  ;;  %vm6918_vm2 = vmmov %vm6862_vm0 }
 0x2f5   : > { %v1843_v34 = vpop.f32.mrf.mxu2  ;;  %v2166_v43 = vpop.f32.mrf.mxu3 }
 0x2f6   : > { %v1844_v38 = vadd.f32 %v1843_v34, %v5915_v31  ;;  %v2183_v40 = vadd.f32 %v2166_v43, %v1907_v57 }
 0x2f7   : > { %v1958_v6 = vpop.f32.mrf.mxu1 }
 0x2f8   : > { %v5991_v59 = vadd.f32 %v1897_v14, %v1844_v38  ;;  %v5993_v49 = vadd.f32 %v2360_v7, %v2183_v40  ;;  %v5995_v36 = vpop.f32.mrf.mxu0 }
 0x2fa   : > { %4312 = vmatmul.msk.bf16.gmra.mxu2 %vm6905_vm7, %v5818_v29  ;;  %vm6919_vm7 = vmmov %vm6862_vm0 }
 0x2fd   : > { %v1846_v22 = vpop.f32.mrf.mxu2  ;;  %v5999_v53 = vpop.f32.mrf.mxu3 }
 0x2fe   : > { %v1847_v37 = vadd.f32 %v1846_v22, %v1774_v33 }
 0x2ff   : > { %v1961_v41 = vpop.f32.mrf.mxu1 }
 0x300   : > { %v1911_v2 = vadd.f32 %v1900_v30, %v1847_v37  ;;  %v2365_v31 = vpop.f32.mrf.mxu0  ;;  %v1952_v30 = vadd.f32 %v1951_v1, %v5824_v45  ;;  %v1957_v1 = vadd.f32 %v1956_v15, %v5860_v50  ;;  %v1959_v50 = vadd.f32 %v1958_v6, %v5881_v8 }
 0x302   : > { %4331 = vmatmul.msk.bf16.gmra.mxu3 %vm6906_vm1, %v5887_v0  ;;  %4324 = vmatmul.msk.bf16.gmra.mxu1 %vm6907_vm3, %v5923_v51  ;;  %vm6920_vm1 = vmmov %vm6862_vm0 }
 0x303   : > { %vm6921_vm3 = vmmov %vm6862_vm0 }
 0x305   : > { %v1848_v14 = vpop.f32.mrf.mxu2  ;;  %v2171_v7 = vpop.f32.mrf.mxu3 }
 0x306   : > { %v1849_v56 = vadd.f32 %v1848_v14, %v1776_v17  ;;  %v2185_v57 = vadd.f32 %v2171_v7, %v1909_v12 }
 0x307   : > { %v1963_v34 = vpop.f32.mrf.mxu1 }
 0x308   : > { %v1912_v43 = vadd.f32 %v1902_v54, %v1849_v56  ;;  %v6005_v38 = vadd.f32 %v2365_v31, %v2185_v57  ;;  %v6012_v37 = vpop.f32.mrf.mxu0 }
 0x30a   : > { %4326 = vmatmul.msk.bf16.vlgmr.msra.gmra.mxu2 %vm6908_vm14, %v5848_v27  ;;  %v1954_v27 = vadd.f32 %v1953_v60, %v5844_v28  ;;  %vm6922_vm14 = vmmov %vm6862_vm0 }
 0x30b   : > { %v2487_v33 = vpop.permute.xlu0 %2486  ;;  %2994 = vmatpush.bf16.msra.mxu2 %v5986_v32 }
 0x30c   : > { %4321 = vmatmul.msk.bf16.gmra.mxu0 %vm6909_vm15, %v2487_v33  ;;  %vm6923_vm15 = vmmov %vm6862_vm0 }
 0x30d   : > { %v2071_v40 = vpop.f32.mrf.mxu2 }
 0x30e   : > { %v2091_v22 = vadd.f32 %v2071_v40, %v1952_v30 }
 0x30f   : > { %v1966_v17 = vpop.f32.mrf.mxu1 }
 0x310   : > { %v1967_v12 = vadd.f32 %v1966_v17, %v5936_v16  ;;  %v6024_v16 = vpop.f32.mrf.mxu3 }
 0x312   : > { %4332 = vmatmul.msk.bf16.gmra.mxu3 %vm6910_vm10, %v5923_v51  ;;  %4325 = vmatmul.msk.bf16.gmra.mxu1 %vm6911_vm4, %v2487_v33  ;;  %vm6924_vm10 = vmmov %vm6862_vm0 }
 0x313   : > { %vm6925_vm4 = vmmov %vm6862_vm0 }
 0x315   : > { %v2073_v54 = vpop.f32.mrf.mxu2 }
 0x316   : > { %v2092_v31 = vadd.f32 %v2073_v54, %v1954_v27  ;;  %v1962_v54 = vadd.f32 %v1961_v41, %v5902_v55 }
 0x317   : > { %v2370_v14 = vpop.f32.mrf.mxu0  ;;  %v1968_v45 = vpop.f32.mrf.mxu1 }
 0x31a   : > { %4327 = vmatmul.msk.bf16.gmra.mxu2 %vm6912_vm13, %v5887_v0  ;;  %vm6926_vm13 = vmmov %vm6862_vm0 }
 0x31c   : > { %4334 = vmatmul.msk.bf16.vlgmr.msra.gmra.mxu0 %vm6862_vm0, %v5626_v13 }
 0x31d   : > { %v2076_v7 = vpop.f32.mrf.mxu2  ;;  %3068 = vmatpush.bf16.msra.mxu0 %v5679_v25 }
 0x31e   : > { %v2093_v56 = vadd.f32 %v2076_v7, %v1957_v1 }
 0x31f   : > { %v6027_v57 = vpop.f32.mrf.mxu0  ;;  %v2392_v28 = vpop.f32.mrf.mxu1 }
 0x320   : > { %v6029_v60 = vadd.f32 %v2392_v28, %v2091_v22 }
 0x322   : > { %4333 = vmatmul.msk.bf16.gmra.mxu3 %vm6913_vm6, %v2487_v33  ;;  %4346 = vmatmul.msk.bf16.vlgmr.msrb.gmra.mxu1 %vm6914_vm11, %v5394_v62  ;;  %vm6927_vm6 = vmmov %vm6862_vm0 }
 0x323   : > { %vm6928_vm11 = vmmov %vm6862_vm0 }
 0x325   : > { %v2176_v0 = vpop.f32.mrf.mxu3  ;;  %v2078_v13 = vpop.f32.mrf.mxu2 }
 0x326   : > { %v2187_v15 = vadd.f32 %v2176_v0, %v1911_v2  ;;  %v2094_v30 = vadd.f32 %v2078_v13, %v1959_v50  ;;  %v4363_v0 = vld [vmem:[%s6786_s4 + $0x1c] sm:$0xf] }
 0x327   : > { %v2512_v40 = vpop.f32.mrf.mxu0  ;;  %v2394_v17 = vpop.f32.mrf.mxu1  ;;  %v6067_v13 = vsel %vm6904_vm9, %v4363_v0, 0  ;;  %vm6933_vm9 = vmmov %vm6862_vm0 }
 0x328   : > { %v6036_v25 = vadd.f32 %v2512_v40, %v5968_v23  ;;  %v6038_v27 = vadd.f32 %v2394_v17, %v2092_v31  ;;  %v6040_v22 = vadd.f32 %v2370_v14, %v2187_v15  ;;  %v2829_v14 = vpop.permute.xlu1 %2828  ;;  %2957 = vmatpush.bf16.msra.mxu1 %v6067_v13  ;;  %v2831_v17 = vpop.permute.xlu2 %2830 }
 0x32a   : > { %4328 = vmatmul.msk.bf16.gmra.mxu2 %vm6915_vm8, %v5923_v51  ;;  %vm6929_vm8 = vmmov %vm6862_vm0 }
 0x32c   : > { %4335 = vmatmul.msk.bf16.gmra.mxu0 %vm6916_vm5, %v5645_v3  ;;  %v1964_v3 = vadd.f32 %v1963_v34, %v5917_v19  ;;  %vm6930_vm5 = vmmov %vm6862_vm0 }
 0x32d   : > { %v2178_v8 = vpop.f32.mrf.mxu3  ;;  %v2081_v6 = vpop.f32.mrf.mxu2 }
 0x32e   : > { %v6047_v2 = vadd.f32 %v2178_v8, %v1912_v43  ;;  %v2095_v1 = vadd.f32 %v2081_v6, %v1962_v54 }
 0x32f   : > { %v6049_v7 = vpop.f32.mrf.mxu0  ;;  %v2397_v23 = vpop.f32.mrf.mxu1 }
 0x330   : > { %v6051_v31 = vadd.f32 %v2397_v23, %v2093_v56 }
 0x332   : > { %4355 = vmatmul.msk.bf16.vlgmr.msrb.gmra.mxu3 %vm6917_vm12, %v2829_v14  ;;  %4347 = vmatmul.msk.bf16.gmra.mxu1 %vm6918_vm2, %v5517_v48  ;;  %vm6931_vm12 = vmmov %vm6862_vm0 }
 0x333   : > { %3204 = vmatpush.bf16.msrb.mxu3 %v5774_v10  ;;  %vm6932_vm2 = vmmov %vm6862_vm0 }
 0x335   : > { %v2458_v55 = vpop.f32.mrf.mxu3  ;;  %v2083_v51 = vpop.f32.mrf.mxu2 }
 0x336   : > { %v2096_v41 = vadd.f32 %v2083_v51, %v1964_v3 }
 0x337   : > { %v2517_v43 = vpop.f32.mrf.mxu0  ;;  %v2399_v28 = vpop.f32.mrf.mxu1 }
 0x338   : > { %v6059_v50 = vadd.f32 %v2517_v43, %v5993_v49  ;;  %v6061_v56 = vadd.f32 %v2399_v28, %v2094_v30  ;;  %v2833_v28 = vpop.permute.xlu0 %2832 }
 0x33a   : > { %4329 = vmatmul.msk.bf16.gmra.mxu2 %vm6919_vm7, %v2487_v33  ;;  %v1969_v33 = vadd.f32 %v1968_v45, %v5952_v61  ;;  %vm6934_vm7 = vcmask 1043456  }
 0x33c   : > { %4336 = vmatmul.msk.bf16.gmra.mxu0 %vm6920_vm1, %v5705_v47  ;;  %vm6935_vm1 = vmmov %vm6862_vm0 }
 0x33d   : > { %v2460_v19 = vpop.f32.mrf.mxu3  ;;  %v2086_v34 = vpop.f32.mrf.mxu2 }
 0x33e   : > { %v2097_v49 = vadd.f32 %v2086_v34, %v1967_v12 }
 0x33f   : > { %v6073_v15 = vpop.f32.mrf.mxu0  ;;  %v2402_v30 = vpop.f32.mrf.mxu1 }
 0x340   : > { %v6075_v40 = vadd.f32 %v2402_v30, %v2095_v1 }
 0x342   : > { %4356 = vmatmul.msk.bf16.gmra.mxu3 %vm6921_vm3, %v2831_v17  ;;  %4348 = vmatmul.msk.bf16.gmra.mxu1 %vm6922_vm14, %v5580_v18  ;;  %vm6936_vm3 = vmmov %vm6862_vm0 }
 0x343   : > { %vm6937_vm14 = vmmov %vm6862_vm0 }
 0x345   : > { %v2463_v54 = vpop.f32.mrf.mxu3  ;;  %v2088_v8 = vpop.f32.mrf.mxu2 }
 0x346   : > { %v2098_v6 = vadd.f32 %v2088_v8, %v1969_v33  ;;  %v6111_v8 = vpop.permute.xlu2 %2927 }
 0x347   : > { %v2522_v47 = vpop.f32.mrf.mxu0  ;;  %v2404_v23 = vpop.f32.mrf.mxu1 }
 0x348   : > { %v6082_v12 = vadd.f32 %v2522_v47, %v6005_v38  ;;  %v6084_v3 = vadd.f32 %v2404_v23, %v2096_v41 }
 0x34a   : > { %4350 = vmatmul.msk.bf16.vlgmr.msrb.gmra.mxu2 %vm6923_vm15, %v5394_v62  ;;  %vm6938_vm15 = vmmov %vm6862_vm0 }
 0x34b   : > { %3167 = vmatpush.bf16.msrb.mxu2 %v6067_v13 }
 0x34c   : > { %4337 = vmatmul.msk.bf16.gmra.mxu0 %vm6924_vm10, %v5818_v29  ;;  %vm6939_vm10 = vmmov %vm6862_vm0 }
 0x34d   : > { %v2465_v1 = vpop.f32.mrf.mxu3  ;;  %v2429_v61 = vpop.f32.mrf.mxu2 }
 0x34e   : > { %v6091_v45 = vadd.f32 %v2458_v55, %v2429_v61 }
 0x34f   : > { %v2407_v51 = vpop.f32.mrf.mxu1 }
 0x350   : > { %v6093_v43 = vadd.f32 %v2407_v51, %v2097_v49 }
 0x352   : > { %4357 = vmatmul.msk.bf16.gmra.mxu3 %vm6925_vm4, %v2833_v28  ;;  %4349 = vmatmul.msk.bf16.gmra.mxu1 %vm6926_vm13, %v5883_v58  ;;  %vm6940_vm4 = vmmov %vm6862_vm0 }
 0x353   : > { %vm6941_vm13 = vmmov %vm6862_vm0 }
 0x355   : > { %v2468_v38 = vpop.f32.mrf.mxu3  ;;  %v2431_v62 = vpop.f32.mrf.mxu2 }
 0x356   : > { %v6098_v41 = vadd.f32 %v2460_v19, %v2431_v62  ;;  %v2835_v19 = vpop.permute.xlu1 %2834  ;;  %v6129_v62 = vpop.permute.xlu0 %2929 }
 0x357   : > { %v2409_v0 = vpop.f32.mrf.mxu1 }
 0x358   : > { %v6100_v34 = vadd.f32 %v2409_v0, %v2098_v6 }
 0x35a   : > { %4351 = vmatmul.msk.bf16.gmra.mxu2 %vm6862_vm0, %v5517_v48 }
 0x35c   : > { %4359 = vmatmul.msk.bf16.vlgmr.msrb.gmra.mxu0 %vm6927_vm6, %v2829_v14  ;;  %vm6942_vm6 = vmmov %vm6862_vm0 }
 0x35d   : > { %v2470_v29 = vpop.f32.mrf.mxu3  ;;  %v2434_v55 = vpop.f32.mrf.mxu2  ;;  %3241 = vmatpush.bf16.msrb.mxu0 %v5692_v63 }
 0x35e   : > { %v6106_v49 = vadd.f32 %v2463_v54, %v2434_v55 }
 0x35f   : > { %v2549_v30 = vpop.f32.mrf.mxu1 }
 0x360   : > { %v6109_v33 = vadd.f32 %v2549_v30, %v6029_v60 }
 0x362   : > { %4358 = vmatmul.msk.bf16.gmra.mxu3 %vm6928_vm11, %v2835_v19  ;;  %4364 = vmatmul.msk.bf16.vlgmr.msra.gmra.mxu1 %vm6929_vm8, %v6111_v8  ;;  %vm6943_vm11 = vmmov %vm6862_vm0 }
 0x363   : > { %vm6944_vm8 = vmmov %vm6862_vm0 }
 0x365   : > { %v2473_v48 = vpop.f32.mrf.mxu3  ;;  %v2436_v14 = vpop.f32.mrf.mxu2 }
 0x366   : > { %v6116_v6 = vadd.f32 %v2465_v1, %v2436_v14 }
 0x367   : > { %v2551_v47 = vpop.f32.mrf.mxu1 }
 0x368   : > { %v6119_v63 = vadd.f32 %v2551_v47, %v6038_v27  ;;  %v6157_v47 = vpop.permute.xlu1 %2931 }
 0x36a   : > { %4352 = vmatmul.msk.bf16.gmra.mxu2 %vm6930_vm5, %v5580_v18  ;;  %vm6945_vm5 = vmmov %vm6862_vm0 }
 0x36c   : > { %4360 = vmatmul.msk.bf16.gmra.mxu0 %vm6931_vm12, %v2831_v17  ;;  %vm6947_vm12 = vmmov %vm6862_vm0 }
 0x36d   : > { %v2475_v60 = vpop.f32.mrf.mxu3  ;;  %v2439_v54 = vpop.f32.mrf.mxu2 }
 0x36e   : > { %v6124_v23 = vadd.f32 %v2468_v38, %v2439_v54  ;;  %v6159_v54 = vpop.f32.mrf.mxu0 }
 0x36f   : > { %v2554_v61 = vpop.f32.mrf.mxu1 }
 0x370   : > { %v6127_v51 = vadd.f32 %v2554_v61, %v6051_v31  ;;  %v4380_v31 = vld [vmem:[%s6786_s4 + $0x20] sm:$0xf] }
 0x371   : > { %v6145_v0 = vsel %vm6934_vm7, %v4380_v31, 0  ;;  %vm6950_vm7 = vmmov %vm6862_vm0 }
 0x372   : > { %4372 = vmatmul.msk.bf16.vlgmr.msra.gmra.mxu3 %vm6932_vm2, %v6111_v8  ;;  %4365 = vmatmul.msk.bf16.gmra.mxu1 %vm6933_vm9, %v6129_v62  ;;  %vm6948_vm2 = vmmov %vm6862_vm0 }
 0x373   : > { %3421 = vmatpush.bf16.msra.mxu3 %v5986_v32  ;;  %3130 = vmatpush.bf16.msrb.mxu1 %v6145_v0  ;;  %vm6949_vm9 = vmmov %vm6862_vm0 }
 0x375   : > { %v2623_v18 = vpop.f32.mrf.mxu3  ;;  %v2441_v27 = vpop.f32.mrf.mxu2 }
 0x376   : > { %v6136_v17 = vadd.f32 %v2470_v29, %v2441_v27 }
 0x377   : > { %v2556_v1 = vpop.f32.mrf.mxu1  ;;  %3298 = vmatpush.bf16.msra.mxu1 %v6145_v0 }
 0x378   : > { %v6139_v38 = vadd.f32 %v2556_v1, %v6061_v56 }
 0x37a   : > { %4353 = vmatmul.msk.bf16.gmra.mxu2 %vm6935_vm1, %v5883_v58  ;;  %vm6951_vm1 = vmmov %vm6862_vm0 }
 0x37c   : > { %4361 = vmatmul.msk.bf16.gmra.mxu0 %vm6936_vm3, %v2833_v28  ;;  %vm6952_vm3 = vmmov %vm6862_vm0 }
 0x37d   : > { %v2625_v29 = vpop.f32.mrf.mxu3  ;;  %v2444_v55 = vpop.f32.mrf.mxu2 }
 0x37e   : > { %v6152_v56 = vadd.f32 %v2473_v48, %v2444_v55 }
 0x37f   : > { %v2559_v30 = vpop.f32.mrf.mxu1 }
 0x380   : > { %v6155_v14 = vadd.f32 %v2559_v30, %v6075_v40 }
 0x382   : > { %4373 = vmatmul.msk.bf16.gmra.mxu3 %vm6937_vm14, %v6129_v62  ;;  %4366 = vmatmul.msk.bf16.gmra.mxu1 %vm6938_vm15, %v6157_v47  ;;  %vm6953_vm14 = vmmov %vm6862_vm0 }
 0x383   : > { %vm6954_vm15 = vmmov %vm6862_vm0 }
 0x385   : > { %v2628_v58 = vpop.f32.mrf.mxu3  ;;  %v2446_v28 = vpop.f32.mrf.mxu2 }
 0x386   : > { %v6165_v61 = vadd.f32 %v2475_v60, %v2446_v28  ;;  %v6185_v28 = vpop.permute.xlu2 %2933 }
 0x387   : > { %v2561_v48 = vpop.f32.mrf.mxu1 }
 0x388   : > { %v6168_v27 = vadd.f32 %v2561_v48, %v6084_v3 }
 0x389   : > { %v2527_v40 = vpop.f32.mrf.mxu0 }
 0x38a   : > { %v6171_v1 = vadd.f32 %v2527_v40, %v6040_v22  ;;  %4368 = vmatmul.msk.bf16.vlgmr.msra.gmra.mxu2 %vm6939_vm10, %v6111_v8  ;;  %v2382_v22 = vadd.f32 %v6027_v57, %v6047_v2  ;;  %vm6955_vm10 = vmmov %vm6862_vm0 }
 0x38b   : > { %3335 = vmatpush.bf16.msra.mxu2 %v5774_v10 }
 0x38c   : > { %4362 = vmatmul.msk.bf16.gmra.mxu0 %vm6940_vm4, %v2835_v19  ;;  %vm6956_vm4 = vmmov %vm6862_vm0 }
 0x38d   : > { %v2630_v31 = vpop.f32.mrf.mxu3  ;;  %v2586_v55 = vpop.f32.mrf.mxu2 }
 0x38e   : > { %v6178_v60 = vadd.f32 %v2586_v55, %v6091_v45 }
 0x38f   : > { %v2564_v30 = vpop.f32.mrf.mxu1 }
 0x390   : > { %v6181_v3 = vadd.f32 %v2564_v30, %v6093_v43 }
 0x391   : > { %v2529_v48 = vpop.f32.mrf.mxu0 }
 0x392   : > { %v6187_v40 = vadd.f32 %v2529_v48, %v2382_v22  ;;  %4374 = vmatmul.msk.bf16.gmra.mxu3 %vm6941_vm13, %v6157_v47  ;;  %4367 = vmatmul.msk.bf16.gmra.mxu1 %vm6862_vm0, %v6185_v28  ;;  %vm6957_vm13 = vmmov %vm6862_vm0 }
 0x395   : > { %v2633_v10 = vpop.f32.mrf.mxu3  ;;  %v2588_v45 = vpop.f32.mrf.mxu2 }
 0x396   : > { %v6194_v19 = vadd.f32 %v2588_v45, %v6098_v41  ;;  %v6212_v45 = vpop.permute.xlu0 %3100 }
 0x397   : > { %v2566_v43 = vpop.f32.mrf.mxu1 }
 0x398   : > { %v6197_v55 = vadd.f32 %v2566_v43, %v6100_v34 }
 0x399   : > { %v2652_v57 = vpop.f32.mrf.mxu0 }
 0x39a   : > { %v6199_v2 = vadd.f32 %v2652_v57, %v2623_v18  ;;  %4369 = vmatmul.msk.bf16.gmra.mxu2 %vm6942_vm6, %v6129_v62  ;;  %vm6958_vm6 = vmmov %vm6862_vm0 }
 0x39c   : > { %4376 = vmatmul.msk.bf16.vlgmr.msra.gmra.mxu0 %vm6943_vm11, %v6111_v8  ;;  %vm6959_vm11 = vmmov %vm6862_vm0 }
 0x39d   : > { %v2635_v30 = vpop.f32.mrf.mxu3  ;;  %v2591_v22 = vpop.f32.mrf.mxu2  ;;  %3610 = vmatpush.bf16.msra.mxu0 %v6067_v13 }
 0x39e   : > { %v6207_v41 = vadd.f32 %v2591_v22, %v6106_v49 }
 0x39f   : > { %v2761_v48 = vpop.f32.mrf.mxu1 }
 0x3a0   : > { %v6210_v34 = vadd.f32 %v2761_v48, %v6109_v33 }
 0x3a1   : > { %v2654_v18 = vpop.f32.mrf.mxu0 }
 0x3a2   : > { %v6214_v43 = vadd.f32 %v2654_v18, %v2625_v29  ;;  %4375 = vmatmul.msk.bf16.gmra.mxu3 %vm6944_vm8, %v6185_v28  ;;  %4381 = vmatmul.msk.bf16.vlgmr.msrb.gmra.mxu1 %vm6945_vm5, %v6212_v45  ;;  %vm6960_vm8 = vmmov %vm6862_vm0 }
 0x3a3   : > { %3647 = vmatpush.bf16.msrb.mxu1 %v5986_v32  ;;  %vm6961_vm5 = vmmov %vm6862_vm0 }
 0x3a5   : > { %v2638_v8 = vpop.f32.mrf.mxu3  ;;  %v2593_v49 = vpop.f32.mrf.mxu2 }
 0x3a6   : > { %v6222_v57 = vadd.f32 %v2593_v49, %v6116_v6  ;;  %v1834_v49 = vadd.f32 %v5948_v11, %v5833_v5 }
 0x3a7   : > { %v2763_v33 = vpop.f32.mrf.mxu1 }
 0x3a8   : > { %v6225_v22 = vadd.f32 %v2763_v33, %v6119_v63 }
 0x3a9   : > { %v2657_v48 = vpop.f32.mrf.mxu0 }
 0x3aa   : > { %6946 = vst [vmem:[#allocation6_spill] sm:$0xff] %v6225_v22  ;;  %v6227_v29 = vadd.f32 %v2657_v48, %v2628_v58  ;;  %4370 = vmatmul.msk.bf16.gmra.mxu2 %vm6947_vm12, %v6157_v47  ;;  %v6241_v58 = vpop.permute.xlu1 %3102  ;;  %vm6962_vm12 = vmmov %vm6862_vm0 }
 0x3ac   : > { %4377 = vmatmul.msk.bf16.gmra.mxu0 %vm6948_vm2, %v6129_v62  ;;  %vm6963_vm2 = vmmov %vm6862_vm0 }
 0x3ad   : > { %v2640_v18 = vpop.f32.mrf.mxu3  ;;  %v2596_v32 = vpop.f32.mrf.mxu2 }
 0x3ae   : > { %v6234_v20 = vadd.f32 %v2596_v32, %v6124_v23  ;;  %v1906_v23 = vadd.f32 %v5846_v52, %v1834_v49 }
 0x3af   : > { %v2766_v6 = vpop.f32.mrf.mxu1 }
 0x3b0   : > { %v6239_v63 = vadd.f32 %v2766_v6, %v6127_v51  ;;  %v2182_v11 = vadd.f32 %v5972_v46, %v1906_v23  ;;  %v6279_v23 = vpop.permute.xlu2 %3104 }
 0x3b1   : > { %v2659_v33 = vpop.f32.mrf.mxu0 }
 0x3b2   : > { %v6243_v48 = vadd.f32 %v2659_v33, %v2630_v31  ;;  %4389 = vmatmul.msk.bf16.vlgmr.msrb.gmra.mxu3 %vm6949_vm9, %v6212_v45  ;;  %4382 = vmatmul.msk.bf16.gmra.mxu1 %vm6950_vm7, %v6241_v58  ;;  %v2376_v22 = vadd.f32 %v5966_v4, %v2182_v11  ;;  %v1839_v4 = vadd.f32 %v5964_v42, %v5878_v24  ;;  %vm6964_vm9 = vmmov %vm6862_vm0 }
 0x3b3   : > { %3741 = vmatpush.bf16.msrb.mxu3 %v6067_v13  ;;  %vm6965_vm7 = vmmov %vm6862_vm0 }
 0x3b4   : > { %v2533_v52 = vadd.f32 %v6049_v7, %v2376_v22 }
 0x3b5   : > { %v2860_v62 = vpop.f32.mrf.mxu3  ;;  %v2598_v5 = vpop.f32.mrf.mxu2 }
 0x3b6   : > { %v6253_v51 = vadd.f32 %v2860_v62, %v6036_v25  ;;  %v6256_v31 = vadd.f32 %v2598_v5, %v6136_v17 }
 0x3b7   : > { %v2768_v32 = vpop.f32.mrf.mxu1 }
 0x3b8   : > { %v6259_v6 = vadd.f32 %v2768_v32, %v6139_v38 }
 0x3b9   : > { %v2662_v33 = vpop.f32.mrf.mxu0 }
 0x3ba   : > { %v6262_v13 = vadd.f32 %v2662_v33, %v2633_v10  ;;  %4371 = vmatmul.msk.bf16.gmra.mxu2 %vm6951_vm1, %v6185_v28  ;;  %vm6966_vm1 = vmmov %vm6862_vm0 }
 0x3bc   : > { %4378 = vmatmul.msk.bf16.gmra.mxu0 %vm6952_vm3, %v6157_v47  ;;  %vm6967_vm3 = vmmov %vm6862_vm0 }
 0x3bd   : > { %v2862_v46 = vpop.f32.mrf.mxu3  ;;  %v2601_v25 = vpop.f32.mrf.mxu2 }
 0x3be   : > { %v6269_v17 = vadd.f32 %v2862_v46, %v2533_v52  ;;  %v6272_v38 = vadd.f32 %v2601_v25, %v6152_v56  ;;  %v1908_v56 = vadd.f32 %v5898_v44, %v1839_v4 }
 0x3bf   : > { %v2771_v49 = vpop.f32.mrf.mxu1 }
 0x3c0   : > { %v6277_v10 = vadd.f32 %v2771_v49, %v6155_v14  ;;  %v2184_v24 = vadd.f32 %v5999_v53, %v1908_v56 }
 0x3c1   : > { %v2664_v7 = vpop.f32.mrf.mxu0 }
 0x3c2   : > { %v6281_v22 = vadd.f32 %v2664_v7, %v2635_v30  ;;  %4390 = vmatmul.msk.bf16.gmra.mxu3 %vm6953_vm14, %v6241_v58  ;;  %4383 = vmatmul.msk.bf16.gmra.mxu1 %vm6954_vm15, %v6279_v23  ;;  %v2378_v32 = vadd.f32 %v5995_v36, %v2184_v24  ;;  %vm6968_vm14 = vmmov %vm6862_vm0 }
 0x3c3   : > { %vm6969_vm15 = vmmov %vm6862_vm0 }
 0x3c4   : > { %v2535_v44 = vadd.f32 %v6073_v15, %v2378_v32 }
 0x3c5   : > { %v2865_v47 = vpop.f32.mrf.mxu3  ;;  %v2603_v62 = vpop.f32.mrf.mxu2 }
 0x3c6   : > { %v6290_v42 = vadd.f32 %v2865_v47, %v6059_v50  ;;  %v6293_v14 = vadd.f32 %v2603_v62, %v6165_v61 }
 0x3c7   : > { %v2773_v30 = vpop.f32.mrf.mxu1 }
 0x3c8   : > { %v6296_v5 = vadd.f32 %v2773_v30, %v6168_v27 }
 0x3c9   : > { %v2667_v11 = vpop.f32.mrf.mxu0 }
 0x3ca   : > { %v6299_v33 = vadd.f32 %v2667_v11, %v2638_v8  ;;  %4385 = vmatmul.msk.bf16.vlgmr.msrb.gmra.mxu2 %vm6955_vm10, %v6212_v45  ;;  %v6313_v8 = vpop.permute.xlu0 %3106  ;;  %v3395_v11 = vpop.permute.xlu1 %3394  ;;  %vm6970_vm10 = vmmov %vm6862_vm0 }
 0x3cb   : > { %3704 = vmatpush.bf16.msrb.mxu2 %v6145_v0 }
 0x3cc   : > { %4379 = vmatmul.msk.bf16.gmra.mxu0 %vm6956_vm4, %v6185_v28  ;;  %vm6971_vm4 = vmmov %vm6862_vm0 }
 0x3cd   : > { %v2867_v53 = vpop.f32.mrf.mxu3  ;;  %v2798_v50 = vpop.f32.mrf.mxu2 }
 0x3ce   : > { %v2883_v61 = vadd.f32 %v2867_v53, %v2535_v44  ;;  %v6308_v27 = vadd.f32 %v2798_v50, %v6199_v2  ;;  %v2186_v2 = vadd.f32 %v6024_v16, %v5991_v59 }
 0x3cf   : > { %v2776_v52 = vpop.f32.mrf.mxu1 }
 0x3d0   : > { %v6311_v36 = vadd.f32 %v2776_v52, %v6181_v3  ;;  %v2380_v56 = vadd.f32 %v6012_v37, %v2186_v2 }
 0x3d1   : > { %v2669_v46 = vpop.f32.mrf.mxu0 }
 0x3d2   : > { %v6315_v25 = vadd.f32 %v2669_v46, %v2640_v18  ;;  %4391 = vmatmul.msk.bf16.gmra.mxu3 %vm6957_vm13, %v6279_v23  ;;  %4384 = vmatmul.msk.bf16.gmra.mxu1 %vm6862_vm0, %v6313_v8  ;;  %v2537_v62 = vadd.f32 %v6159_v54, %v2380_v56  ;;  %v3274_v46 = vpop.permute.xlu1 %3273  ;;  %vm6972_vm13 = vmmov %vm6862_vm0 }
 0x3d5   : > { %v2870_v15 = vpop.f32.mrf.mxu3  ;;  %v2800_v28 = vpop.f32.mrf.mxu2 }
 0x3d6   : > { %v2884_v49 = vadd.f32 %v2870_v15, %v6082_v12  ;;  %v6325_v3 = vadd.f32 %v2800_v28, %v6214_v43 }
 0x3d7   : > { %v2778_v4 = vpop.f32.mrf.mxu1 }
 0x3d8   : > { %v6328_v18 = vadd.f32 %v2778_v4, %v6197_v55 }
 0x3d9   : > { %v2897_v7 = vpop.f32.mrf.mxu0 }
 0x3da   : > { %v2917_v47 = vadd.f32 %v2897_v7, %v6178_v60  ;;  %4386 = vmatmul.msk.bf16.gmra.mxu2 %vm6958_vm6, %v6241_v58  ;;  %v3272_v60 = vpop.permute.xlu2 %3271  ;;  %vm6973_vm6 = vmmov %vm6862_vm0 }
 0x3dc   : > { %4393 = vmatmul.msk.bf16.vlgmr.msrb.gmra.mxu0 %vm6959_vm11, %v6212_v45  ;;  %vm6974_vm11 = vmmov %vm6862_vm0 }
 0x3dd   : > { %v2872_v59 = vpop.f32.mrf.mxu3  ;;  %v2803_v16 = vpop.f32.mrf.mxu2  ;;  %3858 = vmatpush.bf16.msrb.mxu0 %v6145_v0 }
 0x3de   : > { %v2885_v12 = vadd.f32 %v2872_v59, %v2537_v62  ;;  %v6339_v55 = vadd.f32 %v2803_v16, %v6227_v29 }
 0x3df   : > { %v2959_v43 = vpop.f32.mrf.mxu1 }
 0x3e0   : > { %v6342_v37 = vadd.f32 %v2959_v43, %v6253_v51 }
 0x3e1   : > { %v2899_v24 = vpop.f32.mrf.mxu0 }
 0x3e2   : > { %v2918_v30 = vadd.f32 %v2899_v24, %v6194_v19  ;;  %4392 = vmatmul.msk.bf16.gmra.mxu3 %vm6960_vm8, %v6313_v8  ;;  %4397 = vmatmul.msk.bf16.vlgmr.msra.gmra.mxu1 %vm6961_vm5, %v3272_v60  ;;  %vm6975_vm8 = vmmov %vm6862_vm0 }
 0x3e3   : > { %vm6976_vm5 = vmmov %vm6862_vm0 }
 0x3e5   : > { %v2875_v54 = vpop.f32.mrf.mxu3  ;;  %v2805_v45 = vpop.f32.mrf.mxu2 }
 0x3e6   : > { %v2886_v0 = vadd.f32 %v2875_v54, %v6171_v1  ;;  %v6350_v29 = vadd.f32 %v2805_v45, %v6243_v48 }
 0x3e7   : > { %v2961_v32 = vpop.f32.mrf.mxu1 }
 0x3e8   : > { %v6353_v51 = vadd.f32 %v2961_v32, %v6269_v17 }
 0x3e9   : > { %v2902_v44 = vpop.f32.mrf.mxu0 }
 0x3ea   : > { %v2919_v19 = vadd.f32 %v2902_v44, %v6207_v41  ;;  %4387 = vmatmul.msk.bf16.gmra.mxu2 %vm6962_vm12, %v6279_v23  ;;  %vm6977_vm12 = vmmov %vm6862_vm0 }
 0x3ec   : > { %4394 = vmatmul.msk.bf16.gmra.mxu0 %vm6963_vm2, %v6241_v58  ;;  %vm6978_vm2 = vmmov %vm6862_vm0 }
 0x3ed   : > { %v2877_v53 = vpop.f32.mrf.mxu3  ;;  %v2808_v50 = vpop.f32.mrf.mxu2 }
 0x3ee   : > { %v2887_v1 = vadd.f32 %v2877_v53, %v6187_v40  ;;  %v6362_v48 = vadd.f32 %v2808_v50, %v6262_v13  ;;  %v3397_v13 = vpop.permute.xlu0 %3396 }
 0x3ef   : > { %v2964_v52 = vpop.f32.mrf.mxu1 }
 0x3f0   : > { %v6365_v17 = vadd.f32 %v2964_v52, %v6290_v42 }
 0x3f1   : > { %v2904_v15 = vpop.f32.mrf.mxu0 }
 0x3f2   : > { %v2920_v41 = vadd.f32 %v2904_v15, %v6222_v57  ;;  %4421 = vmatmul.msk.bf16.vlgmr.msra.gmra.mxu3 %vm6964_vm9, %v3395_v11  ;;  %4398 = vmatmul.msk.bf16.gmra.mxu1 %vm6965_vm7, %v3274_v46  ;;  %vm6979_vm9 = vmmov %vm6862_vm0 }
 0x3f3   : > { %vm6980_vm7 = vmmov %vm6862_vm0 }
 0x3f5   : > { %v3033_v58 = vpop.f32.mrf.mxu3  ;;  %v2810_v28 = vpop.f32.mrf.mxu2 }
 0x3f6   : > { %v6370_v2 = vadd.f32 %v3033_v58, %v2917_v47  ;;  %v6373_v40 = vadd.f32 %v2810_v28, %v6281_v22 }
 0x3f7   : > { %v2966_v4 = vpop.f32.mrf.mxu1 }
 0x3f8   : > { %v6375_v7 = vadd.f32 %v2966_v4, %v2883_v61  ;;  %v3276_v61 = vpop.permute.xlu0 %3275 }
 0x3f9   : > { %v2907_v42 = vpop.f32.mrf.mxu0 }
 0x3fa   : > { %v2921_v56 = vadd.f32 %v2907_v42, %v6234_v20  ;;  %4388 = vmatmul.msk.bf16.gmra.mxu2 %vm6966_vm1, %v6313_v8  ;;  %vm6981_vm1 = vmmov %vm6862_vm0 }
 0x3fc   : > { %4395 = vmatmul.msk.bf16.gmra.mxu0 %vm6967_vm3, %v6279_v23  ;;  %vm6982_vm3 = vmmov %vm6862_vm0 }
 0x3fd   : > { %v3035_v57 = vpop.f32.mrf.mxu3  ;;  %v2813_v62 = vpop.f32.mrf.mxu2 }
 0x3fe   : > { %v6382_v47 = vadd.f32 %v3035_v57, %v2918_v30  ;;  %v6385_v22 = vadd.f32 %v2813_v62, %v6299_v33  ;;  %v3399_v33 = vpop.permute.xlu2 %3398 }
 0x3ff   : > { %v2969_v59 = vpop.f32.mrf.mxu1 }
 0x400   : > { %v6387_v16 = vadd.f32 %v2969_v59, %v2884_v49 }
 0x401   : > { %v2909_v43 = vpop.f32.mrf.mxu0 }
 0x402   : > { %v2922_v20 = vadd.f32 %v2909_v43, %v6256_v31  ;;  %4422 = vmatmul.msk.bf16.gmra.mxu3 %vm6968_vm14, %v3397_v13  ;;  %4399 = vmatmul.msk.bf16.gmra.mxu1 %vm6969_vm15, %v3276_v61  ;;  %vm6983_vm14 = vmmov %vm6862_vm0 }
 0x403   : > { %vm6984_vm15 = vmmov %vm6862_vm0 }
 0x405   : > { %v3038_v24 = vpop.f32.mrf.mxu3  ;;  %v2815_v23 = vpop.f32.mrf.mxu2 }
 0x406   : > { %v6392_v54 = vadd.f32 %v3038_v24, %v2919_v19  ;;  %v6395_v30 = vadd.f32 %v2815_v23, %v6315_v25 }
 0x407   : > { %v2971_v45 = vpop.f32.mrf.mxu1 }
 0x408   : > { %v6397_v11 = vadd.f32 %v2971_v45, %v2885_v12  ;;  %v3278_v12 = vpop.permute.xlu2 %3277  ;;  %v3678_v45 = vpop.permute.xlu0 %3677 }
 0x409   : > { %v2912_v49 = vpop.f32.mrf.mxu0 }
 0x40a   : > { %v2923_v32 = vadd.f32 %v2912_v49, %v6272_v38  ;;  %4401 = vmatmul.msk.bf16.vlgmr.msra.gmra.mxu2 %vm6970_vm10, %v3272_v60  ;;  %vm6985_vm10 = vmmov %vm6862_vm0 }
 0x40c   : > { %4396 = vmatmul.msk.bf16.gmra.mxu0 %vm6971_vm4, %v6313_v8  ;;  %vm6986_vm4 = vmmov %vm6862_vm0 }
 0x40d   : > { %v3040_v31 = vpop.f32.mrf.mxu3  ;;  %v2996_v44 = vpop.f32.mrf.mxu2 }
 0x40e   : > { %v6403_v53 = vadd.f32 %v3040_v31, %v2920_v41  ;;  %v6406_v19 = vadd.f32 %v2996_v44, %v6210_v34 }
 0x40f   : > { %v2974_v25 = vpop.f32.mrf.mxu1 }
 0x410   : > { %v6408_v50 = vadd.f32 %v2974_v25, %v2886_v0 }
 0x411   : > { %v2914_v52 = vpop.f32.mrf.mxu0 }
 0x412   : > { %v2924_v15 = vadd.f32 %v2914_v52, %v6293_v14  ;;  %4423 = vmatmul.msk.bf16.gmra.mxu3 %vm6972_vm13, %v3399_v33  ;;  %4400 = vmatmul.msk.bf16.gmra.mxu1 %vm6862_vm0, %v3278_v12  ;;  %vm6987_vm13 = vmmov %vm6862_vm0 }
 0x415   : > { %v3043_v38 = vpop.f32.mrf.mxu3  ;;  %v6413_v8 = vpop.f32.mrf.mxu2 }
 0x416   : > { %v6415_v60 = vadd.f32 %v3043_v38, %v2921_v56  ;;  %v3401_v56 = vpop.permute.xlu1 %3400 }
 0x417   : > { %v2976_v41 = vpop.f32.mrf.mxu1 }
 0x418   : > { %v6417_v58 = vadd.f32 %v2976_v41, %v2887_v1 }
 0x419   : > { %v3070_v34 = vpop.f32.mrf.mxu0 }
 0x41a   : > { %v6420_v0 = vadd.f32 %v3070_v34, %v6308_v27  ;;  %4402 = vmatmul.msk.bf16.gmra.mxu2 %vm6973_vm6, %v3274_v46  ;;  %vm6988_vm6 = vmmov %vm6862_vm0 }
 0x41c   : > { %4425 = vmatmul.msk.bf16.vlgmr.msra.gmra.mxu0 %vm6974_vm11, %v5934_v26  ;;  %vm6989_vm11 = vmmov %vm6862_vm0 }
 0x41d   : > { %v3045_v14 = vpop.f32.mrf.mxu3  ;;  %v3001_v28 = vpop.f32.mrf.mxu2 }
 0x41e   : > { %v6425_v13 = vadd.f32 %v3045_v14, %v2922_v20  ;;  %v6428_v4 = vadd.f32 %v3001_v28, %v6239_v63  ;;  %v3680_v38 = vpop.permute.xlu1 %3679 }
 0x41f   : > { %v3132_v42 = vpop.f32.mrf.mxu1 }
 0x420   : > { %v6431_v1 = vadd.f32 %v3132_v42, %v6342_v37 }
 0x421   : > { %v3072_v57 = vpop.f32.mrf.mxu0 }
 0x422   : > { %v6434_v27 = vadd.f32 %v3072_v57, %v6325_v3  ;;  %4424 = vmatmul.msk.bf16.gmra.mxu3 %vm6975_vm8, %v3401_v56  ;;  %4429 = vmatmul.msk.bf16.vlgmr.msrb.gmra.mxu1 %vm6976_vm5, %v5934_v26  ;;  %vm6990_vm8 = vmmov %vm6862_vm0 }
 0x423   : > { %vm6992_vm5 = vmmov %vm6862_vm0 }
 0x425   : > { %v3048_v46 = vpop.f32.mrf.mxu3  ;;  %v6439_v62 = vpop.f32.mrf.mxu2 }
 0x426   : > { %v6441_v59 = vadd.f32 %v3048_v46, %v2923_v32 }
 0x427   : > { %v3134_v63 = vpop.f32.mrf.mxu1 }
 0x428   : > { %v6444_v43 = vadd.f32 %v3134_v63, %v6353_v51 }
 0x429   : > { %v3075_v37 = vpop.f32.mrf.mxu0 }
 0x42a   : > { %v6447_v20 = vadd.f32 %v3075_v37, %v6339_v55  ;;  %4403 = vmatmul.msk.bf16.gmra.mxu2 %vm6977_vm12, %v3276_v61  ;;  %vm6994_vm12 = vmmov %vm6862_vm0 }
 0x42c   : > { %4426 = vmatmul.msk.bf16.gmra.mxu0 %vm6978_vm2, %v5761_v21  ;;  %vm6995_vm2 = vmmov %vm6862_vm0 }
 0x42d   : > { %v3050_v3 = vpop.f32.mrf.mxu3  ;;  %v3006_v26 = vpop.f32.mrf.mxu2 }
 0x42e   : > { %v6452_v24 = vadd.f32 %v3050_v3, %v2924_v15  ;;  %v6455_v23 = vadd.f32 %v3006_v26, %v6277_v10 }
 0x42f   : > { %v3137_v33 = vpop.f32.mrf.mxu1 }
 0x430   : > { %v6458_v51 = vadd.f32 %v3137_v33, %v6365_v17  ;;  %v3684_v33 = vpop.permute.xlu0 %3683 }
 0x431   : > { %v3077_v49 = vpop.f32.mrf.mxu0 }
 0x432   : > { %v6461_v55 = vadd.f32 %v3077_v49, %v6350_v29  ;;  %4437 = vmatmul.msk.bf16.vlgmr.msrb.gmra.mxu3 %vm6979_vm9, %v3678_v45  ;;  %4430 = vmatmul.msk.bf16.gmra.mxu1 %vm6980_vm7, %v5761_v21  ;;  %vm6997_vm9 = vmmov %vm6862_vm0 }
 0x433   : > { %vm6999_vm7 = vmmov %vm6862_vm0 }
 0x435   : > { %v3206_v61 = vpop.f32.mrf.mxu3  ;;  %v6466_v32 = vpop.f32.mrf.mxu2 }
 0x436   : > { %v6469_v10 = vadd.f32 %v3206_v61, %v6370_v2 }
 0x437   : > { %v3139_v31 = vpop.f32.mrf.mxu1 }
 0x438   : > { %v6472_v17 = vadd.f32 %v3139_v31, %v6375_v7 }
 0x439   : > { %v3080_v44 = vpop.f32.mrf.mxu0 }
 0x43a   : > { %v6475_v25 = vadd.f32 %v3080_v44, %v6362_v48  ;;  %4404 = vmatmul.msk.bf16.gmra.mxu2 %vm6981_vm1, %v3278_v12  ;;  %vm3976_vm1 = vcmask 31744  }
 0x43c   : > { %4427 = vmatmul.msk.bf16.gmra.mxu0 %vm6982_vm3, %v5904_v35  ;;  %vm3993_vm3 = vcmask 60416  }
 0x43d   : > { %v3208_v21 = vpop.f32.mrf.mxu3  ;;  %v3011_v29 = vpop.f32.mrf.mxu2 }
 0x43e   : > { %v6481_v52 = vadd.f32 %v3208_v21, %v6382_v47  ;;  %v6484_v2 = vadd.f32 %v3011_v29, %v6311_v36 }
 0x43f   : > { %v3142_v15 = vpop.f32.mrf.mxu1 }
 0x440   : > { %v6487_v7 = vadd.f32 %v3142_v15, %v6387_v16 }
 0x441   : > { %v3082_v48 = vpop.f32.mrf.mxu0 }
 0x442   : > { %v6490_v41 = vadd.f32 %v3082_v48, %v6373_v40  ;;  %4438 = vmatmul.msk.bf16.gmra.mxu3 %vm6983_vm14, %v3680_v38  ;;  %4431 = vmatmul.msk.bf16.gmra.mxu1 %vm6984_vm15, %v5904_v35 }
 0x445   : > { %v3211_v12 = vpop.f32.mrf.mxu3  ;;  %v6495_v47 = vpop.f32.mrf.mxu2 }
 0x446   : > { %v6498_v36 = vadd.f32 %v3211_v12, %v6392_v54 }
 0x447   : > { %v3144_v34 = vpop.f32.mrf.mxu1 }
 0x448   : > { %v6501_v16 = vadd.f32 %v3144_v34, %v6397_v11  ;;  %v3682_v11 = vpop.permute.xlu2 %3681 }
 0x449   : > { %v3085_v14 = vpop.f32.mrf.mxu0 }
 0x44a   : > { %v6504_v28 = vadd.f32 %v3085_v14, %v6385_v22  ;;  %4433 = vmatmul.msk.bf16.vlgmr.msrb.gmra.mxu2 %vm6985_vm10, %v3678_v45 }
 0x44c   : > { %4428 = vmatmul.msk.bf16.gmra.mxu0 %vm6986_vm4, %v5950_v9 }
 0x44d   : > { %v3213_v35 = vpop.f32.mrf.mxu3  ;;  %v3169_v40 = vpop.f32.mrf.mxu2 }
 0x44e   : > { %v6510_v42 = vadd.f32 %v3213_v35, %v6403_v53  ;;  %v3189_v45 = vadd.f32 %v3169_v40, %v6406_v19  ;;  %v6993_v35 = vld [vmem:[#allocation3_spill] sm:$0xff] }
 0x44f   : > { %v3147_v54 = vpop.f32.mrf.mxu1 }
 0x450   : > { %v6513_v56 = vadd.f32 %v3147_v54, %v6408_v50 }
 0x451   : > { %v3087_v57 = vpop.f32.mrf.mxu0 }
 0x452   : > { %v6516_v46 = vadd.f32 %v3087_v57, %v6395_v30  ;;  %4439 = vmatmul.msk.bf16.gmra.mxu3 %vm6987_vm13, %v3682_v11  ;;  %4432 = vmatmul.msk.bf16.gmra.mxu1 %vm6862_vm0, %v5950_v9 }
 0x455   : > { %v3216_v22 = vpop.f32.mrf.mxu3  ;;  %v3171_v53 = vpop.f32.mrf.mxu2 }
 0x456   : > { %v6522_v63 = vadd.f32 %v3216_v22, %v6415_v60 }
 0x457   : > { %v3149_v37 = vpop.f32.mrf.mxu1 }
 0x458   : > { %v6525_v3 = vadd.f32 %v3149_v37, %v6417_v58 }
 0x459   : > { %v3243_v50 = vpop.f32.mrf.mxu0 }
 0x45a   : > { %v6528_v26 = vadd.f32 %v3243_v50, %v6420_v0  ;;  %4434 = vmatmul.msk.bf16.gmra.mxu2 %vm6988_vm6, %v3680_v38  ;;  %v6991_v0 = vld [vmem:[#allocation6_spill] sm:$0xff] }
 0x45b   : > { %v3017_v44 = vadd.f32 %v6413_v8, %v6991_v0 }
 0x45c   : > { %4449 = vmatmul.msk.bf16.vlgmr.msrb.gmra.mxu0 %vm6989_vm11, %v5450_v39  ;;  %v6546_v39 = vld [vmem:[%s6787_s5] ss:$0 sm:$0xff] }
 0x45d   : > { %v3218_v30 = vpop.f32.mrf.mxu3  ;;  %v3174_v49 = vpop.f32.mrf.mxu2  ;;  %v3190_v21 = vadd.f32 %v3171_v53, %v3017_v44 }
 0x45e   : > { %v6534_v9 = vadd.f32 %v3218_v30, %v6425_v13  ;;  %v3191_v37 = vadd.f32 %v3174_v49, %v6428_v4 }
 0x45f   : > { %v3300_v60 = vpop.f32.mrf.mxu1 }
 0x460   : > { %v3320_v61 = vadd.f32 %v3300_v60, %v3189_v45  ;;  %v3019_v60 = vadd.f32 %v6439_v62, %v6259_v6  ;;  %v6996_v62 = vld [vmem:[#allocation4_spill] sm:$0xff] }
 0x461   : > { %v3245_v58 = vpop.f32.mrf.mxu0 }
 0x462   : > { %v6538_v31 = vadd.f32 %v3245_v58, %v6434_v27  ;;  %4440 = vmatmul.msk.bf16.gmra.mxu3 %vm6990_vm8, %v3684_v33  ;;  %v3920_v19 = vmul.f32 %v6546_v39, %v3320_v61  ;;  %v6555_v27 = vld [vmem:[%s6788_s6] ss:$0 sm:$0xff] }
 0x464   : > { %v3928_v48 = vadd.f32 %v6555_v27, %v3920_v19 }
 0x465   : > { %v3221_v13 = vpop.f32.mrf.mxu3  ;;  %v3176_v14 = vpop.f32.mrf.mxu2 }
 0x466   : > { %v6550_v29 = vadd.f32 %v3221_v13, %v6441_v59  ;;  %v3936_v54 = vmax.f32 %v3928_v48, 0.0  ;;  %v3192_v61 = vadd.f32 %v3176_v14, %v3019_v60 }
 0x467   : > { %v3302_v15 = vpop.f32.mrf.mxu1 }
 0x468   : > { %v3321_v38 = vadd.f32 %v3302_v15, %v3190_v21 }
 0x469   : > { %v3248_v8 = vpop.f32.mrf.mxu0 }
 0x46a   : > { %v3921_v12 = vmul.f32 %v6546_v39, %v3321_v38  ;;  %v6560_v34 = vadd.f32 %v3248_v8, %v6447_v20  ;;  %4435 = vmatmul.msk.bf16.gmra.mxu2 %vm6992_vm5, %v3682_v11 }
 0x46c   : > { %v3929_v59 = vadd.f32 %v6555_v27, %v3921_v12  ;;  %4450 = vmatmul.msk.bf16.gmra.mxu0 %vm6994_vm12, %v6993_v35 }
 0x46d   : > { %v3223_v40 = vpop.f32.mrf.mxu3  ;;  %v3179_v45 = vpop.f32.mrf.mxu2 }
 0x46e   : > { %v3937_v57 = vmax.f32 %v3929_v59, 0.0  ;;  %v6567_v22 = vadd.f32 %v3223_v40, %v6452_v24  ;;  %v3193_v12 = vadd.f32 %v3179_v45, %v6455_v23 }
 0x46f   : > { %v3305_v53 = vpop.f32.mrf.mxu1 }
 0x470   : > { %v4502_v50 = vpack.i.bf16 %v3937_v57, %v3936_v54  ;;  %v3322_v30 = vadd.f32 %v3305_v53, %v3191_v37 }
 0x471   : > { %v3250_v20 = vpop.f32.mrf.mxu0 }
 0x472   : > { %v6571_v11 = vadd.f32 %v3250_v20, %v6461_v55  ;;  %4503 = vrot.lane.b32.xlu1 %v4502_v50, %s4557_s13  ;;  %v3922_v24 = vmul.f32 %v6546_v39, %v3322_v30 }
 0x474   : > { %v3930_v13 = vadd.f32 %v6555_v27, %v3922_v24 }
 0x475   : > { %v3423_v58 = vpop.f32.mrf.mxu3  ;;  %v3181_v8 = vpop.f32.mrf.mxu2 }
 0x476   : > { %v3443_v0 = vadd.f32 %v3423_v58, %v6469_v10  ;;  %v3938_v15 = vmax.f32 %v3930_v13, 0.0 }
 0x477   : > { %v3307_v44 = vpop.f32.mrf.mxu1 }
 0x478   : > { %v3323_v4 = vadd.f32 %v3307_v44, %v3192_v61 }
 0x479   : > { %v3253_v49 = vpop.f32.mrf.mxu0 }
 0x47a   : > { %v3923_v55 = vmul.f32 %v6546_v39, %v3323_v4  ;;  %v6581_v21 = vadd.f32 %v3253_v49, %v6475_v25  ;;  %4436 = vmatmul.msk.bf16.gmra.mxu2 %vm6995_vm2, %v3684_v33  ;;  %v3021_v33 = vadd.f32 %v6466_v32, %v6296_v5  ;;  %v6998_v5 = vld [vmem:[#allocation5_spill] sm:$0xff] }
 0x47c   : > { %v3931_v6 = vadd.f32 %v6555_v27, %v3923_v55  ;;  %4451 = vmatmul.msk.bf16.gmra.mxu0 %vm6997_vm9, %v6996_v62  ;;  %v3194_v54 = vadd.f32 %v3181_v8, %v3021_v33  ;;  %v3023_v55 = vadd.f32 %v6495_v47, %v6328_v18 }
 0x47d   : > { %v3425_v19 = vpop.f32.mrf.mxu3  ;;  %v3184_v23 = vpop.f32.mrf.mxu2 }
 0x47e   : > { %v3939_v10 = vmax.f32 %v3931_v6, 0.0  ;;  %v3444_v38 = vadd.f32 %v3425_v19, %v6481_v52  ;;  %v3195_v24 = vadd.f32 %v3184_v23, %v6484_v2 }
 0x47f   : > { %v3310_v48 = vpop.f32.mrf.mxu1 }
 0x480   : > { %v4507_v14 = vpack.i.bf16 %v3939_v10, %v3938_v15  ;;  %v3324_v25 = vadd.f32 %v3310_v48, %v3193_v12 }
 0x481   : > { %v3255_v59 = vpop.f32.mrf.mxu0 }
 0x482   : > { %v6590_v35 = vadd.f32 %v3255_v59, %v6490_v41  ;;  %4508 = vrot.lane.b32.xlu2 %v4507_v14, %s4557_s13  ;;  %v3924_v57 = vmul.f32 %v6546_v39, %v3324_v25 }
 0x484   : > { %v3932_v20 = vadd.f32 %v6555_v27, %v3924_v57 }
 0x485   : > { %v3428_v40 = vpop.f32.mrf.mxu3 }
 0x486   : > { %v3445_v52 = vadd.f32 %v3428_v40, %v6498_v36  ;;  %v3940_v45 = vmax.f32 %v3932_v20, 0.0 }
 0x487   : > { %v3312_v53 = vpop.f32.mrf.mxu1 }
 0x488   : > { %v3325_v37 = vadd.f32 %v3312_v53, %v3194_v54 }
 0x489   : > { %v3258_v50 = vpop.f32.mrf.mxu0 }
 0x48a   : > { %v3925_v41 = vmul.f32 %v6546_v39, %v3325_v37  ;;  %v6600_v30 = vadd.f32 %v3258_v50, %v6504_v28  ;;  %v3186_v28 = vpop.f32.mrf.mxu2 }
 0x48b   : > { %v3196_v62 = vadd.f32 %v3186_v28, %v3023_v55 }
 0x48c   : > { %v3933_v60 = vadd.f32 %v6555_v27, %v3925_v41  ;;  %4452 = vmatmul.msk.bf16.gmra.mxu0 %vm6999_vm7, %v6998_v5 }
 0x48d   : > { %v3430_v32 = vpop.f32.mrf.mxu3 }
 0x48e   : > { %v3941_v58 = vmax.f32 %v3933_v60, 0.0  ;;  %v3446_v36 = vadd.f32 %v3430_v32, %v6510_v42 }
 0x48f   : > { %v3315_v61 = vpop.f32.mrf.mxu1 }
 0x490   : > { %v4512_v44 = vpack.i.bf16 %v3941_v58, %v3940_v45  ;;  %v3326_v49 = vadd.f32 %v3315_v61, %v3195_v24 }
 0x491   : > { %v3260_v4 = vpop.f32.mrf.mxu0 }
 0x492   : > { %v6608_v13 = vadd.f32 %v3260_v4, %v6516_v46  ;;  %4513 = vrot.lane.b32.xlu0 %v4512_v44, %s4557_s13  ;;  %v3926_v19 = vmul.f32 %v6546_v39, %v3326_v49  ;;  %v3337_v60 = vpop.f32.mrf.mxu2  ;;  %v3895_v44 = vmul.f32 %v6546_v39, %v6472_v17 }
 0x493   : > { %v3357_v4 = vadd.f32 %v3337_v60, %v6528_v26 }
 0x494   : > { %v3934_v8 = vadd.f32 %v6555_v27, %v3926_v19 }
 0x495   : > { %v3433_v6 = vpop.f32.mrf.mxu3 }
 0x496   : > { %v3447_v42 = vadd.f32 %v3433_v6, %v6522_v63  ;;  %v3942_v59 = vmax.f32 %v3934_v8, 0.0  ;;  %v3907_v6 = vadd.f32 %v6555_v27, %v3895_v44 }
 0x497   : > { %v3317_v15 = vpop.f32.mrf.mxu1 }
 0x498   : > { %v3327_v2 = vadd.f32 %v3317_v15, %v3196_v62  ;;  %v3892_v15 = vmul.f32 %v6546_v39, %v6431_v1 }
 0x499   : > { %v3612_v10 = vpop.f32.mrf.mxu0 }
 0x49a   : > { %v3927_v46 = vmul.f32 %v6546_v39, %v3327_v2  ;;  %v6617_v48 = vadd.f32 %v3612_v10, %v3443_v0  ;;  %v3904_v1 = vadd.f32 %v6555_v27, %v3892_v15 }
 0x49c   : > { %v3935_v12 = vadd.f32 %v6555_v27, %v3927_v46  ;;  %v3915_v46 = vmax.f32 %v3907_v6, 0.0 }
 0x49d   : > { %v3435_v14 = vpop.f32.mrf.mxu3 }
 0x49e   : > { %v3943_v18 = vmax.f32 %v3935_v12, 0.0  ;;  %v3448_v47 = vadd.f32 %v3435_v14, %v6534_v9 }
 0x49f   : > { %v3649_v5 = vpop.f32.mrf.mxu1 }
 0x4a0   : > { %v4517_v25 = vpack.i.bf16 %v3943_v18, %v3942_v59  ;;  %v3669_v28 = vadd.f32 %v3649_v5, %v3357_v4  ;;  %v6653_v18 = vld [vmem:[%s6787_s5] ss:$0 sm:$0xff] }
 0x4a1   : > { %v3614_v33 = vpop.f32.mrf.mxu0 }
 0x4a2   : > { %v6621_v40 = vadd.f32 %v3614_v33, %v3444_v38  ;;  %4518 = vrot.lane.b32.xlu1 %v4517_v25, %s4557_s13 }
 0x4a5   : > { %v3438_v63 = vpop.f32.mrf.mxu3 }
 0x4a6   : > { %v3449_v54 = vadd.f32 %v3438_v63, %v6550_v29 }
 0x4a7   : > { %v3651_v58 = vpop.f32.mrf.mxu1 }
 0x4a9   : > { %v3617_v57 = vpop.f32.mrf.mxu0 }
 0x4aa   : > { %v6625_v53 = vadd.f32 %v3617_v57, %v3445_v52  ;;  %v3339_v52 = vpop.f32.mrf.mxu2 }
 0x4ab   : > { %v3358_v17 = vadd.f32 %v3339_v52, %v6538_v31 }
 0x4ad   : > { %v3440_v0 = vpop.f32.mrf.mxu3  ;;  %v3670_v59 = vadd.f32 %v3651_v58, %v3358_v17 }
 0x4ae   : > { %v3450_v37 = vadd.f32 %v3440_v0, %v6567_v22 }
 0x4af   : > { %v3654_v62 = vpop.f32.mrf.mxu1 }
 0x4b1   : > { %v3619_v23 = vpop.f32.mrf.mxu0 }
 0x4b2   : > { %v6628_v50 = vadd.f32 %v3619_v23, %v3446_v36  ;;  %v3894_v36 = vmul.f32 %v6546_v39, %v6458_v51  ;;  %v3342_v49 = vpop.f32.mrf.mxu2  ;;  %v3893_v51 = vmul.f32 %v6546_v39, %v6444_v43 }
 0x4b3   : > { %v3359_v52 = vadd.f32 %v3342_v49, %v6560_v34 }
 0x4b4   : > { %v3906_v55 = vadd.f32 %v6555_v27, %v3894_v36 }
 0x4b5   : > { %v3743_v32 = vpop.f32.mrf.mxu3  ;;  %v3671_v44 = vadd.f32 %v3654_v62, %v3359_v52 }
 0x4b6   : > { %v3914_v8 = vmax.f32 %v3906_v55, 0.0 }
 0x4b9   : > { %v3622_v20 = vpop.f32.mrf.mxu0 }
 0x4ba   : > { %v6630_v9 = vadd.f32 %v3622_v20, %v3447_v42  ;;  %v3763_v42 = vadd.f32 %v3743_v32, %v3669_v28  ;;  %v3344_v57 = vpop.f32.mrf.mxu2  ;;  %v3656_v20 = vpop.f32.mrf.mxu1 }
 0x4bb   : > { %v3360_v49 = vadd.f32 %v3344_v57, %v6571_v11 }
 0x4bd   : > { %v3745_v61 = vpop.f32.mrf.mxu3 }
 0x4c1   : > { %v3624_v41 = vpop.f32.mrf.mxu0 }
 0x4c2   : > { %v6632_v38 = vadd.f32 %v3624_v41, %v3448_v47  ;;  %v3764_v47 = vadd.f32 %v3745_v61, %v3670_v59  ;;  %v3912_v41 = vmax.f32 %v3904_v1, 0.0  ;;  %v3347_v34 = vpop.f32.mrf.mxu2  ;;  %v3659_v62 = vpop.f32.mrf.mxu1 }
 0x4c5   : > { %v3748_v2 = vpop.f32.mrf.mxu3 }
 0x4c9   : > { %v3627_v45 = vpop.f32.mrf.mxu0 }
 0x4ca   : > { %v6634_v29 = vadd.f32 %v3627_v45, %v3449_v54  ;;  %v3905_v54 = vadd.f32 %v6555_v27, %v3893_v51  ;;  %v3765_v51 = vadd.f32 %v3748_v2, %v3671_v44 }
 0x4cc   : > { %v3913_v45 = vmax.f32 %v3905_v54, 0.0 }
 0x4cd   : > { %v3750_v58 = vpop.f32.mrf.mxu3 }
 0x4d1   : > { %v3629_v24 = vpop.f32.mrf.mxu0 }
 0x4d2   : > { %v6636_v22 = vadd.f32 %v3629_v24, %v3450_v37  ;;  %v6670_v37 = vld [vmem:[%s6788_s6] ss:$0 sm:$0xff] }
 0x4d9   : > { %v3860_v19 = vpop.f32.mrf.mxu0 }
 0x4da   : > { %v3880_v26 = vadd.f32 %v3860_v19, %v3763_v42 }
 0x4dc   : > { %v4509_v10 = vpop.permute.xlu2 %4508  ;;  %v4034_v25 = vmul.f32 %v6653_v18, %v3880_v26 }
 0x4dd   : > { %v4511_v12 = vunpack.i.h.bf16 %v4509_v10  ;;  %v4510_v14 = vunpack.i.l.bf16 %v4509_v10  ;;  %v3672_v10 = vadd.f32 %v3656_v20, %v3360_v49  ;;  %v3896_v20 = vmul.f32 %v6546_v39, %v6487_v7 }
 0x4de   : > { %v4042_v60 = vadd.f32 %v6670_v37, %v4034_v25 }
 0x4df   : > { %v3980_v43 = vsel %vm3976_vm1, %v3915_v46, %v4511_v12  ;;  %v3979_v31 = vsel %vm3976_vm1, %v3914_v8, %v4510_v14  ;;  %v3753_v8 = vpop.f32.mrf.mxu3  ;;  %v3766_v46 = vadd.f32 %v3750_v58, %v3672_v10 }
 0x4e0   : > { %v3988_v33 = vpack.c.bf16 %v3980_v43, %v3980_v43  ;;  %v3987_v63 = vpack.c.bf16 %v3979_v31, %v3979_v31  ;;  %v4050_v55 = vmax.f32 %v4042_v60, 0.0  ;;  %v3349_v43 = vpop.f32.mrf.mxu2  ;;  %v3361_v31 = vadd.f32 %v3347_v34, %v6581_v21 }
 0x4e1   : > { %v3862_v0 = vpop.f32.mrf.mxu0  ;;  %v3897_v21 = vmul.f32 %v6546_v39, %v6501_v16 }
 0x4e2   : > { %3997 = vst.msk [vmem:[%s6660_s10 + $0x18] sm:$0xf] %vm3993_vm3, %v3988_v33  ;;  %v3881_v23 = vadd.f32 %v3862_v0, %v3764_v47  ;;  %v3661_v47 = vpop.f32.mrf.mxu1  ;;  %v3673_v25 = vadd.f32 %v3659_v62, %v3361_v31 }
 0x4e3   : > { %3996 = vst.msk [vmem:[%s6660_s10 + $0x10] sm:$0xf] %vm3993_vm3, %v3987_v63 }
 0x4e4   : > { %v4035_v5 = vmul.f32 %v6653_v18, %v3881_v23  ;;  %v4504_v32 = vpop.permute.xlu1 %4503  ;;  %v3767_v0 = vadd.f32 %v3753_v8, %v3673_v25 }
 0x4e5   : > { %v4506_v61 = vunpack.i.h.bf16 %v4504_v32  ;;  %v4505_v24 = vunpack.i.l.bf16 %v4504_v32 }
 0x4e6   : > { %v4043_v36 = vadd.f32 %v6670_v37, %v4035_v5 }
 0x4e7   : > { %v3978_v4 = vsel %vm3976_vm1, %v3913_v45, %v4506_v61  ;;  %v3977_v28 = vsel %vm3976_vm1, %v3912_v41, %v4505_v24  ;;  %v3755_v54 = vpop.f32.mrf.mxu3  ;;  %v3362_v41 = vadd.f32 %v3349_v43, %v6590_v35  ;;  %v3908_v45 = vadd.f32 %v6555_v27, %v3896_v20 }
 0x4e8   : > { %v4051_v6 = vmax.f32 %v4043_v36, 0.0  ;;  %v3986_v19 = vpack.c.bf16 %v3978_v4, %v3978_v4  ;;  %v3985_v42 = vpack.c.bf16 %v3977_v28, %v3977_v28  ;;  %v3352_v32 = vpop.f32.mrf.mxu2  ;;  %v3909_v61 = vadd.f32 %v6555_v27, %v3897_v21 }
 0x4e9   : > { %v3865_v15 = vpop.f32.mrf.mxu0  ;;  %v3674_v5 = vadd.f32 %v3661_v47, %v3362_v41  ;;  %v3916_v35 = vmax.f32 %v3908_v45, 0.0  ;;  %v3899_v43 = vmul.f32 %v6546_v39, %v6525_v3 }
 0x4ea   : > { %v4522_v17 = vpack.i.bf16 %v4051_v6, %v4050_v55  ;;  %3995 = vst.msk [vmem:[%s6660_s10 + $0x8] sm:$0xf] %vm3993_vm3, %v3986_v19  ;;  %v3882_v26 = vadd.f32 %v3865_v15, %v3765_v51  ;;  %v3664_v24 = vpop.f32.mrf.mxu1  ;;  %v3917_v16 = vmax.f32 %v3909_v61, 0.0  ;;  %v3363_v6 = vadd.f32 %v3352_v32, %v6600_v30 }
 0x4eb   : > { %3994 = vst.msk [vmem:[%s6660_s10] sm:$0xf] %vm3993_vm3, %v3985_v42  ;;  %v3768_v52 = vadd.f32 %v3755_v54, %v3674_v5 }
 0x4ec   : > { %4523 = vrot.lane.b32.xlu2 %v4522_v17, %s4557_s13  ;;  %v4036_v12 = vmul.f32 %v6653_v18, %v3882_v26  ;;  %v3675_v51 = vadd.f32 %v3664_v24, %v3363_v6 }
 0x4ee   : > { %v4044_v2 = vadd.f32 %v6670_v37, %v4036_v12 }
 0x4ef   : > { %v3758_v44 = vpop.f32.mrf.mxu3 }
 0x4f0   : > { %v4052_v33 = vmax.f32 %v4044_v2, 0.0  ;;  %v3354_v8 = vpop.f32.mrf.mxu2  ;;  %v3769_v12 = vadd.f32 %v3758_v44, %v3675_v51 }
 0x4f1   : > { %v3867_v14 = vpop.f32.mrf.mxu0 }
 0x4f2   : > { %v3883_v59 = vadd.f32 %v3867_v14, %v3766_v46  ;;  %v3666_v30 = vpop.f32.mrf.mxu1 }
 0x4f4   : > { %v4037_v1 = vmul.f32 %v6653_v18, %v3883_v59  ;;  %v3364_v59 = vadd.f32 %v3354_v8, %v6608_v13 }
 0x4f6   : > { %v4045_v11 = vadd.f32 %v6670_v37, %v4037_v1  ;;  %v3898_v1 = vmul.f32 %v6546_v39, %v6513_v56 }
 0x4f7   : > { %v3760_v31 = vpop.f32.mrf.mxu3 }
 0x4f8   : > { %v4053_v63 = vmax.f32 %v4045_v11, 0.0  ;;  %v3676_v11 = vadd.f32 %v3666_v30, %v3364_v59 }
 0x4f9   : > { %v3870_v57 = vpop.f32.mrf.mxu0 }
 0x4fa   : > { %v4527_v23 = vpack.i.bf16 %v4053_v63, %v4052_v33  ;;  %v3884_v60 = vadd.f32 %v3870_v57, %v3767_v0  ;;  %v3770_v47 = vadd.f32 %v3760_v31, %v3676_v11  ;;  %v3910_v33 = vadd.f32 %v6555_v27, %v3898_v1 }
 0x4fb   : > { %v3911_v63 = vadd.f32 %v6555_v27, %v3899_v43 }
 0x4fc   : > { %4528 = vrot.lane.b32.xlu0 %v4527_v23, %s4557_s13  ;;  %v4038_v58 = vmul.f32 %v6653_v18, %v3884_v60  ;;  %v3918_v23 = vmax.f32 %v3910_v33, 0.0 }
 0x4fd   : > { %v3919_v3 = vmax.f32 %v3911_v63, 0.0 }
 0x4fe   : > { %v4046_v4 = vadd.f32 %v6670_v37, %v4038_v58  ;;  %v3706_v58 = vpop.f32.mrf.mxu2 }
 0x500   : > { %v4054_v49 = vmax.f32 %v4046_v4, 0.0 }
 0x501   : > { %v3872_v36 = vpop.f32.mrf.mxu0 }
 0x502   : > { %v3885_v7 = vadd.f32 %v3872_v36, %v3768_v52  ;;  %v3726_v36 = vadd.f32 %v3706_v58, %v6617_v48 }
 0x504   : > { %v4039_v28 = vmul.f32 %v6653_v18, %v3885_v7  ;;  %v4514_v55 = vpop.permute.xlu0 %4513  ;;  %v4006_v44 = vmul.f32 %v6653_v18, %v3726_v36 }
 0x505   : > { %v4516_v19 = vunpack.i.h.bf16 %v4514_v55  ;;  %v4515_v42 = vunpack.i.l.bf16 %v4514_v55 }
 0x506   : > { %v4047_v15 = vadd.f32 %v6670_v37, %v4039_v28  ;;  %v3708_v61 = vpop.f32.mrf.mxu2  ;;  %v4018_v28 = vadd.f32 %v6670_v37, %v4006_v44 }
 0x507   : > { %v3982_v17 = vsel %vm3976_vm1, %v3917_v16, %v4516_v19  ;;  %v3981_v34 = vsel %vm3976_vm1, %v3916_v35, %v4515_v42  ;;  %v3727_v7 = vadd.f32 %v3708_v61, %v6621_v40 }
 0x508   : > { %v4055_v26 = vmax.f32 %v4047_v15, 0.0  ;;  %v3990_v62 = vpack.c.bf16 %v3982_v17, %v3982_v17  ;;  %v3989_v10 = vpack.c.bf16 %v3981_v34, %v3981_v34  ;;  %v4026_v6 = vmax.f32 %v4018_v28, 0.0 }
 0x509   : > { %v3875_v46 = vpop.f32.mrf.mxu0  ;;  %v4007_v35 = vmul.f32 %v6653_v18, %v3727_v7 }
 0x50a   : > { %v4532_v14 = vpack.i.bf16 %v4055_v26, %v4054_v49  ;;  %3999 = vst.msk [vmem:[%s6660_s10 + $0x28] sm:$0xf] %vm3993_vm3, %v3990_v62  ;;  %v3886_v2 = vadd.f32 %v3875_v46, %v3769_v12 }
 0x50b   : > { %3998 = vst.msk [vmem:[%s6660_s10 + $0x20] sm:$0xf] %vm3993_vm3, %v3989_v10  ;;  %v4019_v55 = vadd.f32 %v6670_v37, %v4007_v35 }
 0x50c   : > { %4533 = vrot.lane.b32.xlu1 %v4532_v14, %s4557_s13  ;;  %v4040_v25 = vmul.f32 %v6653_v18, %v3886_v2 }
 0x50d   : > { %v4027_v19 = vmax.f32 %v4019_v55, 0.0 }
 0x50e   : > { %v4048_v57 = vadd.f32 %v6670_v37, %v4040_v25  ;;  %v3711_v24 = vpop.f32.mrf.mxu2 }
 0x50f   : > { %v3728_v62 = vadd.f32 %v3711_v24, %v6625_v53 }
 0x510   : > { %v4056_v27 = vmax.f32 %v4048_v57, 0.0 }
 0x511   : > { %v3877_v54 = vpop.f32.mrf.mxu0  ;;  %v4008_v8 = vmul.f32 %v6653_v18, %v3728_v62 }
 0x512   : > { %v3887_v13 = vadd.f32 %v3877_v54, %v3770_v47 }
 0x513   : > { %v4020_v14 = vadd.f32 %v6670_v37, %v4008_v8 }
 0x514   : > { %v4041_v56 = vmul.f32 %v6653_v18, %v3887_v13  ;;  %v4519_v0 = vpop.permute.xlu1 %4518 }
 0x515   : > { %v4521_v39 = vunpack.i.h.bf16 %v4519_v0  ;;  %v4520_v20 = vunpack.i.l.bf16 %v4519_v0  ;;  %v4028_v1 = vmax.f32 %v4020_v14, 0.0 }
 0x516   : > { %v4049_v41 = vadd.f32 %v6670_v37, %v4041_v56  ;;  %v3713_v4 = vpop.f32.mrf.mxu2 }
 0x517   : > { %v3984_v60 = vsel %vm3976_vm1, %v3919_v3, %v4521_v39  ;;  %v3983_v21 = vsel %vm3976_vm1, %v3918_v23, %v4520_v20  ;;  %v3729_v10 = vadd.f32 %v3713_v4, %v6628_v50 }
 0x518   : > { %v4057_v5 = vmax.f32 %v4049_v41, 0.0  ;;  %v3992_v32 = vpack.c.bf16 %v3984_v60, %v3984_v60  ;;  %v3991_v45 = vpack.c.bf16 %v3983_v21, %v3983_v21 }
 0x519   : > { %v4009_v46 = vmul.f32 %v6653_v18, %v3729_v10 }
 0x51a   : > { %v4537_v52 = vpack.i.bf16 %v4057_v5, %v4056_v27  ;;  %4001 = vst.msk [vmem:[%s6660_s10 + $0x38] sm:$0xf] %vm3993_vm3, %v3992_v32 }
 0x51b   : > { %4000 = vst.msk [vmem:[%s6660_s10 + $0x30] sm:$0xf] %vm3993_vm3, %v3991_v45  ;;  %v4021_v30 = vadd.f32 %v6670_v37, %v4009_v46 }
 0x51c   : > { %4538 = vrot.lane.b32.xlu2 %v4537_v52, %s4557_s13 }
 0x51d   : > { %v4029_v43 = vmax.f32 %v4021_v30, 0.0 }
 0x51e   : > { %v3716_v51 = vpop.f32.mrf.mxu2 }
 0x51f   : > { %v3730_v63 = vadd.f32 %v3716_v51, %v6630_v9 }
 0x521   : > { %v4010_v56 = vmul.f32 %v6653_v18, %v3730_v63 }
 0x523   : > { %v4022_v27 = vadd.f32 %v6670_v37, %v4010_v56 }
 0x525   : > { %v4030_v32 = vmax.f32 %v4022_v27, 0.0 }
 0x526   : > { %v3718_v49 = vpop.f32.mrf.mxu2 }
 0x52e   : > { %v3721_v26 = vpop.f32.mrf.mxu2 }
 0x52f   : > { %v3732_v59 = vadd.f32 %v3721_v26, %v6634_v29  ;;  %v3731_v29 = vadd.f32 %v3718_v49, %v6632_v38 }
 0x531   : > { %v4012_v50 = vmul.f32 %v6653_v18, %v3732_v59  ;;  %v4011_v0 = vmul.f32 %v6653_v18, %v3731_v29 }
 0x533   : > { %v4024_v13 = vadd.f32 %v6670_v37, %v4012_v50  ;;  %v4023_v5 = vadd.f32 %v6670_v37, %v4011_v0 }
 0x535   : > { %v4032_v9 = vmax.f32 %v4024_v13, 0.0  ;;  %v4031_v45 = vmax.f32 %v4023_v5, 0.0 }
 0x536   : > { %v3723_v12 = vpop.f32.mrf.mxu2 }
 0x537   : > { %v3733_v2 = vadd.f32 %v3723_v12, %v6636_v22 }
 0x539   : > { %v4013_v31 = vmul.f32 %v6653_v18, %v3733_v2 }
 0x53b   : > { %v4025_v57 = vadd.f32 %v6670_v37, %v4013_v31 }
 0x53d   : > { %v4033_v3 = vmax.f32 %v4025_v57, 0.0 }
 0x546   : > { %v4524_v16 = vpop.permute.xlu2 %4523 }
 0x547   : > { %v4526_v42 = vunpack.i.h.bf16 %v4524_v16  ;;  %v4525_v15 = vunpack.i.l.bf16 %v4524_v16 }
 0x549   : > { %v4091_v48 = vsel %vm3976_vm1, %v4027_v19, %v4526_v42  ;;  %v4090_v40 = vsel %vm3976_vm1, %v4026_v6, %v4525_v15 }
 0x54a   : > { %v4099_v17 = vpack.c.bf16 %v4091_v48, %v4091_v48  ;;  %v4098_v34 = vpack.c.bf16 %v4090_v40, %v4090_v40 }
 0x54c   : > { %4454 = vst.msk [vmem:[%s6660_s10 + $0xc] sm:$0xf] %vm3993_vm3, %v4099_v17 }
 0x54d   : > { %4453 = vst.msk [vmem:[%s6660_s10 + $0x4] sm:$0xf] %vm3993_vm3, %v4098_v34 }
 0x56e   : > { %v4529_v53 = vpop.permute.xlu0 %4528 }
 0x56f   : > { %v4531_v11 = vunpack.i.h.bf16 %v4529_v53  ;;  %v4530_v47 = vunpack.i.l.bf16 %v4529_v53 }
 0x571   : > { %v4093_v25 = vsel %vm3976_vm1, %v4029_v43, %v4531_v11  ;;  %v4092_v33 = vsel %vm3976_vm1, %v4028_v1, %v4530_v47 }
 0x572   : > { %v4101_v22 = vpack.c.bf16 %v4093_v25, %v4093_v25  ;;  %v4100_v54 = vpack.c.bf16 %v4092_v33, %v4092_v33 }
 0x574   : > { %4456 = vst.msk [vmem:[%s6660_s10 + $0x1c] sm:$0xf] %vm3993_vm3, %v4101_v22 }
 0x575   : > { %4455 = vst.msk [vmem:[%s6660_s10 + $0x14] sm:$0xf] %vm3993_vm3, %v4100_v54 }
 0x576   : > { %v4539_v23 = vpop.permute.xlu2 %4538 }
 0x577   : > { %v4541_v38 = vunpack.i.h.bf16 %v4539_v23  ;;  %v4540_v39 = vunpack.i.l.bf16 %v4539_v23 }
 0x579   : > { %v4097_v20 = vsel %vm3976_vm1, %v4033_v3, %v4541_v38  ;;  %v4096_v41 = vsel %vm3976_vm1, %v4032_v9, %v4540_v39 }
 0x57a   : > { %v4105_v60 = vpack.c.bf16 %v4097_v20, %v4097_v20  ;;  %v4104_v21 = vpack.c.bf16 %v4096_v41, %v4096_v41 }
 0x57c   : > { %4460 = vst.msk [vmem:[%s6660_s10 + $0x3c] sm:$0xf] %vm3993_vm3, %v4105_v60 }
 0x57d   : > { %4459 = vst.msk [vmem:[%s6660_s10 + $0x34] sm:$0xf] %vm3993_vm3, %v4104_v21 }
 0x57e   : > { %v4534_v18 = vpop.permute.xlu1 %4533 }
 0x57f   : > { %v4536_v52 = vunpack.i.h.bf16 %v4534_v18  ;;  %v4535_v58 = vunpack.i.l.bf16 %v4534_v18 }
 0x581   : > { %v4094_v61 = vsel %vm3976_vm1, %v4030_v32, %v4535_v58  ;;  %v4095_v24 = vsel %vm3976_vm1, %v4031_v45, %v4536_v52 }
 0x582   : > { %v4102_v36 = vpack.c.bf16 %v4094_v61, %v4094_v61  ;;  %v4103_v7 = vpack.c.bf16 %v4095_v24, %v4095_v24 }
 0x584   : > { %4457 = vst.msk [vmem:[%s6660_s10 + $0x24] sm:$0xf] %vm3993_vm3, %v4102_v36 }
 0x585   : > { %4458 = vst.msk [vmem:[%s6660_s10 + $0x2c] sm:$0xf] %vm3993_vm3, %v4103_v7 }
 0x586 PF: > { %s17_s24 = sadd.s32 1, %s4555_s24  }
 0x587   : > { %p14_p4 = scmp.ge.s32.totalorder %s17_s24, 4  }
 0x589   :  { %16 = sbr.rel (!%p14_p4) target bundleno = 1 (0x1), region = 94 }

</bundles_post_ra>
